<compile_context>
chip_gen: v5e
topology: v5e:2x2
jax: 0.10.0
libtpu: 0.0.40
codegen_flags: <defaults>
</compile_context>

<pallas_src>
import functools

import jax
import jax.numpy as jnp
from jax.experimental import pallas as pl
from jax.experimental.pallas import tpu as pltpu

_BN_EPS = 1e-5  # PyTorch BatchNorm1d default


def _leaky_relu(v, slope=0.01):
    return jnp.where(v > 0, v, slope * v)


def _decoder3d_kernel(
    x_ref,        # (TB, latent_dim)  bf16
    w_in_ref,     # (latent_dim, N)   bf16  (BN folded)
    w1_ref,       # (N, N)            bf16  (LBAD1, BN folded)
    w2_ref,       # (N, N)            bf16  (LBAD2, BN folded)
    w3_ref,       # (N, N)            bf16  (LBAD3, BN folded)
    w4_ref,       # (N, N)            bf16  (LBAD4, BN folded)
    w_out_ref,    # (N, OUT_PAD)      bf16
    bias_ref,     # (8, WB)           f32   rows: [b_in, b1, b2, b3, b4, b_out, 0, 0]
    o_ref,        # (TB, OUT_PAD)     bf16
    *,
    act_dtype,
):
    f32 = jnp.float32
    bf16 = jnp.bfloat16
    N = w_in_ref.shape[1]
    out_pad = w_out_ref.shape[1]

    def layer(h, w_ref, bias_row):
        # matmul in bf16 (f32 MXU accumulation), bias add in f32, then a single
        # cast to act_dtype (bf16 on v6e/v7x) for LeakyReLU / residual math.
        b = bias_ref[bias_row:bias_row + 1, 0:N]                       # (1, N) f32
        z = jnp.dot(h.astype(bf16), w_ref[...], preferred_element_type=f32) + b
        return _leaky_relu(z.astype(act_dtype))

    # dec_inp_block: Linear + BN(folded) + LeakyReLU (+ Dropout = identity in eval)
    h = layer(x_ref[...], w_in_ref, 0)

    # features: ResBlock of 4 LBAD blocks (Linear no-bias + BN folded + LeakyReLU)
    res = h
    h = layer(h, w1_ref, 1)
    h = layer(h, w2_ref, 2) + res
    res = h
    h = layer(h, w3_ref, 3)
    h = layer(h, w4_ref, 4) + res

    # dec_out_block: Linear + Tanh (padded lanes carry zeros; sliced off in wrapper)
    b_out = bias_ref[5:6, 0:out_pad]
    y = jnp.tanh(
        jnp.dot(h.astype(bf16), w_out_ref[...], preferred_element_type=f32) + b_out
    )
    o_ref[...] = y.astype(o_ref.dtype)


def _fold_bn(w, b, bn_params, eps=_BN_EPS):
    """Fold eval-mode BatchNorm1d (affine, running stats) into the preceding Linear."""
    gamma, beta, mean, var = bn_params
    s = gamma * jax.lax.rsqrt(var + eps)       # per-feature scale
    t = beta - mean * s                        # per-feature shift
    w_f = w * s[None, :]
    b_f = t if b is None else b * s + t
    return w_f, b_f


def _default_act_dtype():
    # bf16 elementwise on v6e/v7x (bf16 VALU); keep f32 on v5* (no bf16 VPU/EUP,
    # and the kernel is MXU-bound there anyway).
    try:
        kind = jax.devices()[0].device_kind.lower()
    except Exception:
        return jnp.bfloat16
    return jnp.float32 if "v5" in kind else jnp.bfloat16


@functools.partial(jax.jit, static_argnames=("tile_b",))
def decoder3d_forward(x, params, *, tile_b=512):
    """x: any shape whose trailing elements flatten to (-1, latent_dim)."""
    w_in = params["w_in"]
    latent_dim, N = w_in.shape
    out_dim = params["w_out"].shape[1]
    out_pad = max(128, ((out_dim + 127) // 128) * 128)   # lane-dense output width

    x2 = x.reshape(-1, latent_dim).astype(jnp.float32)
    B = x2.shape[0]

    # Tile selection: big tiles amortize per-grid-step overhead; for small batches
    # shrink (floor 128) so the grid keeps >= 2 steps and megacore can split work.
    eff_tile = max(8, tile_b)
    while eff_tile > 128 and (B + eff_tile - 1) // eff_tile < 2:
        eff_tile //= 2
    Bp = ((B + eff_tile - 1) // eff_tile) * eff_tile     # pad batch to tile multiple
    if Bp != B:
        x2 = jnp.pad(x2, ((0, Bp - B), (0, 0)))
    x2 = x2.astype(jnp.bfloat16)

    # ---- fold BatchNorm (eval) into the linears; cast weights to bf16 ----
    w_in_f, b_in_f = _fold_bn(w_in, params["b_in"], params["bn_in"])
    ws = [w_in_f.astype(jnp.bfloat16)]
    hidden_biases = [b_in_f]
    for w, bn in params["res"]:
        wf, bf = _fold_bn(w, None, bn)
        ws.append(wf.astype(jnp.bfloat16))
        hidden_biases.append(bf)

    w_out = jnp.pad(params["w_out"], ((0, 0), (0, out_pad - out_dim))).astype(jnp.bfloat16)
    b_out = jnp.pad(params["b_out"], ((0, out_pad - out_dim),))

    # Pack the six bias vectors into one pinned (8, WB) f32 array (sublane aligned).
    wb = max(N, out_pad)
    bias_rows = [jnp.pad(b.astype(jnp.float32), (0, wb - N)) for b in hidden_biases]
    bias_rows.append(jnp.pad(b_out.astype(jnp.float32), (0, wb - out_pad)))
    bias_rows += [jnp.zeros((wb,), jnp.float32)] * (8 - len(bias_rows))
    bias_pack = jnp.stack(bias_rows, axis=0)              # (8, WB) f32

    grid = (Bp // eff_tile,)
    act_dtype = _default_act_dtype()
    kernel = functools.partial(_decoder3d_kernel, act_dtype=act_dtype)

    def pinned(shape):
        # Full-array blocks pinned to block (0, 0): stay VMEM-resident across grid steps.
        return pl.BlockSpec(shape, lambda i: (0, 0))

    out = pl.pallas_call(
        kernel,
        out_shape=jax.ShapeDtypeStruct((Bp, out_pad), jnp.bfloat16),
        grid_spec=pl.GridSpec(
            grid=grid,
            in_specs=[
                pl.BlockSpec((eff_tile, latent_dim), lambda i: (i, 0)),  # x tile
                pinned((latent_dim, N)),                                 # inp block W
                pinned((N, N)), pinned((N, N)),                          # LBAD1/2 W
                pinned((N, N)), pinned((N, N)),                          # LBAD3/4 W
                pinned((N, out_pad)),                                    # out block W
                pinned((8, wb)),                                         # packed biases
            ],
            out_specs=pl.BlockSpec((eff_tile, out_pad), lambda i: (i, 0)),
        ),
        compiler_params=pltpu.CompilerParams(
            dimension_semantics=("parallel",),
        ),
    )(x2, ws[0], ws[1], ws[2], ws[3], ws[4], w_out, bias_pack)

    # Strip batch padding and lane padding; cast back to f32 for callers.
    # scale_3d treated as identity (see TODO at top).
    return out[:B, :out_dim].astype(jnp.float32)


def init_params(key, latent_dim=32, n_joints=16, neurons=256):
    """Deterministic synthetic parameters. Linear weights stored as (in, out)."""
    out_dim = 3 * n_joints
    ks = jax.random.split(key, 32)
    sc = 0.05

    def bn(k):
        k1, k2, k3, k4 = jax.random.split(k, 4)
        gamma = 1.0 + 0.1 * jax.random.normal(k1, (neurons,), jnp.float32)
        beta = 0.1 * jax.random.normal(k2, (neurons,), jnp.float32)
        mean = 0.1 * jax.random.normal(k3, (neurons,), jnp.float32)
        var = jax.random.uniform(k4, (neurons,), jnp.float32, 0.5, 1.5)
        return (gamma, beta, mean, var)

    params = {
        "w_in": sc * jax.random.normal(ks[0], (latent_dim, neurons), jnp.float32),
        "b_in": sc * jax.random.normal(ks[1], (neurons,), jnp.float32),
        "bn_in": bn(ks[2]),
        "res": [
            (sc * jax.random.normal(ks[3 + 2 * i], (neurons, neurons), jnp.float32),
             bn(ks[4 + 2 * i]))
            for i in range(4)
        ],
        "w_out": sc * jax.random.normal(ks[12], (neurons, out_dim), jnp.float32),
        "b_out": sc * jax.random.normal(ks[13], (out_dim,), jnp.float32),
    }
    return params


def reference_forward(x, params):
    """Pure-JAX f32 reference of the PyTorch forward (eval mode, BN un-folded)."""
    w_in = params["w_in"]
    latent_dim = w_in.shape[0]

    def bn(h, p):
        gamma, beta, mean, var = p
        return (h - mean) * jax.lax.rsqrt(var + _BN_EPS) * gamma + beta

    h = x.reshape(-1, latent_dim).astype(jnp.float32)
    h = _leaky_relu(bn(h @ w_in + params["b_in"], params["bn_in"]))
    (w1, bn1), (w2, bn2), (w3, bn3), (w4, bn4) = params["res"]
    res = h
    h = _leaky_relu(bn(h @ w1, bn1))
    h = _leaky_relu(bn(h @ w2, bn2)) + res
    res = h
    h = _leaky_relu(bn(h @ w3, bn3))
    h = _leaky_relu(bn(h @ w4, bn4)) + res
    y = jnp.tanh(h @ params["w_out"] + params["b_out"])
    return y  # scale_3d: identity (TODO above)


if __name__ == "__main__":
    latent_dim = 32
    n_joints = 16
    neurons = 256
    batch = 300          # exercises batch padding (300 -> 512) and a 2-tile grid

    key = jax.random.PRNGKey(0)
    kx, kp = jax.random.split(key)
    x = jax.random.normal(kx, (batch, latent_dim), jnp.float32)
    params = init_params(kp, latent_dim=latent_dim, n_joints=n_joints, neurons=neurons)

    out = decoder3d_forward(x, params, tile_b=512)
    out = jax.block_until_ready(out)

    ref = reference_forward(x, params)
    assert out.shape == (batch, 3 * n_joints), out.shape
    max_err = float(jnp.max(jnp.abs(out - ref)))
    # bf16 matmul operands / bf16 elementwise (v6e/v7x) / bf16 output store, f32
    # accumulation -> loosened tolerance vs. the f32 reference.
    assert jnp.allclose(out, ref, atol=2.5e-2, rtol=2.5e-2), max_err
    print("KERNEL_OK")
</pallas_src>

<mosaic_0001>
module attributes {stable_mosaic.version = 11 : i64} {
  func.func @_decoder3d_kernel(%arg0: i32, %arg1: memref<256x32xbf16, #tpu.memory_space<vmem>>, %arg2: memref<32x256xbf16, #tpu.memory_space<vmem>>, %arg3: memref<256x256xbf16, #tpu.memory_space<vmem>>, %arg4: memref<256x256xbf16, #tpu.memory_space<vmem>>, %arg5: memref<256x256xbf16, #tpu.memory_space<vmem>>, %arg6: memref<256x256xbf16, #tpu.memory_space<vmem>>, %arg7: memref<256x128xbf16, #tpu.memory_space<vmem>>, %arg8: memref<8x256xf32, #tpu.memory_space<vmem>>, %arg9: memref<256x128xbf16, #tpu.memory_space<vmem>>) attributes {dimension_semantics = [#tpu.dimension_semantics<parallel>], iteration_bounds = array<i64: 2>, scalar_prefetch = 0 : i64, scratch_operands = 0 : i64, tpu.core_type = #tpu.core_type<tc>, window_params = [{transform_indices = @transform_0, window_bounds = array<i64: 256, 32>}, {pipeline_mode = #tpu.pipeline_mode<synchronous>, transform_indices = @transform_1, window_bounds = array<i64: 32, 256>}, {pipeline_mode = #tpu.pipeline_mode<synchronous>, transform_indices = @transform_2, window_bounds = array<i64: 256, 256>}, {pipeline_mode = #tpu.pipeline_mode<synchronous>, transform_indices = @transform_3, window_bounds = array<i64: 256, 256>}, {pipeline_mode = #tpu.pipeline_mode<synchronous>, transform_indices = @transform_4, window_bounds = array<i64: 256, 256>}, {pipeline_mode = #tpu.pipeline_mode<synchronous>, transform_indices = @transform_5, window_bounds = array<i64: 256, 256>}, {pipeline_mode = #tpu.pipeline_mode<synchronous>, transform_indices = @transform_6, window_bounds = array<i64: 256, 128>}, {pipeline_mode = #tpu.pipeline_mode<synchronous>, transform_indices = @transform_7, window_bounds = array<i64: 8, 256>}, {transform_indices = @transform_8, window_bounds = array<i64: 256, 128>}]} {
    %c0 = arith.constant 0 : index
    %c0_0 = arith.constant 0 : index
    %0 = vector.load %arg1[%c0, %c0_0] : memref<256x32xbf16, #tpu.memory_space<vmem>>, vector<256x32xbf16>
    %c0_1 = arith.constant 0 : index
    %c0_2 = arith.constant 0 : index
    %1 = vector.load %arg8[%c0_1, %c0_2] : memref<8x256xf32, #tpu.memory_space<vmem>>, vector<1x256xf32>
    %c0_3 = arith.constant 0 : index
    %c0_4 = arith.constant 0 : index
    %2 = vector.load %arg2[%c0_3, %c0_4] : memref<32x256xbf16, #tpu.memory_space<vmem>>, vector<32x256xbf16>
    %cst = arith.constant dense<0.000000e+00> : vector<256x256xf32>
    %3 = tpu.matmul %0, %2, %cst {dimension_numbers = #tpu.dot_dimension_numbers<[1], [0], [0], [1], [0, 0, 1, 1], [], []>} : vector<256x32xbf16>, vector<32x256xbf16>, vector<256x256xf32> -> vector<256x256xf32>
    %4 = vector.broadcast %1 : vector<1x256xf32> to vector<256x256xf32>
    %5 = arith.addf %3, %4 : vector<256x256xf32>
    %6 = arith.truncf %5 : vector<256x256xf32> to vector<256x256xbf16>
    %cst_5 = arith.constant 0.000000e+00 : bf16
    %7 = vector.broadcast %cst_5 : bf16 to vector<256x256xbf16>
    %8 = arith.cmpf ogt, %6, %7 : vector<256x256xbf16>
    %cst_6 = arith.constant 1.000980e-02 : bf16
    %9 = vector.broadcast %cst_6 : bf16 to vector<256x256xbf16>
    %10 = arith.mulf %9, %6 : vector<256x256xbf16>
    %11 = arith.select %8, %6, %10 : vector<256x256xi1>, vector<256x256xbf16>
    %c1 = arith.constant 1 : index
    %c0_7 = arith.constant 0 : index
    %12 = vector.load %arg8[%c1, %c0_7] : memref<8x256xf32, #tpu.memory_space<vmem>>, vector<1x256xf32>
    %c0_8 = arith.constant 0 : index
    %c0_9 = arith.constant 0 : index
    %13 = vector.load %arg3[%c0_8, %c0_9] : memref<256x256xbf16, #tpu.memory_space<vmem>>, vector<256x256xbf16>
    %cst_10 = arith.constant dense<0.000000e+00> : vector<256x256xf32>
    %14 = tpu.matmul %11, %13, %cst_10 {dimension_numbers = #tpu.dot_dimension_numbers<[1], [0], [0], [1], [0, 0, 1, 1], [], []>} : vector<256x256xbf16>, vector<256x256xbf16>, vector<256x256xf32> -> vector<256x256xf32>
    %15 = vector.broadcast %12 : vector<1x256xf32> to vector<256x256xf32>
    %16 = arith.addf %14, %15 : vector<256x256xf32>
    %17 = arith.truncf %16 : vector<256x256xf32> to vector<256x256xbf16>
    %cst_11 = arith.constant 0.000000e+00 : bf16
    %18 = vector.broadcast %cst_11 : bf16 to vector<256x256xbf16>
    %19 = arith.cmpf ogt, %17, %18 : vector<256x256xbf16>
    %cst_12 = arith.constant 1.000980e-02 : bf16
    %20 = vector.broadcast %cst_12 : bf16 to vector<256x256xbf16>
    %21 = arith.mulf %20, %17 : vector<256x256xbf16>
    %22 = arith.select %19, %17, %21 : vector<256x256xi1>, vector<256x256xbf16>
    %c2 = arith.constant 2 : index
    %c0_13 = arith.constant 0 : index
    %23 = vector.load %arg8[%c2, %c0_13] : memref<8x256xf32, #tpu.memory_space<vmem>>, vector<1x256xf32>
    %c0_14 = arith.constant 0 : index
    %c0_15 = arith.constant 0 : index
    %24 = vector.load %arg4[%c0_14, %c0_15] : memref<256x256xbf16, #tpu.memory_space<vmem>>, vector<256x256xbf16>
    %cst_16 = arith.constant dense<0.000000e+00> : vector<256x256xf32>
    %25 = tpu.matmul %22, %24, %cst_16 {dimension_numbers = #tpu.dot_dimension_numbers<[1], [0], [0], [1], [0, 0, 1, 1], [], []>} : vector<256x256xbf16>, vector<256x256xbf16>, vector<256x256xf32> -> vector<256x256xf32>
    %26 = vector.broadcast %23 : vector<1x256xf32> to vector<256x256xf32>
    %27 = arith.addf %25, %26 : vector<256x256xf32>
    %28 = arith.truncf %27 : vector<256x256xf32> to vector<256x256xbf16>
    %cst_17 = arith.constant 0.000000e+00 : bf16
    %29 = vector.broadcast %cst_17 : bf16 to vector<256x256xbf16>
    %30 = arith.cmpf ogt, %28, %29 : vector<256x256xbf16>
    %cst_18 = arith.constant 1.000980e-02 : bf16
    %31 = vector.broadcast %cst_18 : bf16 to vector<256x256xbf16>
    %32 = arith.mulf %31, %28 : vector<256x256xbf16>
    %33 = arith.select %30, %28, %32 : vector<256x256xi1>, vector<256x256xbf16>
    %34 = arith.addf %33, %11 : vector<256x256xbf16>
    %c3 = arith.constant 3 : index
    %c0_19 = arith.constant 0 : index
    %35 = vector.load %arg8[%c3, %c0_19] : memref<8x256xf32, #tpu.memory_space<vmem>>, vector<1x256xf32>
    %c0_20 = arith.constant 0 : index
    %c0_21 = arith.constant 0 : index
    %36 = vector.load %arg5[%c0_20, %c0_21] : memref<256x256xbf16, #tpu.memory_space<vmem>>, vector<256x256xbf16>
    %cst_22 = arith.constant dense<0.000000e+00> : vector<256x256xf32>
    %37 = tpu.matmul %34, %36, %cst_22 {dimension_numbers = #tpu.dot_dimension_numbers<[1], [0], [0], [1], [0, 0, 1, 1], [], []>} : vector<256x256xbf16>, vector<256x256xbf16>, vector<256x256xf32> -> vector<256x256xf32>
    %38 = vector.broadcast %35 : vector<1x256xf32> to vector<256x256xf32>
    %39 = arith.addf %37, %38 : vector<256x256xf32>
    %40 = arith.truncf %39 : vector<256x256xf32> to vector<256x256xbf16>
    %cst_23 = arith.constant 0.000000e+00 : bf16
    %41 = vector.broadcast %cst_23 : bf16 to vector<256x256xbf16>
    %42 = arith.cmpf ogt, %40, %41 : vector<256x256xbf16>
    %cst_24 = arith.constant 1.000980e-02 : bf16
    %43 = vector.broadcast %cst_24 : bf16 to vector<256x256xbf16>
    %44 = arith.mulf %43, %40 : vector<256x256xbf16>
    %45 = arith.select %42, %40, %44 : vector<256x256xi1>, vector<256x256xbf16>
    %c4 = arith.constant 4 : index
    %c0_25 = arith.constant 0 : index
    %46 = vector.load %arg8[%c4, %c0_25] : memref<8x256xf32, #tpu.memory_space<vmem>>, vector<1x256xf32>
    %c0_26 = arith.constant 0 : index
    %c0_27 = arith.constant 0 : index
    %47 = vector.load %arg6[%c0_26, %c0_27] : memref<256x256xbf16, #tpu.memory_space<vmem>>, vector<256x256xbf16>
    %cst_28 = arith.constant dense<0.000000e+00> : vector<256x256xf32>
    %48 = tpu.matmul %45, %47, %cst_28 {dimension_numbers = #tpu.dot_dimension_numbers<[1], [0], [0], [1], [0, 0, 1, 1], [], []>} : vector<256x256xbf16>, vector<256x256xbf16>, vector<256x256xf32> -> vector<256x256xf32>
    %49 = vector.broadcast %46 : vector<1x256xf32> to vector<256x256xf32>
    %50 = arith.addf %48, %49 : vector<256x256xf32>
    %51 = arith.truncf %50 : vector<256x256xf32> to vector<256x256xbf16>
    %cst_29 = arith.constant 0.000000e+00 : bf16
    %52 = vector.broadcast %cst_29 : bf16 to vector<256x256xbf16>
    %53 = arith.cmpf ogt, %51, %52 : vector<256x256xbf16>
    %cst_30 = arith.constant 1.000980e-02 : bf16
    %54 = vector.broadcast %cst_30 : bf16 to vector<256x256xbf16>
    %55 = arith.mulf %54, %51 : vector<256x256xbf16>
    %56 = arith.select %53, %51, %55 : vector<256x256xi1>, vector<256x256xbf16>
    %57 = arith.addf %56, %34 : vector<256x256xbf16>
    %c5 = arith.constant 5 : index
    %c0_31 = arith.constant 0 : index
    %58 = vector.load %arg8[%c5, %c0_31] : memref<8x256xf32, #tpu.memory_space<vmem>>, vector<1x128xf32>
    %c0_32 = arith.constant 0 : index
    %c0_33 = arith.constant 0 : index
    %59 = vector.load %arg7[%c0_32, %c0_33] : memref<256x128xbf16, #tpu.memory_space<vmem>>, vector<256x128xbf16>
    %cst_34 = arith.constant dense<0.000000e+00> : vector<256x128xf32>
    %60 = tpu.matmul %57, %59, %cst_34 {dimension_numbers = #tpu.dot_dimension_numbers<[1], [0], [0], [1], [0, 0, 1, 1], [], []>} : vector<256x256xbf16>, vector<256x128xbf16>, vector<256x128xf32> -> vector<256x128xf32>
    %61 = vector.broadcast %58 : vector<1x128xf32> to vector<256x128xf32>
    %62 = arith.addf %60, %61 : vector<256x128xf32>
    %63 = math.tanh %62 : vector<256x128xf32>
    %64 = arith.truncf %63 : vector<256x128xf32> to vector<256x128xbf16>
    %c0_35 = arith.constant 0 : index
    %c0_36 = arith.constant 0 : index
    %65 = vector.load %arg9[%c0_35, %c0_36] : memref<256x128xbf16, #tpu.memory_space<vmem>>, vector<256x128xbf16>
    tpu.vector_store %arg9[%c0_35, %c0_36], %64 {strides = array<i32>} : memref<256x128xbf16, #tpu.memory_space<vmem>>, vector<256x128xbf16>,
    return
  }
  func.func @transform_0(%arg0: i32) -> (i32, i32) {
    %c0_i32 = arith.constant 0 : i32
    %c0_i32_0 = arith.constant 0 : i32
    return %arg0, %c0_i32 : i32, i32
  }
  func.func @transform_1(%arg0: i32) -> (i32, i32) {
    %c0_i32 = arith.constant 0 : i32
    %c0_i32_0 = arith.constant 0 : i32
    %c0_i32_1 = arith.constant 0 : i32
    return %c0_i32, %c0_i32_0 : i32, i32
  }
  func.func @transform_2(%arg0: i32) -> (i32, i32) {
    %c0_i32 = arith.constant 0 : i32
    %c0_i32_0 = arith.constant 0 : i32
    %c0_i32_1 = arith.constant 0 : i32
    return %c0_i32, %c0_i32_0 : i32, i32
  }
  func.func @transform_3(%arg0: i32) -> (i32, i32) {
    %c0_i32 = arith.constant 0 : i32
    %c0_i32_0 = arith.constant 0 : i32
    %c0_i32_1 = arith.constant 0 : i32
    return %c0_i32, %c0_i32_0 : i32, i32
  }
  func.func @transform_4(%arg0: i32) -> (i32, i32) {
    %c0_i32 = arith.constant 0 : i32
    %c0_i32_0 = arith.constant 0 : i32
    %c0_i32_1 = arith.constant 0 : i32
    return %c0_i32, %c0_i32_0 : i32, i32
  }
  func.func @transform_5(%arg0: i32) -> (i32, i32) {
    %c0_i32 = arith.constant 0 : i32
    %c0_i32_0 = arith.constant 0 : i32
    %c0_i32_1 = arith.constant 0 : i32
    return %c0_i32, %c0_i32_0 : i32, i32
  }
  func.func @transform_6(%arg0: i32) -> (i32, i32) {
    %c0_i32 = arith.constant 0 : i32
    %c0_i32_0 = arith.constant 0 : i32
    %c0_i32_1 = arith.constant 0 : i32
    return %c0_i32, %c0_i32_0 : i32, i32
  }
  func.func @transform_7(%arg0: i32) -> (i32, i32) {
    %c0_i32 = arith.constant 0 : i32
    %c0_i32_0 = arith.constant 0 : i32
    %c0_i32_1 = arith.constant 0 : i32
    return %c0_i32, %c0_i32_0 : i32, i32
  }
  func.func @transform_8(%arg0: i32) -> (i32, i32) {
    %c0_i32 = arith.constant 0 : i32
    %c0_i32_0 = arith.constant 0 : i32
    return %arg0, %c0_i32 : i32, i32
  }
}

</mosaic_0001>

<bundles_post_ra>
// kernel: decoder3d_forward.1
= control target key start
LH: loop header
LB: loop body
LE: loop exit
PB: predicated region body
PF: predicated region fallthrough
CT: control target
= control target key end

     0   :  { %s7133_s27 = smov 0   ;;  %s10770_s0 = inlined_call_operand.vmem [shape: bf16[512,32], index: 0, kind: input, shape index: {}]   ;;  %s10771_s1 = inlined_call_operand.vmem [shape: bf16[32,256], index: 1, kind: input, shape index: {}]   ;;  %s10772_s2 = inlined_call_operand.vmem [shape: bf16[256,256], index: 2, kind: input, shape index: {}]   ;;  %s10773_s3 = inlined_call_operand.vmem [shape: bf16[256,256], index: 3, kind: input, shape index: {}]   ;;  %s10774_s4 = inlined_call_operand.vmem [shape: bf16[256,256], index: 4, kind: input, shape index: {}]   ;;  %s10775_s5 = inlined_call_operand.vmem [shape: bf16[256,256], index: 5, kind: input, shape index: {}]   ;;  %s10776_s6 = inlined_call_operand.vmem [shape: bf16[256,128], index: 6, kind: input, shape index: {}]   ;;  %s10777_s7 = inlined_call_operand.vmem [shape: f32[8,256], index: 7, kind: input, shape index: {}]   ;;  %s10778_s8 = inlined_call_operand.vmem [shape: bf16[512,128], index: 8, kind: output, shape index: {}]  }
   0x1 LB: > { %s6046_s28 = sadd.s32 4294967295, %s7086_s27   ;;  %p6050_p0 = scmp.ge.s32.totalorder %s7086_s27, 1  ;;  %s7086_s27 = sphi %s7133_s27, %s18_s27  }
   0x2   : > { %p263_p1 = scmp.lt.s32.totalorder %s7086_s27, 3 }
   0x4   : > { %p264_p2 = pnand %p6050_p0, %p263_p1 }
   0x6   : > { %267 = sbr.rel (%p264_p2) target bundleno = 1599 (0x63f), region = 52 }
   0xb   : > { %v6129_v0 = vld [vmem:[%s10771_s1 + $0x10] sm:$0xf]  ;;  %v6768_v1 = vld [vmem:[%s10771_s1 + $0x14] sm:$0xf0]  ;;  %v6767_v2 = vld [vmem:[%s10771_s1 + $0x14] sm:$0xf] }
   0xc   : > { %v6130_v3 = vor.u32 %v6768_v1, %v6129_v0  ;;  %v6131_v4 = vld [vmem:[%s10771_s1 + $0x18] sm:$0xf0]  ;;  %v6121_v5 = vld [vmem:[%s10771_s1] sm:$0xf]  ;;  %v6766_v6 = vld [vmem:[%s10771_s1 + $0x4] sm:$0xf0] }
   0xd   : > { %v6134_v7 = vor.u32 %v6767_v2, %v6131_v4  ;;  %v6765_v8 = vld [vmem:[%s10771_s1 + $0x4] sm:$0xf]  ;;  %v6123_v9 = vld [vmem:[%s10771_s1 + $0x8] sm:$0xf0]  ;;  %s6051_s23 = sshll.u32 %s6046_s28, 5  ;;  %v6122_v10 = vor.u32 %v6766_v6, %v6121_v5  ;;  %vm452_vm0 = vcmask 261120  }
   0xe   : > { %507 = vmatpush.bf16.msra.mxu0 %v6130_v3  ;;  %p298_p3 = scmp.lt.s32.totalorder %s6051_s23, 63  ;;  %v6783_v11 = vld [vmem:[%s10772_s2 + $0x74] sm:$0xf]  ;;  %v6228_v12 = vld [vmem:[%s10772_s2 + $0x78] sm:$0xf0]  ;;  %v6126_v13 = vor.u32 %v6765_v8, %v6123_v9 }
   0xf   : > { %596 = vmatpush.bf16.msra.mxu1 %v6134_v7  ;;  %v6231_v14 = vor.u32 %v6783_v11, %v6228_v12  ;;  %v6799_v15 = vld [vmem:[%s10772_s2 + $0xf4] sm:$0xf]  ;;  %v6292_v16 = vld [vmem:[%s10772_s2 + $0xf8] sm:$0xf0]  ;;  %v6781_v19 = vld [vmem:[%s10772_s2 + $0x64] sm:$0xf] }
  0x10   : > { %s11254_s23 = smov (!%p298_p3, %s6051_s23), 63  ;;  %v6295_v17 = vor.u32 %v6799_v15, %v6292_v16  ;;  %v6220_v20 = vld [vmem:[%s10772_s2 + $0x68] sm:$0xf0]  ;;  %v6797_v21 = vld [vmem:[%s10772_s2 + $0xe4] sm:$0xf] }
  0x11   : > { %s6052_s11 = sshll.u32 %s11254_s23, 2  ;;  %v6223_v22 = vor.u32 %v6781_v19, %v6220_v20  ;;  %v6284_v23 = vld [vmem:[%s10772_s2 + $0xe8] sm:$0xf0]  ;;  %v6779_v27 = vld [vmem:[%s10772_s2 + $0x54] sm:$0xf] }
  0x12   : > { %508 = vmatpush.bf16.msra.mxu0 %v6122_v10  ;;  %s7185_s14 = scalar_lea.vmem %s10770_s0, %s6052_s11  ;;  %v6287_v24 = vor.u32 %v6797_v21, %v6284_v23  ;;  %v6212_v28 = vld [vmem:[%s10772_s2 + $0x58] sm:$0xf0]  ;;  %v6795_v29 = vld [vmem:[%s10772_s2 + $0xd4] sm:$0xf]  ;;  %v6777_v35 = vld [vmem:[%s10772_s2 + $0x44] sm:$0xf]  ;;  %s10659_s22 = scalar_lea.vmem %s10778_s8, %s6052_s11 }
  0x13   : > { %597 = vmatpush.bf16.msra.mxu1 %v6126_v13  ;;  %v6749_v18 = vld [vmem:[%s7185_s14] sm:$0xff]  ;;  %v6750_v25 = vld [vmem:[%s7185_s14 + $0x8] sm:$0xff]  ;;  %v6751_v26 = vld [vmem:[%s7185_s14 + $0x10] sm:$0xff]  ;;  %v6215_v30 = vor.u32 %v6779_v27, %v6212_v28 }
  0x14   : > { %v6276_v31 = vld [vmem:[%s10772_s2 + $0xd8] sm:$0xf0]  ;;  %v6753_v34 = vld [vmem:[%s7185_s14 + $0x20] sm:$0xff]  ;;  %v6204_v36 = vld [vmem:[%s10772_s2 + $0x48] sm:$0xf0] }
  0x15   : > { %6135 = vmatmul.msk.bf16.vlgmr.msra.gmra.mxu0 %vm452_vm0, %v6749_v18  ;;  %v6279_v32 = vor.u32 %v6795_v29, %v6276_v31  ;;  %v6752_v33 = vld [vmem:[%s7185_s14 + $0x18] sm:$0xff]  ;;  %v6793_v37 = vld [vmem:[%s10772_s2 + $0xc4] sm:$0xf]  ;;  %v6207_v38 = vor.u32 %v6777_v35, %v6204_v36  ;;  %v6268_v39 = vld [vmem:[%s10772_s2 + $0xc8] sm:$0xf0] }
  0x16   : > { %1536 = vmatpush.bf16.msrb.mxu0 %v6231_v14  ;;  %6151 = vmatmul.msk.bf16.vlgmr.msra.gmra.mxu1 %vm452_vm0, %v6749_v18  ;;  %v6271_v40 = vor.u32 %v6793_v37, %v6268_v39  ;;  %v6754_v41 = vld [vmem:[%s7185_s14 + $0x28] sm:$0xff]  ;;  %v6226_v42 = vld [vmem:[%s10772_s2 + $0x70] sm:$0xf]  ;;  %v6784_v43 = vld [vmem:[%s10772_s2 + $0x74] sm:$0xf0] }
  0x17   : > { %1625 = vmatpush.bf16.msrb.mxu1 %v6295_v17  ;;  %v6290_v44 = vld [vmem:[%s10772_s2 + $0xf0] sm:$0xf]  ;;  %v6227_v45 = vor.u32 %v6784_v43, %v6226_v42  ;;  %v6800_v46 = vld [vmem:[%s10772_s2 + $0xf4] sm:$0xf0]  ;;  %v6218_v47 = vld [vmem:[%s10772_s2 + $0x60] sm:$0xf] }
  0x18   : > { %v6782_v48 = vld [vmem:[%s10772_s2 + $0x64] sm:$0xf0]  ;;  %v6291_v49 = vor.u32 %v6800_v46, %v6290_v44  ;;  %v6282_v50 = vld [vmem:[%s10772_s2 + $0xe0] sm:$0xf]  ;;  %v6210_v54 = vld [vmem:[%s10772_s2 + $0x50] sm:$0xf] }
  0x19   : > { %v6798_v51 = vld [vmem:[%s10772_s2 + $0xe4] sm:$0xf0]  ;;  %1358 = vmatpush.bf16.msra.mxu2 %v6227_v45  ;;  %v6219_v52 = vor.u32 %v6782_v48, %v6218_v47  ;;  %v6780_v55 = vld [vmem:[%s10772_s2 + $0x54] sm:$0xf0]  ;;  %v6274_v56 = vld [vmem:[%s10772_s2 + $0xd0] sm:$0xf] }
  0x1a   : > { %1537 = vmatpush.bf16.msrb.mxu0 %v6223_v22  ;;  %1447 = vmatpush.bf16.msra.mxu3 %v6291_v49  ;;  %v6283_v53 = vor.u32 %v6798_v51, %v6282_v50  ;;  %v6755_v57 = vld [vmem:[%s7185_s14 + $0x30] sm:$0xff]  ;;  %v6211_v58 = vor.u32 %v6780_v55, %v6210_v54  ;;  %v6796_v59 = vld [vmem:[%s10772_s2 + $0xd4] sm:$0xf0]  ;;  %v6202_v61 = vld [vmem:[%s10772_s2 + $0x40] sm:$0xf] }
  0x1b   : > { %1626 = vmatpush.bf16.msrb.mxu1 %v6287_v24  ;;  %v6275_v60 = vor.u32 %v6796_v59, %v6274_v56  ;;  %v6778_v62 = vld [vmem:[%s10772_s2 + $0x44] sm:$0xf0]  ;;  %v6266_v63 = vld [vmem:[%s10772_s2 + $0xc0] sm:$0xf]  ;;  %v6194_v3 = vld [vmem:[%s10772_s2 + $0x30] sm:$0xf] }
  0x1c   : > { %v6203_v0 = vor.u32 %v6778_v62, %v6202_v61  ;;  %v6794_v1 = vld [vmem:[%s10772_s2 + $0xc4] sm:$0xf0]  ;;  %v6776_v4 = vld [vmem:[%s10772_s2 + $0x34] sm:$0xf0]  ;;  %v6258_v5 = vld [vmem:[%s10772_s2 + $0xb0] sm:$0xf] }
  0x1d   : > { %1359 = vmatpush.bf16.msra.mxu2 %v6219_v52  ;;  %v6267_v2 = vor.u32 %v6794_v1, %v6266_v63  ;;  %v6195_v6 = vor.u32 %v6776_v4, %v6194_v3  ;;  %v6792_v7 = vld [vmem:[%s10772_s2 + $0xb4] sm:$0xf0]  ;;  %v6186_v9 = vld [vmem:[%s10772_s2 + $0x20] sm:$0xf]  ;;  %v6774_v10 = vld [vmem:[%s10772_s2 + $0x24] sm:$0xf0] }
  0x1e   : > { %1538 = vmatpush.bf16.msrb.mxu0 %v6215_v30  ;;  %1448 = vmatpush.bf16.msra.mxu3 %v6283_v53  ;;  %v6259_v8 = vor.u32 %v6792_v7, %v6258_v5  ;;  %v6250_v11 = vld [vmem:[%s10772_s2 + $0xa0] sm:$0xf]  ;;  %v6187_v12 = vor.u32 %v6774_v10, %v6186_v9  ;;  %v6790_v13 = vld [vmem:[%s10772_s2 + $0xa4] sm:$0xf0]  ;;  %v6775_v14 = vld [vmem:[%s10772_s2 + $0x34] sm:$0xf] }
  0x1f   : > { %1627 = vmatpush.bf16.msrb.mxu1 %v6279_v32  ;;  %v6196_v15 = vld [vmem:[%s10772_s2 + $0x38] sm:$0xf0]  ;;  %v6791_v16 = vld [vmem:[%s10772_s2 + $0xb4] sm:$0xf]  ;;  %v6251_v17 = vor.u32 %v6790_v13, %v6250_v11  ;;  %v6178_v21 = vld [vmem:[%s10772_s2 + $0x10] sm:$0xf] }
  0x20   : > { %v6199_v18 = vor.u32 %v6775_v14, %v6196_v15  ;;  %v6260_v19 = vld [vmem:[%s10772_s2 + $0xb8] sm:$0xf0]  ;;  %v6772_v22 = vld [vmem:[%s10772_s2 + $0x14] sm:$0xf0]  ;;  %v6242_v23 = vld [vmem:[%s10772_s2 + $0x90] sm:$0xf] }
  0x21   : > { %1360 = vmatpush.bf16.msra.mxu2 %v6211_v58  ;;  %v6263_v20 = vor.u32 %v6791_v16, %v6260_v19  ;;  %v6756_v24 = vld [vmem:[%s7185_s14 + $0x38] sm:$0xff]  ;;  %v6170_v28 = vld [vmem:[%s10772_s2] sm:$0xf]  ;;  %v6770_v29 = vld [vmem:[%s10772_s2 + $0x4] sm:$0xf0] }
  0x22   : > { %1539 = vmatpush.bf16.msrb.mxu0 %v6207_v38  ;;  %1449 = vmatpush.bf16.msra.mxu3 %v6275_v60  ;;  %v6234_v30 = vld [vmem:[%s10772_s2 + $0x80] sm:$0xf]  ;;  %v6171_v31 = vor.u32 %v6770_v29, %v6170_v28  ;;  %v6786_v32 = vld [vmem:[%s10772_s2 + $0x84] sm:$0xf0]  ;;  %v6355_v54 = vld [vmem:[%s10773_s3 + $0x70] sm:$0xf] }
  0x23   : > { %1628 = vmatpush.bf16.msrb.mxu1 %v6271_v40  ;;  %v6757_v37 = vld [vmem:[%s7185_s14 + $0x40] sm:$0xff]  ;;  %v6816_v55 = vld [vmem:[%s10773_s3 + $0x74] sm:$0xf0]  ;;  %v6419_v56 = vld [vmem:[%s10773_s3 + $0xf0] sm:$0xf] }
  0x24   : > { %v6356_v60 = vor.u32 %v6816_v55, %v6355_v54  ;;  %v6832_v61 = vld [vmem:[%s10773_s3 + $0xf4] sm:$0xf0]  ;;  %v6773_v62 = vld [vmem:[%s10772_s2 + $0x24] sm:$0xf]  ;;  %v6188_v63 = vld [vmem:[%s10772_s2 + $0x28] sm:$0xf0] }
  0x25   : > { %6136 = vmatmul.msk.bf16.gmra.mxu0 %vm452_vm0, %v6750_v25  ;;  %1361 = vmatpush.bf16.msra.mxu2 %v6203_v0  ;;  %v6420_v0 = vor.u32 %v6832_v61, %v6419_v56  ;;  %v6191_v1 = vor.u32 %v6773_v62, %v6188_v63  ;;  %v6252_v3 = vld [vmem:[%s10772_s2 + $0xa8] sm:$0xf0]  ;;  %v6347_v4 = vld [vmem:[%s10773_s3 + $0x60] sm:$0xf]  ;;  %v6814_v5 = vld [vmem:[%s10773_s3 + $0x64] sm:$0xf0] }
  0x26   : > { %6152 = vmatmul.msk.bf16.gmra.mxu1 %vm452_vm0, %v6750_v25  ;;  %1450 = vmatpush.bf16.msra.mxu3 %v6267_v2  ;;  %v6179_v25 = vor.u32 %v6772_v22, %v6178_v21  ;;  %v6789_v2 = vld [vmem:[%s10772_s2 + $0xa4] sm:$0xf] }
  0x27   : > { %1540 = vmatpush.bf16.msrb.mxu0 %v6199_v18  ;;  %1629 = vmatpush.bf16.msrb.mxu1 %v6263_v20  ;;  %v6255_v11 = vor.u32 %v6789_v2, %v6252_v3 }
  0x29   : > { %1362 = vmatpush.bf16.msra.mxu2 %v6195_v6 }
  0x2a   : > { %1451 = vmatpush.bf16.msra.mxu3 %v6259_v8  ;;  %v6758_v8 = vld [vmem:[%s7185_s14 + $0x48] sm:$0xff] }
  0x2b   : > { %1541 = vmatpush.bf16.msrb.mxu0 %v6191_v1  ;;  %1630 = vmatpush.bf16.msrb.mxu1 %v6255_v11  ;;  %v6830_v11 = vld [vmem:[%s10773_s3 + $0xe4] sm:$0xf0] }
  0x2d   : > { %1363 = vmatpush.bf16.msra.mxu2 %v6187_v12 }
  0x2e   : > { %1452 = vmatpush.bf16.msra.mxu3 %v6251_v17 }
  0x31   : > { %1364 = vmatpush.bf16.msra.mxu2 %v6179_v25 }
  0x35   : > { %6137 = vmatmul.msk.bf16.gmra.mxu0 %vm452_vm0, %v6751_v26  ;;  %1365 = vmatpush.bf16.msra.mxu2 %v6171_v31 }
  0x36   : > { %6153 = vmatmul.msk.bf16.gmra.mxu1 %vm452_vm0, %v6751_v26  ;;  %v6788_v26 = vld [vmem:[%s10772_s2 + $0x94] sm:$0xf0] }
  0x37   : > { %v6243_v27 = vor.u32 %v6788_v26, %v6242_v23 }
  0x39   : > { %1453 = vmatpush.bf16.msra.mxu3 %v6243_v27  ;;  %2393 = vmatpush.bf16.msrb.mxu2 %v6356_v60 }
  0x45   : > { %6138 = vmatmul.msk.bf16.gmra.mxu0 %vm452_vm0, %v6752_v33 }
  0x46   : > { %6154 = vmatmul.msk.bf16.gmra.mxu1 %vm452_vm0, %v6752_v33  ;;  %v6235_v33 = vor.u32 %v6786_v32, %v6234_v30 }
  0x48   : > { %1454 = vmatpush.bf16.msra.mxu3 %v6235_v33 }
  0x4c   : > { %2482 = vmatpush.bf16.msrb.mxu3 %v6420_v0 }
  0x55   : > { %6139 = vmatmul.msk.bf16.gmra.mxu0 %vm452_vm0, %v6753_v34 }
  0x56   : > { %6155 = vmatmul.msk.bf16.gmra.mxu1 %vm452_vm0, %v6753_v34  ;;  %v342_v34 = vld [vmem:[%s10777_s7] ss:$8 sm:$0x3] }
  0x57   : > { %v7358_v35 = vperm.slane %v342_v34, 0  ;;  %v7360_v36 = vperm.slane %v342_v34, 1 }
  0x65   : > { %6140 = vmatmul.msk.bf16.gmra.mxu0 %vm452_vm0, %v6754_v41 }
  0x66   : > { %6156 = vmatmul.msk.bf16.gmra.mxu1 %vm452_vm0, %v6754_v41 }
  0x75   : > { %6141 = vmatmul.msk.bf16.gmra.mxu0 %vm452_vm0, %v6755_v57 }
  0x76   : > { %6157 = vmatmul.msk.bf16.gmra.mxu1 %vm452_vm0, %v6755_v57 }
  0x85   : > { %6142 = vmatmul.msk.bf16.gmra.mxu0 %vm452_vm0, %v6756_v24 }
  0x86   : > { %6158 = vmatmul.msk.bf16.gmra.mxu1 %vm452_vm0, %v6756_v24 }
  0x92   : > { %v510_v38 = vpop.f32.mrf.mxu0 }
  0x93   : > { %v599_v39 = vpop.f32.mrf.mxu1  ;;  %v511_v40 = vadd.f32 %v510_v38, %v7358_v35 }
  0x94   : > { %v600_v41 = vadd.f32 %v599_v39, %v7360_v36 }
  0x95   : > { %6143 = vmatmul.msk.bf16.gmra.mxu0 %vm452_vm0, %v6757_v37 }
  0x96   : > { %v679_v42 = vpack.c.bf16 %v600_v41, %v511_v40  ;;  %6159 = vmatmul.msk.bf16.gmra.mxu1 %vm452_vm0, %v6757_v37 }
  0x98   : > { %v711_v43 = vunpack.c.l.bf16 %v679_v42  ;;  %v712_v44 = vunpack.c.h.bf16 %v679_v42 }
  0x9a   : > { %v512_v45 = vpop.f32.mrf.mxu0  ;;  %v839_v47 = vmul.f32 0.010009766, %v711_v43  ;;  %v840_v48 = vmul.f32 0.010009766, %v712_v44  ;;  %vm7369_vm1 = vcmp.gt.f32.partialorder %v711_v43, 0.0  ;;  %vm7373_vm2 = vcmp.gt.f32.partialorder %v712_v44, 0.0 }
  0x9b   : > { %v601_v46 = vpop.f32.mrf.mxu1  ;;  %v513_v49 = vadd.f32 %v512_v45, %v7358_v35  ;;  %vm935_vm5 = vmpackc.low %vm7373_vm2, %vm7369_vm1 }
  0x9c   : > { %v602_v50 = vadd.f32 %v601_v46, %v7360_v36  ;;  %v903_v57 = vpack.c.bf16 %v840_v48, %v839_v47 }
  0x9e   : > { %v680_v53 = vpack.c.bf16 %v602_v50, %v513_v49  ;;  %v7414_v12 = vsel %vm935_vm5, %v679_v42, %v903_v57  ;;  %v6759_v42 = vld [vmem:[%s7185_s14 + $0x50] sm:$0xff] }
  0x9f   : > { %v1070_v18 = vunpack.c.l.b16 %v7414_v12  ;;  %v1071_v20 = vunpack.c.h.b16 %v7414_v12 }
  0xa0   : > { %v713_v58 = vunpack.c.l.bf16 %v680_v53  ;;  %v714_v59 = vunpack.c.h.bf16 %v680_v53 }
  0xa2   : > { %vm7401_vm3 = vcmp.gt.f32.partialorder %v713_v58, 0.0  ;;  %vm7405_vm4 = vcmp.gt.f32.partialorder %v714_v59, 0.0  ;;  %v841_v6 = vmul.f32 0.010009766, %v713_v58  ;;  %v842_v7 = vmul.f32 0.010009766, %v714_v59  ;;  %v515_v9 = vpop.f32.mrf.mxu0 }
  0xa3   : > { %v604_v10 = vpop.f32.mrf.mxu1  ;;  %v516_v13 = vadd.f32 %v515_v9, %v7358_v35  ;;  %vm936_vm6 = vmpackc.low %vm7405_vm4, %vm7401_vm3 }
  0xa4   : > { %v605_v14 = vadd.f32 %v604_v10, %v7360_v36  ;;  %v904_v15 = vpack.c.bf16 %v842_v7, %v841_v6  ;;  %v6411_v6 = vld [vmem:[%s10773_s3 + $0xe0] sm:$0xf]  ;;  %v6348_v10 = vor.u32 %v6814_v5, %v6347_v4 }
  0xa5   : > { %6144 = vmatmul.msk.bf16.gmra.mxu0 %vm452_vm0, %v6758_v8 }
  0xa6   : > { %v681_v16 = vpack.c.bf16 %v605_v14, %v516_v13  ;;  %6160 = vmatmul.msk.bf16.gmra.mxu1 %vm452_vm0, %v6758_v8  ;;  %v7424_v17 = vsel %vm936_vm6, %v680_v53, %v904_v15  ;;  %v6771_v13 = vld [vmem:[%s10772_s2 + $0x14] sm:$0xf]  ;;  %v6180_v14 = vld [vmem:[%s10772_s2 + $0x18] sm:$0xf0]  ;;  %v6412_v15 = vor.u32 %v6830_v11, %v6411_v6  ;;  %2394 = vmatpush.bf16.msrb.mxu2 %v6348_v10 }
  0xa7   : > { %v1072_v19 = vunpack.c.l.b16 %v7424_v17  ;;  %v1073_v21 = vunpack.c.h.b16 %v7424_v17 }
  0xa8   : > { %v715_v22 = vunpack.c.l.bf16 %v681_v16  ;;  %v716_v23 = vunpack.c.h.bf16 %v681_v16  ;;  %2483 = vmatpush.bf16.msrb.mxu3 %v6412_v15 }
  0xa9   : > { %v7430_v24 = vpack.c.b16 %v1072_v19, %v1070_v18  ;;  %v7432_v25 = vpack.c.b16 %v1073_v21, %v1071_v20  ;;  %v6787_v18 = vld [vmem:[%s10772_s2 + $0x94] sm:$0xf]  ;;  %v6244_v19 = vld [vmem:[%s10772_s2 + $0x98] sm:$0xf0] }
  0xaa   : > { %v517_v26 = vpop.f32.mrf.mxu0  ;;  %v843_v28 = vmul.f32 0.010009766, %v715_v22  ;;  %v844_v29 = vmul.f32 0.010009766, %v716_v23  ;;  %vm779_vm7 = vcmp.gt.f32.partialorder %v715_v22, 0.0  ;;  %vm780_vm8 = vcmp.gt.f32.partialorder %v716_v23, 0.0 }
  0xab   : > { %v606_v27 = vpop.f32.mrf.mxu1  ;;  %1366 = vmatmul.bf16.vlgmr.msra.gmra.mxu2 %v7430_v24  ;;  %1455 = vmatmul.bf16.vlgmr.msra.gmra.mxu3 %v7432_v25  ;;  %v518_v30 = vadd.f32 %v517_v26, %v7358_v35  ;;  %vm937_vm11 = vmpackc.low %vm780_vm8, %vm779_vm7  ;;  %v6760_v26 = vld [vmem:[%s7185_s14 + $0x58] sm:$0xff] }
  0xac   : > { %v607_v31 = vadd.f32 %v606_v27, %v7360_v36  ;;  %v905_v33 = vpack.c.bf16 %v844_v29, %v843_v28  ;;  %v6247_v29 = vor.u32 %v6787_v18, %v6244_v19 }
  0xae   : > { %v682_v32 = vpack.c.bf16 %v607_v31, %v518_v30  ;;  %v7447_v45 = vsel %vm937_vm11, %v681_v16, %v905_v33  ;;  %v6183_v16 = vor.u32 %v6771_v13, %v6180_v14  ;;  %1631 = vmatpush.bf16.msrb.mxu1 %v6247_v29 }
  0xaf   : > { %v1074_v51 = vunpack.c.l.b16 %v7447_v45  ;;  %v1075_v53 = vunpack.c.h.b16 %v7447_v45 }
  0xb0   : > { %v717_v34 = vunpack.c.l.bf16 %v682_v32  ;;  %v718_v37 = vunpack.c.h.bf16 %v682_v32  ;;  %1542 = vmatpush.bf16.msrb.mxu0 %v6183_v16 }
  0xb2   : > { %vm7438_vm9 = vcmp.gt.f32.partialorder %v717_v34, 0.0  ;;  %vm7442_vm10 = vcmp.gt.f32.partialorder %v718_v37, 0.0  ;;  %v845_v40 = vmul.f32 0.010009766, %v717_v34  ;;  %v846_v41 = vmul.f32 0.010009766, %v718_v37  ;;  %v520_v43 = vpop.f32.mrf.mxu0 }
  0xb3   : > { %v609_v44 = vpop.f32.mrf.mxu1  ;;  %v521_v46 = vadd.f32 %v520_v43, %v7358_v35  ;;  %vm938_vm12 = vmpackc.low %vm7442_vm10, %vm7438_vm9 }
  0xb4   : > { %v610_v47 = vadd.f32 %v609_v44, %v7360_v36  ;;  %v906_v48 = vpack.c.bf16 %v846_v41, %v845_v40 }
  0xb5   : > { %6145 = vmatmul.msk.bf16.gmra.mxu0 %vm452_vm0, %v6759_v42 }
  0xb6   : > { %v683_v49 = vpack.c.bf16 %v610_v47, %v521_v46  ;;  %6161 = vmatmul.msk.bf16.gmra.mxu1 %vm452_vm0, %v6759_v42  ;;  %v7457_v50 = vsel %vm938_vm12, %v682_v32, %v906_v48 }
  0xb7   : > { %v1076_v52 = vunpack.c.l.b16 %v7457_v50  ;;  %v1077_v54 = vunpack.c.h.b16 %v7457_v50 }
  0xb8   : > { %v719_v55 = vunpack.c.l.bf16 %v683_v49  ;;  %v720_v56 = vunpack.c.h.bf16 %v683_v49 }
  0xb9   : > { %v7463_v57 = vpack.c.b16 %v1076_v52, %v1074_v51  ;;  %v7465_v58 = vpack.c.b16 %v1077_v54, %v1075_v53 }
  0xba   : > { %v522_v59 = vpop.f32.mrf.mxu0  ;;  %v847_v61 = vmul.f32 0.010009766, %v719_v55  ;;  %v848_v62 = vmul.f32 0.010009766, %v720_v56  ;;  %vm7471_vm13 = vcmp.gt.f32.partialorder %v719_v55, 0.0  ;;  %vm7475_vm14 = vcmp.gt.f32.partialorder %v720_v56, 0.0 }
  0xbb   : > { %v611_v60 = vpop.f32.mrf.mxu1  ;;  %1371 = vmatmul.bf16.gmra.mxu2 %v7463_v57  ;;  %1460 = vmatmul.bf16.gmra.mxu3 %v7465_v58  ;;  %v523_v63 = vadd.f32 %v522_v59, %v7358_v35  ;;  %vm939_vm2 = vmpackc.low %vm7475_vm14, %vm7471_vm13 }
  0xbc   : > { %v612_v0 = vadd.f32 %v611_v60, %v7360_v36  ;;  %v907_v7 = vpack.c.bf16 %v848_v62, %v847_v61 }
  0xbe   : > { %v684_v3 = vpack.c.bf16 %v612_v0, %v523_v63  ;;  %v7516_v30 = vsel %vm939_vm2, %v683_v49, %v907_v7  ;;  %v6761_v0 = vld [vmem:[%s7185_s14 + $0x60] sm:$0xff] }
  0xbf   : > { %v1078_v38 = vunpack.c.l.b16 %v7516_v30  ;;  %v1079_v40 = vunpack.c.h.b16 %v7516_v30 }
  0xc0   : > { %v721_v8 = vunpack.c.l.bf16 %v684_v3  ;;  %v722_v9 = vunpack.c.h.bf16 %v684_v3 }
  0xc2   : > { %vm7503_vm15 = vcmp.gt.f32.partialorder %v721_v8, 0.0  ;;  %vm7507_vm1 = vcmp.gt.f32.partialorder %v722_v9, 0.0  ;;  %v849_v22 = vmul.f32 0.010009766, %v721_v8  ;;  %v850_v23 = vmul.f32 0.010009766, %v722_v9  ;;  %v525_v27 = vpop.f32.mrf.mxu0 }
  0xc3   : > { %v614_v28 = vpop.f32.mrf.mxu1  ;;  %v526_v31 = vadd.f32 %v525_v27, %v7358_v35  ;;  %vm940_vm3 = vmpackc.low %vm7507_vm1, %vm7503_vm15 }
  0xc4   : > { %v615_v32 = vadd.f32 %v614_v28, %v7360_v36  ;;  %v908_v33 = vpack.c.bf16 %v850_v23, %v849_v22 }
  0xc5   : > { %6146 = vmatmul.msk.bf16.gmra.mxu0 %vm452_vm0, %v6760_v26 }
  0xc6   : > { %v685_v34 = vpack.c.bf16 %v615_v32, %v526_v31  ;;  %6162 = vmatmul.msk.bf16.gmra.mxu1 %vm452_vm0, %v6760_v26  ;;  %v7526_v37 = vsel %vm940_vm3, %v684_v3, %v908_v33  ;;  %v6339_v31 = vld [vmem:[%s10773_s3 + $0x50] sm:$0xf]  ;;  %v6812_v32 = vld [vmem:[%s10773_s3 + $0x54] sm:$0xf0] }
  0xc7   : > { %v1080_v39 = vunpack.c.l.b16 %v7526_v37  ;;  %v1081_v41 = vunpack.c.h.b16 %v7526_v37  ;;  %v6403_v33 = vld [vmem:[%s10773_s3 + $0xd0] sm:$0xf] }
  0xc8   : > { %v723_v42 = vunpack.c.l.bf16 %v685_v34  ;;  %v724_v43 = vunpack.c.h.bf16 %v685_v34 }
  0xc9   : > { %v7532_v44 = vpack.c.b16 %v1080_v39, %v1078_v38  ;;  %v7534_v46 = vpack.c.b16 %v1081_v41, %v1079_v40  ;;  %v6340_v40 = vor.u32 %v6812_v32, %v6339_v31  ;;  %v6828_v41 = vld [vmem:[%s10773_s3 + $0xd4] sm:$0xf0]  ;;  %v6831_v31 = vld [vmem:[%s10773_s3 + $0xf4] sm:$0xf]  ;;  %v6421_v32 = vld [vmem:[%s10773_s3 + $0xf8] sm:$0xf0] }
  0xca   : > { %v527_v47 = vpop.f32.mrf.mxu0  ;;  %v851_v49 = vmul.f32 0.010009766, %v723_v42  ;;  %v852_v51 = vmul.f32 0.010009766, %v724_v43  ;;  %vm787_vm4 = vcmp.gt.f32.partialorder %v723_v42, 0.0  ;;  %vm788_vm5 = vcmp.gt.f32.partialorder %v724_v43, 0.0  ;;  %v6769_v42 = vld [vmem:[%s10772_s2 + $0x4] sm:$0xf] }
  0xcb   : > { %v616_v48 = vpop.f32.mrf.mxu1  ;;  %1376 = vmatmul.bf16.gmra.mxu2 %v7532_v44  ;;  %1465 = vmatmul.bf16.gmra.mxu3 %v7534_v46  ;;  %v528_v52 = vadd.f32 %v527_v47, %v7358_v35  ;;  %vm941_vm8 = vmpackc.low %vm788_vm5, %vm787_vm4  ;;  %v6172_v43 = vld [vmem:[%s10772_s2 + $0x8] sm:$0xf0]  ;;  %v6404_v47 = vor.u32 %v6828_v41, %v6403_v33 }
  0xcc   : > { %v617_v53 = vadd.f32 %v616_v48, %v7360_v36  ;;  %v909_v55 = vpack.c.bf16 %v852_v51, %v851_v49  ;;  %v6175_v48 = vor.u32 %v6769_v42, %v6172_v43  ;;  %v6785_v49 = vld [vmem:[%s10772_s2 + $0x84] sm:$0xf]  ;;  %v6236_v51 = vld [vmem:[%s10772_s2 + $0x88] sm:$0xf0]  ;;  %2395 = vmatpush.bf16.msrb.mxu2 %v6340_v40 }
  0xcd   : > { %2484 = vmatpush.bf16.msrb.mxu3 %v6404_v47  ;;  %v6239_v61 = vor.u32 %v6785_v49, %v6236_v51 }
  0xce   : > { %v686_v54 = vpack.c.bf16 %v617_v53, %v528_v52  ;;  %v7549_v3 = vsel %vm941_vm8, %v685_v34, %v909_v55  ;;  %1543 = vmatpush.bf16.msrb.mxu0 %v6175_v48 }
  0xcf   : > { %v1082_v9 = vunpack.c.l.b16 %v7549_v3  ;;  %v1083_v11 = vunpack.c.h.b16 %v7549_v3  ;;  %1632 = vmatpush.bf16.msrb.mxu1 %v6239_v61 }
  0xd0   : > { %v725_v56 = vunpack.c.l.bf16 %v686_v54  ;;  %v726_v59 = vunpack.c.h.bf16 %v686_v54 }
  0xd2   : > { %vm7540_vm6 = vcmp.gt.f32.partialorder %v725_v56, 0.0  ;;  %vm7544_vm7 = vcmp.gt.f32.partialorder %v726_v59, 0.0  ;;  %v853_v62 = vmul.f32 0.010009766, %v725_v56  ;;  %v854_v63 = vmul.f32 0.010009766, %v726_v59  ;;  %v530_v1 = vpop.f32.mrf.mxu0  ;;  %v6762_v56 = vld [vmem:[%s7185_s14 + $0x68] sm:$0xff] }
  0xd3   : > { %v619_v2 = vpop.f32.mrf.mxu1  ;;  %v531_v4 = vadd.f32 %v530_v1, %v7358_v35  ;;  %vm942_vm9 = vmpackc.low %vm7544_vm7, %vm7540_vm6 }
  0xd4   : > { %v620_v5 = vadd.f32 %v619_v2, %v7360_v36  ;;  %v910_v6 = vpack.c.bf16 %v854_v63, %v853_v62 }
  0xd5   : > { %6147 = vmatmul.msk.bf16.gmra.mxu0 %vm452_vm0, %v6761_v0 }
  0xd6   : > { %v687_v7 = vpack.c.bf16 %v620_v5, %v531_v4  ;;  %6163 = vmatmul.msk.bf16.gmra.mxu1 %vm452_vm0, %v6761_v0  ;;  %v7559_v8 = vsel %vm942_vm9, %v686_v54, %v910_v6 }
  0xd7   : > { %v1084_v10 = vunpack.c.l.b16 %v7559_v8  ;;  %v1085_v13 = vunpack.c.h.b16 %v7559_v8 }
  0xd8   : > { %v727_v14 = vunpack.c.l.bf16 %v687_v7  ;;  %v728_v15 = vunpack.c.h.bf16 %v687_v7 }
  0xd9   : > { %v7565_v16 = vpack.c.b16 %v1084_v10, %v1082_v9  ;;  %v7567_v18 = vpack.c.b16 %v1085_v13, %v1083_v11 }
  0xda   : > { %v532_v19 = vpop.f32.mrf.mxu0  ;;  %v855_v21 = vmul.f32 0.010009766, %v727_v14  ;;  %v856_v22 = vmul.f32 0.010009766, %v728_v15  ;;  %vm7573_vm10 = vcmp.gt.f32.partialorder %v727_v14, 0.0  ;;  %vm7577_vm11 = vcmp.gt.f32.partialorder %v728_v15, 0.0 }
  0xdb   : > { %v621_v20 = vpop.f32.mrf.mxu1  ;;  %1381 = vmatmul.bf16.gmra.mxu2 %v7565_v16  ;;  %1470 = vmatmul.bf16.gmra.mxu3 %v7567_v18  ;;  %v533_v23 = vadd.f32 %v532_v19, %v7358_v35  ;;  %vm943_vm14 = vmpackc.low %vm7577_vm11, %vm7573_vm10 }
  0xdc   : > { %v622_v26 = vadd.f32 %v621_v20, %v7360_v36  ;;  %v911_v34 = vpack.c.bf16 %v856_v22, %v855_v21 }
  0xde   : > { %v688_v29 = vpack.c.bf16 %v622_v26, %v533_v23  ;;  %v7618_v62 = vsel %vm943_vm14, %v687_v7, %v911_v34 }
  0xdf   : > { %v1086_v5 = vunpack.c.l.b16 %v7618_v62  ;;  %v1087_v7 = vunpack.c.h.b16 %v7618_v62 }
  0xe0   : > { %v729_v38 = vunpack.c.l.bf16 %v688_v29  ;;  %v730_v39 = vunpack.c.h.bf16 %v688_v29 }
  0xe2   : > { %vm7605_vm12 = vcmp.gt.f32.partialorder %v729_v38, 0.0  ;;  %vm7609_vm13 = vcmp.gt.f32.partialorder %v730_v39, 0.0  ;;  %v857_v54 = vmul.f32 0.010009766, %v729_v38  ;;  %v858_v55 = vmul.f32 0.010009766, %v730_v39  ;;  %v535_v59 = vpop.f32.mrf.mxu0  ;;  %v6763_v38 = vld [vmem:[%s7185_s14 + $0x70] sm:$0xff] }
  0xe3   : > { %v624_v60 = vpop.f32.mrf.mxu1  ;;  %v536_v63 = vadd.f32 %v535_v59, %v7358_v35  ;;  %vm944_vm15 = vmpackc.low %vm7609_vm13, %vm7605_vm12 }
  0xe4   : > { %v625_v0 = vadd.f32 %v624_v60, %v7360_v36  ;;  %v912_v1 = vpack.c.bf16 %v858_v55, %v857_v54 }
  0xe5   : > { %6148 = vmatmul.msk.bf16.gmra.mxu0 %vm452_vm0, %v6762_v56 }
  0xe6   : > { %v689_v2 = vpack.c.bf16 %v625_v0, %v536_v63  ;;  %6164 = vmatmul.msk.bf16.gmra.mxu1 %vm452_vm0, %v6762_v56  ;;  %v7628_v4 = vsel %vm944_vm15, %v688_v29, %v912_v1 }
  0xe7   : > { %v1088_v6 = vunpack.c.l.b16 %v7628_v4  ;;  %v1089_v9 = vunpack.c.h.b16 %v7628_v4 }
  0xe8   : > { %v731_v10 = vunpack.c.l.bf16 %v689_v2  ;;  %v732_v11 = vunpack.c.h.bf16 %v689_v2 }
  0xe9   : > { %v7634_v13 = vpack.c.b16 %v1088_v6, %v1086_v5  ;;  %v7636_v14 = vpack.c.b16 %v1089_v9, %v1087_v7 }
  0xea   : > { %v537_v15 = vpop.f32.mrf.mxu0  ;;  %v859_v20 = vmul.f32 0.010009766, %v731_v10  ;;  %v860_v21 = vmul.f32 0.010009766, %v732_v11  ;;  %vm795_vm1 = vcmp.gt.f32.partialorder %v731_v10, 0.0  ;;  %vm796_vm2 = vcmp.gt.f32.partialorder %v732_v11, 0.0  ;;  %v6331_v10 = vld [vmem:[%s10773_s3 + $0x40] sm:$0xf] }
  0xeb   : > { %v626_v19 = vpop.f32.mrf.mxu1  ;;  %1386 = vmatmul.bf16.gmra.mxu2 %v7634_v13  ;;  %1475 = vmatmul.bf16.gmra.mxu3 %v7636_v14  ;;  %v538_v22 = vadd.f32 %v537_v15, %v7358_v35  ;;  %vm945_vm5 = vmpackc.low %vm796_vm2, %vm795_vm1  ;;  %v6810_v11 = vld [vmem:[%s10773_s3 + $0x44] sm:$0xf0]  ;;  %v6395_v15 = vld [vmem:[%s10773_s3 + $0xc0] sm:$0xf] }
  0xec   : > { %v627_v23 = vadd.f32 %v626_v19, %v7360_v36  ;;  %v913_v27 = vpack.c.bf16 %v860_v21, %v859_v20 }
  0xee   : > { %v690_v26 = vpack.c.bf16 %v627_v23, %v538_v22  ;;  %v7651_v41 = vsel %vm945_vm5, %v689_v2, %v913_v27  ;;  %v6332_v22 = vor.u32 %v6810_v11, %v6331_v10  ;;  %v6826_v23 = vld [vmem:[%s10773_s3 + $0xc4] sm:$0xf0]  ;;  %v6357_v27 = vld [vmem:[%s10773_s3 + $0x78] sm:$0xf0] }
  0xef   : > { %v1090_v51 = vunpack.c.l.b16 %v7651_v41  ;;  %v1091_v53 = vunpack.c.h.b16 %v7651_v41 }
  0xf0   : > { %v733_v28 = vunpack.c.l.bf16 %v690_v26  ;;  %v734_v29 = vunpack.c.h.bf16 %v690_v26  ;;  %2396 = vmatpush.bf16.msrb.mxu2 %v6332_v22 }
  0xf2   : > { %vm7642_vm3 = vcmp.gt.f32.partialorder %v733_v28, 0.0  ;;  %vm7646_vm4 = vcmp.gt.f32.partialorder %v734_v29, 0.0  ;;  %v861_v33 = vmul.f32 0.010009766, %v733_v28  ;;  %v862_v34 = vmul.f32 0.010009766, %v734_v29  ;;  %v540_v39 = vpop.f32.mrf.mxu0 }
  0xf3   : > { %v629_v40 = vpop.f32.mrf.mxu1  ;;  %v541_v42 = vadd.f32 %v540_v39, %v7358_v35  ;;  %vm946_vm6 = vmpackc.low %vm7646_vm4, %vm7642_vm3  ;;  %v6396_v28 = vor.u32 %v6826_v23, %v6395_v15 }
  0xf4   : > { %v630_v43 = vadd.f32 %v629_v40, %v7360_v36  ;;  %v914_v47 = vpack.c.bf16 %v862_v34, %v861_v33  ;;  %v6764_v40 = vld [vmem:[%s7185_s14 + $0x78] sm:$0xff] }
  0xf5   : > { %6149 = vmatmul.msk.bf16.gmra.mxu0 %vm452_vm0, %v6763_v38  ;;  %2485 = vmatpush.bf16.msrb.mxu3 %v6396_v28 }
  0xf6   : > { %v691_v48 = vpack.c.bf16 %v630_v43, %v541_v42  ;;  %6165 = vmatmul.msk.bf16.gmra.mxu1 %vm452_vm0, %v6763_v38  ;;  %v7661_v49 = vsel %vm946_vm6, %v690_v26, %v914_v47  ;;  %v6815_v26 = vld [vmem:[%s10773_s3 + $0x74] sm:$0xf]  ;;  %v6424_v47 = vor.u32 %v6831_v31, %v6421_v32 }
  0xf7   : > { %v1092_v52 = vunpack.c.l.b16 %v7661_v49  ;;  %v1093_v54 = vunpack.c.h.b16 %v7661_v49  ;;  %v6360_v29 = vor.u32 %v6815_v26, %v6357_v27  ;;  %v6813_v26 = vld [vmem:[%s10773_s3 + $0x64] sm:$0xf] }
  0xf8   : > { %v735_v55 = vunpack.c.l.bf16 %v691_v48  ;;  %v736_v56 = vunpack.c.h.bf16 %v691_v48  ;;  %2660 = vmatpush.bf16.msra.mxu1 %v6424_v47 }
  0xf9   : > { %v7667_v59 = vpack.c.b16 %v1092_v52, %v1090_v51  ;;  %v7669_v60 = vpack.c.b16 %v1093_v54, %v1091_v53  ;;  %2571 = vmatpush.bf16.msra.mxu0 %v6360_v29 }
  0xfa   : > { %v542_v61 = vpop.f32.mrf.mxu0  ;;  %v863_v0 = vmul.f32 0.010009766, %v735_v55  ;;  %v864_v1 = vmul.f32 0.010009766, %v736_v56  ;;  %vm7675_vm7 = vcmp.gt.f32.partialorder %v735_v55, 0.0  ;;  %vm7679_vm8 = vcmp.gt.f32.partialorder %v736_v56, 0.0 }
  0xfb   : > { %v631_v63 = vpop.f32.mrf.mxu1  ;;  %1391 = vmatmul.bf16.gmra.mxu2 %v7667_v59  ;;  %1480 = vmatmul.bf16.gmra.mxu3 %v7669_v60  ;;  %v543_v2 = vadd.f32 %v542_v61, %v7358_v35  ;;  %vm947_vm11 = vmpackc.low %vm7679_vm8, %vm7675_vm7 }
  0xfc   : > { %v632_v5 = vadd.f32 %v631_v63, %v7360_v36  ;;  %v915_v19 = vpack.c.bf16 %v864_v1, %v863_v0 }
  0xfe   : > { %v692_v9 = vpack.c.bf16 %v632_v5, %v543_v2  ;;  %v7720_v51 = vsel %vm947_vm11, %v691_v48, %v915_v19 }
  0xff   : > { %10901 = vst [vmem:[#allocation2_spill] sm:$0xff] %v7720_v51  ;;  %v1094_v48 = vunpack.c.l.b16 %v7720_v51  ;;  %v1095_v63 = vunpack.c.h.b16 %v7720_v51 }
 0x100   : > { %v737_v20 = vunpack.c.l.bf16 %v692_v9  ;;  %v738_v21 = vunpack.c.h.bf16 %v692_v9 }
 0x102   : > { %vm7707_vm9 = vcmp.gt.f32.partialorder %v737_v20, 0.0  ;;  %vm7711_vm10 = vcmp.gt.f32.partialorder %v738_v21, 0.0  ;;  %v865_v38 = vmul.f32 0.010009766, %v737_v20  ;;  %v866_v39 = vmul.f32 0.010009766, %v738_v21  ;;  %v545_v42 = vpop.f32.mrf.mxu0 }
 0x103   : > { %v634_v43 = vpop.f32.mrf.mxu1  ;;  %v546_v52 = vadd.f32 %v545_v42, %v7358_v35  ;;  %vm948_vm12 = vmpackc.low %vm7711_vm10, %vm7707_vm9 }
 0x104   : > { %v635_v53 = vadd.f32 %v634_v43, %v7360_v36  ;;  %v916_v54 = vpack.c.bf16 %v866_v39, %v865_v38 }
 0x105   : > { %6150 = vmatmul.msk.bf16.gmra.mxu0 %vm452_vm0, %v6764_v40 }
 0x106   : > { %v693_v55 = vpack.c.bf16 %v635_v53, %v546_v52  ;;  %6166 = vmatmul.msk.bf16.gmra.mxu1 %vm452_vm0, %v6764_v40  ;;  %v7730_v56 = vsel %vm948_vm12, %v692_v9, %v916_v54 }
 0x107   : > { %10902 = vst [vmem:[#allocation3_spill] sm:$0xff] %v7730_v56  ;;  %v1096_v61 = vunpack.c.l.b16 %v7730_v56  ;;  %v1097_v0 = vunpack.c.h.b16 %v7730_v56 }
 0x108   : > { %v739_v1 = vunpack.c.l.bf16 %v693_v55  ;;  %v740_v2 = vunpack.c.h.bf16 %v693_v55 }
 0x109   : > { %v7736_v5 = vpack.c.b16 %v1096_v61, %v1094_v48  ;;  %v7738_v6 = vpack.c.b16 %v1097_v0, %v1095_v63 }
 0x10a   : > { %v547_v7 = vpop.f32.mrf.mxu0  ;;  %v867_v9 = vmul.f32 0.010009766, %v739_v1  ;;  %v868_v11 = vmul.f32 0.010009766, %v740_v2  ;;  %vm803_vm0 = vcmp.gt.f32.partialorder %v739_v1, 0.0  ;;  %vm804_vm13 = vcmp.gt.f32.partialorder %v740_v2, 0.0 }
 0x10b   : > { %v636_v10 = vpop.f32.mrf.mxu1  ;;  %1396 = vmatmul.bf16.gmra.mxu2 %v7736_v5  ;;  %1485 = vmatmul.bf16.gmra.mxu3 %v7738_v6  ;;  %v548_v15 = vadd.f32 %v547_v7, %v7358_v35  ;;  %vm949_vm1 = vmpackc.low %vm804_vm13, %vm803_vm0 }
 0x10c   : > { %v637_v19 = vadd.f32 %v636_v10, %v7360_v36  ;;  %v917_v21 = vpack.c.bf16 %v868_v11, %v867_v9  ;;  %v6323_v9 = vld [vmem:[%s10773_s3 + $0x30] sm:$0xf]  ;;  %v6808_v11 = vld [vmem:[%s10773_s3 + $0x34] sm:$0xf0] }
 0x10e   : > { %v694_v20 = vpack.c.bf16 %v637_v19, %v548_v15  ;;  %v7748_v32 = vsel %vm949_vm1, %v693_v55, %v917_v21  ;;  %v6387_v15 = vld [vmem:[%s10773_s3 + $0xb0] sm:$0xf] }
 0x10f   : > { %10905 = vst [vmem:[#allocation4_spill] sm:$0xff] %v7748_v32  ;;  %v1098_v42 = vunpack.c.l.b16 %v7748_v32  ;;  %v1099_v47 = vunpack.c.h.b16 %v7748_v32 }
 0x110   : > { %v741_v22 = vunpack.c.l.bf16 %v694_v20  ;;  %v742_v23 = vunpack.c.h.bf16 %v694_v20 }
 0x112   : > { %vm7744_vm14 = vcmp.gt.f32.partialorder %v741_v22, 0.0  ;;  %vm806_vm15 = vcmp.gt.f32.partialorder %v742_v23, 0.0  ;;  %v869_v27 = vmul.f32 0.010009766, %v741_v22  ;;  %v870_v28 = vmul.f32 0.010009766, %v742_v23  ;;  %v550_v29 = vpop.f32.mrf.mxu0  ;;  %v6824_v23 = vld [vmem:[%s10773_s3 + $0xb4] sm:$0xf0] }
 0x113   : > { %v639_v31 = vpop.f32.mrf.mxu1  ;;  %v551_v33 = vadd.f32 %v550_v29, %v7358_v35  ;;  %vm950_vm2 = vmpackc.low %vm806_vm15, %vm7744_vm14  ;;  %v6324_v22 = vor.u32 %v6808_v11, %v6323_v9 }
 0x114   : > { %v640_v34 = vadd.f32 %v639_v31, %v7360_v36  ;;  %v918_v38 = vpack.c.bf16 %v870_v28, %v869_v27  ;;  %v6349_v27 = vld [vmem:[%s10773_s3 + $0x68] sm:$0xf0]  ;;  %v6388_v28 = vor.u32 %v6824_v23, %v6387_v15  ;;  %v6829_v31 = vld [vmem:[%s10773_s3 + $0xe4] sm:$0xf] }
 0x115   : > { %1544 = vmatmul.bf16.vlgmr.msrb.gmra.mxu0 %v7430_v24  ;;  %v6352_v29 = vor.u32 %v6813_v26, %v6349_v27  ;;  %2397 = vmatpush.bf16.msrb.mxu2 %v6324_v22  ;;  %v7833_v15 = vld [vmem:[%s10777_s7 + $0x1] ss:$8 sm:$0x3] }
 0x116   : > { %v695_v39 = vpack.c.bf16 %v640_v34, %v551_v33  ;;  %1633 = vmatmul.bf16.vlgmr.msrb.gmra.mxu1 %v7432_v25  ;;  %v7756_v40 = vsel %vm950_vm2, %v694_v20, %v918_v38  ;;  %v6413_v33 = vld [vmem:[%s10773_s3 + $0xe8] sm:$0xf0]  ;;  %2486 = vmatpush.bf16.msrb.mxu3 %v6388_v28 }
 0x117   : > { %10906 = vst [vmem:[#allocation5_spill] sm:$0xff] %v7756_v40  ;;  %v1100_v43 = vunpack.c.l.b16 %v7756_v40  ;;  %v1101_v52 = vunpack.c.h.b16 %v7756_v40  ;;  %2572 = vmatpush.bf16.msra.mxu0 %v6352_v29  ;;  %v6325_v40 = vld [vmem:[%s10773_s3 + $0x38] sm:$0xf0] }
 0x118   : > { %v743_v53 = vunpack.c.l.bf16 %v695_v39  ;;  %v744_v54 = vunpack.c.h.bf16 %v695_v39 }
 0x119   : > { %v7762_v55 = vpack.c.b16 %v1100_v43, %v1098_v42  ;;  %v7764_v48 = vpack.c.b16 %v1101_v52, %v1099_v47 }
 0x11a   : > { %v552_v61 = vpop.f32.mrf.mxu0  ;;  %v871_v25 = vmul.f32 0.010009766, %v743_v53  ;;  %v872_v63 = vmul.f32 0.010009766, %v744_v54  ;;  %vm7770_vm3 = vcmp.gt.f32.partialorder %v743_v53, 0.0  ;;  %vm7774_vm4 = vcmp.gt.f32.partialorder %v744_v54, 0.0 }
 0x11b   : > { %v641_v24 = vpop.f32.mrf.mxu1  ;;  %1401 = vmatmul.bf16.gmra.mxu2 %v7762_v55  ;;  %1490 = vmatmul.bf16.gmra.mxu3 %v7764_v48  ;;  %v553_v0 = vadd.f32 %v552_v61, %v7358_v35  ;;  %vm951_vm7 = vmpackc.low %vm7774_vm4, %vm7770_vm3  ;;  %v6416_v53 = vor.u32 %v6829_v31, %v6413_v33 }
 0x11c   : > { %v642_v1 = vadd.f32 %v641_v24, %v7360_v36  ;;  %v919_v19 = vpack.c.bf16 %v872_v63, %v871_v25 }
 0x11d   : > { %2661 = vmatpush.bf16.msra.mxu1 %v6416_v53 }
 0x11e   : > { %v696_v10 = vpack.c.bf16 %v642_v1, %v553_v0  ;;  %v7814_v54 = vsel %vm951_vm7, %v695_v39, %v919_v19 }
 0x11f   : > { %10915 = vst [vmem:[#allocation6_spill] sm:$0xff] %v7814_v54  ;;  %v1102_v39 = vunpack.c.l.b16 %v7814_v54  ;;  %v1103_v2 = vunpack.c.h.b16 %v7814_v54 }
 0x120   : > { %v745_v20 = vunpack.c.l.bf16 %v696_v10  ;;  %v746_v21 = vunpack.c.h.bf16 %v696_v10 }
 0x122   : > { %vm7802_vm5 = vcmp.gt.f32.partialorder %v745_v20, 0.0  ;;  %vm7806_vm6 = vcmp.gt.f32.partialorder %v746_v21, 0.0  ;;  %v873_v42 = vmul.f32 0.010009766, %v745_v20  ;;  %v874_v43 = vmul.f32 0.010009766, %v746_v21  ;;  %v555_v47 = vpop.f32.mrf.mxu0 }
 0x123   : > { %v644_v52 = vpop.f32.mrf.mxu1  ;;  %v556_v61 = vadd.f32 %v555_v47, %v7358_v35  ;;  %vm952_vm8 = vmpackc.low %vm7806_vm6, %vm7802_vm5  ;;  %v7842_v20 = vperm.slane %v7833_v15, 0 }
 0x124   : > { %v645_v24 = vadd.f32 %v644_v52, %v7360_v36  ;;  %v920_v25 = vpack.c.bf16 %v874_v43, %v873_v42 }
 0x125   : > { %1549 = vmatmul.bf16.gmra.mxu0 %v7463_v57 }
 0x126   : > { %v697_v63 = vpack.c.bf16 %v645_v24, %v556_v61  ;;  %1638 = vmatmul.bf16.gmra.mxu1 %v7465_v58  ;;  %v7824_v0 = vsel %vm952_vm8, %v696_v10, %v920_v25 }
 0x127   : > { %10916 = vst [vmem:[#allocation7_spill] sm:$0xff] %v7824_v0  ;;  %v1104_v1 = vunpack.c.l.b16 %v7824_v0  ;;  %v1105_v7 = vunpack.c.h.b16 %v7824_v0 }
 0x128   : > { %v747_v9 = vunpack.c.l.bf16 %v697_v63  ;;  %v748_v11 = vunpack.c.h.bf16 %v697_v63 }
 0x129   : > { %v7835_v57 = vpack.c.b16 %v1104_v1, %v1102_v39  ;;  %v7837_v58 = vpack.c.b16 %v1105_v7, %v1103_v2 }
 0x12a   : > { %v557_v10 = vpop.f32.mrf.mxu0  ;;  %v875_v21 = vmul.f32 0.010009766, %v747_v9  ;;  %v876_v22 = vmul.f32 0.010009766, %v748_v11  ;;  %vm811_vm9 = vcmp.gt.f32.partialorder %v747_v9, 0.0  ;;  %vm812_vm10 = vcmp.gt.f32.partialorder %v748_v11, 0.0 }
 0x12b   : > { %v646_v19 = vpop.f32.mrf.mxu1  ;;  %1406 = vmatmul.bf16.gmra.mxu2 %v7835_v57  ;;  %1495 = vmatmul.bf16.gmra.mxu3 %v7837_v58  ;;  %v558_v23 = vadd.f32 %v557_v10, %v7358_v35  ;;  %vm953_vm0 = vmpackc.low %vm812_vm10, %vm811_vm9 }
 0x12c   : > { %v647_v26 = vadd.f32 %v646_v19, %v7360_v36  ;;  %v921_v33 = vpack.c.bf16 %v876_v22, %v875_v21 }
 0x12e   : > { %v698_v27 = vpack.c.bf16 %v647_v26, %v558_v23  ;;  %v1367_v28 = vpop.f32.mrf.mxu2  ;;  %v1456_v29 = vpop.f32.mrf.mxu3  ;;  %v7857_v25 = vsel %vm953_vm0, %v697_v63, %v921_v33 }
 0x12f   : > { %v1368_v31 = vadd.f32 %v1367_v28, %v7842_v20  ;;  %10921 = vst [vmem:[#allocation8_spill] sm:$0xff] %v7857_v25  ;;  %v1106_v19 = vunpack.c.l.b16 %v7857_v25 }
 0x130   : > { %v749_v34 = vunpack.c.l.bf16 %v698_v27  ;;  %v750_v38 = vunpack.c.h.bf16 %v698_v27 }
 0x131   : > { %v7847_v42 = vadd.f32 %v1456_v29, %v1368_v31 }
 0x132   : > { %vm7849_vm11 = vcmp.gt.f32.partialorder %v749_v34, 0.0  ;;  %vm7853_vm12 = vcmp.gt.f32.partialorder %v750_v38, 0.0  ;;  %v877_v52 = vmul.f32 0.010009766, %v749_v34  ;;  %v878_v53 = vmul.f32 0.010009766, %v750_v38  ;;  %v560_v61 = vpop.f32.mrf.mxu0 }
 0x133   : > { %v649_v24 = vpop.f32.mrf.mxu1  ;;  %v561_v39 = vadd.f32 %v560_v61, %v7358_v35  ;;  %vm954_vm13 = vmpackc.low %vm7853_vm12, %vm7849_vm11 }
 0x134   : > { %v650_v1 = vadd.f32 %v649_v24, %v7360_v36  ;;  %v922_v2 = vpack.c.bf16 %v878_v53, %v877_v52 }
 0x135   : > { %1554 = vmatmul.bf16.gmra.mxu0 %v7532_v44  ;;  %v1107_v44 = vunpack.c.h.b16 %v7857_v25 }
 0x136   : > { %v699_v7 = vpack.c.bf16 %v650_v1, %v561_v39  ;;  %v1369_v9 = vpop.f32.mrf.mxu2  ;;  %v1458_v11 = vpop.f32.mrf.mxu3  ;;  %1643 = vmatmul.bf16.gmra.mxu1 %v7534_v46  ;;  %v7867_v10 = vsel %vm954_vm13, %v698_v27, %v922_v2  ;;  %v6315_v1 = vld [vmem:[%s10773_s3 + $0x20] sm:$0xf]  ;;  %v6806_v2 = vld [vmem:[%s10773_s3 + $0x24] sm:$0xf0] }
 0x137   : > { %10922 = vst [vmem:[#allocation9_spill] sm:$0xff] %v7867_v10  ;;  %v1370_v63 = vadd.f32 %v1369_v9, %v7842_v20  ;;  %v1108_v21 = vunpack.c.l.b16 %v7867_v10  ;;  %v1109_v26 = vunpack.c.h.b16 %v7867_v10  ;;  %v6379_v9 = vld [vmem:[%s10773_s3 + $0xa0] sm:$0xf] }
 0x138   : > { %v751_v22 = vunpack.c.l.bf16 %v699_v7  ;;  %v752_v23 = vunpack.c.h.bf16 %v699_v7 }
 0x139   : > { %v7873_v28 = vadd.f32 %v1458_v11, %v1370_v63  ;;  %v7875_v29 = vpack.c.b16 %v1108_v21, %v1106_v19  ;;  %v7879_v27 = vpack.c.b16 %v1109_v26, %v1107_v44  ;;  %v6316_v21 = vor.u32 %v6806_v2, %v6315_v1  ;;  %v6341_v26 = vld [vmem:[%s10773_s3 + $0x58] sm:$0xf0] }
 0x13a   : > { %v562_v31 = vpop.f32.mrf.mxu0  ;;  %v879_v33 = vmul.f32 0.010009766, %v751_v22  ;;  %v880_v34 = vmul.f32 0.010009766, %v752_v23  ;;  %vm7884_vm14 = vcmp.gt.f32.partialorder %v751_v22, 0.0  ;;  %vm7888_vm15 = vcmp.gt.f32.partialorder %v752_v23, 0.0  ;;  %v6822_v22 = vld [vmem:[%s10773_s3 + $0xa4] sm:$0xf0] }
 0x13b   : > { %v651_v46 = vpop.f32.mrf.mxu1  ;;  %1411 = vmatmul.bf16.gmra.mxu2 %v7875_v29  ;;  %v563_v38 = vadd.f32 %v562_v31, %v7358_v35  ;;  %1500 = vmatmul.bf16.gmra.mxu3 %v7879_v27  ;;  %v6811_v23 = vld [vmem:[%s10773_s3 + $0x54] sm:$0xf]  ;;  %v6380_v31 = vor.u32 %v6822_v22, %v6379_v9  ;;  %vm955_vm3 = vmpackc.low %vm7888_vm15, %vm7884_vm14 }
 0x13c   : > { %v652_v43 = vadd.f32 %v651_v46, %v7360_v36  ;;  %v923_v11 = vpack.c.bf16 %v880_v34, %v879_v33  ;;  %v6344_v46 = vor.u32 %v6811_v23, %v6341_v26  ;;  %v6827_v33 = vld [vmem:[%s10773_s3 + $0xd4] sm:$0xf]  ;;  %v6405_v34 = vld [vmem:[%s10773_s3 + $0xd8] sm:$0xf0]  ;;  %2398 = vmatpush.bf16.msrb.mxu2 %v6316_v21 }
 0x13d   : > { %2487 = vmatpush.bf16.msrb.mxu3 %v6380_v31  ;;  %v6408_v2 = vor.u32 %v6827_v33, %v6405_v34 }
 0x13e   : > { %v700_v53 = vpack.c.bf16 %v652_v43, %v563_v38  ;;  %v1372_v61 = vpop.f32.mrf.mxu2  ;;  %v1461_v24 = vpop.f32.mrf.mxu3  ;;  %2573 = vmatpush.bf16.msra.mxu0 %v6344_v46  ;;  %v7931_v9 = vsel %vm955_vm3, %v699_v7, %v923_v11 }
 0x13f   : > { %v1373_v39 = vadd.f32 %v1372_v61, %v7842_v20  ;;  %10931 = vst [vmem:[#allocation10_spill] sm:$0xff] %v7931_v9  ;;  %2662 = vmatpush.bf16.msra.mxu1 %v6408_v2 }
 0x140   : > { %v753_v63 = vunpack.c.l.bf16 %v700_v53  ;;  %v754_v19 = vunpack.c.h.bf16 %v700_v53 }
 0x141   : > { %v7911_v44 = vadd.f32 %v1461_v24, %v1373_v39 }
 0x142   : > { %vm7919_vm1 = vcmp.gt.f32.partialorder %v753_v63, 0.0  ;;  %vm7923_vm2 = vcmp.gt.f32.partialorder %v754_v19, 0.0  ;;  %v881_v61 = vmul.f32 0.010009766, %v753_v63  ;;  %v882_v24 = vmul.f32 0.010009766, %v754_v19  ;;  %v565_v39 = vpop.f32.mrf.mxu0 }
 0x143   : > { %v654_v1 = vpop.f32.mrf.mxu1  ;;  %v566_v22 = vadd.f32 %v565_v39, %v7358_v35  ;;  %vm956_vm4 = vmpackc.low %vm7923_vm2, %vm7919_vm1  ;;  %v1110_v19 = vunpack.c.l.b16 %v7931_v9 }
 0x144   : > { %v655_v23 = vadd.f32 %v654_v1, %v7360_v36  ;;  %v924_v26 = vpack.c.bf16 %v882_v24, %v881_v61 }
 0x145   : > { %1559 = vmatmul.bf16.gmra.mxu0 %v7565_v16  ;;  %v1111_v16 = vunpack.c.h.b16 %v7931_v9 }
 0x146   : > { %v701_v47 = vpack.c.bf16 %v655_v23, %v566_v22  ;;  %v1374_v52 = vpop.f32.mrf.mxu2  ;;  %v1463_v63 = vpop.f32.mrf.mxu3  ;;  %1648 = vmatmul.bf16.gmra.mxu1 %v7567_v18  ;;  %v7941_v7 = vsel %vm956_vm4, %v700_v53, %v924_v26 }
 0x147   : > { %10932 = vst [vmem:[#allocation11_spill] sm:$0xff] %v7941_v7  ;;  %v1375_v11 = vadd.f32 %v1374_v52, %v7842_v20  ;;  %v1112_v21 = vunpack.c.l.b16 %v7941_v7  ;;  %v1113_v33 = vunpack.c.h.b16 %v7941_v7 }
 0x148   : > { %v755_v31 = vunpack.c.l.bf16 %v701_v47  ;;  %v756_v46 = vunpack.c.h.bf16 %v701_v47 }
 0x149   : > { %v7947_v34 = vadd.f32 %v1463_v63, %v1375_v11  ;;  %v7949_v38 = vpack.c.b16 %v1112_v21, %v1110_v19  ;;  %v7953_v53 = vpack.c.b16 %v1113_v33, %v1111_v16 }
 0x14a   : > { %v567_v43 = vpop.f32.mrf.mxu0  ;;  %v883_v61 = vmul.f32 0.010009766, %v755_v31  ;;  %v884_v24 = vmul.f32 0.010009766, %v756_v46  ;;  %vm819_vm5 = vcmp.gt.f32.partialorder %v755_v31, 0.0  ;;  %vm820_vm6 = vcmp.gt.f32.partialorder %v756_v46, 0.0 }
 0x14b   : > { %v656_v18 = vpop.f32.mrf.mxu1  ;;  %1416 = vmatmul.bf16.gmra.mxu2 %v7949_v38  ;;  %v568_v39 = vadd.f32 %v567_v43, %v7358_v35  ;;  %1505 = vmatmul.bf16.gmra.mxu3 %v7953_v53  ;;  %vm957_vm9 = vmpackc.low %vm820_vm6, %vm819_vm5 }
 0x14c   : > { %v657_v1 = vadd.f32 %v656_v18, %v7360_v36  ;;  %v925_v52 = vpack.c.bf16 %v884_v24, %v883_v61 }
 0x14e   : > { %v702_v2 = vpack.c.bf16 %v657_v1, %v568_v39  ;;  %v1377_v22 = vpop.f32.mrf.mxu2  ;;  %v1466_v23 = vpop.f32.mrf.mxu3  ;;  %v7969_v39 = vsel %vm957_vm9, %v701_v47, %v925_v52 }
 0x14f   : > { %v1378_v26 = vadd.f32 %v1377_v22, %v7842_v20  ;;  %10937 = vst [vmem:[#allocation12_spill] sm:$0xff] %v7969_v39  ;;  %v1114_v52 = vunpack.c.l.b16 %v7969_v39 }
 0x150   : > { %v757_v63 = vunpack.c.l.bf16 %v702_v2  ;;  %v758_v11 = vunpack.c.h.bf16 %v702_v2 }
 0x151   : > { %v7959_v19 = vadd.f32 %v1466_v23, %v1378_v26 }
 0x152   : > { %vm7961_vm7 = vcmp.gt.f32.partialorder %v757_v63, 0.0  ;;  %vm7965_vm8 = vcmp.gt.f32.partialorder %v758_v11, 0.0  ;;  %v885_v16 = vmul.f32 0.010009766, %v757_v63  ;;  %v886_v43 = vmul.f32 0.010009766, %v758_v11  ;;  %v570_v31 = vpop.f32.mrf.mxu0 }
 0x153   : > { %v659_v18 = vpop.f32.mrf.mxu1  ;;  %v571_v46 = vadd.f32 %v570_v31, %v7358_v35  ;;  %vm958_vm10 = vmpackc.low %vm7965_vm8, %vm7961_vm7 }
 0x154   : > { %v660_v61 = vadd.f32 %v659_v18, %v7360_v36  ;;  %v926_v24 = vpack.c.bf16 %v886_v43, %v885_v16 }
 0x155   : > { %1564 = vmatmul.bf16.gmra.mxu0 %v7634_v13  ;;  %v1115_v13 = vunpack.c.h.b16 %v7969_v39  ;;  %v6333_v39 = vld [vmem:[%s10773_s3 + $0x48] sm:$0xf0] }
 0x156   : > { %v703_v1 = vpack.c.bf16 %v660_v61, %v571_v46  ;;  %v1379_v22 = vpop.f32.mrf.mxu2  ;;  %v1468_v23 = vpop.f32.mrf.mxu3  ;;  %1653 = vmatmul.bf16.gmra.mxu1 %v7636_v14  ;;  %v7979_v26 = vsel %vm958_vm10, %v702_v2, %v926_v24 }
 0x157   : > { %10938 = vst [vmem:[#allocation13_spill] sm:$0xff] %v7979_v26  ;;  %v1380_v47 = vadd.f32 %v1379_v22, %v7842_v20  ;;  %v1116_v63 = vunpack.c.l.b16 %v7979_v26  ;;  %v1117_v33 = vunpack.c.h.b16 %v7979_v26 }
 0x158   : > { %v759_v11 = vunpack.c.l.bf16 %v703_v1  ;;  %v760_v21 = vunpack.c.h.bf16 %v703_v1 }
 0x159   : > { %v7985_v16 = vadd.f32 %v1468_v23, %v1380_v47  ;;  %v7987_v43 = vpack.c.b16 %v1116_v63, %v1114_v52  ;;  %v7991_v2 = vpack.c.b16 %v1117_v33, %v1115_v13  ;;  %v6307_v13 = vld [vmem:[%s10773_s3 + $0x10] sm:$0xf] }
 0x15a   : > { %v572_v31 = vpop.f32.mrf.mxu0  ;;  %v887_v18 = vmul.f32 0.010009766, %v759_v11  ;;  %v888_v46 = vmul.f32 0.010009766, %v760_v21  ;;  %vm7996_vm11 = vcmp.gt.f32.partialorder %v759_v11, 0.0  ;;  %vm8000_vm12 = vcmp.gt.f32.partialorder %v760_v21, 0.0  ;;  %v6804_v11 = vld [vmem:[%s10773_s3 + $0x14] sm:$0xf0] }
 0x15b   : > { %v661_v14 = vpop.f32.mrf.mxu1  ;;  %1421 = vmatmul.bf16.gmra.mxu2 %v7987_v43  ;;  %v573_v61 = vadd.f32 %v572_v31, %v7358_v35  ;;  %1510 = vmatmul.bf16.gmra.mxu3 %v7991_v2  ;;  %v6371_v21 = vld [vmem:[%s10773_s3 + $0x90] sm:$0xf]  ;;  %vm959_vm14 = vmpackc.low %vm8000_vm12, %vm7996_vm11 }
 0x15c   : > { %v662_v24 = vadd.f32 %v661_v14, %v7360_v36  ;;  %v927_v31 = vpack.c.bf16 %v888_v46, %v887_v18  ;;  %v6825_v18 = vld [vmem:[%s10773_s3 + $0xc4] sm:$0xf]  ;;  %v6397_v46 = vld [vmem:[%s10773_s3 + $0xc8] sm:$0xf0] }
 0x15e   : > { %v704_v47 = vpack.c.bf16 %v662_v24, %v573_v61  ;;  %v1382_v52 = vpop.f32.mrf.mxu2  ;;  %v1471_v63 = vpop.f32.mrf.mxu3  ;;  %v6308_v61 = vor.u32 %v6804_v11, %v6307_v13  ;;  %v6820_v24 = vld [vmem:[%s10773_s3 + $0x94] sm:$0xf0] }
 0x15f   : > { %v1383_v33 = vadd.f32 %v1382_v52, %v7842_v20  ;;  %v6809_v52 = vld [vmem:[%s10773_s3 + $0x44] sm:$0xf]  ;;  %v6372_v9 = vor.u32 %v6820_v24, %v6371_v21  ;;  %v6400_v24 = vor.u32 %v6825_v18, %v6397_v46 }
 0x160   : > { %v761_v14 = vunpack.c.l.bf16 %v704_v47  ;;  %v762_v26 = vunpack.c.h.bf16 %v704_v47  ;;  %v6336_v10 = vor.u32 %v6809_v52, %v6333_v39  ;;  %2399 = vmatpush.bf16.msrb.mxu2 %v6308_v61  ;;  %v8043_v52 = vsel %vm959_vm14, %v703_v1, %v927_v31 }
 0x161   : > { %v8023_v7 = vadd.f32 %v1471_v63, %v1383_v33  ;;  %2488 = vmatpush.bf16.msrb.mxu3 %v6372_v9  ;;  %10947 = vst [vmem:[#allocation14_spill] sm:$0xff] %v8043_v52  ;;  %2663 = vmatpush.bf16.msra.mxu1 %v6400_v24  ;;  %v1118_v1 = vunpack.c.l.b16 %v8043_v52 }
 0x162   : > { %vm8031_vm0 = vcmp.gt.f32.partialorder %v761_v14, 0.0  ;;  %vm8035_vm13 = vcmp.gt.f32.partialorder %v762_v26, 0.0  ;;  %v889_v63 = vmul.f32 0.010009766, %v761_v14  ;;  %v890_v33 = vmul.f32 0.010009766, %v762_v26  ;;  %v575_v39 = vpop.f32.mrf.mxu0  ;;  %2574 = vmatpush.bf16.msra.mxu0 %v6336_v10 }
 0x163   : > { %v664_v21 = vpop.f32.mrf.mxu1  ;;  %v576_v0 = vadd.f32 %v575_v39, %v7358_v35  ;;  %vm960_vm15 = vmpackc.low %vm8035_vm13, %vm8031_vm0 }
 0x164   : > { %v928_v25 = vpack.c.bf16 %v890_v33, %v889_v63  ;;  %v665_v54 = vadd.f32 %v664_v21, %v7360_v36 }
 0x165   : > { %1569 = vmatmul.bf16.gmra.mxu0 %v7667_v59 }
 0x166   : > { %v8051_v26 = vsel %vm960_vm15, %v704_v47, %v928_v25  ;;  %v705_v22 = vpack.c.bf16 %v665_v54, %v576_v0  ;;  %v1384_v23 = vpop.f32.mrf.mxu2  ;;  %v1473_v9 = vpop.f32.mrf.mxu3  ;;  %1658 = vmatmul.bf16.gmra.mxu1 %v7669_v60  ;;  %v1119_v54 = vunpack.c.h.b16 %v8043_v52  ;;  %v6807_v52 = vld [vmem:[%s10773_s3 + $0x34] sm:$0xf] }
 0x167   : > { %10948 = vst [vmem:[#allocation15_spill] sm:$0xff] %v8051_v26  ;;  %v1385_v10 = vadd.f32 %v1384_v23, %v7842_v20  ;;  %v1120_v31 = vunpack.c.l.b16 %v8051_v26  ;;  %v1121_v18 = vunpack.c.h.b16 %v8051_v26  ;;  %v6328_v56 = vor.u32 %v6807_v52, %v6325_v40 }
 0x168   : > { %v763_v14 = vunpack.c.l.bf16 %v705_v22  ;;  %v764_v61 = vunpack.c.h.bf16 %v705_v22 }
 0x169   : > { %v8059_v46 = vadd.f32 %v1473_v9, %v1385_v10  ;;  %v8061_v25 = vpack.c.b16 %v1120_v31, %v1118_v1  ;;  %v8065_v60 = vpack.c.b16 %v1121_v18, %v1119_v54  ;;  %2575 = vmatpush.bf16.msra.mxu0 %v6328_v56 }
 0x16a   : > { %v577_v0 = vpop.f32.mrf.mxu0  ;;  %v891_v47 = vmul.f32 0.010009766, %v763_v14  ;;  %v892_v13 = vmul.f32 0.010009766, %v764_v61  ;;  %vm827_vm1 = vcmp.gt.f32.partialorder %v763_v14, 0.0  ;;  %vm828_vm2 = vcmp.gt.f32.partialorder %v764_v61, 0.0 }
 0x16b   : > { %v666_v59 = vpop.f32.mrf.mxu1  ;;  %1426 = vmatmul.bf16.gmra.mxu2 %v8061_v25  ;;  %v578_v11 = vadd.f32 %v577_v0, %v7358_v35  ;;  %1515 = vmatmul.bf16.gmra.mxu3 %v8065_v60  ;;  %vm961_vm5 = vmpackc.low %vm828_vm2, %vm827_vm1 }
 0x16c   : > { %v667_v63 = vadd.f32 %v666_v59, %v7360_v36  ;;  %v929_v23 = vpack.c.bf16 %v892_v13, %v891_v47 }
 0x16e   : > { %v706_v33 = vpack.c.bf16 %v667_v63, %v578_v11  ;;  %v1387_v39 = vpop.f32.mrf.mxu2  ;;  %v1476_v21 = vpop.f32.mrf.mxu3  ;;  %v8073_v59 = vsel %vm961_vm5, %v705_v22, %v929_v23 }
 0x16f   : > { %v1388_v24 = vadd.f32 %v1387_v39, %v7842_v20  ;;  %10949 = vst [vmem:[#allocation16_spill] sm:$0xff] %v8073_v59  ;;  %v1122_v22 = vunpack.c.l.b16 %v8073_v59 }
 0x170   : > { %v765_v9 = vunpack.c.l.bf16 %v706_v33  ;;  %v766_v10 = vunpack.c.h.bf16 %v706_v33 }
 0x171   : > { %v8071_v1 = vadd.f32 %v1476_v21, %v1388_v24 }
 0x172   : > { %vm829_vm3 = vcmp.gt.f32.partialorder %v765_v9, 0.0  ;;  %vm830_vm4 = vcmp.gt.f32.partialorder %v766_v10, 0.0  ;;  %v893_v31 = vmul.f32 0.010009766, %v765_v9  ;;  %v894_v18 = vmul.f32 0.010009766, %v766_v10  ;;  %v580_v54 = vpop.f32.mrf.mxu0 }
 0x173   : > { %v669_v0 = vpop.f32.mrf.mxu1  ;;  %v581_v14 = vadd.f32 %v580_v54, %v7358_v35  ;;  %vm962_vm6 = vmpackc.low %vm830_vm4, %vm829_vm3 }
 0x174   : > { %v930_v11 = vpack.c.bf16 %v894_v18, %v893_v31  ;;  %v670_v63 = vadd.f32 %v669_v0, %v7360_v36  ;;  %v1123_v18 = vunpack.c.h.b16 %v8073_v59 }
 0x175   : > { %1574 = vmatmul.bf16.gmra.mxu0 %v7736_v5 }
 0x176   : > { %v8077_v61 = vsel %vm962_vm6, %v706_v33, %v930_v11  ;;  %v707_v47 = vpack.c.bf16 %v670_v63, %v581_v14  ;;  %v1389_v13 = vpop.f32.mrf.mxu2  ;;  %v1478_v39 = vpop.f32.mrf.mxu3  ;;  %1663 = vmatmul.bf16.gmra.mxu1 %v7738_v6 }
 0x177   : > { %10950 = vst [vmem:[#allocation17_spill] sm:$0xff] %v8077_v61  ;;  %v1390_v21 = vadd.f32 %v1389_v13, %v7842_v20  ;;  %v1124_v24 = vunpack.c.l.b16 %v8077_v61  ;;  %v1125_v10 = vunpack.c.h.b16 %v8077_v61 }
 0x178   : > { %v767_v23 = vunpack.c.l.bf16 %v707_v47  ;;  %v768_v9 = vunpack.c.h.bf16 %v707_v47 }
 0x179   : > { %v8085_v31 = vadd.f32 %v1478_v39, %v1390_v21  ;;  %v8087_v33 = vpack.c.b16 %v1124_v24, %v1122_v22  ;;  %v8091_v11 = vpack.c.b16 %v1125_v10, %v1123_v18 }
 0x17a   : > { %v895_v54 = vmul.f32 0.010009766, %v767_v23  ;;  %v896_v5 = vmul.f32 0.010009766, %v768_v9  ;;  %v582_v0 = vpop.f32.mrf.mxu0  ;;  %vm8096_vm7 = vcmp.gt.f32.partialorder %v767_v23, 0.0  ;;  %vm8100_vm8 = vcmp.gt.f32.partialorder %v768_v9, 0.0  ;;  %v6802_v23 = vld [vmem:[%s10773_s3 + $0x4] sm:$0xf0] }
 0x17b   : > { %v671_v6 = vpop.f32.mrf.mxu1  ;;  %1431 = vmatmul.bf16.gmra.mxu2 %v8087_v33  ;;  %v583_v14 = vadd.f32 %v582_v0, %v7358_v35  ;;  %1520 = vmatmul.bf16.gmra.mxu3 %v8091_v11  ;;  %v6363_v9 = vld [vmem:[%s10773_s3 + $0x80] sm:$0xf]  ;;  %vm963_vm9 = vmpackc.low %vm8100_vm8, %vm8096_vm7 }
 0x17c   : > { %v672_v63 = vadd.f32 %v671_v6, %v7360_v36  ;;  %v931_v61 = vpack.c.bf16 %v896_v5, %v895_v54  ;;  %v6299_v6 = vld [vmem:[%s10773_s3] sm:$0xf] }
 0x17d   : > { %v6300_v24 = vor.u32 %v6802_v23, %v6299_v6 }
 0x17e   : > { %v708_v13 = vpack.c.bf16 %v672_v63, %v583_v14  ;;  %v1392_v39 = vpop.f32.mrf.mxu2  ;;  %v1481_v21 = vpop.f32.mrf.mxu3 }
 0x17f   : > { %v1393_v10 = vadd.f32 %v1392_v39, %v7842_v20  ;;  %v6818_v39 = vld [vmem:[%s10773_s3 + $0x84] sm:$0xf0]  ;;  %2400 = vmatpush.bf16.msrb.mxu2 %v6300_v24 }
 0x180   : > { %v769_v18 = vunpack.c.l.bf16 %v708_v13  ;;  %v770_v0 = vunpack.c.h.bf16 %v708_v13  ;;  %v6364_v26 = vor.u32 %v6818_v39, %v6363_v9 }
 0x181   : > { %v8105_v59 = vadd.f32 %v1481_v21, %v1393_v10  ;;  %v8131_v21 = vsel %vm963_vm9, %v707_v47, %v931_v61  ;;  %v6823_v61 = vld [vmem:[%s10773_s3 + $0xb4] sm:$0xf]  ;;  %v6389_v47 = vld [vmem:[%s10773_s3 + $0xb8] sm:$0xf0] }
 0x182   : > { %vm8120_vm10 = vcmp.gt.f32.partialorder %v769_v18, 0.0  ;;  %vm8124_vm11 = vcmp.gt.f32.partialorder %v770_v0, 0.0  ;;  %v897_v14 = vmul.f32 0.010009766, %v769_v18  ;;  %v898_v63 = vmul.f32 0.010009766, %v770_v0  ;;  %10959 = vst [vmem:[#allocation18_spill] sm:$0xff] %v8131_v21  ;;  %v585_v22 = vpop.f32.mrf.mxu0  ;;  %2489 = vmatpush.bf16.msrb.mxu3 %v6364_v26 }
 0x183   : > { %v674_v10 = vpop.f32.mrf.mxu1  ;;  %v586_v0 = vadd.f32 %v585_v22, %v7358_v35  ;;  %vm964_vm12 = vmpackc.low %vm8124_vm11, %vm8120_vm10  ;;  %v6392_v6 = vor.u32 %v6823_v61, %v6389_v47 }
 0x184   : > { %v932_v18 = vpack.c.bf16 %v898_v63, %v897_v14  ;;  %v675_v32 = vadd.f32 %v674_v10, %v7360_v36  ;;  %v1126_v63 = vunpack.c.l.b16 %v8131_v21 }
 0x185   : > { %1579 = vmatmul.bf16.gmra.mxu0 %v7762_v55  ;;  %2664 = vmatpush.bf16.msra.mxu1 %v6392_v6  ;;  %v1127_v55 = vunpack.c.h.b16 %v8131_v21 }
 0x186   : > { %v8151_v23 = vsel %vm964_vm12, %v708_v13, %v932_v18  ;;  %v709_v9 = vpack.c.bf16 %v675_v32, %v586_v0  ;;  %v1394_v40 = vpop.f32.mrf.mxu2  ;;  %v1483_v52 = vpop.f32.mrf.mxu3  ;;  %1668 = vmatmul.bf16.gmra.mxu1 %v7764_v48 }
 0x187   : > { %10960 = vst [vmem:[#allocation19_spill] sm:$0xff] %v8151_v23  ;;  %v1395_v14 = vadd.f32 %v1394_v40, %v7842_v20  ;;  %v1128_v54 = vunpack.c.l.b16 %v8151_v23  ;;  %v1129_v13 = vunpack.c.h.b16 %v8151_v23 }
 0x188   : > { %v771_v5 = vunpack.c.l.bf16 %v709_v9  ;;  %v772_v26 = vunpack.c.h.bf16 %v709_v9 }
 0x189   : > { %v8159_v39 = vadd.f32 %v1483_v52, %v1395_v14  ;;  %v8161_v32 = vpack.c.b16 %v1128_v54, %v1126_v63  ;;  %v8165_v10 = vpack.c.b16 %v1129_v13, %v1127_v55  ;;  %v8176_v14 = vperm.slane %v7833_v15, 1 }
 0x18a   : > { %v587_v22 = vpop.f32.mrf.mxu0  ;;  %v899_v24 = vmul.f32 0.010009766, %v771_v5  ;;  %v900_v18 = vmul.f32 0.010009766, %v772_v26  ;;  %vm8170_vm0 = vcmp.gt.f32.partialorder %v771_v5, 0.0  ;;  %vm836_vm13 = vcmp.gt.f32.partialorder %v772_v26, 0.0 }
 0x18b   : > { %v676_v48 = vpop.f32.mrf.mxu1  ;;  %1436 = vmatmul.bf16.gmra.mxu2 %v8161_v32  ;;  %v588_v56 = vadd.f32 %v587_v22, %v7358_v35  ;;  %1525 = vmatmul.bf16.gmra.mxu3 %v8165_v10  ;;  %vm965_vm1 = vmpackc.low %vm836_vm13, %vm8170_vm0 }
 0x18c   : > { %v677_v0 = vadd.f32 %v676_v48, %v7360_v36  ;;  %v933_v63 = vpack.c.bf16 %v900_v18, %v899_v24 }
 0x18e   : > { %v710_v61 = vpack.c.bf16 %v677_v0, %v588_v56  ;;  %v1397_v47 = vpop.f32.mrf.mxu2  ;;  %v1486_v6 = vpop.f32.mrf.mxu3  ;;  %v8182_v48 = vsel %vm965_vm1, %v709_v9, %v933_v63 }
 0x18f   : > { %v1398_v52 = vadd.f32 %v1397_v47, %v7842_v20  ;;  %10963 = vst [vmem:[#allocation20_spill] sm:$0xff] %v8182_v48 }
 0x190   : > { %v773_v54 = vunpack.c.l.bf16 %v710_v61  ;;  %v774_v35 = vunpack.c.h.bf16 %v710_v61 }
 0x191   : > { %v8178_v13 = vadd.f32 %v1486_v6, %v1398_v52  ;;  %v1130_v6 = vunpack.c.l.b16 %v8182_v48  ;;  %v1131_v52 = vunpack.c.h.b16 %v8182_v48 }
 0x192   : > { %vm837_vm14 = vcmp.gt.f32.partialorder %v773_v54, 0.0  ;;  %vm838_vm15 = vcmp.gt.f32.partialorder %v774_v35, 0.0  ;;  %v901_v36 = vmul.f32 0.010009766, %v773_v54  ;;  %v902_v55 = vmul.f32 0.010009766, %v774_v35  ;;  %v1545_v5 = vpop.f32.mrf.mxu0 }
 0x193   : > { %v1634_v22 = vpop.f32.mrf.mxu1  ;;  %v1546_v15 = vadd.f32 %v1545_v5, %v8176_v14  ;;  %vm966_vm2 = vmpackc.low %vm838_vm15, %vm837_vm14 }
 0x194   : > { %v934_v56 = vpack.c.bf16 %v902_v55, %v901_v36 }
 0x195   : > { %v1635_v24 = vadd.f32 %v1634_v22, %v1546_v15  ;;  %1584 = vmatmul.bf16.gmra.mxu0 %v7835_v57  ;;  %v6848_v15 = vld [vmem:[%s10774_s4 + $0x74] sm:$0xf0] }
 0x196   : > { %v8185_v26 = vsel %vm966_vm2, %v710_v61, %v934_v56  ;;  %v1399_v18 = vpop.f32.mrf.mxu2  ;;  %v1488_v0 = vpop.f32.mrf.mxu3  ;;  %1673 = vmatmul.bf16.gmra.mxu1 %v7837_v58  ;;  %v6484_v56 = vld [vmem:[%s10774_s4 + $0x70] sm:$0xf] }
 0x197   : > { %10964 = vst [vmem:[#allocation21_spill] sm:$0xff] %v8185_v26  ;;  %v1400_v47 = vadd.f32 %v1399_v18, %v7842_v20  ;;  %v1132_v9 = vunpack.c.l.b16 %v8185_v26  ;;  %v1714_v40 = vpack.c.bf16 %v1635_v24, %v7847_v42  ;;  %v1133_v61 = vunpack.c.h.b16 %v8185_v26  ;;  %v6548_v24 = vld [vmem:[%s10774_s4 + $0xf0] sm:$0xf] }
 0x199   : > { %v8195_v63 = vadd.f32 %v1488_v0, %v1400_v47  ;;  %v8197_v54 = vpack.c.b16 %v1132_v9, %v1130_v6  ;;  %v8199_v35 = vpack.c.b16 %v1133_v61, %v1131_v52  ;;  %v1746_v36 = vunpack.c.l.bf16 %v1714_v40  ;;  %v6864_v6 = vld [vmem:[%s10774_s4 + $0xf4] sm:$0xf0]  ;;  %v6805_v9 = vld [vmem:[%s10773_s3 + $0x24] sm:$0xf]  ;;  %v6317_v52 = vld [vmem:[%s10773_s3 + $0x28] sm:$0xf0] }
 0x19a   : > { %v1547_v57 = vpop.f32.mrf.mxu0  ;;  %v1747_v55 = vunpack.c.h.bf16 %v1714_v40  ;;  %v6485_v47 = vor.u32 %v6848_v15, %v6484_v56  ;;  %v6549_v26 = vor.u32 %v6864_v6, %v6548_v24  ;;  %v6320_v48 = vor.u32 %v6805_v9, %v6317_v52 }
 0x19b   : > { %1441 = vmatmul.bf16.gmra.mxu2 %v8197_v54  ;;  %v1636_v58 = vpop.f32.mrf.mxu1  ;;  %1530 = vmatmul.bf16.gmra.mxu3 %v8199_v35  ;;  %v1548_v42 = vadd.f32 %v1547_v57, %v8176_v14  ;;  %v1874_v61 = vmul.f32 0.010009766, %v1746_v36  ;;  %vm8232_vm3 = vcmp.gt.f32.partialorder %v1746_v36, 0.0 }
 0x19c   : > { %v1875_v57 = vmul.f32 0.010009766, %v1747_v55  ;;  %3652 = vmatpush.bf16.msra.mxu2 %v6485_v47  ;;  %3741 = vmatpush.bf16.msra.mxu3 %v6549_v26  ;;  %vm8236_vm4 = vcmp.gt.f32.partialorder %v1747_v55, 0.0 }
 0x19d   : > { %v1637_v18 = vadd.f32 %v1636_v58, %v1548_v42  ;;  %v6821_v58 = vld [vmem:[%s10773_s3 + $0xa4] sm:$0xf]  ;;  %v6381_v42 = vld [vmem:[%s10773_s3 + $0xa8] sm:$0xf0]  ;;  %2576 = vmatpush.bf16.msra.mxu0 %v6320_v48  ;;  %vm1970_vm7 = vmpackc.low %vm8236_vm4, %vm8232_vm3 }
 0x19e   : > { %v1402_v5 = vpop.f32.mrf.mxu2  ;;  %v1491_v22 = vpop.f32.mrf.mxu3  ;;  %v6384_v15 = vor.u32 %v6821_v58, %v6381_v42  ;;  %v1938_v51 = vpack.c.bf16 %v1875_v57, %v1874_v61 }
 0x19f   : > { %v1403_v0 = vadd.f32 %v1402_v5, %v7842_v20  ;;  %v1715_v5 = vpack.c.bf16 %v1637_v18, %v7873_v28 }
 0x1a0   : > { %2665 = vmatpush.bf16.msra.mxu1 %v6384_v15  ;;  %v2002_v61 = vsel %vm1970_vm7, %v1714_v40, %v1938_v51 }
 0x1a1   : > { %v8230_v56 = vadd.f32 %v1491_v22, %v1403_v0  ;;  %v1748_v23 = vunpack.c.l.bf16 %v1715_v5  ;;  %v1749_v21 = vunpack.c.h.bf16 %v1715_v5  ;;  %v2106_v42 = vunpack.c.h.b16 %v2002_v61 }
 0x1a2   : > { %v1550_v24 = vpop.f32.mrf.mxu0 }
 0x1a3   : > { %v1639_v6 = vpop.f32.mrf.mxu1  ;;  %v1551_v28 = vadd.f32 %v1550_v24, %v8176_v14  ;;  %vm8241_vm5 = vcmp.gt.f32.partialorder %v1748_v23, 0.0  ;;  %vm1813_vm6 = vcmp.gt.f32.partialorder %v1749_v21, 0.0  ;;  %v1876_v48 = vmul.f32 0.010009766, %v1748_v23 }
 0x1a4   : > { %v1877_v22 = vmul.f32 0.010009766, %v1749_v21  ;;  %vm1971_vm8 = vmpackc.low %vm1813_vm6, %vm8241_vm5 }
 0x1a5   : > { %v1640_v18 = vadd.f32 %v1639_v6, %v1551_v28  ;;  %1589 = vmatmul.bf16.gmra.mxu0 %v7875_v29 }
 0x1a6   : > { %v1404_v36 = vpop.f32.mrf.mxu2  ;;  %v1493_v0 = vpop.f32.mrf.mxu3  ;;  %1678 = vmatmul.bf16.gmra.mxu1 %v7879_v27  ;;  %v1939_v55 = vpack.c.bf16 %v1877_v22, %v1876_v48  ;;  %v2105_v27 = vunpack.c.l.b16 %v2002_v61 }
 0x1a7   : > { %v1405_v47 = vadd.f32 %v1404_v36, %v7842_v20  ;;  %v1716_v21 = vpack.c.bf16 %v1640_v18, %v7911_v44 }
 0x1a8   : > { %v2003_v23 = vsel %vm1971_vm8, %v1715_v5, %v1939_v55 }
 0x1a9   : > { %v8255_v57 = vadd.f32 %v1493_v0, %v1405_v47  ;;  %v2107_v29 = vunpack.c.l.b16 %v2003_v23  ;;  %v2108_v58 = vunpack.c.h.b16 %v2003_v23  ;;  %v1750_v6 = vunpack.c.l.bf16 %v1716_v21 }
 0x1aa   : > { %v1552_v15 = vpop.f32.mrf.mxu0  ;;  %v1751_v9 = vunpack.c.h.bf16 %v1716_v21 }
 0x1ab   : > { %v1641_v24 = vpop.f32.mrf.mxu1  ;;  %v1553_v52 = vadd.f32 %v1552_v15, %v8176_v14  ;;  %v8258_v28 = vpack.c.b16 %v2107_v29, %v2105_v27  ;;  %v8260_v51 = vpack.c.b16 %v2108_v58, %v2106_v42  ;;  %v1878_v48 = vmul.f32 0.010009766, %v1750_v6 }
 0x1ac   : > { %v1879_v22 = vmul.f32 0.010009766, %v1751_v9  ;;  %vm8268_vm9 = vcmp.gt.f32.partialorder %v1750_v6, 0.0  ;;  %vm8272_vm10 = vcmp.gt.f32.partialorder %v1751_v9, 0.0 }
 0x1ad   : > { %v1642_v44 = vadd.f32 %v1641_v24, %v1553_v52  ;;  %2401 = vmatmul.bf16.vlgmr.msrb.gmra.mxu2 %v8258_v28  ;;  %2490 = vmatmul.bf16.vlgmr.msrb.gmra.mxu3 %v8260_v51  ;;  %vm1972_vm0 = vmpackc.low %vm8272_vm10, %vm8268_vm9 }
 0x1ae   : > { %v1407_v40 = vpop.f32.mrf.mxu2  ;;  %v1496_v26 = vpop.f32.mrf.mxu3  ;;  %v1940_v58 = vpack.c.bf16 %v1879_v22, %v1878_v48 }
 0x1af   : > { %v1408_v5 = vadd.f32 %v1407_v40, %v7842_v20  ;;  %v1717_v18 = vpack.c.bf16 %v1642_v44, %v7947_v34 }
 0x1b1   : > { %v8266_v36 = vadd.f32 %v1496_v26, %v1408_v5  ;;  %v1752_v0 = vunpack.c.l.bf16 %v1717_v18  ;;  %v1753_v55 = vunpack.c.h.bf16 %v1717_v18  ;;  %v2004_v26 = vsel %vm1972_vm0, %v1716_v21, %v1940_v58  ;;  %v6846_v58 = vld [vmem:[%s10774_s4 + $0x64] sm:$0xf0] }
 0x1b2   : > { %v1555_v47 = vpop.f32.mrf.mxu0 }
 0x1b3   : > { %v1644_v61 = vpop.f32.mrf.mxu1  ;;  %v1556_v27 = vadd.f32 %v1555_v47, %v8176_v14  ;;  %v1880_v42 = vmul.f32 0.010009766, %v1752_v0  ;;  %v1881_v15 = vmul.f32 0.010009766, %v1753_v55  ;;  %vm1816_vm11 = vcmp.gt.f32.partialorder %v1752_v0, 0.0 }
 0x1b4   : > { %vm1817_vm12 = vcmp.gt.f32.partialorder %v1753_v55, 0.0  ;;  %v2109_v0 = vunpack.c.l.b16 %v2004_v26  ;;  %v2110_v55 = vunpack.c.h.b16 %v2004_v26 }
 0x1b5   : > { %v1645_v34 = vadd.f32 %v1644_v61, %v1556_v27  ;;  %1594 = vmatmul.bf16.gmra.mxu0 %v7949_v38  ;;  %v1941_v9 = vpack.c.bf16 %v1881_v15, %v1880_v42  ;;  %vm1973_vm13 = vmpackc.low %vm1817_vm12, %vm1816_vm11  ;;  %v6540_v27 = vld [vmem:[%s10774_s4 + $0xe0] sm:$0xf] }
 0x1b6   : > { %v1409_v24 = vpop.f32.mrf.mxu2  ;;  %v1498_v52 = vpop.f32.mrf.mxu3  ;;  %1683 = vmatmul.bf16.gmra.mxu1 %v7953_v53 }
 0x1b7   : > { %v1410_v6 = vadd.f32 %v1409_v24, %v7842_v20  ;;  %v8285_v40 = vpack.c.bf16 %v1645_v34, %v7959_v19  ;;  %v2005_v5 = vsel %vm1973_vm13, %v1717_v18, %v1941_v9  ;;  %v6476_v18 = vld [vmem:[%s10774_s4 + $0x60] sm:$0xf]  ;;  %v6862_v24 = vld [vmem:[%s10774_s4 + $0xe4] sm:$0xf0] }
 0x1b8   : > { %v2111_v48 = vunpack.c.l.b16 %v2005_v5  ;;  %v2112_v38 = vunpack.c.h.b16 %v2005_v5  ;;  %v6477_v34 = vor.u32 %v6846_v58, %v6476_v18 }
 0x1b9   : > { %v8287_v44 = vadd.f32 %v1498_v52, %v1410_v6  ;;  %v1754_v47 = vunpack.c.l.bf16 %v8285_v40  ;;  %v1755_v61 = vunpack.c.h.bf16 %v8285_v40  ;;  %v6803_v52 = vld [vmem:[%s10773_s3 + $0x14] sm:$0xf]  ;;  %v6309_v6 = vld [vmem:[%s10773_s3 + $0x18] sm:$0xf0] }
 0x1ba   : > { %v1557_v22 = vpop.f32.mrf.mxu0  ;;  %v8292_v29 = vpack.c.b16 %v2111_v48, %v2109_v0  ;;  %v8294_v19 = vpack.c.b16 %v2112_v38, %v2110_v55  ;;  %v6541_v48 = vor.u32 %v6862_v24, %v6540_v27  ;;  %v6312_v38 = vor.u32 %v6803_v52, %v6309_v6  ;;  %3653 = vmatpush.bf16.msra.mxu2 %v6477_v34 }
 0x1bb   : > { %v1646_v53 = vpop.f32.mrf.mxu1  ;;  %v1558_v23 = vadd.f32 %v1557_v22, %v8176_v14  ;;  %v1882_v9 = vmul.f32 0.010009766, %v1754_v47  ;;  %v1883_v26 = vmul.f32 0.010009766, %v1755_v61  ;;  %v6819_v22 = vld [vmem:[%s10773_s3 + $0x94] sm:$0xf]  ;;  %vm8326_vm14 = vcmp.gt.f32.partialorder %v1754_v47, 0.0 }
 0x1bc   : > { %3742 = vmatpush.bf16.msra.mxu3 %v6541_v48  ;;  %2577 = vmatpush.bf16.msra.mxu0 %v6312_v38  ;;  %vm8330_vm15 = vcmp.gt.f32.partialorder %v1755_v61, 0.0 }
 0x1bd   : > { %v1647_v42 = vadd.f32 %v1646_v53, %v1558_v23  ;;  %2406 = vmatmul.bf16.gmra.mxu2 %v8292_v29  ;;  %2495 = vmatmul.bf16.gmra.mxu3 %v8294_v19  ;;  %v6373_v53 = vld [vmem:[%s10773_s3 + $0x98] sm:$0xf0]  ;;  %v1942_v6 = vpack.c.bf16 %v1883_v26, %v1882_v9  ;;  %vm1974_vm3 = vmpackc.low %vm8330_vm15, %vm8326_vm14 }
 0x1be   : > { %v1412_v21 = vpop.f32.mrf.mxu2  ;;  %v1501_v5 = vpop.f32.mrf.mxu3  ;;  %v6376_v23 = vor.u32 %v6819_v22, %v6373_v53 }
 0x1bf   : > { %v1413_v15 = vadd.f32 %v1412_v21, %v7842_v20  ;;  %v1719_v0 = vpack.c.bf16 %v1647_v42, %v7985_v16  ;;  %v2006_v48 = vsel %vm1974_vm3, %v8285_v40, %v1942_v6 }
 0x1c0   : > { %2666 = vmatpush.bf16.msra.mxu1 %v6376_v23 }
 0x1c1   : > { %v8324_v55 = vadd.f32 %v1501_v5, %v1413_v15  ;;  %v1756_v21 = vunpack.c.l.bf16 %v1719_v0  ;;  %v1757_v18 = vunpack.c.h.bf16 %v1719_v0 }
 0x1c2   : > { %v1560_v58 = vpop.f32.mrf.mxu0 }
 0x1c3   : > { %v1649_v27 = vpop.f32.mrf.mxu1  ;;  %v1561_v16 = vadd.f32 %v1560_v58, %v8176_v14  ;;  %v1884_v42 = vmul.f32 0.010009766, %v1756_v21  ;;  %v1885_v15 = vmul.f32 0.010009766, %v1757_v18  ;;  %vm1820_vm1 = vcmp.gt.f32.partialorder %v1756_v21, 0.0 }
 0x1c4   : > { %vm1821_vm2 = vcmp.gt.f32.partialorder %v1757_v18, 0.0  ;;  %v2113_v21 = vunpack.c.l.b16 %v2006_v48  ;;  %v2114_v18 = vunpack.c.h.b16 %v2006_v48 }
 0x1c5   : > { %v1650_v34 = vadd.f32 %v1649_v27, %v1561_v16  ;;  %1599 = vmatmul.bf16.gmra.mxu0 %v7987_v43  ;;  %v1943_v61 = vpack.c.bf16 %v1885_v15, %v1884_v42  ;;  %vm1975_vm4 = vmpackc.low %vm1821_vm2, %vm1820_vm1 }
 0x1c6   : > { %v1414_v5 = vpop.f32.mrf.mxu2  ;;  %1688 = vmatmul.bf16.gmra.mxu1 %v7991_v2  ;;  %v1503_v26 = vpop.f32.mrf.mxu3 }
 0x1c7   : > { %v1415_v47 = vadd.f32 %v1414_v5, %v7842_v20  ;;  %v1720_v9 = vpack.c.bf16 %v1650_v34, %v8023_v7  ;;  %v2007_v22 = vsel %vm1975_vm4, %v1719_v0, %v1943_v61 }
 0x1c8   : > { %v2115_v43 = vunpack.c.l.b16 %v2007_v22  ;;  %v2116_v53 = vunpack.c.h.b16 %v2007_v22 }
 0x1c9   : > { %v8344_v38 = vadd.f32 %v1503_v26, %v1415_v47  ;;  %v1758_v58 = vunpack.c.l.bf16 %v1720_v9  ;;  %v1759_v27 = vunpack.c.h.bf16 %v1720_v9 }
 0x1ca   : > { %v1562_v2 = vpop.f32.mrf.mxu0  ;;  %v8347_v52 = vpack.c.b16 %v2115_v43, %v2113_v21  ;;  %v8349_v7 = vpack.c.b16 %v2116_v53, %v2114_v18 }
 0x1cb   : > { %v1651_v23 = vpop.f32.mrf.mxu1  ;;  %v1563_v24 = vadd.f32 %v1562_v2, %v8176_v14  ;;  %v1886_v0 = vmul.f32 0.010009766, %v1758_v58  ;;  %v1887_v6 = vmul.f32 0.010009766, %v1759_v27  ;;  %vm8357_vm5 = vcmp.gt.f32.partialorder %v1758_v58, 0.0 }
 0x1cc   : > { %vm8361_vm6 = vcmp.gt.f32.partialorder %v1759_v27, 0.0 }
 0x1cd   : > { %v1652_v42 = vadd.f32 %v1651_v23, %v1563_v24  ;;  %2411 = vmatmul.bf16.gmra.mxu2 %v8347_v52  ;;  %2500 = vmatmul.bf16.gmra.mxu3 %v8349_v7  ;;  %v1944_v53 = vpack.c.bf16 %v1887_v6, %v1886_v0  ;;  %vm1976_vm9 = vmpackc.low %vm8361_vm6, %vm8357_vm5 }
 0x1ce   : > { %v1417_v16 = vpop.f32.mrf.mxu2  ;;  %v1506_v15 = vpop.f32.mrf.mxu3 }
 0x1cf   : > { %v1418_v40 = vadd.f32 %v1417_v16, %v7842_v20  ;;  %v1721_v34 = vpack.c.bf16 %v1652_v42, %v8059_v46  ;;  %v2008_v42 = vsel %vm1976_vm9, %v1720_v9, %v1944_v53  ;;  %v6844_v53 = vld [vmem:[%s10774_s4 + $0x54] sm:$0xf0] }
 0x1d1   : > { %v8355_v5 = vadd.f32 %v1506_v15, %v1418_v40  ;;  %v1760_v47 = vunpack.c.l.bf16 %v1721_v34  ;;  %v1761_v61 = vunpack.c.h.bf16 %v1721_v34 }
 0x1d2   : > { %v1565_v26 = vpop.f32.mrf.mxu0 }
 0x1d3   : > { %v1654_v48 = vpop.f32.mrf.mxu1  ;;  %v1566_v2 = vadd.f32 %v1565_v26, %v8176_v14  ;;  %v1888_v23 = vmul.f32 0.010009766, %v1760_v47  ;;  %v1889_v21 = vmul.f32 0.010009766, %v1761_v61  ;;  %vm1824_vm7 = vcmp.gt.f32.partialorder %v1760_v47, 0.0 }
 0x1d4   : > { %vm1825_vm8 = vcmp.gt.f32.partialorder %v1761_v61, 0.0  ;;  %v2117_v47 = vunpack.c.l.b16 %v2008_v42  ;;  %v2118_v61 = vunpack.c.h.b16 %v2008_v42 }
 0x1d5   : > { %v1655_v46 = vadd.f32 %v1654_v48, %v1566_v2  ;;  %1604 = vmatmul.bf16.gmra.mxu0 %v8061_v25  ;;  %v1945_v24 = vpack.c.bf16 %v1889_v21, %v1888_v23  ;;  %vm1977_vm10 = vmpackc.low %vm1825_vm8, %vm1824_vm7  ;;  %v6532_v2 = vld [vmem:[%s10774_s4 + $0xd0] sm:$0xf] }
 0x1d6   : > { %v1419_v18 = vpop.f32.mrf.mxu2  ;;  %1693 = vmatmul.bf16.gmra.mxu1 %v8065_v60  ;;  %v1508_v16 = vpop.f32.mrf.mxu3 }
 0x1d7   : > { %v1420_v58 = vadd.f32 %v1419_v18, %v7842_v20  ;;  %v8374_v27 = vpack.c.bf16 %v1655_v46, %v8071_v1  ;;  %v2009_v0 = vsel %vm1977_vm10, %v1721_v34, %v1945_v24  ;;  %v6468_v34 = vld [vmem:[%s10774_s4 + $0x50] sm:$0xf]  ;;  %v6860_v18 = vld [vmem:[%s10774_s4 + $0xd4] sm:$0xf0]  ;;  %v6301_v24 = vld [vmem:[%s10773_s3 + $0x8] sm:$0xf0] }
 0x1d8   : > { %v2119_v25 = vunpack.c.l.b16 %v2009_v0  ;;  %v2120_v6 = vunpack.c.h.b16 %v2009_v0  ;;  %v6469_v46 = vor.u32 %v6844_v53, %v6468_v34 }
 0x1d9   : > { %v8376_v40 = vadd.f32 %v1508_v16, %v1420_v58  ;;  %v1762_v26 = vunpack.c.l.bf16 %v8374_v27  ;;  %v1763_v48 = vunpack.c.h.bf16 %v8374_v27  ;;  %v6801_v58 = vld [vmem:[%s10773_s3 + $0x4] sm:$0xf] }
 0x1da   : > { %v1567_v60 = vpop.f32.mrf.mxu0  ;;  %v8381_v1 = vpack.c.b16 %v2119_v25, %v2117_v47  ;;  %v8383_v43 = vpack.c.b16 %v2120_v6, %v2118_v61  ;;  %v6533_v25 = vor.u32 %v6860_v18, %v6532_v2  ;;  %v6304_v6 = vor.u32 %v6801_v58, %v6301_v24  ;;  %3654 = vmatpush.bf16.msra.mxu2 %v6469_v46 }
 0x1db   : > { %v1656_v15 = vpop.f32.mrf.mxu1  ;;  %v1568_v22 = vadd.f32 %v1567_v60, %v8176_v14  ;;  %v1890_v16 = vmul.f32 0.010009766, %v1762_v26  ;;  %v1891_v42 = vmul.f32 0.010009766, %v1763_v48  ;;  %v6817_v60 = vld [vmem:[%s10773_s3 + $0x84] sm:$0xf]  ;;  %vm8415_vm11 = vcmp.gt.f32.partialorder %v1762_v26, 0.0 }
 0x1dc   : > { %3743 = vmatpush.bf16.msra.mxu3 %v6533_v25  ;;  %2578 = vmatpush.bf16.msra.mxu0 %v6304_v6  ;;  %vm8419_vm12 = vcmp.gt.f32.partialorder %v1763_v48, 0.0 }
 0x1dd   : > { %v1657_v23 = vadd.f32 %v1656_v15, %v1568_v22  ;;  %2416 = vmatmul.bf16.gmra.mxu2 %v8381_v1  ;;  %2505 = vmatmul.bf16.gmra.mxu3 %v8383_v43  ;;  %v6365_v15 = vld [vmem:[%s10773_s3 + $0x88] sm:$0xf0]  ;;  %v1946_v24 = vpack.c.bf16 %v1891_v42, %v1890_v16  ;;  %vm1978_vm14 = vmpackc.low %vm8419_vm12, %vm8415_vm11 }
 0x1de   : > { %v1422_v9 = vpop.f32.mrf.mxu2  ;;  %v1511_v0 = vpop.f32.mrf.mxu3  ;;  %v6368_v22 = vor.u32 %v6817_v60, %v6365_v15 }
 0x1df   : > { %v1423_v21 = vadd.f32 %v1422_v9, %v7842_v20  ;;  %v1723_v47 = vpack.c.bf16 %v1657_v23, %v8085_v31  ;;  %v2010_v25 = vsel %vm1978_vm14, %v8374_v27, %v1946_v24 }
 0x1e0   : > { %2667 = vmatpush.bf16.msra.mxu1 %v6368_v22 }
 0x1e1   : > { %v8413_v61 = vadd.f32 %v1511_v0, %v1423_v21  ;;  %v1764_v9 = vunpack.c.l.bf16 %v1723_v47  ;;  %v1765_v34 = vunpack.c.h.bf16 %v1723_v47 }
 0x1e2   : > { %v1570_v53 = vpop.f32.mrf.mxu0 }
 0x1e3   : > { %v1659_v2 = vpop.f32.mrf.mxu1  ;;  %v1571_v31 = vadd.f32 %v1570_v53, %v8176_v14  ;;  %v1892_v23 = vmul.f32 0.010009766, %v1764_v9  ;;  %v1893_v21 = vmul.f32 0.010009766, %v1765_v34  ;;  %vm1828_vm0 = vcmp.gt.f32.partialorder %v1764_v9, 0.0 }
 0x1e4   : > { %vm1829_vm13 = vcmp.gt.f32.partialorder %v1765_v34, 0.0  ;;  %v2121_v9 = vunpack.c.l.b16 %v2010_v25  ;;  %v2122_v34 = vunpack.c.h.b16 %v2010_v25 }
 0x1e5   : > { %v1660_v46 = vadd.f32 %v1659_v2, %v1571_v31  ;;  %1609 = vmatmul.bf16.gmra.mxu0 %v8087_v33  ;;  %v1947_v48 = vpack.c.bf16 %v1893_v21, %v1892_v23  ;;  %vm1979_vm15 = vmpackc.low %vm1829_vm13, %vm1828_vm0 }
 0x1e6   : > { %v1424_v0 = vpop.f32.mrf.mxu2  ;;  %1698 = vmatmul.bf16.gmra.mxu1 %v8091_v11  ;;  %v1513_v42 = vpop.f32.mrf.mxu3 }
 0x1e7   : > { %v1425_v26 = vadd.f32 %v1424_v0, %v7842_v20  ;;  %v1724_v16 = vpack.c.bf16 %v1660_v46, %v8105_v59  ;;  %v2011_v60 = vsel %vm1979_vm15, %v1723_v47, %v1947_v48 }
 0x1e8   : > { %v2123_v33 = vunpack.c.l.b16 %v2011_v60  ;;  %v2124_v15 = vunpack.c.h.b16 %v2011_v60 }
 0x1e9   : > { %v8433_v6 = vadd.f32 %v1513_v42, %v1425_v26  ;;  %v1766_v53 = vunpack.c.l.bf16 %v1724_v16  ;;  %v1767_v2 = vunpack.c.h.bf16 %v1724_v16 }
 0x1ea   : > { %v1572_v11 = vpop.f32.mrf.mxu0  ;;  %v8436_v58 = vpack.c.b16 %v2123_v33, %v2121_v9  ;;  %v8438_v59 = vpack.c.b16 %v2124_v15, %v2122_v34 }
 0x1eb   : > { %v1661_v22 = vpop.f32.mrf.mxu1  ;;  %v1573_v18 = vadd.f32 %v1572_v11, %v8176_v14  ;;  %v1894_v47 = vmul.f32 0.010009766, %v1766_v53  ;;  %v1895_v24 = vmul.f32 0.010009766, %v1767_v2  ;;  %vm8446_vm1 = vcmp.gt.f32.partialorder %v1766_v53, 0.0 }
 0x1ec   : > { %vm8450_vm2 = vcmp.gt.f32.partialorder %v1767_v2, 0.0 }
 0x1ed   : > { %v1662_v23 = vadd.f32 %v1661_v22, %v1573_v18  ;;  %2421 = vmatmul.bf16.gmra.mxu2 %v8436_v58  ;;  %2510 = vmatmul.bf16.gmra.mxu3 %v8438_v59  ;;  %v1948_v15 = vpack.c.bf16 %v1895_v24, %v1894_v47  ;;  %vm1980_vm5 = vmpackc.low %vm8450_vm2, %vm8446_vm1 }
 0x1ee   : > { %v1427_v31 = vpop.f32.mrf.mxu2  ;;  %v1516_v21 = vpop.f32.mrf.mxu3 }
 0x1ef   : > { %v1428_v27 = vadd.f32 %v1427_v31, %v7842_v20  ;;  %v1725_v46 = vpack.c.bf16 %v1662_v23, %v8159_v39  ;;  %v2012_v23 = vsel %vm1980_vm5, %v1724_v16, %v1948_v15  ;;  %v6842_v15 = vld [vmem:[%s10774_s4 + $0x44] sm:$0xf0] }
 0x1f1   : > { %v8444_v0 = vadd.f32 %v1516_v21, %v1428_v27  ;;  %v1768_v26 = vunpack.c.l.bf16 %v1725_v46  ;;  %v1769_v48 = vunpack.c.h.bf16 %v1725_v46 }
 0x1f2   : > { %v1575_v42 = vpop.f32.mrf.mxu0 }
 0x1f3   : > { %v1664_v25 = vpop.f32.mrf.mxu1  ;;  %v1576_v11 = vadd.f32 %v1575_v42, %v8176_v14  ;;  %v1896_v22 = vmul.f32 0.010009766, %v1768_v26  ;;  %v1897_v9 = vmul.f32 0.010009766, %v1769_v48  ;;  %vm1832_vm3 = vcmp.gt.f32.partialorder %v1768_v26, 0.0 }
 0x1f4   : > { %vm1833_vm4 = vcmp.gt.f32.partialorder %v1769_v48, 0.0  ;;  %v2125_v26 = vunpack.c.l.b16 %v2012_v23  ;;  %v2126_v48 = vunpack.c.h.b16 %v2012_v23 }
 0x1f5   : > { %v1665_v39 = vadd.f32 %v1664_v25, %v1576_v11  ;;  %1614 = vmatmul.bf16.gmra.mxu0 %v8161_v32  ;;  %v1949_v18 = vpack.c.bf16 %v1897_v9, %v1896_v22  ;;  %vm1981_vm6 = vmpackc.low %vm1833_vm4, %vm1832_vm3  ;;  %v6524_v11 = vld [vmem:[%s10774_s4 + $0xc0] sm:$0xf] }
 0x1f6   : > { %v1429_v34 = vpop.f32.mrf.mxu2  ;;  %1703 = vmatmul.bf16.gmra.mxu1 %v8165_v10  ;;  %v1518_v31 = vpop.f32.mrf.mxu3 }
 0x1f7   : > { %v1430_v53 = vadd.f32 %v1429_v34, %v7842_v20  ;;  %v8463_v2 = vpack.c.bf16 %v1665_v39, %v8178_v13  ;;  %v2013_v47 = vsel %vm1981_vm6, %v1725_v46, %v1949_v18  ;;  %v6460_v46 = vld [vmem:[%s10774_s4 + $0x40] sm:$0xf]  ;;  %v6858_v34 = vld [vmem:[%s10774_s4 + $0xc4] sm:$0xf0]  ;;  %v6486_v18 = vld [vmem:[%s10774_s4 + $0x78] sm:$0xf0] }
 0x1f8   : > { %v2127_v32 = vunpack.c.l.b16 %v2013_v47  ;;  %v2128_v24 = vunpack.c.h.b16 %v2013_v47  ;;  %v6461_v39 = vor.u32 %v6842_v15, %v6460_v46 }
 0x1f9   : > { %v8465_v27 = vadd.f32 %v1518_v31, %v1430_v53  ;;  %v1770_v42 = vunpack.c.l.bf16 %v8463_v2  ;;  %v1771_v25 = vunpack.c.h.bf16 %v8463_v2  ;;  %v6847_v53 = vld [vmem:[%s10774_s4 + $0x74] sm:$0xf] }
 0x1fa   : > { %v1577_v10 = vpop.f32.mrf.mxu0  ;;  %v8470_v13 = vpack.c.b16 %v2127_v32, %v2125_v26  ;;  %v8472_v33 = vpack.c.b16 %v2128_v24, %v2126_v48  ;;  %v6525_v32 = vor.u32 %v6858_v34, %v6524_v11  ;;  %v6489_v24 = vor.u32 %v6847_v53, %v6486_v18  ;;  %3655 = vmatpush.bf16.msra.mxu2 %v6461_v39  ;;  %v6550_v18 = vld [vmem:[%s10774_s4 + $0xf8] sm:$0xf0] }
 0x1fb   : > { %v1666_v21 = vpop.f32.mrf.mxu1  ;;  %v1578_v60 = vadd.f32 %v1577_v10, %v8176_v14  ;;  %v1898_v31 = vmul.f32 0.010009766, %v1770_v42  ;;  %v1899_v23 = vmul.f32 0.010009766, %v1771_v25  ;;  %vm8498_vm7 = vcmp.gt.f32.partialorder %v1770_v42, 0.0  ;;  %v6863_v42 = vld [vmem:[%s10774_s4 + $0xf4] sm:$0xf] }
 0x1fc   : > { %3744 = vmatpush.bf16.msra.mxu3 %v6525_v32  ;;  %3830 = vmatpush.bf16.msrb.mxu0 %v6489_v24  ;;  %vm8502_vm8 = vcmp.gt.f32.partialorder %v1771_v25, 0.0 }
 0x1fd   : > { %v1667_v22 = vadd.f32 %v1666_v21, %v1578_v60  ;;  %2426 = vmatmul.bf16.gmra.mxu2 %v8470_v13  ;;  %2515 = vmatmul.bf16.gmra.mxu3 %v8472_v33  ;;  %v1950_v11 = vpack.c.bf16 %v1899_v23, %v1898_v31  ;;  %vm1982_vm11 = vmpackc.low %vm8502_vm8, %vm8498_vm7 }
 0x1fe   : > { %v1432_v16 = vpop.f32.mrf.mxu2  ;;  %v1521_v47 = vpop.f32.mrf.mxu3 }
 0x1ff   : > { %v1433_v9 = vadd.f32 %v1432_v16, %v7842_v20  ;;  %v1727_v10 = vpack.c.bf16 %v1667_v22, %v8195_v63 }
 0x201   : > { %v8496_v21 = vadd.f32 %v1521_v47, %v1433_v9  ;;  %v1772_v26 = vunpack.c.l.bf16 %v1727_v10  ;;  %v1773_v48 = vunpack.c.h.bf16 %v1727_v10  ;;  %v6553_v47 = vor.u32 %v6863_v42, %v6550_v18 }
 0x202   : > { %v1580_v60 = vpop.f32.mrf.mxu0 }
 0x203   : > { %v1669_v16 = vpop.f32.mrf.mxu1  ;;  %v1581_v63 = vadd.f32 %v1580_v60, %v8176_v14  ;;  %v1900_v22 = vmul.f32 0.010009766, %v1772_v26  ;;  %v1901_v9 = vmul.f32 0.010009766, %v1773_v48  ;;  %vm8507_vm9 = vcmp.gt.f32.partialorder %v1772_v26, 0.0  ;;  %3919 = vmatpush.bf16.msrb.mxu1 %v6553_v47 }
 0x204   : > { %vm8511_vm10 = vcmp.gt.f32.partialorder %v1773_v48, 0.0 }
 0x205   : > { %v1670_v25 = vadd.f32 %v1669_v16, %v1581_v63  ;;  %1619 = vmatmul.bf16.gmra.mxu0 %v8197_v54  ;;  %v1951_v23 = vpack.c.bf16 %v1901_v9, %v1900_v22  ;;  %vm1983_vm12 = vmpackc.low %vm8511_vm10, %vm8507_vm9  ;;  %v2014_v54 = vsel %vm1982_vm11, %v8463_v2, %v1950_v11 }
 0x206   : > { %v1434_v53 = vpop.f32.mrf.mxu2  ;;  %1708 = vmatmul.bf16.gmra.mxu1 %v8199_v35  ;;  %v1523_v24 = vpop.f32.mrf.mxu3  ;;  %v2129_v15 = vunpack.c.l.b16 %v2014_v54  ;;  %v2130_v63 = vunpack.c.h.b16 %v2014_v54 }
 0x207   : > { %v1435_v31 = vadd.f32 %v1434_v53, %v7842_v20  ;;  %v1728_v32 = vpack.c.bf16 %v1670_v25, %v8230_v56  ;;  %v2015_v26 = vsel %vm1983_vm12, %v1727_v10, %v1951_v23 }
 0x208   : > { %v2131_v48 = vunpack.c.l.b16 %v2015_v26  ;;  %v2132_v60 = vunpack.c.h.b16 %v2015_v26 }
 0x209   : > { %v8534_v35 = vadd.f32 %v1523_v24, %v1435_v31  ;;  %v1774_v22 = vunpack.c.l.bf16 %v1728_v32  ;;  %v1775_v56 = vunpack.c.h.bf16 %v1728_v32 }
 0x20a   : > { %v1582_v16 = vpop.f32.mrf.mxu0  ;;  %v8537_v39 = vpack.c.b16 %v2131_v48, %v2129_v15  ;;  %v8539_v34 = vpack.c.b16 %v2132_v60, %v2130_v63 }
 0x20b   : > { %v1671_v46 = vpop.f32.mrf.mxu1  ;;  %v1583_v9 = vadd.f32 %v1582_v16, %v8176_v14  ;;  %v1902_v11 = vmul.f32 0.010009766, %v1774_v22  ;;  %v1903_v25 = vmul.f32 0.010009766, %v1775_v56  ;;  %vm8547_vm0 = vcmp.gt.f32.partialorder %v1774_v22, 0.0 }
 0x20c   : > { %vm8551_vm13 = vcmp.gt.f32.partialorder %v1775_v56, 0.0 }
 0x20d   : > { %v1672_v2 = vadd.f32 %v1671_v46, %v1583_v9  ;;  %2431 = vmatmul.bf16.gmra.mxu2 %v8537_v39  ;;  %2520 = vmatmul.bf16.gmra.mxu3 %v8539_v34  ;;  %v1952_v60 = vpack.c.bf16 %v1903_v25, %v1902_v11  ;;  %vm1984_vm1 = vmpackc.low %vm8551_vm13, %vm8547_vm0 }
 0x20e   : > { %v1437_v42 = vpop.f32.mrf.mxu2  ;;  %v1526_v53 = vpop.f32.mrf.mxu3 }
 0x20f   : > { %v1438_v10 = vadd.f32 %v1437_v42, %v7842_v20  ;;  %v1729_v18 = vpack.c.bf16 %v1672_v2, %v8255_v57  ;;  %v2016_v2 = vsel %vm1984_vm1, %v1728_v32, %v1952_v60  ;;  %v6840_v60 = vld [vmem:[%s10774_s4 + $0x34] sm:$0xf0] }
 0x211   : > { %v8545_v31 = vadd.f32 %v1526_v53, %v1438_v10  ;;  %v1776_v23 = vunpack.c.l.bf16 %v1729_v18  ;;  %v1777_v47 = vunpack.c.h.bf16 %v1729_v18 }
 0x212   : > { %v1585_v24 = vpop.f32.mrf.mxu0 }
 0x213   : > { %v1674_v54 = vpop.f32.mrf.mxu1  ;;  %v1586_v16 = vadd.f32 %v1585_v24, %v8176_v14  ;;  %v1904_v46 = vmul.f32 0.010009766, %v1776_v23  ;;  %v1905_v15 = vmul.f32 0.010009766, %v1777_v47  ;;  %vm1840_vm14 = vcmp.gt.f32.partialorder %v1776_v23, 0.0 }
 0x214   : > { %vm1841_vm15 = vcmp.gt.f32.partialorder %v1777_v47, 0.0  ;;  %v2133_v23 = vunpack.c.l.b16 %v2016_v2  ;;  %v2134_v47 = vunpack.c.h.b16 %v2016_v2 }
 0x215   : > { %v1675_v57 = vadd.f32 %v1674_v54, %v1586_v16  ;;  %2579 = vmatmul.bf16.vlgmr.msra.gmra.mxu0 %v8258_v28  ;;  %v1953_v9 = vpack.c.bf16 %v1905_v15, %v1904_v46  ;;  %vm1985_vm2 = vmpackc.low %vm1841_vm15, %vm1840_vm14  ;;  %v6516_v16 = vld [vmem:[%s10774_s4 + $0xb0] sm:$0xf] }
 0x216   : > { %v1439_v63 = vpop.f32.mrf.mxu2  ;;  %2668 = vmatmul.bf16.vlgmr.msra.gmra.mxu1 %v8260_v51  ;;  %v1528_v42 = vpop.f32.mrf.mxu3 }
 0x217   : > { %v1440_v22 = vadd.f32 %v1439_v63, %v7842_v20  ;;  %v8564_v56 = vpack.c.bf16 %v1675_v57, %v8266_v36  ;;  %v2017_v11 = vsel %vm1985_vm2, %v1729_v18, %v1953_v9  ;;  %v6452_v18 = vld [vmem:[%s10774_s4 + $0x30] sm:$0xf]  ;;  %v6856_v63 = vld [vmem:[%s10774_s4 + $0xb4] sm:$0xf0]  ;;  %v6478_v9 = vld [vmem:[%s10774_s4 + $0x68] sm:$0xf0] }
 0x218   : > { %v2135_v28 = vunpack.c.l.b16 %v2017_v11  ;;  %v2136_v25 = vunpack.c.h.b16 %v2017_v11  ;;  %v6453_v57 = vor.u32 %v6840_v60, %v6452_v18 }
 0x219   : > { %v8566_v10 = vadd.f32 %v1528_v42, %v1440_v22  ;;  %v1778_v24 = vunpack.c.l.bf16 %v8564_v56  ;;  %v1779_v54 = vunpack.c.h.bf16 %v8564_v56  ;;  %v6845_v22 = vld [vmem:[%s10774_s4 + $0x64] sm:$0xf] }
 0x21a   : > { %v1587_v51 = vpop.f32.mrf.mxu0  ;;  %v8571_v36 = vpack.c.b16 %v2135_v28, %v2133_v23  ;;  %v8573_v48 = vpack.c.b16 %v2136_v25, %v2134_v47  ;;  %v6517_v28 = vor.u32 %v6856_v63, %v6516_v16  ;;  %v6481_v25 = vor.u32 %v6845_v22, %v6478_v9  ;;  %3656 = vmatpush.bf16.msra.mxu2 %v6453_v57  ;;  %v6542_v9 = vld [vmem:[%s10774_s4 + $0xe8] sm:$0xf0] }
 0x21b   : > { %v1676_v53 = vpop.f32.mrf.mxu1  ;;  %v1588_v26 = vadd.f32 %v1587_v51, %v8176_v14  ;;  %v1906_v42 = vmul.f32 0.010009766, %v1778_v24  ;;  %v1907_v2 = vmul.f32 0.010009766, %v1779_v54  ;;  %vm8599_vm3 = vcmp.gt.f32.partialorder %v1778_v24, 0.0  ;;  %v6861_v24 = vld [vmem:[%s10774_s4 + $0xe4] sm:$0xf] }
 0x21c   : > { %3745 = vmatpush.bf16.msra.mxu3 %v6517_v28  ;;  %3831 = vmatpush.bf16.msrb.mxu0 %v6481_v25  ;;  %vm8603_vm4 = vcmp.gt.f32.partialorder %v1779_v54, 0.0 }
 0x21d   : > { %v1677_v46 = vadd.f32 %v1676_v53, %v1588_v26  ;;  %2436 = vmatmul.bf16.gmra.mxu2 %v8571_v36  ;;  %2525 = vmatmul.bf16.gmra.mxu3 %v8573_v48  ;;  %v1954_v16 = vpack.c.bf16 %v1907_v2, %v1906_v42  ;;  %vm1986_vm7 = vmpackc.low %vm8603_vm4, %vm8599_vm3 }
 0x21e   : > { %v1442_v32 = vpop.f32.mrf.mxu2  ;;  %v1531_v11 = vpop.f32.mrf.mxu3 }
 0x21f   : > { %v1443_v15 = vadd.f32 %v1442_v32, %v7842_v20  ;;  %v1731_v51 = vpack.c.bf16 %v1677_v46, %v8287_v44 }
 0x221   : > { %v8597_v53 = vadd.f32 %v1531_v11, %v1443_v15  ;;  %v1780_v23 = vunpack.c.l.bf16 %v1731_v51  ;;  %v1781_v47 = vunpack.c.h.bf16 %v1731_v51  ;;  %v6545_v11 = vor.u32 %v6861_v24, %v6542_v9 }
 0x222   : > { %v1590_v26 = vpop.f32.mrf.mxu0 }
 0x223   : > { %v1679_v32 = vpop.f32.mrf.mxu1  ;;  %v1591_v44 = vadd.f32 %v1590_v26, %v8176_v14  ;;  %v1908_v46 = vmul.f32 0.010009766, %v1780_v23  ;;  %v1909_v15 = vmul.f32 0.010009766, %v1781_v47  ;;  %vm8608_vm5 = vcmp.gt.f32.partialorder %v1780_v23, 0.0  ;;  %3920 = vmatpush.bf16.msrb.mxu1 %v6545_v11 }
 0x224   : > { %vm8612_vm6 = vcmp.gt.f32.partialorder %v1781_v47, 0.0 }
 0x225   : > { %v1680_v54 = vadd.f32 %v1679_v32, %v1591_v44  ;;  %2584 = vmatmul.bf16.gmra.mxu0 %v8292_v29  ;;  %v1955_v2 = vpack.c.bf16 %v1909_v15, %v1908_v46  ;;  %vm1987_vm8 = vmpackc.low %vm8612_vm6, %vm8608_vm5  ;;  %v2018_v29 = vsel %vm1986_vm7, %v8564_v56, %v1954_v16  ;;  %v8640_v46 = vld [vmem:[%s10777_s7 + $0x2] ss:$8 sm:$0x3] }
 0x226   : > { %v1444_v22 = vpop.f32.mrf.mxu2  ;;  %2673 = vmatmul.bf16.gmra.mxu1 %v8294_v19  ;;  %v1533_v25 = vpop.f32.mrf.mxu3  ;;  %v2137_v18 = vunpack.c.l.b16 %v2018_v29  ;;  %v2138_v60 = vunpack.c.h.b16 %v2018_v29  ;;  %v8650_v57 = vperm.slane %v8640_v46, 0 }
 0x227   : > { %v1445_v42 = vadd.f32 %v1444_v22, %v7842_v20  ;;  %v1732_v28 = vpack.c.bf16 %v1680_v54, %v8324_v55  ;;  %v2019_v20 = vsel %vm1987_vm8, %v1731_v51, %v1955_v2 }
 0x228   : > { %v2139_v23 = vunpack.c.l.b16 %v2019_v20  ;;  %v2140_v47 = vunpack.c.h.b16 %v2019_v20 }
 0x229   : > { %v8635_v19 = vadd.f32 %v1533_v25, %v1445_v42  ;;  %v1782_v44 = vunpack.c.l.bf16 %v1732_v28  ;;  %v1783_v55 = vunpack.c.h.bf16 %v1732_v28 }
 0x22a   : > { %v1592_v26 = vpop.f32.mrf.mxu0  ;;  %v8643_v56 = vpack.c.b16 %v2139_v23, %v2137_v18  ;;  %v8645_v16 = vpack.c.b16 %v2140_v47, %v2138_v60  ;;  %v6444_v23 = vld [vmem:[%s10774_s4 + $0x20] sm:$0xf] }
 0x22b   : > { %v1681_v32 = vpop.f32.mrf.mxu1  ;;  %v1593_v15 = vadd.f32 %v1592_v26, %v8176_v14  ;;  %v1910_v63 = vmul.f32 0.010009766, %v1782_v44  ;;  %v1911_v24 = vmul.f32 0.010009766, %v1783_v55  ;;  %vm8654_vm9 = vcmp.gt.f32.partialorder %v1782_v44, 0.0 }
 0x22c   : > { %vm8658_vm10 = vcmp.gt.f32.partialorder %v1783_v55, 0.0 }
 0x22d   : > { %v1682_v51 = vadd.f32 %v1681_v32, %v1593_v15  ;;  %2441 = vmatmul.bf16.gmra.mxu2 %v8643_v56  ;;  %2530 = vmatmul.bf16.gmra.mxu3 %v8645_v16  ;;  %v1956_v47 = vpack.c.bf16 %v1911_v24, %v1910_v63  ;;  %vm1988_vm0 = vmpackc.low %vm8658_vm10, %vm8654_vm9 }
 0x22f   : > { %v1733_v54 = vpack.c.bf16 %v1682_v51, %v8344_v38  ;;  %v2020_v15 = vsel %vm1988_vm0, %v1732_v28, %v1956_v47  ;;  %v6838_v47 = vld [vmem:[%s10774_s4 + $0x24] sm:$0xf0] }
 0x230   : > { %v2402_v22 = vpop.f32.mrf.mxu2  ;;  %v2491_v9 = vpop.f32.mrf.mxu3 }
 0x231   : > { %v1784_v42 = vunpack.c.l.bf16 %v1733_v54  ;;  %v1785_v2 = vunpack.c.h.bf16 %v1733_v54  ;;  %v2403_v11 = vadd.f32 %v2402_v22, %v8650_v57 }
 0x232   : > { %v1595_v25 = vpop.f32.mrf.mxu0 }
 0x233   : > { %v1684_v29 = vpop.f32.mrf.mxu1  ;;  %v1596_v26 = vadd.f32 %v1595_v25, %v8176_v14  ;;  %v1912_v38 = vmul.f32 0.010009766, %v1784_v42  ;;  %v1913_v32 = vmul.f32 0.010009766, %v1785_v2  ;;  %v8663_v18 = vadd.f32 %v2491_v9, %v2403_v11 }
 0x234   : > { %vm1848_vm11 = vcmp.gt.f32.partialorder %v1784_v42, 0.0  ;;  %vm1849_vm12 = vcmp.gt.f32.partialorder %v1785_v2, 0.0  ;;  %v2141_v2 = vunpack.c.l.b16 %v2020_v15  ;;  %v2142_v11 = vunpack.c.h.b16 %v2020_v15  ;;  %v6470_v15 = vld [vmem:[%s10774_s4 + $0x58] sm:$0xf0] }
 0x235   : > { %v1685_v60 = vadd.f32 %v1684_v29, %v1596_v26  ;;  %2589 = vmatmul.bf16.gmra.mxu0 %v8347_v52  ;;  %v1957_v44 = vpack.c.bf16 %v1913_v32, %v1912_v38  ;;  %vm1989_vm13 = vmpackc.low %vm1849_vm12, %vm1848_vm11  ;;  %v6508_v26 = vld [vmem:[%s10774_s4 + $0xa0] sm:$0xf]  ;;  %v6445_v32 = vor.u32 %v6838_v47, %v6444_v23 }
 0x236   : > { %2678 = vmatmul.bf16.gmra.mxu1 %v8349_v7 }
 0x237   : > { %v8672_v55 = vpack.c.bf16 %v1685_v60, %v8355_v5  ;;  %v2021_v51 = vsel %vm1989_vm13, %v1733_v54, %v1957_v44  ;;  %v6854_v60 = vld [vmem:[%s10774_s4 + $0xa4] sm:$0xf0]  ;;  %v6843_v44 = vld [vmem:[%s10774_s4 + $0x54] sm:$0xf]  ;;  %3657 = vmatpush.bf16.msra.mxu2 %v6445_v32 }
 0x238   : > { %v2404_v63 = vpop.f32.mrf.mxu2  ;;  %v2493_v24 = vpop.f32.mrf.mxu3  ;;  %v2143_v22 = vunpack.c.l.b16 %v2021_v51  ;;  %v2144_v9 = vunpack.c.h.b16 %v2021_v51 }
 0x239   : > { %v2405_v52 = vadd.f32 %v2404_v63, %v8650_v57  ;;  %v1786_v25 = vunpack.c.l.bf16 %v8672_v55  ;;  %v1787_v29 = vunpack.c.h.bf16 %v8672_v55 }
 0x23a   : > { %v1597_v7 = vpop.f32.mrf.mxu0  ;;  %v8680_v28 = vpack.c.b16 %v2143_v22, %v2141_v2  ;;  %v8682_v54 = vpack.c.b16 %v2144_v9, %v2142_v11  ;;  %v6473_v22 = vor.u32 %v6843_v44, %v6470_v15  ;;  %v6859_v15 = vld [vmem:[%s10774_s4 + $0xd4] sm:$0xf] }
 0x23b   : > { %v1686_v42 = vpop.f32.mrf.mxu1  ;;  %v8677_v20 = vadd.f32 %v2493_v24, %v2405_v52  ;;  %v1598_v5 = vadd.f32 %v1597_v7, %v8176_v14  ;;  %v1914_v51 = vmul.f32 0.010009766, %v1786_v25  ;;  %v1915_v63 = vmul.f32 0.010009766, %v1787_v29 }
 0x23c   : > { %v6509_v24 = vor.u32 %v6854_v60, %v6508_v26  ;;  %3832 = vmatpush.bf16.msrb.mxu0 %v6473_v22  ;;  %vm8706_vm14 = vcmp.gt.f32.partialorder %v1786_v25, 0.0  ;;  %vm8710_vm15 = vcmp.gt.f32.partialorder %v1787_v29, 0.0  ;;  %v6534_v29 = vld [vmem:[%s10774_s4 + $0xd8] sm:$0xf0] }
 0x23d   : > { %v1687_v38 = vadd.f32 %v1686_v42, %v1598_v5  ;;  %2446 = vmatmul.bf16.gmra.mxu2 %v8680_v28  ;;  %2535 = vmatmul.bf16.gmra.mxu3 %v8682_v54  ;;  %vm1990_vm3 = vmpackc.low %vm8710_vm15, %vm8706_vm14 }
 0x23e   : > { %3746 = vmatpush.bf16.msra.mxu3 %v6509_v24 }
 0x23f   : > { %v1735_v9 = vpack.c.bf16 %v1687_v38, %v8376_v40  ;;  %v1958_v40 = vpack.c.bf16 %v1915_v63, %v1914_v51  ;;  %v6537_v63 = vor.u32 %v6859_v15, %v6534_v29 }
 0x240   : > { %v2407_v52 = vpop.f32.mrf.mxu2  ;;  %v2496_v7 = vpop.f32.mrf.mxu3 }
 0x241   : > { %v1788_v42 = vunpack.c.l.bf16 %v1735_v9  ;;  %v1789_v2 = vunpack.c.h.bf16 %v1735_v9  ;;  %v2408_v11 = vadd.f32 %v2407_v52, %v8650_v57  ;;  %v2022_v22 = vsel %vm1990_vm3, %v8672_v55, %v1958_v40  ;;  %3921 = vmatpush.bf16.msrb.mxu1 %v6537_v63 }
 0x242   : > { %v1600_v5 = vpop.f32.mrf.mxu0  ;;  %v2146_v47 = vunpack.c.h.b16 %v2022_v22 }
 0x243   : > { %v1689_v23 = vpop.f32.mrf.mxu1  ;;  %v1601_v38 = vadd.f32 %v1600_v5, %v8176_v14  ;;  %v1916_v32 = vmul.f32 0.010009766, %v1788_v42  ;;  %v1917_v60 = vmul.f32 0.010009766, %v1789_v2  ;;  %v8715_v44 = vadd.f32 %v2496_v7, %v2408_v11 }
 0x244   : > { %vm1852_vm1 = vcmp.gt.f32.partialorder %v1788_v42, 0.0  ;;  %vm1853_vm2 = vcmp.gt.f32.partialorder %v1789_v2, 0.0 }
 0x245   : > { %v1690_v25 = vadd.f32 %v1689_v23, %v1601_v38  ;;  %2594 = vmatmul.bf16.gmra.mxu0 %v8381_v1  ;;  %v1959_v51 = vpack.c.bf16 %v1917_v60, %v1916_v32  ;;  %vm1991_vm4 = vmpackc.low %vm1853_vm2, %vm1852_vm1  ;;  %v2145_v23 = vunpack.c.l.b16 %v2022_v22 }
 0x246   : > { %2683 = vmatmul.bf16.gmra.mxu1 %v8383_v43 }
 0x247   : > { %v1736_v24 = vpack.c.bf16 %v1690_v25, %v8413_v61  ;;  %v2023_v1 = vsel %vm1991_vm4, %v1735_v9, %v1959_v51 }
 0x248   : > { %v2409_v43 = vpop.f32.mrf.mxu2  ;;  %v2498_v52 = vpop.f32.mrf.mxu3  ;;  %v2147_v7 = vunpack.c.l.b16 %v2023_v1  ;;  %v2148_v42 = vunpack.c.h.b16 %v2023_v1 }
 0x249   : > { %v2410_v2 = vadd.f32 %v2409_v43, %v8650_v57  ;;  %v1790_v26 = vunpack.c.l.bf16 %v1736_v24  ;;  %v1791_v38 = vunpack.c.h.bf16 %v1736_v24 }
 0x24a   : > { %v1602_v11 = vpop.f32.mrf.mxu0  ;;  %v8735_v60 = vpack.c.b16 %v2147_v7, %v2145_v23  ;;  %v8737_v55 = vpack.c.b16 %v2148_v42, %v2146_v47  ;;  %v6436_v42 = vld [vmem:[%s10774_s4 + $0x10] sm:$0xf] }
 0x24b   : > { %v1691_v5 = vpop.f32.mrf.mxu1  ;;  %v8732_v32 = vadd.f32 %v2498_v52, %v2410_v2  ;;  %v1603_v61 = vadd.f32 %v1602_v11, %v8176_v14  ;;  %v1918_v40 = vmul.f32 0.010009766, %v1790_v26  ;;  %v1919_v15 = vmul.f32 0.010009766, %v1791_v38 }
 0x24c   : > { %vm8743_vm5 = vcmp.gt.f32.partialorder %v1790_v26, 0.0  ;;  %vm8747_vm6 = vcmp.gt.f32.partialorder %v1791_v38, 0.0 }
 0x24d   : > { %v1692_v9 = vadd.f32 %v1691_v5, %v1603_v61  ;;  %2451 = vmatmul.bf16.gmra.mxu2 %v8735_v60  ;;  %2540 = vmatmul.bf16.gmra.mxu3 %v8737_v55  ;;  %v1960_v2 = vpack.c.bf16 %v1919_v15, %v1918_v40  ;;  %vm1992_vm9 = vmpackc.low %vm8747_vm6, %vm8743_vm5 }
 0x24f   : > { %v1737_v25 = vpack.c.bf16 %v1692_v9, %v8433_v6  ;;  %v2024_v61 = vsel %vm1992_vm9, %v1736_v24, %v1960_v2  ;;  %v6836_v2 = vld [vmem:[%s10774_s4 + $0x14] sm:$0xf0] }
 0x250   : > { %v2412_v29 = vpop.f32.mrf.mxu2  ;;  %v2501_v51 = vpop.f32.mrf.mxu3 }
 0x251   : > { %v1792_v63 = vunpack.c.l.bf16 %v1737_v25  ;;  %v1793_v22 = vunpack.c.h.bf16 %v1737_v25  ;;  %v2413_v1 = vadd.f32 %v2412_v29, %v8650_v57 }
 0x252   : > { %v1605_v43 = vpop.f32.mrf.mxu0 }
 0x253   : > { %v1694_v52 = vpop.f32.mrf.mxu1  ;;  %v1606_v11 = vadd.f32 %v1605_v43, %v8176_v14  ;;  %v1920_v6 = vmul.f32 0.010009766, %v1792_v63  ;;  %v1921_v5 = vmul.f32 0.010009766, %v1793_v22  ;;  %v8752_v23 = vadd.f32 %v2501_v51, %v2413_v1 }
 0x254   : > { %vm1856_vm7 = vcmp.gt.f32.partialorder %v1792_v63, 0.0  ;;  %vm1857_vm8 = vcmp.gt.f32.partialorder %v1793_v22, 0.0  ;;  %v2149_v22 = vunpack.c.l.b16 %v2024_v61  ;;  %v2150_v1 = vunpack.c.h.b16 %v2024_v61  ;;  %v6462_v61 = vld [vmem:[%s10774_s4 + $0x48] sm:$0xf0] }
 0x255   : > { %v1695_v47 = vadd.f32 %v1694_v52, %v1606_v11  ;;  %2599 = vmatmul.bf16.gmra.mxu0 %v8436_v58  ;;  %v1961_v26 = vpack.c.bf16 %v1921_v5, %v1920_v6  ;;  %vm1993_vm10 = vmpackc.low %vm1857_vm8, %vm1856_vm7  ;;  %v6500_v11 = vld [vmem:[%s10774_s4 + $0x90] sm:$0xf]  ;;  %v6437_v5 = vor.u32 %v6836_v2, %v6436_v42 }
 0x256   : > { %2688 = vmatmul.bf16.gmra.mxu1 %v8438_v59 }
 0x257   : > { %v8761_v38 = vpack.c.bf16 %v1695_v47, %v8444_v0  ;;  %v2025_v9 = vsel %vm1993_vm10, %v1737_v25, %v1961_v26  ;;  %v6852_v47 = vld [vmem:[%s10774_s4 + $0x94] sm:$0xf0]  ;;  %v6841_v26 = vld [vmem:[%s10774_s4 + $0x44] sm:$0xf]  ;;  %3658 = vmatpush.bf16.msra.mxu2 %v6437_v5 }
 0x258   : > { %v2414_v40 = vpop.f32.mrf.mxu2  ;;  %v2503_v15 = vpop.f32.mrf.mxu3  ;;  %v2151_v29 = vunpack.c.l.b16 %v2025_v9  ;;  %v2152_v51 = vunpack.c.h.b16 %v2025_v9 }
 0x259   : > { %v2415_v58 = vadd.f32 %v2414_v40, %v8650_v57  ;;  %v1794_v43 = vunpack.c.l.bf16 %v8761_v38  ;;  %v1795_v52 = vunpack.c.h.bf16 %v8761_v38 }
 0x25a   : > { %v1607_v59 = vpop.f32.mrf.mxu0  ;;  %v8769_v24 = vpack.c.b16 %v2151_v29, %v2149_v22  ;;  %v8771_v25 = vpack.c.b16 %v2152_v51, %v2150_v1  ;;  %v6465_v29 = vor.u32 %v6841_v26, %v6462_v61  ;;  %v6857_v61 = vld [vmem:[%s10774_s4 + $0xc4] sm:$0xf] }
 0x25b   : > { %v1696_v63 = vpop.f32.mrf.mxu1  ;;  %v8766_v7 = vadd.f32 %v2503_v15, %v2415_v58  ;;  %v1608_v0 = vadd.f32 %v1607_v59, %v8176_v14  ;;  %v1922_v9 = vmul.f32 0.010009766, %v1794_v43  ;;  %v1923_v40 = vmul.f32 0.010009766, %v1795_v52 }
 0x25c   : > { %v6501_v15 = vor.u32 %v6852_v47, %v6500_v11  ;;  %3833 = vmatpush.bf16.msrb.mxu0 %v6465_v29  ;;  %vm8795_vm11 = vcmp.gt.f32.partialorder %v1794_v43, 0.0  ;;  %vm8799_vm12 = vcmp.gt.f32.partialorder %v1795_v52, 0.0  ;;  %v6526_v52 = vld [vmem:[%s10774_s4 + $0xc8] sm:$0xf0] }
 0x25d   : > { %v1697_v6 = vadd.f32 %v1696_v63, %v1608_v0  ;;  %2456 = vmatmul.bf16.gmra.mxu2 %v8769_v24  ;;  %2545 = vmatmul.bf16.gmra.mxu3 %v8771_v25  ;;  %vm1994_vm14 = vmpackc.low %vm8799_vm12, %vm8795_vm11 }
 0x25e   : > { %3747 = vmatpush.bf16.msra.mxu3 %v6501_v15 }
 0x25f   : > { %v1739_v51 = vpack.c.bf16 %v1697_v6, %v8465_v27  ;;  %v1962_v27 = vpack.c.bf16 %v1923_v40, %v1922_v9  ;;  %v6529_v40 = vor.u32 %v6857_v61, %v6526_v52 }
 0x260   : > { %v2417_v58 = vpop.f32.mrf.mxu2  ;;  %v2506_v59 = vpop.f32.mrf.mxu3 }
 0x261   : > { %v1796_v63 = vunpack.c.l.bf16 %v1739_v51  ;;  %v1797_v22 = vunpack.c.h.bf16 %v1739_v51  ;;  %v2418_v1 = vadd.f32 %v2417_v58, %v8650_v57  ;;  %v2026_v29 = vsel %vm1994_vm14, %v8761_v38, %v1962_v27  ;;  %3922 = vmatpush.bf16.msrb.mxu1 %v6529_v40 }
 0x262   : > { %v1610_v0 = vpop.f32.mrf.mxu0  ;;  %v2154_v2 = vunpack.c.h.b16 %v2026_v29 }
 0x263   : > { %v1699_v42 = vpop.f32.mrf.mxu1  ;;  %v1611_v6 = vadd.f32 %v1610_v0, %v8176_v14  ;;  %v1924_v5 = vmul.f32 0.010009766, %v1796_v63  ;;  %v1925_v47 = vmul.f32 0.010009766, %v1797_v22  ;;  %v8804_v26 = vadd.f32 %v2506_v59, %v2418_v1 }
 0x264   : > { %vm1860_vm0 = vcmp.gt.f32.partialorder %v1796_v63, 0.0  ;;  %vm1861_vm13 = vcmp.gt.f32.partialorder %v1797_v22, 0.0 }
 0x265   : > { %v1700_v43 = vadd.f32 %v1699_v42, %v1611_v6  ;;  %2604 = vmatmul.bf16.gmra.mxu0 %v8470_v13  ;;  %v1963_v9 = vpack.c.bf16 %v1925_v47, %v1924_v5  ;;  %vm1995_vm15 = vmpackc.low %vm1861_vm13, %vm1860_vm0  ;;  %v2153_v42 = vunpack.c.l.b16 %v2026_v29 }
 0x266   : > { %2693 = vmatmul.bf16.gmra.mxu1 %v8472_v33 }
 0x267   : > { %v1740_v15 = vpack.c.bf16 %v1700_v43, %v8496_v21  ;;  %v2027_v13 = vsel %vm1995_vm15, %v1739_v51, %v1963_v9 }
 0x268   : > { %v2419_v33 = vpop.f32.mrf.mxu2  ;;  %v2508_v58 = vpop.f32.mrf.mxu3  ;;  %v2155_v59 = vunpack.c.l.b16 %v2027_v13  ;;  %v2156_v63 = vunpack.c.h.b16 %v2027_v13 }
 0x269   : > { %v2420_v22 = vadd.f32 %v2419_v33, %v8650_v57  ;;  %v1798_v11 = vunpack.c.l.bf16 %v1740_v15  ;;  %v1799_v6 = vunpack.c.h.bf16 %v1740_v15 }
 0x26a   : > { %v1612_v1 = vpop.f32.mrf.mxu0  ;;  %v8824_v47 = vpack.c.b16 %v2155_v59, %v2153_v42  ;;  %v8826_v38 = vpack.c.b16 %v2156_v63, %v2154_v2 }
 0x26b   : > { %v1701_v0 = vpop.f32.mrf.mxu1  ;;  %v8821_v5 = vadd.f32 %v2508_v58, %v2420_v22  ;;  %v1613_v21 = vadd.f32 %v1612_v1, %v8176_v14  ;;  %v1926_v27 = vmul.f32 0.010009766, %v1798_v11  ;;  %v1927_v61 = vmul.f32 0.010009766, %v1799_v6 }
 0x26c   : > { %vm8832_vm1 = vcmp.gt.f32.partialorder %v1798_v11, 0.0  ;;  %vm8836_vm2 = vcmp.gt.f32.partialorder %v1799_v6, 0.0 }
 0x26d   : > { %v1702_v51 = vadd.f32 %v1701_v0, %v1613_v21  ;;  %2461 = vmatmul.bf16.gmra.mxu2 %v8824_v47  ;;  %2550 = vmatmul.bf16.gmra.mxu3 %v8826_v38  ;;  %v1964_v22 = vpack.c.bf16 %v1927_v61, %v1926_v27  ;;  %vm1996_vm5 = vmpackc.low %vm8836_vm2, %vm8832_vm1 }
 0x26f   : > { %v1741_v43 = vpack.c.bf16 %v1702_v51, %v8534_v35  ;;  %v2028_v21 = vsel %vm1996_vm5, %v1740_v15, %v1964_v22 }
 0x270   : > { %v2422_v52 = vpop.f32.mrf.mxu2  ;;  %v2511_v9 = vpop.f32.mrf.mxu3 }
 0x271   : > { %v1800_v40 = vunpack.c.l.bf16 %v1741_v43  ;;  %v1801_v29 = vunpack.c.h.bf16 %v1741_v43  ;;  %v2423_v13 = vadd.f32 %v2422_v52, %v8650_v57 }
 0x272   : > { %v1615_v33 = vpop.f32.mrf.mxu0 }
 0x273   : > { %v1704_v58 = vpop.f32.mrf.mxu1  ;;  %v1616_v1 = vadd.f32 %v1615_v33, %v8176_v14  ;;  %v1928_v35 = vmul.f32 0.010009766, %v1800_v40  ;;  %v1929_v0 = vmul.f32 0.010009766, %v1801_v29  ;;  %v8841_v42 = vadd.f32 %v2511_v9, %v2423_v13 }
 0x274   : > { %vm1864_vm3 = vcmp.gt.f32.partialorder %v1800_v40, 0.0  ;;  %vm1865_vm4 = vcmp.gt.f32.partialorder %v1801_v29, 0.0  ;;  %v2157_v29 = vunpack.c.l.b16 %v2028_v21  ;;  %v2158_v13 = vunpack.c.h.b16 %v2028_v21 }
 0x275   : > { %v1705_v2 = vadd.f32 %v1704_v58, %v1616_v1  ;;  %2609 = vmatmul.bf16.gmra.mxu0 %v8537_v39  ;;  %v1965_v11 = vpack.c.bf16 %v1929_v0, %v1928_v35  ;;  %vm1997_vm6 = vmpackc.low %vm1865_vm4, %vm1864_vm3 }
 0x276   : > { %2698 = vmatmul.bf16.gmra.mxu1 %v8539_v34 }
 0x277   : > { %v1742_v6 = vpack.c.bf16 %v1705_v2, %v8545_v31  ;;  %v2029_v51 = vsel %vm1997_vm6, %v1741_v43, %v1965_v11 }
 0x278   : > { %v2424_v27 = vpop.f32.mrf.mxu2  ;;  %v2513_v61 = vpop.f32.mrf.mxu3  ;;  %v2159_v52 = vunpack.c.l.b16 %v2029_v51  ;;  %v2160_v9 = vunpack.c.h.b16 %v2029_v51 }
 0x279   : > { %v2425_v39 = vadd.f32 %v2424_v27, %v8650_v57  ;;  %v1802_v33 = vunpack.c.l.bf16 %v1742_v6  ;;  %v1803_v58 = vunpack.c.h.bf16 %v1742_v6 }
 0x27a   : > { %v1617_v40 = vpop.f32.mrf.mxu0  ;;  %v8854_v31 = vpack.c.b16 %v2159_v52, %v2157_v29  ;;  %v8856_v15 = vpack.c.b16 %v2160_v9, %v2158_v13 }
 0x27b   : > { %v1706_v34 = vpop.f32.mrf.mxu1  ;;  %v8851_v59 = vadd.f32 %v2513_v61, %v2425_v39  ;;  %v1618_v63 = vadd.f32 %v1617_v40, %v8176_v14  ;;  %v1930_v22 = vmul.f32 0.010009766, %v1802_v33  ;;  %v1931_v1 = vmul.f32 0.010009766, %v1803_v58 }
 0x27c   : > { %vm8862_vm7 = vcmp.gt.f32.partialorder %v1802_v33, 0.0  ;;  %vm8866_vm8 = vcmp.gt.f32.partialorder %v1803_v58, 0.0  ;;  %v6428_v33 = vld [vmem:[%s10774_s4] sm:$0xf]  ;;  %v6834_v58 = vld [vmem:[%s10774_s4 + $0x4] sm:$0xf0] }
 0x27d   : > { %v1707_v43 = vadd.f32 %v1706_v34, %v1618_v63  ;;  %2466 = vmatmul.bf16.gmra.mxu2 %v8854_v31  ;;  %2555 = vmatmul.bf16.gmra.mxu3 %v8856_v15  ;;  %v1966_v39 = vpack.c.bf16 %v1931_v1, %v1930_v22  ;;  %vm1998_vm11 = vmpackc.low %vm8866_vm8, %vm8862_vm7  ;;  %v6429_v1 = vor.u32 %v6834_v58, %v6428_v33 }
 0x27f   : > { %v1743_v35 = vpack.c.bf16 %v1707_v43, %v8566_v10  ;;  %v6492_v43 = vld [vmem:[%s10774_s4 + $0x80] sm:$0xf]  ;;  %3659 = vmatpush.bf16.msra.mxu2 %v6429_v1  ;;  %v6855_v1 = vld [vmem:[%s10774_s4 + $0xb4] sm:$0xf] }
 0x280   : > { %v2427_v0 = vpop.f32.mrf.mxu2  ;;  %v2516_v2 = vpop.f32.mrf.mxu3 }
 0x281   : > { %v1804_v11 = vunpack.c.l.bf16 %v1743_v35  ;;  %v1805_v21 = vunpack.c.h.bf16 %v1743_v35  ;;  %v2428_v51 = vadd.f32 %v2427_v0, %v8650_v57 }
 0x282   : > { %v1620_v27 = vpop.f32.mrf.mxu0 }
 0x283   : > { %v1709_v61 = vpop.f32.mrf.mxu1  ;;  %v1621_v40 = vadd.f32 %v1620_v27, %v8176_v14  ;;  %v1932_v10 = vmul.f32 0.010009766, %v1804_v11  ;;  %v1933_v34 = vmul.f32 0.010009766, %v1805_v21  ;;  %v8871_v29 = vadd.f32 %v2516_v2, %v2428_v51 }
 0x284   : > { %vm8873_vm9 = vcmp.gt.f32.partialorder %v1804_v11, 0.0  ;;  %vm1869_vm10 = vcmp.gt.f32.partialorder %v1805_v21, 0.0  ;;  %v2030_v2 = vsel %vm1998_vm11, %v1742_v6, %v1966_v39  ;;  %v6454_v21 = vld [vmem:[%s10774_s4 + $0x38] sm:$0xf0] }
 0x285   : > { %v1710_v63 = vadd.f32 %v1709_v61, %v1621_v40  ;;  %2614 = vmatmul.bf16.gmra.mxu0 %v8571_v36  ;;  %v1967_v22 = vpack.c.bf16 %v1933_v34, %v1932_v10  ;;  %v6850_v36 = vld [vmem:[%s10774_s4 + $0x84] sm:$0xf0]  ;;  %vm1999_vm12 = vmpackc.low %vm1869_vm10, %vm8873_vm9  ;;  %v2161_v13 = vunpack.c.l.b16 %v2030_v2  ;;  %v2162_v33 = vunpack.c.h.b16 %v2030_v2 }
 0x286   : > { %2703 = vmatmul.bf16.gmra.mxu1 %v8573_v48  ;;  %v6839_v48 = vld [vmem:[%s10774_s4 + $0x34] sm:$0xf]  ;;  %v6493_v11 = vor.u32 %v6850_v36, %v6492_v43  ;;  %v6518_v36 = vld [vmem:[%s10774_s4 + $0xb8] sm:$0xf0] }
 0x287   : > { %v1744_v0 = vpack.c.bf16 %v1710_v63, %v8597_v53  ;;  %v2031_v51 = vsel %vm1999_vm12, %v1743_v35, %v1967_v22  ;;  %v6457_v27 = vor.u32 %v6839_v48, %v6454_v21 }
 0x288   : > { %v2429_v61 = vpop.f32.mrf.mxu2  ;;  %v2518_v52 = vpop.f32.mrf.mxu3  ;;  %v2163_v9 = vunpack.c.l.b16 %v2031_v51  ;;  %v2164_v40 = vunpack.c.h.b16 %v2031_v51  ;;  %3748 = vmatpush.bf16.msra.mxu3 %v6493_v11  ;;  %v6521_v11 = vor.u32 %v6855_v1, %v6518_v36 }
 0x289   : > { %v2430_v10 = vadd.f32 %v2429_v61, %v8650_v57  ;;  %3834 = vmatpush.bf16.msrb.mxu0 %v6457_v27  ;;  %v1806_v6 = vunpack.c.l.bf16 %v1744_v0  ;;  %v1807_v39 = vunpack.c.h.bf16 %v1744_v0 }
 0x28a   : > { %v1622_v53 = vpop.f32.mrf.mxu0  ;;  %v8908_v58 = vpack.c.b16 %v2163_v9, %v2161_v13  ;;  %v8910_v43 = vpack.c.b16 %v2164_v40, %v2162_v33  ;;  %3923 = vmatpush.bf16.msrb.mxu1 %v6521_v11 }
 0x28b   : > { %v1711_v34 = vpop.f32.mrf.mxu1  ;;  %v8905_v63 = vadd.f32 %v2518_v52, %v2430_v10  ;;  %v1623_v35 = vadd.f32 %v1622_v53, %v8176_v14  ;;  %v1934_v48 = vmul.f32 0.010009766, %v1806_v6  ;;  %v1935_v2 = vmul.f32 0.010009766, %v1807_v39 }
 0x28c   : > { %v8921_v14 = vperm.slane %v8640_v46, 1  ;;  %vm8925_vm0 = vcmp.gt.f32.partialorder %v1806_v6, 0.0  ;;  %vm8929_vm13 = vcmp.gt.f32.partialorder %v1807_v39, 0.0 }
 0x28d   : > { %v1712_v22 = vadd.f32 %v1711_v34, %v1623_v35  ;;  %2471 = vmatmul.bf16.gmra.mxu2 %v8908_v58  ;;  %2560 = vmatmul.bf16.gmra.mxu3 %v8910_v43  ;;  %v1968_v46 = vpack.c.bf16 %v1935_v2, %v1934_v48  ;;  %vm2000_vm1 = vmpackc.low %vm8929_vm13, %vm8925_vm0 }
 0x28f   : > { %v1745_v21 = vpack.c.bf16 %v1712_v22, %v8635_v19  ;;  %v2032_v1 = vsel %vm2000_vm1, %v1744_v0, %v1968_v46 }
 0x290   : > { %v2432_v51 = vpop.f32.mrf.mxu2  ;;  %v2521_v27 = vpop.f32.mrf.mxu3 }
 0x291   : > { %v1808_v61 = vunpack.c.l.bf16 %v1745_v21  ;;  %v1809_v52 = vunpack.c.h.bf16 %v1745_v21  ;;  %v2433_v9 = vadd.f32 %v2432_v51, %v8650_v57 }
 0x292   : > { %v2580_v40 = vpop.f32.mrf.mxu0 }
 0x293   : > { %v2669_v10 = vpop.f32.mrf.mxu1  ;;  %v2581_v19 = vadd.f32 %v2580_v40, %v8921_v14  ;;  %v1936_v13 = vmul.f32 0.010009766, %v1808_v61  ;;  %v1937_v33 = vmul.f32 0.010009766, %v1809_v52  ;;  %v8934_v35 = vadd.f32 %v2521_v27, %v2433_v9 }
 0x294   : > { %vm1872_vm14 = vcmp.gt.f32.partialorder %v1808_v61, 0.0  ;;  %vm1873_vm15 = vcmp.gt.f32.partialorder %v1809_v52, 0.0  ;;  %v2165_v9 = vunpack.c.l.b16 %v2032_v1  ;;  %v2166_v40 = vunpack.c.h.b16 %v2032_v1 }
 0x295   : > { %v2670_v22 = vadd.f32 %v2669_v10, %v2581_v19  ;;  %2619 = vmatmul.bf16.gmra.mxu0 %v8643_v56  ;;  %v1969_v6 = vpack.c.bf16 %v1937_v33, %v1936_v13  ;;  %vm2001_vm2 = vmpackc.low %vm1873_vm15, %vm1872_vm14  ;;  %v3133_v13 = vunpack.c.l.bf16 %v7414_v12 }
 0x296   : > { %2708 = vmatmul.bf16.gmra.mxu1 %v8645_v16 }
 0x297   : > { %v2749_v39 = vpack.c.bf16 %v2670_v22, %v8663_v18  ;;  %v2033_v36 = vsel %vm2001_vm2, %v1745_v21, %v1969_v6  ;;  %v3134_v22 = vunpack.c.h.bf16 %v7414_v12 }
 0x298   : > { %v2434_v11 = vpop.f32.mrf.mxu2  ;;  %v2523_v51 = vpop.f32.mrf.mxu3  ;;  %v2167_v27 = vunpack.c.l.b16 %v2033_v36  ;;  %v2168_v56 = vunpack.c.h.b16 %v2033_v36 }
 0x299   : > { %v2781_v48 = vunpack.c.l.bf16 %v2749_v39  ;;  %v2782_v2 = vunpack.c.h.bf16 %v2749_v39  ;;  %v2435_v16 = vadd.f32 %v2434_v11, %v8650_v57 }
 0x29a   : > { %v2582_v61 = vpop.f32.mrf.mxu0  ;;  %v8947_v21 = vpack.c.b16 %v2167_v27, %v2165_v9  ;;  %v8949_v34 = vpack.c.b16 %v2168_v56, %v2166_v40 }
 0x29b   : > { %v2671_v52 = vpop.f32.mrf.mxu1  ;;  %vm2845_vm3 = vcmp.gt.f32.partialorder %v2781_v48, 0.0  ;;  %vm2846_vm4 = vcmp.gt.f32.partialorder %v2782_v2, 0.0  ;;  %v2909_v10 = vmul.f32 0.010009766, %v2781_v48  ;;  %v2910_v53 = vmul.f32 0.010009766, %v2782_v2 }
 0x29c   : > { %v8944_v18 = vadd.f32 %v2523_v51, %v2435_v16  ;;  %v2583_v0 = vadd.f32 %v2582_v61, %v8921_v14  ;;  %vm3005_vm5 = vmpackc.low %vm2846_vm4, %vm2845_vm3 }
 0x29d   : > { %v2973_v46 = vpack.c.bf16 %v2910_v53, %v2909_v10  ;;  %2476 = vmatmul.bf16.gmra.mxu2 %v8947_v21  ;;  %2565 = vmatmul.bf16.gmra.mxu3 %v8949_v34 }
 0x29e   : > { %v2672_v19 = vadd.f32 %v2671_v52, %v2583_v0 }
 0x29f   : > { %v3037_v33 = vsel %vm3005_vm5, %v2749_v39, %v2973_v46 }
 0x2a0   : > { %v3069_v6 = vunpack.c.l.bf16 %v3037_v33  ;;  %v3070_v1 = vunpack.c.h.bf16 %v3037_v33  ;;  %v2750_v36 = vpack.c.bf16 %v2672_v19, %v8677_v20  ;;  %v2437_v48 = vpop.f32.mrf.mxu2  ;;  %v2526_v2 = vpop.f32.mrf.mxu3  ;;  %v6613_v20 = vld [vmem:[%s10775_s5 + $0x70] sm:$0xf]  ;;  %v6880_v19 = vld [vmem:[%s10775_s5 + $0x74] sm:$0xf0] }
 0x2a1   : > { %v2438_v52 = vadd.f32 %v2437_v48, %v8650_v57  ;;  %v6614_v33 = vor.u32 %v6880_v19, %v6613_v20 }
 0x2a2   : > { %v3197_v11 = vadd.f32 %v3133_v13, %v3069_v6  ;;  %v3198_v51 = vadd.f32 %v3134_v22, %v3070_v1  ;;  %v2783_v27 = vunpack.c.l.bf16 %v2750_v36  ;;  %v2784_v56 = vunpack.c.h.bf16 %v2750_v36  ;;  %v2585_v16 = vpop.f32.mrf.mxu0  ;;  %v6677_v13 = vld [vmem:[%s10775_s5 + $0xf0] sm:$0xf]  ;;  %v6896_v22 = vld [vmem:[%s10775_s5 + $0xf4] sm:$0xf0]  ;;  %v6837_v6 = vld [vmem:[%s10774_s4 + $0x24] sm:$0xf] }
 0x2a3   : > { %v2674_v61 = vpop.f32.mrf.mxu1  ;;  %v2586_v9 = vadd.f32 %v2585_v16, %v8921_v14  ;;  %v8971_v0 = vadd.f32 %v2526_v2, %v2438_v52  ;;  %v6678_v48 = vor.u32 %v6896_v22, %v6677_v13  ;;  %4687 = vmatpush.bf16.msrb.mxu2 %v6614_v33  ;;  %v3136_v52 = vunpack.c.h.bf16 %v7424_v17 }
 0x2a4   : > { %v8958_v40 = vpack.c.bf16 %v3198_v51, %v3197_v11  ;;  %vm8960_vm6 = vcmp.gt.f32.partialorder %v2783_v27, 0.0  ;;  %v2911_v39 = vmul.f32 0.010009766, %v2783_v27  ;;  %vm8967_vm7 = vcmp.gt.f32.partialorder %v2784_v56, 0.0 }
 0x2a5   : > { %v2912_v53 = vmul.f32 0.010009766, %v2784_v56  ;;  %v2675_v46 = vadd.f32 %v2674_v61, %v2586_v9  ;;  %2624 = vmatmul.bf16.gmra.mxu0 %v8680_v28  ;;  %v6446_v28 = vld [vmem:[%s10774_s4 + $0x28] sm:$0xf0]  ;;  %vm3006_vm8 = vmpackc.low %vm8967_vm7, %vm8960_vm6  ;;  %v3135_v11 = vunpack.c.l.bf16 %v7424_v17  ;;  %4776 = vmatpush.bf16.msrb.mxu3 %v6678_v48 }
 0x2a6   : > { %2713 = vmatmul.bf16.gmra.mxu1 %v8682_v54  ;;  %v6449_v2 = vor.u32 %v6837_v6, %v6446_v28  ;;  %v6510_v48 = vld [vmem:[%s10774_s4 + $0xa8] sm:$0xf0] }
 0x2a7   : > { %v2974_v54 = vpack.c.bf16 %v2912_v53, %v2911_v39  ;;  %v2751_v1 = vpack.c.bf16 %v2675_v46, %v8715_v44 }
 0x2a8   : > { %v2439_v16 = vpop.f32.mrf.mxu2  ;;  %v2528_v61 = vpop.f32.mrf.mxu3  ;;  %3835 = vmatpush.bf16.msrb.mxu0 %v6449_v2  ;;  %v3137_v2 = vunpack.c.l.bf16 %v7447_v45 }
 0x2a9   : > { %v3038_v51 = vsel %vm3006_vm8, %v2750_v36, %v2974_v54  ;;  %v2785_v27 = vunpack.c.l.bf16 %v2751_v1  ;;  %v2786_v56 = vunpack.c.h.bf16 %v2751_v1  ;;  %v2440_v39 = vadd.f32 %v2439_v16, %v8650_v57  ;;  %v6853_v54 = vld [vmem:[%s10774_s4 + $0xa4] sm:$0xf] }
 0x2aa   : > { %v3071_v44 = vunpack.c.l.bf16 %v3038_v51  ;;  %v3072_v9 = vunpack.c.h.bf16 %v3038_v51  ;;  %v2587_v12 = vpop.f32.mrf.mxu0 }
 0x2ab   : > { %v2676_v20 = vpop.f32.mrf.mxu1  ;;  %vm8998_vm9 = vcmp.gt.f32.partialorder %v2785_v27, 0.0  ;;  %vm9002_vm10 = vcmp.gt.f32.partialorder %v2786_v56, 0.0  ;;  %v2913_v53 = vmul.f32 0.010009766, %v2785_v27  ;;  %v2914_v46 = vmul.f32 0.010009766, %v2786_v56 }
 0x2ac   : > { %v3199_v19 = vadd.f32 %v3135_v11, %v3071_v44  ;;  %v3200_v13 = vadd.f32 %v3136_v52, %v3072_v9  ;;  %v9006_v33 = vadd.f32 %v2528_v61, %v2440_v39  ;;  %v2588_v17 = vadd.f32 %v2587_v12, %v8921_v14  ;;  %vm3007_vm11 = vmpackc.low %vm9002_vm10, %vm8998_vm9 }
 0x2ad   : > { %v2975_v22 = vpack.c.bf16 %v2914_v46, %v2913_v53  ;;  %v3138_v11 = vunpack.c.h.bf16 %v7447_v45  ;;  %v6513_v27 = vor.u32 %v6853_v54, %v6510_v48  ;;  %v3364_v39 = vunpack.c.l.b16 %v8958_v40 }
 0x2ae   : > { %v9009_v6 = vpack.c.bf16 %v3200_v13, %v3199_v19  ;;  %v2677_v28 = vadd.f32 %v2676_v20, %v2588_v17  ;;  %v3365_v12 = vunpack.c.h.b16 %v8958_v40 }
 0x2af   : > { %v3039_v51 = vsel %vm3007_vm11, %v2751_v1, %v2975_v22  ;;  %3924 = vmatpush.bf16.msrb.mxu1 %v6513_v27  ;;  %v3139_v27 = vunpack.c.l.bf16 %v7457_v50 }
 0x2b0   : > { %v3073_v56 = vunpack.c.l.bf16 %v3039_v51  ;;  %v3074_v16 = vunpack.c.h.bf16 %v3039_v51  ;;  %v2752_v61 = vpack.c.bf16 %v2677_v28, %v8732_v32  ;;  %v3366_v52 = vunpack.c.l.b16 %v9009_v6  ;;  %v2442_v44 = vpop.f32.mrf.mxu2  ;;  %v2531_v9 = vpop.f32.mrf.mxu3 }
 0x2b1   : > { %v3367_v20 = vunpack.c.h.b16 %v9009_v6  ;;  %v2443_v19 = vadd.f32 %v2442_v44, %v8650_v57 }
 0x2b2   : > { %v3201_v10 = vadd.f32 %v3137_v2, %v3073_v56  ;;  %v3202_v36 = vadd.f32 %v3138_v11, %v3074_v16  ;;  %v2787_v45 = vunpack.c.l.bf16 %v2752_v61  ;;  %v2788_v1 = vunpack.c.h.bf16 %v2752_v61  ;;  %v2590_v53 = vpop.f32.mrf.mxu0 }
 0x2b3   : > { %v2679_v46 = vpop.f32.mrf.mxu1  ;;  %v2591_v32 = vadd.f32 %v2590_v53, %v8921_v14  ;;  %v9030_v13 = vpack.c.b16 %v3366_v52, %v3364_v39  ;;  %v9032_v17 = vpack.c.b16 %v3367_v20, %v3365_v12  ;;  %v9036_v48 = vadd.f32 %v2531_v9, %v2443_v19 }
 0x2b4   : > { %v9034_v22 = vpack.c.bf16 %v3202_v36, %v3201_v10  ;;  %vm2851_vm12 = vcmp.gt.f32.partialorder %v2787_v45, 0.0  ;;  %v2915_v28 = vmul.f32 0.010009766, %v2787_v45  ;;  %vm2852_vm0 = vcmp.gt.f32.partialorder %v2788_v1, 0.0 }
 0x2b5   : > { %v2916_v54 = vmul.f32 0.010009766, %v2788_v1  ;;  %v2680_v2 = vadd.f32 %v2679_v46, %v2591_v32  ;;  %3660 = vmatmul.bf16.vlgmr.msra.gmra.mxu2 %v9030_v13  ;;  %3749 = vmatmul.bf16.vlgmr.msra.gmra.mxu3 %v9032_v17  ;;  %vm3008_vm13 = vmpackc.low %vm2852_vm0, %vm2851_vm12  ;;  %v3140_v39 = vunpack.c.h.bf16 %v7457_v50  ;;  %v3141_v32 = vunpack.c.l.bf16 %v7516_v30 }
 0x2b6   : > { %2629 = vmatmul.bf16.gmra.mxu0 %v8735_v60  ;;  %2718 = vmatmul.bf16.gmra.mxu1 %v8737_v55 }
 0x2b7   : > { %v2976_v11 = vpack.c.bf16 %v2916_v54, %v2915_v28  ;;  %v2753_v51 = vpack.c.bf16 %v2680_v2, %v8752_v23  ;;  %v3142_v28 = vunpack.c.h.bf16 %v7516_v30 }
 0x2b8   : > { %v2444_v44 = vpop.f32.mrf.mxu2  ;;  %v2533_v9 = vpop.f32.mrf.mxu3 }
 0x2b9   : > { %v3040_v56 = vsel %vm3008_vm13, %v2752_v61, %v2976_v11  ;;  %v2789_v16 = vunpack.c.l.bf16 %v2753_v51  ;;  %v2790_v52 = vunpack.c.h.bf16 %v2753_v51  ;;  %v2445_v10 = vadd.f32 %v2444_v44, %v8650_v57 }
 0x2ba   : > { %v3075_v12 = vunpack.c.l.bf16 %v3040_v56  ;;  %v3076_v20 = vunpack.c.h.bf16 %v3040_v56  ;;  %v2592_v60 = vpop.f32.mrf.mxu0  ;;  %v3368_v44 = vunpack.c.l.b16 %v9034_v22 }
 0x2bb   : > { %v2681_v36 = vpop.f32.mrf.mxu1  ;;  %vm2853_vm14 = vcmp.gt.f32.partialorder %v2789_v16, 0.0  ;;  %vm2854_vm15 = vcmp.gt.f32.partialorder %v2790_v52, 0.0  ;;  %v2917_v55 = vmul.f32 0.010009766, %v2789_v16  ;;  %v2918_v23 = vmul.f32 0.010009766, %v2790_v52 }
 0x2bc   : > { %v3203_v45 = vadd.f32 %v3139_v27, %v3075_v12  ;;  %v3204_v1 = vadd.f32 %v3140_v39, %v3076_v20  ;;  %v9046_v53 = vadd.f32 %v2533_v9, %v2445_v10  ;;  %v2593_v61 = vadd.f32 %v2592_v60, %v8921_v14  ;;  %vm3009_vm1 = vmpackc.low %vm2854_vm15, %vm2853_vm14 }
 0x2bd   : > { %v2977_v46 = vpack.c.bf16 %v2918_v23, %v2917_v55  ;;  %v3369_v9 = vunpack.c.h.b16 %v9034_v22 }
 0x2be   : > { %v9049_v19 = vpack.c.bf16 %v3204_v1, %v3203_v45  ;;  %v2682_v50 = vadd.f32 %v2681_v36, %v2593_v61 }
 0x2bf   : > { %v3041_v54 = vsel %vm3009_vm1, %v2753_v51, %v2977_v46  ;;  %v6605_v46 = vld [vmem:[%s10775_s5 + $0x60] sm:$0xf] }
 0x2c0   : > { %v3077_v2 = vunpack.c.l.bf16 %v3041_v54  ;;  %v3078_v11 = vunpack.c.h.bf16 %v3041_v54  ;;  %v2754_v56 = vpack.c.bf16 %v2682_v50, %v8766_v7  ;;  %v3370_v27 = vunpack.c.l.b16 %v9049_v19  ;;  %v2447_v16 = vpop.f32.mrf.mxu2  ;;  %v2536_v52 = vpop.f32.mrf.mxu3 }
 0x2c1   : > { %v3371_v39 = vunpack.c.h.b16 %v9049_v19  ;;  %v2448_v36 = vadd.f32 %v2447_v16, %v8650_v57  ;;  %v6894_v16 = vld [vmem:[%s10775_s5 + $0xe4] sm:$0xf0] }
 0x2c2   : > { %v3205_v12 = vadd.f32 %v3141_v32, %v3077_v2  ;;  %v3206_v20 = vadd.f32 %v3142_v28, %v3078_v11  ;;  %v2791_v10 = vunpack.c.l.bf16 %v2754_v56  ;;  %v2792_v60 = vunpack.c.h.bf16 %v2754_v56  ;;  %v2595_v30 = vpop.f32.mrf.mxu0  ;;  %v6878_v2 = vld [vmem:[%s10775_s5 + $0x64] sm:$0xf0]  ;;  %v6669_v11 = vld [vmem:[%s10775_s5 + $0xe0] sm:$0xf] }
 0x2c3   : > { %v2684_v51 = vpop.f32.mrf.mxu1  ;;  %v2596_v7 = vadd.f32 %v2595_v30, %v8921_v14  ;;  %v9060_v55 = vpack.c.b16 %v3370_v27, %v3368_v44  ;;  %v9062_v23 = vpack.c.b16 %v3371_v39, %v3369_v9  ;;  %v9077_v28 = vadd.f32 %v2536_v52, %v2448_v36  ;;  %v6835_v52 = vld [vmem:[%s10774_s4 + $0x14] sm:$0xf]  ;;  %v6438_v44 = vld [vmem:[%s10774_s4 + $0x18] sm:$0xf0] }
 0x2c4   : > { %v9064_v45 = vpack.c.bf16 %v3206_v20, %v3205_v12  ;;  %vm9066_vm2 = vcmp.gt.f32.partialorder %v2791_v10, 0.0  ;;  %v2919_v61 = vmul.f32 0.010009766, %v2791_v10  ;;  %vm9073_vm3 = vcmp.gt.f32.partialorder %v2792_v60, 0.0 }
 0x2c5   : > { %v2920_v32 = vmul.f32 0.010009766, %v2792_v60  ;;  %v2685_v54 = vadd.f32 %v2684_v51, %v2596_v7  ;;  %3665 = vmatmul.bf16.gmra.mxu2 %v9060_v55  ;;  %3754 = vmatmul.bf16.gmra.mxu3 %v9062_v23  ;;  %v6606_v27 = vor.u32 %v6878_v2, %v6605_v46  ;;  %v6670_v12 = vor.u32 %v6894_v16, %v6669_v11  ;;  %vm3010_vm4 = vmpackc.low %vm9073_vm3, %vm9066_vm2 }
 0x2c6   : > { %2634 = vmatmul.bf16.gmra.mxu0 %v8769_v24  ;;  %2723 = vmatmul.bf16.gmra.mxu1 %v8771_v25  ;;  %v6441_v24 = vor.u32 %v6835_v52, %v6438_v44  ;;  %v3143_v25 = vunpack.c.l.bf16 %v7526_v37  ;;  %v3144_v36 = vunpack.c.h.bf16 %v7526_v37 }
 0x2c7   : > { %v2978_v9 = vpack.c.bf16 %v2920_v32, %v2919_v61  ;;  %v2755_v39 = vpack.c.bf16 %v2685_v54, %v8804_v26  ;;  %4688 = vmatpush.bf16.msrb.mxu2 %v6606_v27  ;;  %4777 = vmatpush.bf16.msrb.mxu3 %v6670_v12  ;;  %v6502_v12 = vld [vmem:[%s10774_s4 + $0x98] sm:$0xf0] }
 0x2c8   : > { %v2449_v30 = vpop.f32.mrf.mxu2  ;;  %v2538_v51 = vpop.f32.mrf.mxu3  ;;  %3836 = vmatpush.bf16.msrb.mxu0 %v6441_v24  ;;  %v3145_v24 = vunpack.c.l.bf16 %v7549_v3 }
 0x2c9   : > { %v3042_v20 = vsel %vm3010_vm4, %v2754_v56, %v2978_v9  ;;  %v2793_v10 = vunpack.c.l.bf16 %v2755_v39  ;;  %v2794_v60 = vunpack.c.h.bf16 %v2755_v39  ;;  %v2450_v61 = vadd.f32 %v2449_v30, %v8650_v57  ;;  %v6851_v9 = vld [vmem:[%s10774_s4 + $0x94] sm:$0xf] }
 0x2ca   : > { %v3079_v26 = vunpack.c.l.bf16 %v3042_v20  ;;  %v3080_v7 = vunpack.c.h.bf16 %v3042_v20  ;;  %v2597_v1 = vpop.f32.mrf.mxu0 }
 0x2cb   : > { %v2686_v46 = vpop.f32.mrf.mxu1  ;;  %vm9106_vm5 = vcmp.gt.f32.partialorder %v2793_v10, 0.0  ;;  %vm9110_vm6 = vcmp.gt.f32.partialorder %v2794_v60, 0.0  ;;  %v2921_v32 = vmul.f32 0.010009766, %v2793_v10  ;;  %v2922_v54 = vmul.f32 0.010009766, %v2794_v60 }
 0x2cc   : > { %v3207_v2 = vadd.f32 %v3143_v25, %v3079_v26  ;;  %v3208_v11 = vadd.f32 %v3144_v36, %v3080_v7  ;;  %v9114_v27 = vadd.f32 %v2538_v51, %v2450_v61  ;;  %v2598_v37 = vadd.f32 %v2597_v1, %v8921_v14  ;;  %vm3011_vm7 = vmpackc.low %vm9110_vm6, %vm9106_vm5 }
 0x2cd   : > { %v2979_v16 = vpack.c.bf16 %v2922_v54, %v2921_v32  ;;  %v3146_v25 = vunpack.c.h.bf16 %v7549_v3  ;;  %v6505_v10 = vor.u32 %v6851_v9, %v6502_v12  ;;  %v3372_v61 = vunpack.c.l.b16 %v9064_v45 }
 0x2ce   : > { %v9117_v52 = vpack.c.bf16 %v3208_v11, %v3207_v2  ;;  %v2687_v44 = vadd.f32 %v2686_v46, %v2598_v37  ;;  %v3373_v1 = vunpack.c.h.b16 %v9064_v45 }
 0x2cf   : > { %v3043_v20 = vsel %vm3011_vm7, %v2755_v39, %v2979_v16  ;;  %3925 = vmatpush.bf16.msrb.mxu1 %v6505_v10  ;;  %v3147_v10 = vunpack.c.l.bf16 %v7559_v8 }
 0x2d0   : > { %v3081_v60 = vunpack.c.l.bf16 %v3043_v20  ;;  %v3082_v30 = vunpack.c.h.bf16 %v3043_v20  ;;  %v2756_v51 = vpack.c.bf16 %v2687_v44, %v8821_v5  ;;  %v3374_v36 = vunpack.c.l.b16 %v9117_v52  ;;  %v2452_v26 = vpop.f32.mrf.mxu2  ;;  %v2541_v7 = vpop.f32.mrf.mxu3 }
 0x2d1   : > { %v3375_v46 = vunpack.c.h.b16 %v9117_v52  ;;  %v2453_v2 = vadd.f32 %v2452_v26, %v8650_v57 }
 0x2d2   : > { %v3209_v50 = vadd.f32 %v3145_v24, %v3081_v60  ;;  %v3210_v56 = vadd.f32 %v3146_v25, %v3082_v30  ;;  %v2795_v3 = vunpack.c.l.bf16 %v2756_v51  ;;  %v2796_v39 = vunpack.c.h.bf16 %v2756_v51  ;;  %v2600_v32 = vpop.f32.mrf.mxu0 }
 0x2d3   : > { %v2689_v54 = vpop.f32.mrf.mxu1  ;;  %v2601_v5 = vadd.f32 %v2600_v32, %v8921_v14  ;;  %v9138_v11 = vpack.c.b16 %v3374_v36, %v3372_v61  ;;  %v9140_v37 = vpack.c.b16 %v3375_v46, %v3373_v1  ;;  %v9144_v12 = vadd.f32 %v2541_v7, %v2453_v2 }
 0x2d4   : > { %v9142_v16 = vpack.c.bf16 %v3210_v56, %v3209_v50  ;;  %vm2859_vm8 = vcmp.gt.f32.partialorder %v2795_v3, 0.0  ;;  %v2923_v44 = vmul.f32 0.010009766, %v2795_v3  ;;  %vm2860_vm9 = vcmp.gt.f32.partialorder %v2796_v39, 0.0 }
 0x2d5   : > { %v2924_v9 = vmul.f32 0.010009766, %v2796_v39  ;;  %v2690_v24 = vadd.f32 %v2689_v54, %v2601_v5  ;;  %3670 = vmatmul.bf16.gmra.mxu2 %v9138_v11  ;;  %3759 = vmatmul.bf16.gmra.mxu3 %v9140_v37  ;;  %vm3012_vm10 = vmpackc.low %vm2860_vm9, %vm2859_vm8  ;;  %v3148_v61 = vunpack.c.h.bf16 %v7559_v8  ;;  %v3149_v5 = vunpack.c.l.bf16 %v7618_v62 }
 0x2d6   : > { %2639 = vmatmul.bf16.gmra.mxu0 %v8824_v47  ;;  %2728 = vmatmul.bf16.gmra.mxu1 %v8826_v38 }
 0x2d7   : > { %v2980_v25 = vpack.c.bf16 %v2924_v9, %v2923_v44  ;;  %v2757_v20 = vpack.c.bf16 %v2690_v24, %v8841_v42  ;;  %v3150_v44 = vunpack.c.h.bf16 %v7618_v62 }
 0x2d8   : > { %v2454_v26 = vpop.f32.mrf.mxu2  ;;  %v2543_v7 = vpop.f32.mrf.mxu3 }
 0x2d9   : > { %v3044_v60 = vsel %vm3012_vm10, %v2756_v51, %v2980_v25  ;;  %v2797_v30 = vunpack.c.l.bf16 %v2757_v20  ;;  %v2798_v36 = vunpack.c.h.bf16 %v2757_v20  ;;  %v2455_v50 = vadd.f32 %v2454_v26, %v8650_v57 }
 0x2da   : > { %v3083_v1 = vunpack.c.l.bf16 %v3044_v60  ;;  %v3084_v46 = vunpack.c.h.bf16 %v3044_v60  ;;  %v2602_v47 = vpop.f32.mrf.mxu0  ;;  %v3376_v26 = vunpack.c.l.b16 %v9142_v16 }
 0x2db   : > { %v2691_v56 = vpop.f32.mrf.mxu1  ;;  %vm2861_vm11 = vcmp.gt.f32.partialorder %v2797_v30, 0.0  ;;  %vm2862_vm12 = vcmp.gt.f32.partialorder %v2798_v36, 0.0  ;;  %v2925_v38 = vmul.f32 0.010009766, %v2797_v30  ;;  %v2926_v42 = vmul.f32 0.010009766, %v2798_v36 }
 0x2dc   : > { %v3211_v3 = vadd.f32 %v3147_v10, %v3083_v1  ;;  %v3212_v39 = vadd.f32 %v3148_v61, %v3084_v46  ;;  %v9154_v32 = vadd.f32 %v2543_v7, %v2455_v50  ;;  %v2603_v51 = vadd.f32 %v2602_v47, %v8921_v14  ;;  %vm3013_vm0 = vmpackc.low %vm2862_vm12, %vm2861_vm11 }
 0x2dd   : > { %v2981_v54 = vpack.c.bf16 %v2926_v42, %v2925_v38  ;;  %v3377_v7 = vunpack.c.h.b16 %v9142_v16 }
 0x2de   : > { %v9157_v2 = vpack.c.bf16 %v3212_v39, %v3211_v3  ;;  %v2692_v8 = vadd.f32 %v2691_v56, %v2603_v51 }
 0x2df   : > { %v3045_v9 = vsel %vm3013_vm0, %v2757_v20, %v2981_v54  ;;  %v6597_v54 = vld [vmem:[%s10775_s5 + $0x50] sm:$0xf] }
 0x2e0   : > { %v3085_v24 = vunpack.c.l.bf16 %v3045_v9  ;;  %v3086_v25 = vunpack.c.h.bf16 %v3045_v9  ;;  %v2758_v60 = vpack.c.bf16 %v2692_v8, %v8851_v59  ;;  %v3378_v10 = vunpack.c.l.b16 %v9157_v2  ;;  %v2457_v30 = vpop.f32.mrf.mxu2  ;;  %v2546_v36 = vpop.f32.mrf.mxu3 }
 0x2e1   : > { %v3379_v61 = vunpack.c.h.b16 %v9157_v2  ;;  %v2458_v56 = vadd.f32 %v2457_v30, %v8650_v57  ;;  %v6892_v30 = vld [vmem:[%s10775_s5 + $0xd4] sm:$0xf0] }
 0x2e2   : > { %v3213_v1 = vadd.f32 %v3149_v5, %v3085_v24  ;;  %v3214_v46 = vadd.f32 %v3150_v44, %v3086_v25  ;;  %v2799_v50 = vunpack.c.l.bf16 %v2758_v60  ;;  %v2800_v47 = vunpack.c.h.bf16 %v2758_v60  ;;  %v2605_v62 = vpop.f32.mrf.mxu0  ;;  %v6876_v24 = vld [vmem:[%s10775_s5 + $0x54] sm:$0xf0]  ;;  %v6661_v25 = vld [vmem:[%s10775_s5 + $0xd0] sm:$0xf] }
 0x2e3   : > { %v2694_v20 = vpop.f32.mrf.mxu1  ;;  %v2606_v59 = vadd.f32 %v2605_v62, %v8921_v14  ;;  %v9168_v38 = vpack.c.b16 %v3378_v10, %v3376_v26  ;;  %v9170_v42 = vpack.c.b16 %v3379_v61, %v3377_v7  ;;  %v9185_v44 = vadd.f32 %v2546_v36, %v2458_v56  ;;  %v6833_v36 = vld [vmem:[%s10774_s4 + $0x4] sm:$0xf]  ;;  %v6430_v26 = vld [vmem:[%s10774_s4 + $0x8] sm:$0xf0] }
 0x2e4   : > { %v9172_v3 = vpack.c.bf16 %v3214_v46, %v3213_v1  ;;  %vm9174_vm13 = vcmp.gt.f32.partialorder %v2799_v50, 0.0  ;;  %v2927_v51 = vmul.f32 0.010009766, %v2799_v50  ;;  %vm9181_vm14 = vcmp.gt.f32.partialorder %v2800_v47, 0.0 }
 0x2e5   : > { %v2928_v5 = vmul.f32 0.010009766, %v2800_v47  ;;  %v2695_v9 = vadd.f32 %v2694_v20, %v2606_v59  ;;  %3675 = vmatmul.bf16.gmra.mxu2 %v9168_v38  ;;  %3764 = vmatmul.bf16.gmra.mxu3 %v9170_v42  ;;  %v6598_v10 = vor.u32 %v6876_v24, %v6597_v54  ;;  %v6662_v1 = vor.u32 %v6892_v30, %v6661_v25  ;;  %vm3014_vm15 = vmpackc.low %vm9181_vm14, %vm9174_vm13 }
 0x2e6   : > { %2644 = vmatmul.bf16.gmra.mxu0 %v8854_v31  ;;  %2733 = vmatmul.bf16.gmra.mxu1 %v8856_v15  ;;  %v6433_v31 = vor.u32 %v6833_v36, %v6430_v26  ;;  %v3151_v15 = vunpack.c.l.bf16 %v7628_v4  ;;  %v3152_v56 = vunpack.c.h.bf16 %v7628_v4 }
 0x2e7   : > { %v2982_v7 = vpack.c.bf16 %v2928_v5, %v2927_v51  ;;  %v2759_v61 = vpack.c.bf16 %v2695_v9, %v8871_v29  ;;  %4689 = vmatpush.bf16.msrb.mxu2 %v6598_v10  ;;  %4778 = vmatpush.bf16.msrb.mxu3 %v6662_v1  ;;  %v6494_v1 = vld [vmem:[%s10774_s4 + $0x88] sm:$0xf0] }
 0x2e8   : > { %v2459_v62 = vpop.f32.mrf.mxu2  ;;  %v2548_v20 = vpop.f32.mrf.mxu3  ;;  %3837 = vmatpush.bf16.msrb.mxu0 %v6433_v31  ;;  %v3153_v31 = vunpack.c.l.bf16 %v7651_v41 }
 0x2e9   : > { %v3046_v46 = vsel %vm3014_vm15, %v2758_v60, %v2982_v7  ;;  %v2801_v50 = vunpack.c.l.bf16 %v2759_v61  ;;  %v2802_v47 = vunpack.c.h.bf16 %v2759_v61  ;;  %v2460_v51 = vadd.f32 %v2459_v62, %v8650_v57  ;;  %v6849_v7 = vld [vmem:[%s10774_s4 + $0x84] sm:$0xf] }
 0x2ea   : > { %v3087_v29 = vunpack.c.l.bf16 %v3046_v46  ;;  %v3088_v59 = vunpack.c.h.bf16 %v3046_v46  ;;  %v2607_v39 = vpop.f32.mrf.mxu0 }
 0x2eb   : > { %v2696_v54 = vpop.f32.mrf.mxu1  ;;  %vm9214_vm1 = vcmp.gt.f32.partialorder %v2801_v50, 0.0  ;;  %vm9218_vm2 = vcmp.gt.f32.partialorder %v2802_v47, 0.0  ;;  %v2929_v5 = vmul.f32 0.010009766, %v2801_v50  ;;  %v2930_v9 = vmul.f32 0.010009766, %v2802_v47 }
 0x2ec   : > { %v3215_v24 = vadd.f32 %v3151_v15, %v3087_v29  ;;  %v3216_v25 = vadd.f32 %v3152_v56, %v3088_v59  ;;  %v9222_v10 = vadd.f32 %v2548_v20, %v2460_v51  ;;  %v2608_v4 = vadd.f32 %v2607_v39, %v8921_v14  ;;  %vm3015_vm3 = vmpackc.low %vm9218_vm2, %vm9214_vm1 }
 0x2ed   : > { %v2983_v30 = vpack.c.bf16 %v2930_v9, %v2929_v5  ;;  %v3154_v15 = vunpack.c.h.bf16 %v7651_v41  ;;  %v6497_v50 = vor.u32 %v6849_v7, %v6494_v1  ;;  %v3380_v51 = vunpack.c.l.b16 %v9172_v3 }
 0x2ee   : > { %v9225_v36 = vpack.c.bf16 %v3216_v25, %v3215_v24  ;;  %v2697_v26 = vadd.f32 %v2696_v54, %v2608_v4  ;;  %v3381_v39 = vunpack.c.h.b16 %v9172_v3 }
 0x2ef   : > { %v3047_v46 = vsel %vm3015_vm3, %v2759_v61, %v2983_v30  ;;  %3926 = vmatpush.bf16.msrb.mxu1 %v6497_v50  ;;  %v3155_v50 = vunpack.c.l.bf16 %v7661_v49 }
 0x2f0   : > { %v3089_v47 = vunpack.c.l.bf16 %v3047_v46  ;;  %v3090_v62 = vunpack.c.h.bf16 %v3047_v46  ;;  %v2760_v20 = vpack.c.bf16 %v2697_v26, %v8905_v63  ;;  %v3382_v56 = vunpack.c.l.b16 %v9225_v36  ;;  %v2462_v29 = vpop.f32.mrf.mxu2  ;;  %v2551_v59 = vpop.f32.mrf.mxu3 }
 0x2f1   : > { %v3383_v54 = vunpack.c.h.b16 %v9225_v36  ;;  %v2463_v24 = vadd.f32 %v2462_v29, %v8650_v57 }
 0x2f2   : > { %v3217_v8 = vadd.f32 %v3153_v31, %v3089_v47  ;;  %v3218_v60 = vadd.f32 %v3154_v15, %v3090_v62  ;;  %v2803_v41 = vunpack.c.l.bf16 %v2760_v20  ;;  %v2804_v61 = vunpack.c.h.bf16 %v2760_v20  ;;  %v2610_v5 = vpop.f32.mrf.mxu0 }
 0x2f3   : > { %v2699_v9 = vpop.f32.mrf.mxu1  ;;  %v2611_v63 = vadd.f32 %v2610_v5, %v8921_v14  ;;  %v9246_v25 = vpack.c.b16 %v3382_v56, %v3380_v51  ;;  %v9248_v4 = vpack.c.b16 %v3383_v54, %v3381_v39  ;;  %v9252_v1 = vadd.f32 %v2551_v59, %v2463_v24 }
 0x2f4   : > { %v9250_v30 = vpack.c.bf16 %v3218_v60, %v3217_v8  ;;  %vm2867_vm4 = vcmp.gt.f32.partialorder %v2803_v41, 0.0  ;;  %v2931_v26 = vmul.f32 0.010009766, %v2803_v41  ;;  %vm2868_vm5 = vcmp.gt.f32.partialorder %v2804_v61, 0.0 }
 0x2f5   : > { %v2932_v7 = vmul.f32 0.010009766, %v2804_v61  ;;  %v2700_v31 = vadd.f32 %v2699_v9, %v2611_v63  ;;  %3680 = vmatmul.bf16.gmra.mxu2 %v9246_v25  ;;  %3769 = vmatmul.bf16.gmra.mxu3 %v9248_v4  ;;  %vm3016_vm6 = vmpackc.low %vm2868_vm5, %vm2867_vm4  ;;  %v3156_v51 = vunpack.c.h.bf16 %v7661_v49  ;;  %v11066_v63 = vld [vmem:[#allocation2_spill] sm:$0xff] }
 0x2f6   : > { %2649 = vmatmul.bf16.gmra.mxu0 %v8908_v58  ;;  %2738 = vmatmul.bf16.gmra.mxu1 %v8910_v43 }
 0x2f7   : > { %v2984_v15 = vpack.c.bf16 %v2932_v7, %v2931_v26  ;;  %v2761_v46 = vpack.c.bf16 %v2700_v31, %v8934_v35  ;;  %v3157_v26 = vunpack.c.l.bf16 %v11066_v63  ;;  %v3158_v7 = vunpack.c.h.bf16 %v11066_v63  ;;  %v6589_v63 = vld [vmem:[%s10775_s5 + $0x40] sm:$0xf] }
 0x2f8   : > { %v2464_v29 = vpop.f32.mrf.mxu2  ;;  %v2553_v59 = vpop.f32.mrf.mxu3 }
 0x2f9   : > { %v3048_v47 = vsel %vm3016_vm6, %v2760_v20, %v2984_v15  ;;  %v2805_v62 = vunpack.c.l.bf16 %v2761_v46  ;;  %v2806_v56 = vunpack.c.h.bf16 %v2761_v46  ;;  %v2465_v8 = vadd.f32 %v2464_v29, %v8650_v57 }
 0x2fa   : > { %v3091_v39 = vunpack.c.l.bf16 %v3048_v47  ;;  %v3092_v54 = vunpack.c.h.bf16 %v3048_v47  ;;  %v2612_v58 = vpop.f32.mrf.mxu0 }
 0x2fb   : > { %v2701_v60 = vpop.f32.mrf.mxu1  ;;  %vm2869_vm7 = vcmp.gt.f32.partialorder %v2805_v62, 0.0  ;;  %vm2870_vm8 = vcmp.gt.f32.partialorder %v2806_v56, 0.0  ;;  %v2933_v43 = vmul.f32 0.010009766, %v2805_v62  ;;  %v2934_v35 = vmul.f32 0.010009766, %v2806_v56 }
 0x2fc   : > { %v3219_v41 = vadd.f32 %v3155_v50, %v3091_v39  ;;  %v3220_v61 = vadd.f32 %v3156_v51, %v3092_v54  ;;  %v9262_v5 = vadd.f32 %v2553_v59, %v2465_v8  ;;  %v2613_v20 = vadd.f32 %v2612_v58, %v8921_v14  ;;  %vm3017_vm9 = vmpackc.low %vm2870_vm8, %vm2869_vm7 }
 0x2fd   : > { %v2985_v9 = vpack.c.bf16 %v2934_v35, %v2933_v43  ;;  %v3384_v59 = vunpack.c.l.b16 %v9250_v30  ;;  %v3385_v51 = vunpack.c.h.b16 %v9250_v30 }
 0x2fe   : > { %v9265_v24 = vpack.c.bf16 %v3220_v61, %v3219_v41  ;;  %v2702_v49 = vadd.f32 %v2701_v60, %v2613_v20 }
 0x2ff   : > { %v3049_v31 = vsel %vm3017_vm9, %v2761_v46, %v2985_v9 }
 0x300   : > { %11065 = vst [vmem:[#allocation22_spill] sm:$0xff] %v9265_v24  ;;  %v3093_v15 = vunpack.c.l.bf16 %v3049_v31  ;;  %v3094_v47 = vunpack.c.h.bf16 %v3049_v31  ;;  %v2762_v62 = vpack.c.bf16 %v2702_v49, %v8944_v18  ;;  %v3386_v50 = vunpack.c.l.b16 %v9265_v24  ;;  %v2467_v56 = vpop.f32.mrf.mxu2  ;;  %v2556_v29 = vpop.f32.mrf.mxu3 }
 0x301   : > { %v3387_v39 = vunpack.c.h.b16 %v9265_v24  ;;  %v2468_v35 = vadd.f32 %v2467_v56, %v8650_v57 }
 0x302   : > { %v3221_v54 = vadd.f32 %v3157_v26, %v3093_v15  ;;  %v3222_v8 = vadd.f32 %v3158_v7, %v3094_v47  ;;  %v2807_v58 = vunpack.c.l.bf16 %v2762_v62  ;;  %v2808_v60 = vunpack.c.h.bf16 %v2762_v62  ;;  %v2615_v43 = vpop.f32.mrf.mxu0  ;;  %v6874_v47 = vld [vmem:[%s10775_s5 + $0x44] sm:$0xf0] }
 0x303   : > { %v2704_v46 = vpop.f32.mrf.mxu1  ;;  %v2616_v18 = vadd.f32 %v2615_v43, %v8921_v14  ;;  %v9276_v41 = vpack.c.b16 %v3386_v50, %v3384_v59  ;;  %v9278_v61 = vpack.c.b16 %v3387_v39, %v3385_v51  ;;  %v9293_v31 = vadd.f32 %v2556_v29, %v2468_v35  ;;  %v6653_v50 = vld [vmem:[%s10775_s5 + $0xc0] sm:$0xf]  ;;  %v6890_v29 = vld [vmem:[%s10775_s5 + $0xc4] sm:$0xf0]  ;;  %v6879_v59 = vld [vmem:[%s10775_s5 + $0x74] sm:$0xf] }
 0x304   : > { %v9280_v20 = vpack.c.bf16 %v3222_v8, %v3221_v54  ;;  %vm9282_vm10 = vcmp.gt.f32.partialorder %v2807_v58, 0.0  ;;  %v2935_v49 = vmul.f32 0.010009766, %v2807_v58  ;;  %vm9289_vm11 = vcmp.gt.f32.partialorder %v2808_v60, 0.0  ;;  %v6615_v51 = vld [vmem:[%s10775_s5 + $0x78] sm:$0xf0] }
 0x305   : > { %v2936_v7 = vmul.f32 0.010009766, %v2808_v60  ;;  %v2705_v15 = vadd.f32 %v2704_v46, %v2616_v18  ;;  %3685 = vmatmul.bf16.gmra.mxu2 %v9276_v41  ;;  %3774 = vmatmul.bf16.gmra.mxu3 %v9278_v61  ;;  %v6590_v56 = vor.u32 %v6874_v47, %v6589_v63  ;;  %v6654_v8 = vor.u32 %v6890_v29, %v6653_v50  ;;  %vm3018_vm12 = vmpackc.low %vm9289_vm11, %vm9282_vm10 }
 0x306   : > { %11067 = vst [vmem:[#allocation2_spill] sm:$0xff] %v9280_v20  ;;  %2654 = vmatmul.bf16.gmra.mxu0 %v8947_v21  ;;  %2743 = vmatmul.bf16.gmra.mxu1 %v8949_v34  ;;  %v6618_v21 = vor.u32 %v6879_v59, %v6615_v51  ;;  %v11072_v34 = vld [vmem:[#allocation3_spill] sm:$0xff]  ;;  %v3388_v26 = vunpack.c.l.b16 %v9280_v20 }
 0x307   : > { %v2986_v39 = vpack.c.bf16 %v2936_v7, %v2935_v49  ;;  %v2763_v54 = vpack.c.bf16 %v2705_v15, %v8971_v0  ;;  %4690 = vmatpush.bf16.msrb.mxu2 %v6590_v56  ;;  %v3159_v58 = vunpack.c.l.bf16 %v11072_v34  ;;  %4779 = vmatpush.bf16.msrb.mxu3 %v6654_v8  ;;  %v3160_v49 = vunpack.c.h.bf16 %v11072_v34  ;;  %v6895_v34 = vld [vmem:[%s10775_s5 + $0xf4] sm:$0xf] }
 0x308   : > { %v2469_v35 = vpop.f32.mrf.mxu2  ;;  %v2558_v18 = vpop.f32.mrf.mxu3  ;;  %4865 = vmatpush.bf16.msra.mxu0 %v6618_v21 }
 0x309   : > { %v3050_v60 = vsel %vm3018_vm12, %v2762_v62, %v2986_v39  ;;  %v2809_v43 = vunpack.c.l.bf16 %v2763_v54  ;;  %v2810_v46 = vunpack.c.h.bf16 %v2763_v54  ;;  %v2470_v7 = vadd.f32 %v2469_v35, %v8650_v57 }
 0x30a   : > { %v3095_v0 = vunpack.c.l.bf16 %v3050_v60  ;;  %v3096_v63 = vunpack.c.h.bf16 %v3050_v60  ;;  %v2617_v9 = vpop.f32.mrf.mxu0  ;;  %v11078_v60 = vld [vmem:[#allocation4_spill] sm:$0xff]  ;;  %v3389_v62 = vunpack.c.h.b16 %v9280_v20 }
 0x30b   : > { %v2706_v15 = vpop.f32.mrf.mxu1  ;;  %vm9322_vm0 = vcmp.gt.f32.partialorder %v2809_v43, 0.0  ;;  %vm9326_vm13 = vcmp.gt.f32.partialorder %v2810_v46, 0.0  ;;  %v2937_v47 = vmul.f32 0.010009766, %v2809_v43  ;;  %v2938_v50 = vmul.f32 0.010009766, %v2810_v46 }
 0x30c   : > { %v3223_v56 = vadd.f32 %v3159_v58, %v3095_v0  ;;  %v3224_v29 = vadd.f32 %v3160_v49, %v3096_v63  ;;  %v9330_v59 = vadd.f32 %v2558_v18, %v2470_v7  ;;  %v2618_v51 = vadd.f32 %v2617_v9, %v8921_v14  ;;  %vm3019_vm14 = vmpackc.low %vm9326_vm13, %vm9322_vm0  ;;  %v6679_v58 = vld [vmem:[%s10775_s5 + $0xf8] sm:$0xf0] }
 0x30d   : > { %v2987_v39 = vpack.c.bf16 %v2938_v50, %v2937_v47  ;;  %v3161_v43 = vunpack.c.l.bf16 %v11078_v60  ;;  %v3162_v46 = vunpack.c.h.bf16 %v11078_v60  ;;  %v6682_v18 = vor.u32 %v6895_v34, %v6679_v58 }
 0x30e   : > { %v9333_v8 = vpack.c.bf16 %v3224_v29, %v3223_v56  ;;  %v2707_v21 = vadd.f32 %v2706_v15, %v2618_v51 }
 0x30f   : > { %v3051_v35 = vsel %vm3019_vm14, %v2763_v54, %v2987_v39  ;;  %4954 = vmatpush.bf16.msra.mxu1 %v6682_v18 }
 0x310   : > { %11077 = vst [vmem:[#allocation3_spill] sm:$0xff] %v9333_v8  ;;  %v3097_v49 = vunpack.c.l.bf16 %v3051_v35  ;;  %v3098_v0 = vunpack.c.h.bf16 %v3051_v35  ;;  %v2764_v63 = vpack.c.bf16 %v2707_v21, %v9006_v33  ;;  %v3390_v7 = vunpack.c.l.b16 %v9333_v8  ;;  %v2472_v9 = vpop.f32.mrf.mxu2  ;;  %v2561_v15 = vpop.f32.mrf.mxu3 }
 0x311   : > { %v3391_v47 = vunpack.c.h.b16 %v9333_v8  ;;  %v2473_v34 = vadd.f32 %v2472_v9, %v8650_v57 }
 0x312   : > { %v3225_v50 = vadd.f32 %v3161_v43, %v3097_v49  ;;  %v3226_v56 = vadd.f32 %v3162_v46, %v3098_v0  ;;  %v2811_v29 = vunpack.c.l.bf16 %v2764_v63  ;;  %v2812_v54 = vunpack.c.h.bf16 %v2764_v63  ;;  %v2620_v51 = vpop.f32.mrf.mxu0 }
 0x313   : > { %v2709_v39 = vpop.f32.mrf.mxu1  ;;  %v2621_v33 = vadd.f32 %v2620_v51, %v8921_v14  ;;  %v9354_v21 = vpack.c.b16 %v3390_v7, %v3388_v26  ;;  %v9356_v58 = vpack.c.b16 %v3391_v47, %v3389_v62  ;;  %v9360_v43 = vadd.f32 %v2561_v15, %v2473_v34  ;;  %v11079_v7 = vld [vmem:[#allocation5_spill] sm:$0xff] }
 0x314   : > { %v9358_v60 = vpack.c.bf16 %v3226_v56, %v3225_v50  ;;  %vm2875_vm15 = vcmp.gt.f32.partialorder %v2811_v29, 0.0  ;;  %v2939_v35 = vmul.f32 0.010009766, %v2811_v29  ;;  %vm2876_vm1 = vcmp.gt.f32.partialorder %v2812_v54, 0.0 }
 0x315   : > { %v2940_v18 = vmul.f32 0.010009766, %v2812_v54  ;;  %v2710_v46 = vadd.f32 %v2709_v39, %v2621_v33  ;;  %3690 = vmatmul.bf16.gmra.mxu2 %v9354_v21  ;;  %3779 = vmatmul.bf16.gmra.mxu3 %v9356_v58  ;;  %vm3020_vm2 = vmpackc.low %vm2876_vm1, %vm2875_vm15  ;;  %v3163_v9 = vunpack.c.l.bf16 %v11079_v7  ;;  %v3164_v56 = vunpack.c.h.bf16 %v11079_v7  ;;  %v11081_v7 = vld [vmem:[#allocation6_spill] sm:$0xff] }
 0x316   : > { %3838 = vmatmul.bf16.vlgmr.msrb.gmra.mxu0 %v9030_v13  ;;  %3927 = vmatmul.bf16.vlgmr.msrb.gmra.mxu1 %v9032_v17 }
 0x317   : > { %v2988_v49 = vpack.c.bf16 %v2940_v18, %v2939_v35  ;;  %v2765_v0 = vpack.c.bf16 %v2710_v46, %v9036_v48 }
 0x318   : > { %v2474_v15 = vpop.f32.mrf.mxu2  ;;  %v2563_v50 = vpop.f32.mrf.mxu3 }
 0x319   : > { %v3052_v26 = vsel %vm3020_vm2, %v2764_v63, %v2988_v49  ;;  %v2813_v62 = vunpack.c.l.bf16 %v2765_v0  ;;  %v2814_v47 = vunpack.c.h.bf16 %v2765_v0  ;;  %v2475_v51 = vadd.f32 %v2474_v15, %v8650_v57 }
 0x31a   : > { %v3099_v29 = vunpack.c.l.bf16 %v3052_v26  ;;  %v3100_v54 = vunpack.c.h.bf16 %v3052_v26  ;;  %v2622_v13 = vpop.f32.mrf.mxu0  ;;  %v3165_v26 = vunpack.c.l.bf16 %v11081_v7  ;;  %v3166_v15 = vunpack.c.h.bf16 %v11081_v7 }
 0x31b   : > { %v2711_v39 = vpop.f32.mrf.mxu1  ;;  %vm2877_vm3 = vcmp.gt.f32.partialorder %v2813_v62, 0.0  ;;  %vm2878_vm4 = vcmp.gt.f32.partialorder %v2814_v47, 0.0  ;;  %v2941_v17 = vmul.f32 0.010009766, %v2813_v62  ;;  %v2942_v48 = vmul.f32 0.010009766, %v2814_v47 }
 0x31c   : > { %v3227_v34 = vadd.f32 %v3163_v9, %v3099_v29  ;;  %v3228_v33 = vadd.f32 %v3164_v56, %v3100_v54  ;;  %v9370_v35 = vadd.f32 %v2563_v50, %v2475_v51  ;;  %v2623_v63 = vadd.f32 %v2622_v13, %v8921_v14  ;;  %vm3021_vm5 = vmpackc.low %vm2878_vm4, %vm2877_vm3 }
 0x31d   : > { %v2989_v18 = vpack.c.bf16 %v2942_v48, %v2941_v17  ;;  %v3392_v56 = vunpack.c.l.b16 %v9358_v60  ;;  %v3393_v29 = vunpack.c.h.b16 %v9358_v60 }
 0x31e   : > { %v9373_v46 = vpack.c.bf16 %v3228_v33, %v3227_v34  ;;  %v2712_v49 = vadd.f32 %v2711_v39, %v2623_v63 }
 0x31f   : > { %v3053_v8 = vsel %vm3021_vm5, %v2765_v0, %v2989_v18 }
 0x320   : > { %11080 = vst [vmem:[#allocation4_spill] sm:$0xff] %v9373_v46  ;;  %v3101_v20 = vunpack.c.l.bf16 %v3053_v8  ;;  %v3102_v24 = vunpack.c.h.bf16 %v3053_v8  ;;  %v2766_v62 = vpack.c.bf16 %v2712_v49, %v9046_v53  ;;  %v3394_v9 = vunpack.c.l.b16 %v9373_v46  ;;  %v2477_v47 = vpop.f32.mrf.mxu2  ;;  %v2566_v50 = vpop.f32.mrf.mxu3 }
 0x321   : > { %v3395_v54 = vunpack.c.h.b16 %v9373_v46  ;;  %v2478_v8 = vadd.f32 %v2477_v47, %v8650_v57  ;;  %v6645_v47 = vld [vmem:[%s10775_s5 + $0xb0] sm:$0xf] }
 0x322   : > { %v3229_v51 = vadd.f32 %v3165_v26, %v3101_v20  ;;  %v3230_v13 = vadd.f32 %v3166_v15, %v3102_v24  ;;  %v2815_v39 = vunpack.c.l.bf16 %v2766_v62  ;;  %v2816_v17 = vunpack.c.h.bf16 %v2766_v62  ;;  %v2625_v48 = vpop.f32.mrf.mxu0  ;;  %v6581_v15 = vld [vmem:[%s10775_s5 + $0x30] sm:$0xf] }
 0x323   : > { %v2714_v0 = vpop.f32.mrf.mxu1  ;;  %v2626_v53 = vadd.f32 %v2625_v48, %v8921_v14  ;;  %v9384_v34 = vpack.c.b16 %v3394_v9, %v3392_v56  ;;  %v9386_v33 = vpack.c.b16 %v3395_v54, %v3393_v29  ;;  %v9398_v7 = vadd.f32 %v2566_v50, %v2478_v8  ;;  %v6872_v9 = vld [vmem:[%s10775_s5 + $0x34] sm:$0xf0]  ;;  %v6607_v54 = vld [vmem:[%s10775_s5 + $0x68] sm:$0xf0] }
 0x324   : > { %v9388_v63 = vpack.c.bf16 %v3230_v13, %v3229_v51  ;;  %vm9390_vm6 = vcmp.gt.f32.partialorder %v2815_v39, 0.0  ;;  %v2943_v20 = vmul.f32 0.010009766, %v2815_v39  ;;  %vm9394_vm7 = vcmp.gt.f32.partialorder %v2816_v17, 0.0  ;;  %v11087_v13 = vld [vmem:[#allocation7_spill] sm:$0xff] }
 0x325   : > { %v2944_v49 = vmul.f32 0.010009766, %v2816_v17  ;;  %v2715_v26 = vadd.f32 %v2714_v0, %v2626_v53  ;;  %3695 = vmatmul.bf16.gmra.mxu2 %v9384_v34  ;;  %3784 = vmatmul.bf16.gmra.mxu3 %v9386_v33  ;;  %v6582_v29 = vor.u32 %v6872_v9, %v6581_v15  ;;  %vm3022_vm8 = vmpackc.low %vm9394_vm7, %vm9390_vm6  ;;  %v3167_v39 = vunpack.c.l.bf16 %v11087_v13 }
 0x326   : > { %11082 = vst [vmem:[#allocation5_spill] sm:$0xff] %v9388_v63  ;;  %3843 = vmatmul.bf16.gmra.mxu0 %v9060_v55  ;;  %3932 = vmatmul.bf16.gmra.mxu1 %v9062_v23  ;;  %v6888_v55 = vld [vmem:[%s10775_s5 + $0xb4] sm:$0xf0]  ;;  %v6877_v23 = vld [vmem:[%s10775_s5 + $0x64] sm:$0xf]  ;;  %v3168_v53 = vunpack.c.h.bf16 %v11087_v13  ;;  %v3397_v24 = vunpack.c.h.b16 %v9388_v63 }
 0x327   : > { %v2990_v50 = vpack.c.bf16 %v2944_v49, %v2943_v20  ;;  %v2767_v56 = vpack.c.bf16 %v2715_v26, %v9077_v28  ;;  %v6646_v51 = vor.u32 %v6888_v55, %v6645_v47  ;;  %v6610_v28 = vor.u32 %v6877_v23, %v6607_v54  ;;  %4691 = vmatpush.bf16.msrb.mxu2 %v6582_v29  ;;  %v6893_v13 = vld [vmem:[%s10775_s5 + $0xe4] sm:$0xf] }
 0x328   : > { %v2479_v8 = vpop.f32.mrf.mxu2 }
 0x329   : > { %v3054_v17 = vsel %vm3022_vm8, %v2766_v62, %v2990_v50  ;;  %v2817_v48 = vunpack.c.l.bf16 %v2767_v56  ;;  %v2818_v0 = vunpack.c.h.bf16 %v2767_v56  ;;  %v2480_v26 = vadd.f32 %v2479_v8, %v8650_v57  ;;  %4780 = vmatpush.bf16.msrb.mxu3 %v6646_v51  ;;  %4866 = vmatpush.bf16.msra.mxu0 %v6610_v28  ;;  %v2568_v50 = vpop.f32.mrf.mxu3 }
 0x32a   : > { %v3103_v20 = vunpack.c.l.bf16 %v3054_v17  ;;  %v3104_v49 = vunpack.c.h.bf16 %v3054_v17  ;;  %v2627_v15 = vpop.f32.mrf.mxu0  ;;  %v11093_v17 = vld [vmem:[#allocation8_spill] sm:$0xff] }
 0x32b   : > { %v2716_v18 = vpop.f32.mrf.mxu1  ;;  %vm9430_vm9 = vcmp.gt.f32.partialorder %v2817_v48, 0.0  ;;  %vm9434_vm10 = vcmp.gt.f32.partialorder %v2818_v0, 0.0  ;;  %v2945_v9 = vmul.f32 0.010009766, %v2817_v48  ;;  %v2946_v47 = vmul.f32 0.010009766, %v2818_v0 }
 0x32c   : > { %v3231_v29 = vadd.f32 %v3167_v39, %v3103_v20  ;;  %v3232_v55 = vadd.f32 %v3168_v53, %v3104_v49  ;;  %v9438_v23 = vadd.f32 %v2568_v50, %v2480_v26  ;;  %v2628_v57 = vadd.f32 %v2627_v15, %v8921_v14  ;;  %vm3023_vm11 = vmpackc.low %vm9434_vm10, %vm9430_vm9  ;;  %v6671_v39 = vld [vmem:[%s10775_s5 + $0xe8] sm:$0xf0] }
 0x32d   : > { %v2991_v54 = vpack.c.bf16 %v2946_v47, %v2945_v9  ;;  %v3169_v48 = vunpack.c.l.bf16 %v11093_v17  ;;  %v3170_v0 = vunpack.c.h.bf16 %v11093_v17  ;;  %v6674_v53 = vor.u32 %v6893_v13, %v6671_v39  ;;  %v9463_v9 = vld [vmem:[%s10777_s7 + $0x3] ss:$8 sm:$0x3] }
 0x32e   : > { %v9441_v51 = vpack.c.bf16 %v3232_v55, %v3231_v29  ;;  %v2717_v28 = vadd.f32 %v2716_v18, %v2628_v57  ;;  %v3396_v18 = vunpack.c.l.b16 %v9388_v63  ;;  %v9472_v39 = vperm.slane %v9463_v9, 0 }
 0x32f   : > { %v3055_v8 = vsel %vm3023_vm11, %v2767_v56, %v2991_v54  ;;  %4955 = vmatpush.bf16.msra.mxu1 %v6674_v53 }
 0x330   : > { %11092 = vst [vmem:[#allocation6_spill] sm:$0xff] %v9441_v51  ;;  %v3105_v20 = vunpack.c.l.bf16 %v3055_v8  ;;  %v3106_v49 = vunpack.c.h.bf16 %v3055_v8  ;;  %v2768_v26 = vpack.c.bf16 %v2717_v28, %v9114_v27  ;;  %v3398_v15 = vunpack.c.l.b16 %v9441_v51 }
 0x331   : > { %v3399_v62 = vunpack.c.h.b16 %v9441_v51 }
 0x332   : > { %v3233_v56 = vadd.f32 %v3169_v48, %v3105_v20  ;;  %v3234_v47 = vadd.f32 %v3170_v0, %v3106_v49  ;;  %v2819_v50 = vunpack.c.l.bf16 %v2768_v26  ;;  %v2820_v29 = vunpack.c.h.bf16 %v2768_v26 }
 0x333   : > { %v2630_v55 = vpop.f32.mrf.mxu0  ;;  %v2719_v27 = vpop.f32.mrf.mxu1  ;;  %v9465_v57 = vpack.c.b16 %v3398_v15, %v3396_v18  ;;  %v9467_v54 = vpack.c.b16 %v3399_v62, %v3397_v24  ;;  %v11095_v24 = vld [vmem:[#allocation9_spill] sm:$0xff] }
 0x334   : > { %v9469_v28 = vpack.c.bf16 %v3234_v47, %v3233_v56  ;;  %v2947_v13 = vmul.f32 0.010009766, %v2819_v50  ;;  %vm2883_vm12 = vcmp.gt.f32.partialorder %v2819_v50, 0.0  ;;  %vm2884_vm0 = vcmp.gt.f32.partialorder %v2820_v29, 0.0 }
 0x335   : > { %v2948_v17 = vmul.f32 0.010009766, %v2820_v29  ;;  %v2631_v48 = vadd.f32 %v2630_v55, %v8921_v14  ;;  %3700 = vmatmul.bf16.gmra.mxu2 %v9465_v57  ;;  %3789 = vmatmul.bf16.gmra.mxu3 %v9467_v54  ;;  %vm3024_vm13 = vmpackc.low %vm2884_vm0, %vm2883_vm12  ;;  %v3171_v62 = vunpack.c.l.bf16 %v11095_v24  ;;  %v3172_v56 = vunpack.c.h.bf16 %v11095_v24 }
 0x336   : > { %11094 = vst [vmem:[#allocation7_spill] sm:$0xff] %v9469_v28  ;;  %3848 = vmatmul.bf16.gmra.mxu0 %v9138_v11  ;;  %3937 = vmatmul.bf16.gmra.mxu1 %v9140_v37 }
 0x337   : > { %v2992_v0 = vpack.c.bf16 %v2948_v17, %v2947_v13  ;;  %v2720_v8 = vadd.f32 %v2719_v27, %v2631_v48 }
 0x338   : > { %v3661_v53 = vpop.f32.mrf.mxu2  ;;  %v3750_v20 = vpop.f32.mrf.mxu3 }
 0x339   : > { %v3056_v49 = vsel %vm3024_vm13, %v2768_v26, %v2992_v0  ;;  %v2769_v15 = vpack.c.bf16 %v2720_v8, %v9144_v12  ;;  %v3662_v18 = vadd.f32 %v3661_v53, %v9472_v39 }
 0x33a   : > { %v3107_v47 = vunpack.c.l.bf16 %v3056_v49  ;;  %v3108_v50 = vunpack.c.h.bf16 %v3056_v49  ;;  %v11099_v49 = vld [vmem:[#allocation10_spill] sm:$0xff] }
 0x33b   : > { %v2821_v29 = vunpack.c.l.bf16 %v2769_v15  ;;  %v2822_v11 = vunpack.c.h.bf16 %v2769_v15  ;;  %v9483_v55 = vadd.f32 %v3750_v20, %v3662_v18  ;;  %v2632_v37 = vpop.f32.mrf.mxu0  ;;  %v2721_v27 = vpop.f32.mrf.mxu1  ;;  %v3173_v24 = vunpack.c.l.bf16 %v11099_v49 }
 0x33c   : > { %v3235_v13 = vadd.f32 %v3171_v62, %v3107_v47  ;;  %v3236_v17 = vadd.f32 %v3172_v56, %v3108_v50  ;;  %v2633_v26 = vadd.f32 %v2632_v37, %v8921_v14  ;;  %v3174_v18 = vunpack.c.h.bf16 %v11099_v49 }
 0x33d   : > { %vm9486_vm14 = vcmp.gt.f32.partialorder %v2821_v29, 0.0  ;;  %vm2886_vm15 = vcmp.gt.f32.partialorder %v2822_v11, 0.0  ;;  %v2949_v48 = vmul.f32 0.010009766, %v2821_v29  ;;  %v2950_v0 = vmul.f32 0.010009766, %v2822_v11 }
 0x33e   : > { %v9490_v8 = vpack.c.bf16 %v3236_v17, %v3235_v13  ;;  %v2722_v53 = vadd.f32 %v2721_v27, %v2633_v26  ;;  %vm3025_vm1 = vmpackc.low %vm2886_vm15, %vm9486_vm14  ;;  %v3400_v27 = vunpack.c.l.b16 %v9469_v28  ;;  %v3401_v13 = vunpack.c.h.b16 %v9469_v28 }
 0x33f   : > { %v2993_v20 = vpack.c.bf16 %v2950_v0, %v2949_v48 }
 0x340   : > { %11098 = vst [vmem:[#allocation8_spill] sm:$0xff] %v9490_v8  ;;  %v2770_v62 = vpack.c.bf16 %v2722_v53, %v9154_v32  ;;  %v3663_v56 = vpop.f32.mrf.mxu2  ;;  %v3752_v47 = vpop.f32.mrf.mxu3  ;;  %v3402_v50 = vunpack.c.l.b16 %v9490_v8  ;;  %v3403_v29 = vunpack.c.h.b16 %v9490_v8 }
 0x341   : > { %v3057_v11 = vsel %vm3025_vm1, %v2769_v15, %v2993_v20  ;;  %v3664_v37 = vadd.f32 %v3663_v56, %v9472_v39 }
 0x342   : > { %v3109_v17 = vunpack.c.l.bf16 %v3057_v11  ;;  %v3110_v26 = vunpack.c.h.bf16 %v3057_v11  ;;  %v2823_v48 = vunpack.c.l.bf16 %v2770_v62  ;;  %v2824_v12 = vunpack.c.h.bf16 %v2770_v62 }
 0x343   : > { %v9502_v0 = vadd.f32 %v3752_v47, %v3664_v37  ;;  %v2635_v32 = vpop.f32.mrf.mxu0  ;;  %v2724_v53 = vpop.f32.mrf.mxu1  ;;  %v9504_v49 = vpack.c.b16 %v3402_v50, %v3400_v27  ;;  %v9506_v51 = vpack.c.b16 %v3403_v29, %v3401_v13  ;;  %v6637_v29 = vld [vmem:[%s10775_s5 + $0xa0] sm:$0xf]  ;;  %v6599_v13 = vld [vmem:[%s10775_s5 + $0x58] sm:$0xf0] }
 0x344   : > { %v3237_v8 = vadd.f32 %v3173_v24, %v3109_v17  ;;  %v3238_v15 = vadd.f32 %v3174_v18, %v3110_v26  ;;  %vm9508_vm2 = vcmp.gt.f32.partialorder %v2823_v48, 0.0  ;;  %vm9512_vm3 = vcmp.gt.f32.partialorder %v2824_v12, 0.0  ;;  %v6573_v24 = vld [vmem:[%s10775_s5 + $0x20] sm:$0xf]  ;;  %v6870_v18 = vld [vmem:[%s10775_s5 + $0x24] sm:$0xf0] }
 0x345   : > { %v2951_v11 = vmul.f32 0.010009766, %v2823_v48  ;;  %v2952_v28 = vmul.f32 0.010009766, %v2824_v12  ;;  %v2636_v47 = vadd.f32 %v2635_v32, %v8921_v14  ;;  %3705 = vmatmul.bf16.gmra.mxu2 %v9504_v49  ;;  %3794 = vmatmul.bf16.gmra.mxu3 %v9506_v51  ;;  %vm3026_vm4 = vmpackc.low %vm9512_vm3, %vm9508_vm2 }
 0x346   : > { %v9519_v50 = vpack.c.bf16 %v3238_v15, %v3237_v8  ;;  %3853 = vmatmul.bf16.gmra.mxu0 %v9168_v38  ;;  %3942 = vmatmul.bf16.gmra.mxu1 %v9170_v42  ;;  %v6574_v8 = vor.u32 %v6870_v18, %v6573_v24  ;;  %v6886_v38 = vld [vmem:[%s10775_s5 + $0xa4] sm:$0xf0]  ;;  %v6875_v42 = vld [vmem:[%s10775_s5 + $0x54] sm:$0xf] }
 0x347   : > { %v2994_v37 = vpack.c.bf16 %v2952_v28, %v2951_v11  ;;  %v2725_v27 = vadd.f32 %v2724_v53, %v2636_v47  ;;  %v6638_v26 = vor.u32 %v6886_v38, %v6637_v29  ;;  %v6602_v48 = vor.u32 %v6875_v42, %v6599_v13  ;;  %v11105_v15 = vld [vmem:[#allocation11_spill] sm:$0xff] }
 0x348   : > { %11104 = vst [vmem:[#allocation9_spill] sm:$0xff] %v9519_v50  ;;  %v3666_v28 = vpop.f32.mrf.mxu2  ;;  %v3755_v17 = vpop.f32.mrf.mxu3  ;;  %4692 = vmatpush.bf16.msrb.mxu2 %v6574_v8  ;;  %v3175_v11 = vunpack.c.l.bf16 %v11105_v15  ;;  %v3176_v47 = vunpack.c.h.bf16 %v11105_v15 }
 0x349   : > { %v3058_v12 = vsel %vm3026_vm4, %v2770_v62, %v2994_v37  ;;  %v2771_v32 = vpack.c.bf16 %v2725_v27, %v9185_v44  ;;  %v3667_v53 = vadd.f32 %v3666_v28, %v9472_v39  ;;  %4781 = vmatpush.bf16.msrb.mxu3 %v6638_v26  ;;  %4867 = vmatpush.bf16.msra.mxu0 %v6602_v48  ;;  %v6891_v26 = vld [vmem:[%s10775_s5 + $0xd4] sm:$0xf]  ;;  %v6663_v48 = vld [vmem:[%s10775_s5 + $0xd8] sm:$0xf0] }
 0x34a   : > { %v3111_v24 = vunpack.c.l.bf16 %v3058_v12  ;;  %v3112_v18 = vunpack.c.h.bf16 %v3058_v12  ;;  %v11111_v12 = vld [vmem:[#allocation12_spill] sm:$0xff] }
 0x34b   : > { %v2825_v20 = vunpack.c.l.bf16 %v2771_v32  ;;  %v2826_v56 = vunpack.c.h.bf16 %v2771_v32  ;;  %v9549_v63 = vadd.f32 %v3755_v17, %v3667_v53  ;;  %v2637_v29 = vpop.f32.mrf.mxu0  ;;  %v2726_v38 = vpop.f32.mrf.mxu1  ;;  %v3177_v53 = vunpack.c.l.bf16 %v11111_v12 }
 0x34c   : > { %v3239_v62 = vadd.f32 %v3175_v11, %v3111_v24  ;;  %v3240_v37 = vadd.f32 %v3176_v47, %v3112_v18  ;;  %v2638_v44 = vadd.f32 %v2637_v29, %v8921_v14  ;;  %v6666_v11 = vor.u32 %v6891_v26, %v6663_v48 }
 0x34d   : > { %vm9552_vm5 = vcmp.gt.f32.partialorder %v2825_v20, 0.0  ;;  %vm9556_vm6 = vcmp.gt.f32.partialorder %v2826_v56, 0.0  ;;  %v2953_v42 = vmul.f32 0.010009766, %v2825_v20  ;;  %v2954_v13 = vmul.f32 0.010009766, %v2826_v56 }
 0x34e   : > { %v9560_v28 = vpack.c.bf16 %v3240_v37, %v3239_v62  ;;  %v2727_v17 = vadd.f32 %v2726_v38, %v2638_v44  ;;  %v3178_v47 = vunpack.c.h.bf16 %v11111_v12  ;;  %vm3027_vm7 = vmpackc.low %vm9556_vm6, %vm9552_vm5  ;;  %v3404_v37 = vunpack.c.l.b16 %v9519_v50  ;;  %4956 = vmatpush.bf16.msra.mxu1 %v6666_v11 }
 0x34f   : > { %v2995_v15 = vpack.c.bf16 %v2954_v13, %v2953_v42  ;;  %v3405_v44 = vunpack.c.h.b16 %v9519_v50 }
 0x350   : > { %11110 = vst [vmem:[#allocation10_spill] sm:$0xff] %v9560_v28  ;;  %v2772_v24 = vpack.c.bf16 %v2727_v17, %v9222_v10  ;;  %v3668_v18 = vpop.f32.mrf.mxu2  ;;  %v3757_v20 = vpop.f32.mrf.mxu3  ;;  %v3406_v56 = vunpack.c.l.b16 %v9560_v28  ;;  %v3407_v29 = vunpack.c.h.b16 %v9560_v28 }
 0x351   : > { %v3059_v38 = vsel %vm3027_vm7, %v2771_v32, %v2995_v15  ;;  %v3669_v62 = vadd.f32 %v3668_v18, %v9472_v39 }
 0x352   : > { %v3113_v27 = vunpack.c.l.bf16 %v3059_v38  ;;  %v3114_v42 = vunpack.c.h.bf16 %v3059_v38  ;;  %v2827_v8 = vunpack.c.l.bf16 %v2772_v24  ;;  %v2828_v13 = vunpack.c.h.bf16 %v2772_v24 }
 0x353   : > { %v9580_v26 = vadd.f32 %v3757_v20, %v3669_v62  ;;  %v2640_v10 = vpop.f32.mrf.mxu0  ;;  %v2729_v17 = vpop.f32.mrf.mxu1  ;;  %v9582_v48 = vpack.c.b16 %v3406_v56, %v3404_v37  ;;  %v9584_v12 = vpack.c.b16 %v3407_v29, %v3405_v44 }
 0x354   : > { %v3241_v32 = vadd.f32 %v3177_v53, %v3113_v27  ;;  %v3242_v15 = vadd.f32 %v3178_v47, %v3114_v42  ;;  %vm9586_vm8 = vcmp.gt.f32.partialorder %v2827_v8, 0.0  ;;  %vm2892_vm9 = vcmp.gt.f32.partialorder %v2828_v13, 0.0  ;;  %v11115_v27 = vld [vmem:[#allocation13_spill] sm:$0xff] }
 0x355   : > { %v2955_v11 = vmul.f32 0.010009766, %v2827_v8  ;;  %v2956_v28 = vmul.f32 0.010009766, %v2828_v13  ;;  %v2641_v38 = vadd.f32 %v2640_v10, %v8921_v14  ;;  %3710 = vmatmul.bf16.gmra.mxu2 %v9582_v48  ;;  %3799 = vmatmul.bf16.gmra.mxu3 %v9584_v12  ;;  %vm3028_vm10 = vmpackc.low %vm2892_vm9, %vm9586_vm8  ;;  %v3179_v42 = vunpack.c.l.bf16 %v11115_v27 }
 0x356   : > { %v9593_v20 = vpack.c.bf16 %v3242_v15, %v3241_v32  ;;  %3858 = vmatmul.bf16.gmra.mxu0 %v9246_v25  ;;  %3947 = vmatmul.bf16.gmra.mxu1 %v9248_v4  ;;  %v3180_v8 = vunpack.c.h.bf16 %v11115_v27 }
 0x357   : > { %v2996_v53 = vpack.c.bf16 %v2956_v28, %v2955_v11  ;;  %v2730_v47 = vadd.f32 %v2729_v17, %v2641_v38 }
 0x358   : > { %11114 = vst [vmem:[#allocation11_spill] sm:$0xff] %v9593_v20  ;;  %v3671_v56 = vpop.f32.mrf.mxu2  ;;  %v3760_v29 = vpop.f32.mrf.mxu3 }
 0x359   : > { %v3060_v62 = vsel %vm3028_vm10, %v2772_v24, %v2996_v53  ;;  %v2773_v37 = vpack.c.bf16 %v2730_v47, %v9252_v1  ;;  %v3672_v44 = vadd.f32 %v3671_v56, %v9472_v39  ;;  %v11119_v56 = vld [vmem:[#allocation14_spill] sm:$0xff] }
 0x35a   : > { %v3115_v13 = vunpack.c.l.bf16 %v3060_v62  ;;  %v3116_v25 = vunpack.c.h.bf16 %v3060_v62  ;;  %v3181_v62 = vunpack.c.l.bf16 %v11119_v56 }
 0x35b   : > { %v2829_v10 = vunpack.c.l.bf16 %v2773_v37  ;;  %v2830_v4 = vunpack.c.h.bf16 %v2773_v37  ;;  %v9603_v28 = vadd.f32 %v3760_v29, %v3672_v44  ;;  %v2642_v17 = vpop.f32.mrf.mxu0  ;;  %v2731_v32 = vpop.f32.mrf.mxu1  ;;  %v3182_v44 = vunpack.c.h.bf16 %v11119_v56 }
 0x35c   : > { %v3243_v15 = vadd.f32 %v3179_v42, %v3115_v13  ;;  %v3244_v18 = vadd.f32 %v3180_v8, %v3116_v25  ;;  %v2643_v24 = vadd.f32 %v2642_v17, %v8921_v14  ;;  %v3408_v17 = vunpack.c.l.b16 %v9593_v20 }
 0x35d   : > { %vm9606_vm11 = vcmp.gt.f32.partialorder %v2829_v10, 0.0  ;;  %vm2894_vm12 = vcmp.gt.f32.partialorder %v2830_v4, 0.0  ;;  %v2957_v11 = vmul.f32 0.010009766, %v2829_v10  ;;  %v2958_v38 = vmul.f32 0.010009766, %v2830_v4 }
 0x35e   : > { %v9610_v53 = vpack.c.bf16 %v3244_v18, %v3243_v15  ;;  %v2732_v47 = vadd.f32 %v2731_v32, %v2643_v24  ;;  %vm3029_vm0 = vmpackc.low %vm2894_vm12, %vm9606_vm11  ;;  %v3409_v32 = vunpack.c.h.b16 %v9593_v20 }
 0x35f   : > { %v2997_v29 = vpack.c.bf16 %v2958_v38, %v2957_v11 }
 0x360   : > { %11118 = vst [vmem:[#allocation12_spill] sm:$0xff] %v9610_v53  ;;  %v2774_v27 = vpack.c.bf16 %v2732_v47, %v9262_v5  ;;  %v3673_v42 = vpop.f32.mrf.mxu2  ;;  %v3762_v8 = vpop.f32.mrf.mxu3  ;;  %v3410_v13 = vunpack.c.l.b16 %v9610_v53  ;;  %v3411_v25 = vunpack.c.h.b16 %v9610_v53 }
 0x361   : > { %v3061_v10 = vsel %vm3029_vm0, %v2773_v37, %v2997_v29  ;;  %v3674_v4 = vadd.f32 %v3673_v42, %v9472_v39 }
 0x362   : > { %v3117_v15 = vunpack.c.l.bf16 %v3061_v10  ;;  %v3118_v18 = vunpack.c.h.bf16 %v3061_v10  ;;  %v2831_v24 = vunpack.c.l.bf16 %v2774_v27  ;;  %v2832_v1 = vunpack.c.h.bf16 %v2774_v27 }
 0x363   : > { %v9622_v11 = vadd.f32 %v3762_v8, %v3674_v4  ;;  %v2645_v5 = vpop.f32.mrf.mxu0  ;;  %v2734_v38 = vpop.f32.mrf.mxu1  ;;  %v9624_v47 = vpack.c.b16 %v3410_v13, %v3408_v17  ;;  %v9626_v56 = vpack.c.b16 %v3411_v25, %v3409_v32  ;;  %v6629_v25 = vld [vmem:[%s10775_s5 + $0x90] sm:$0xf]  ;;  %v6591_v32 = vld [vmem:[%s10775_s5 + $0x48] sm:$0xf0] }
 0x364   : > { %v3245_v53 = vadd.f32 %v3181_v62, %v3117_v15  ;;  %v3246_v37 = vadd.f32 %v3182_v44, %v3118_v18  ;;  %vm9628_vm13 = vcmp.gt.f32.partialorder %v2831_v24, 0.0  ;;  %vm9632_vm14 = vcmp.gt.f32.partialorder %v2832_v1, 0.0  ;;  %v6565_v62 = vld [vmem:[%s10775_s5 + $0x10] sm:$0xf]  ;;  %v6868_v44 = vld [vmem:[%s10775_s5 + $0x14] sm:$0xf0] }
 0x365   : > { %v2959_v10 = vmul.f32 0.010009766, %v2831_v24  ;;  %v2960_v20 = vmul.f32 0.010009766, %v2832_v1  ;;  %v2646_v8 = vadd.f32 %v2645_v5, %v8921_v14  ;;  %3715 = vmatmul.bf16.gmra.mxu2 %v9624_v47  ;;  %3804 = vmatmul.bf16.gmra.mxu3 %v9626_v56  ;;  %vm3030_vm15 = vmpackc.low %vm9632_vm14, %vm9628_vm13 }
 0x366   : > { %v9639_v13 = vpack.c.bf16 %v3246_v37, %v3245_v53  ;;  %3863 = vmatmul.bf16.gmra.mxu0 %v9276_v41  ;;  %3952 = vmatmul.bf16.gmra.mxu1 %v9278_v61  ;;  %v6566_v53 = vor.u32 %v6868_v44, %v6565_v62  ;;  %v6884_v41 = vld [vmem:[%s10775_s5 + $0x94] sm:$0xf0]  ;;  %v6873_v61 = vld [vmem:[%s10775_s5 + $0x44] sm:$0xf]  ;;  %v11125_v37 = vld [vmem:[#allocation15_spill] sm:$0xff] }
 0x367   : > { %v2998_v4 = vpack.c.bf16 %v2960_v20, %v2959_v10  ;;  %v2735_v17 = vadd.f32 %v2734_v38, %v2646_v8  ;;  %v6630_v18 = vor.u32 %v6884_v41, %v6629_v25  ;;  %v6594_v24 = vor.u32 %v6873_v61, %v6591_v32 }
 0x368   : > { %11124 = vst [vmem:[#allocation13_spill] sm:$0xff] %v9639_v13  ;;  %v3676_v20 = vpop.f32.mrf.mxu2  ;;  %v3765_v15 = vpop.f32.mrf.mxu3  ;;  %4693 = vmatpush.bf16.msrb.mxu2 %v6566_v53  ;;  %v3183_v10 = vunpack.c.l.bf16 %v11125_v37  ;;  %v3184_v8 = vunpack.c.h.bf16 %v11125_v37 }
 0x369   : > { %v3062_v1 = vsel %vm3030_vm15, %v2774_v27, %v2998_v4  ;;  %v2775_v5 = vpack.c.bf16 %v2735_v17, %v9293_v31  ;;  %v3677_v38 = vadd.f32 %v3676_v20, %v9472_v39  ;;  %4782 = vmatpush.bf16.msrb.mxu3 %v6630_v18  ;;  %4868 = vmatpush.bf16.msra.mxu0 %v6594_v24  ;;  %v6889_v18 = vld [vmem:[%s10775_s5 + $0xc4] sm:$0xf]  ;;  %v6655_v24 = vld [vmem:[%s10775_s5 + $0xc8] sm:$0xf0] }
 0x36a   : > { %v3119_v62 = vunpack.c.l.bf16 %v3062_v1  ;;  %v3120_v44 = vunpack.c.h.bf16 %v3062_v1  ;;  %v11131_v1 = vld [vmem:[#allocation16_spill] sm:$0xff] }
 0x36b   : > { %v2833_v29 = vunpack.c.l.bf16 %v2775_v5  ;;  %v2834_v42 = vunpack.c.h.bf16 %v2775_v5  ;;  %v9669_v50 = vadd.f32 %v3765_v15, %v3677_v38  ;;  %v2647_v25 = vpop.f32.mrf.mxu0  ;;  %v2736_v41 = vpop.f32.mrf.mxu1  ;;  %v3185_v38 = vunpack.c.l.bf16 %v11131_v1 }
 0x36c   : > { %v3247_v27 = vadd.f32 %v3183_v10, %v3119_v62  ;;  %v3248_v4 = vadd.f32 %v3184_v8, %v3120_v44  ;;  %v2648_v31 = vadd.f32 %v2647_v25, %v8921_v14  ;;  %v6658_v10 = vor.u32 %v6889_v18, %v6655_v24 }
 0x36d   : > { %vm9672_vm1 = vcmp.gt.f32.partialorder %v2833_v29, 0.0  ;;  %vm9676_vm2 = vcmp.gt.f32.partialorder %v2834_v42, 0.0  ;;  %v2961_v61 = vmul.f32 0.010009766, %v2833_v29  ;;  %v2962_v32 = vmul.f32 0.010009766, %v2834_v42 }
 0x36e   : > { %v9680_v20 = vpack.c.bf16 %v3248_v4, %v3247_v27  ;;  %v2737_v15 = vadd.f32 %v2736_v41, %v2648_v31  ;;  %v3186_v8 = vunpack.c.h.bf16 %v11131_v1  ;;  %vm3031_vm3 = vmpackc.low %vm9676_vm2, %vm9672_vm1  ;;  %v3412_v4 = vunpack.c.l.b16 %v9639_v13  ;;  %4957 = vmatpush.bf16.msra.mxu1 %v6658_v10 }
 0x36f   : > { %v2999_v37 = vpack.c.bf16 %v2962_v32, %v2961_v61  ;;  %v3413_v31 = vunpack.c.h.b16 %v9639_v13 }
 0x370   : > { %11130 = vst [vmem:[#allocation14_spill] sm:$0xff] %v9680_v20  ;;  %v2776_v62 = vpack.c.bf16 %v2737_v15, %v9330_v59  ;;  %v3678_v44 = vpop.f32.mrf.mxu2  ;;  %v3767_v29 = vpop.f32.mrf.mxu3  ;;  %v3414_v42 = vunpack.c.l.b16 %v9680_v20  ;;  %v3415_v25 = vunpack.c.h.b16 %v9680_v20 }
 0x371   : > { %v3063_v41 = vsel %vm3031_vm3, %v2775_v5, %v2999_v37  ;;  %v3679_v27 = vadd.f32 %v3678_v44, %v9472_v39 }
 0x372   : > { %v3121_v17 = vunpack.c.l.bf16 %v3063_v41  ;;  %v3122_v61 = vunpack.c.h.bf16 %v3063_v41  ;;  %v2835_v53 = vunpack.c.l.bf16 %v2776_v62  ;;  %v2836_v32 = vunpack.c.h.bf16 %v2776_v62 }
 0x373   : > { %v9700_v18 = vadd.f32 %v3767_v29, %v3679_v27  ;;  %v2650_v59 = vpop.f32.mrf.mxu0  ;;  %v2739_v15 = vpop.f32.mrf.mxu1  ;;  %v9702_v24 = vpack.c.b16 %v3414_v42, %v3412_v4  ;;  %v9704_v1 = vpack.c.b16 %v3415_v25, %v3413_v31 }
 0x374   : > { %v3249_v5 = vadd.f32 %v3185_v38, %v3121_v17  ;;  %v3250_v37 = vadd.f32 %v3186_v8, %v3122_v61  ;;  %vm9706_vm4 = vcmp.gt.f32.partialorder %v2835_v53, 0.0  ;;  %vm2900_vm5 = vcmp.gt.f32.partialorder %v2836_v32, 0.0  ;;  %v11135_v17 = vld [vmem:[#allocation17_spill] sm:$0xff] }
 0x375   : > { %v2963_v10 = vmul.f32 0.010009766, %v2835_v53  ;;  %v2964_v20 = vmul.f32 0.010009766, %v2836_v32  ;;  %v2651_v41 = vadd.f32 %v2650_v59, %v8921_v14  ;;  %3720 = vmatmul.bf16.gmra.mxu2 %v9702_v24  ;;  %3809 = vmatmul.bf16.gmra.mxu3 %v9704_v1  ;;  %vm3032_vm6 = vmpackc.low %vm2900_vm5, %vm9706_vm4  ;;  %v3187_v61 = vunpack.c.l.bf16 %v11135_v17 }
 0x376   : > { %v9713_v29 = vpack.c.bf16 %v3250_v37, %v3249_v5  ;;  %3868 = vmatmul.bf16.gmra.mxu0 %v9354_v21  ;;  %3957 = vmatmul.bf16.gmra.mxu1 %v9356_v58  ;;  %v3188_v53 = vunpack.c.h.bf16 %v11135_v17 }
 0x377   : > { %v3000_v38 = vpack.c.bf16 %v2964_v20, %v2963_v10  ;;  %v2740_v8 = vadd.f32 %v2739_v15, %v2651_v41 }
 0x378   : > { %11134 = vst [vmem:[#allocation15_spill] sm:$0xff] %v9713_v29  ;;  %v3681_v42 = vpop.f32.mrf.mxu2  ;;  %v3770_v25 = vpop.f32.mrf.mxu3 }
 0x379   : > { %v3064_v27 = vsel %vm3032_vm6, %v2776_v62, %v3000_v38  ;;  %v2777_v4 = vpack.c.bf16 %v2740_v8, %v9360_v43  ;;  %v3682_v31 = vadd.f32 %v3681_v42, %v9472_v39  ;;  %v11139_v42 = vld [vmem:[#allocation18_spill] sm:$0xff] }
 0x37a   : > { %v3123_v32 = vunpack.c.l.bf16 %v3064_v27  ;;  %v3124_v21 = vunpack.c.h.bf16 %v3064_v27  ;;  %v3189_v27 = vunpack.c.l.bf16 %v11139_v42 }
 0x37b   : > { %v2837_v59 = vunpack.c.l.bf16 %v2777_v4  ;;  %v2838_v58 = vunpack.c.h.bf16 %v2777_v4  ;;  %v9723_v20 = vadd.f32 %v3770_v25, %v3682_v31  ;;  %v2652_v15 = vpop.f32.mrf.mxu0  ;;  %v2741_v5 = vpop.f32.mrf.mxu1  ;;  %v3190_v31 = vunpack.c.h.bf16 %v11139_v42 }
 0x37c   : > { %v3251_v37 = vadd.f32 %v3187_v61, %v3123_v32  ;;  %v3252_v44 = vadd.f32 %v3188_v53, %v3124_v21  ;;  %v2653_v62 = vadd.f32 %v2652_v15, %v8921_v14  ;;  %v3416_v15 = vunpack.c.l.b16 %v9713_v29 }
 0x37d   : > { %vm9726_vm7 = vcmp.gt.f32.partialorder %v2837_v59, 0.0  ;;  %vm2902_vm8 = vcmp.gt.f32.partialorder %v2838_v58, 0.0  ;;  %v2965_v10 = vmul.f32 0.010009766, %v2837_v59  ;;  %v2966_v41 = vmul.f32 0.010009766, %v2838_v58 }
 0x37e   : > { %v9730_v38 = vpack.c.bf16 %v3252_v44, %v3251_v37  ;;  %v2742_v8 = vadd.f32 %v2741_v5, %v2653_v62  ;;  %vm3033_vm9 = vmpackc.low %vm2902_vm8, %vm9726_vm7  ;;  %v3417_v5 = vunpack.c.h.b16 %v9713_v29  ;;  %v6871_v29 = vld [vmem:[%s10775_s5 + $0x34] sm:$0xf] }
 0x37f   : > { %v3001_v25 = vpack.c.bf16 %v2966_v41, %v2965_v10  ;;  %v6866_v10 = vld [vmem:[%s10775_s5 + $0x4] sm:$0xf0] }
 0x380   : > { %11138 = vst [vmem:[#allocation16_spill] sm:$0xff] %v9730_v38  ;;  %v2778_v17 = vpack.c.bf16 %v2742_v8, %v9370_v35  ;;  %v3683_v61 = vpop.f32.mrf.mxu2  ;;  %v3772_v53 = vpop.f32.mrf.mxu3  ;;  %v3418_v32 = vunpack.c.l.b16 %v9730_v38  ;;  %v3419_v21 = vunpack.c.h.b16 %v9730_v38  ;;  %v6557_v35 = vld [vmem:[%s10775_s5] sm:$0xf]  ;;  %v6882_v38 = vld [vmem:[%s10775_s5 + $0x84] sm:$0xf0] }
 0x381   : > { %v3065_v59 = vsel %vm3033_vm9, %v2777_v4, %v3001_v25  ;;  %v3684_v58 = vadd.f32 %v3683_v61, %v9472_v39  ;;  %v6621_v4 = vld [vmem:[%s10775_s5 + $0x80] sm:$0xf] }
 0x382   : > { %v3125_v37 = vunpack.c.l.bf16 %v3065_v59  ;;  %v3126_v44 = vunpack.c.h.bf16 %v3065_v59  ;;  %v2839_v62 = vunpack.c.l.bf16 %v2778_v17  ;;  %v2840_v43 = vunpack.c.h.bf16 %v2778_v17 }
 0x383   : > { %v9751_v41 = vadd.f32 %v3772_v53, %v3684_v58  ;;  %v2655_v8 = vpop.f32.mrf.mxu0  ;;  %v2744_v42 = vpop.f32.mrf.mxu1  ;;  %v9753_v25 = vpack.c.b16 %v3418_v32, %v3416_v15  ;;  %v9755_v61 = vpack.c.b16 %v3419_v21, %v3417_v5  ;;  %v6558_v59 = vor.u32 %v6866_v10, %v6557_v35  ;;  %v6583_v53 = vld [vmem:[%s10775_s5 + $0x38] sm:$0xf0] }
 0x384   : > { %v3253_v58 = vadd.f32 %v3189_v27, %v3125_v37  ;;  %v3254_v13 = vadd.f32 %v3190_v31, %v3126_v44  ;;  %vm9766_vm10 = vcmp.gt.f32.partialorder %v2839_v62, 0.0  ;;  %vm9770_vm11 = vcmp.gt.f32.partialorder %v2840_v43, 0.0 }
 0x385   : > { %v2967_v15 = vmul.f32 0.010009766, %v2839_v62  ;;  %v2968_v5 = vmul.f32 0.010009766, %v2840_v43  ;;  %v2656_v35 = vadd.f32 %v2655_v8, %v8921_v14  ;;  %3725 = vmatmul.bf16.gmra.mxu2 %v9753_v25  ;;  %3814 = vmatmul.bf16.gmra.mxu3 %v9755_v61  ;;  %v6622_v10 = vor.u32 %v6882_v38, %v6621_v4  ;;  %vm3034_vm12 = vmpackc.low %vm9770_vm11, %vm9766_vm10  ;;  %v11144_v43 = vld [vmem:[#allocation19_spill] sm:$0xff] }
 0x386   : > { %v9777_v46 = vpack.c.bf16 %v3254_v13, %v3253_v58  ;;  %3873 = vmatmul.bf16.gmra.mxu0 %v9384_v34  ;;  %3962 = vmatmul.bf16.gmra.mxu1 %v9386_v33  ;;  %v6586_v27 = vor.u32 %v6871_v29, %v6583_v53  ;;  %v3191_v33 = vunpack.c.l.bf16 %v11144_v43  ;;  %v3192_v29 = vunpack.c.h.bf16 %v11144_v43 }
 0x387   : > { %v3002_v31 = vpack.c.bf16 %v2968_v5, %v2967_v15  ;;  %v2745_v37 = vadd.f32 %v2744_v42, %v2656_v35  ;;  %4694 = vmatpush.bf16.msrb.mxu2 %v6558_v59  ;;  %4783 = vmatpush.bf16.msrb.mxu3 %v6622_v10 }
 0x388   : > { %v3686_v44 = vpop.f32.mrf.mxu2  ;;  %v3775_v62 = vpop.f32.mrf.mxu3  ;;  %4869 = vmatpush.bf16.msra.mxu0 %v6586_v27 }
 0x389   : > { %v3066_v38 = vsel %vm3034_vm12, %v2778_v17, %v3002_v31  ;;  %v2779_v13 = vpack.c.bf16 %v2745_v37, %v9398_v7  ;;  %v3687_v34 = vadd.f32 %v3686_v44, %v9472_v39  ;;  %v6887_v17 = vld [vmem:[%s10775_s5 + $0xb4] sm:$0xf]  ;;  %v6647_v7 = vld [vmem:[%s10775_s5 + $0xb8] sm:$0xf0] }
 0x38a   : > { %v3127_v4 = vunpack.c.l.bf16 %v3066_v38  ;;  %v3128_v8 = vunpack.c.h.bf16 %v3066_v38  ;;  %v6650_v35 = vor.u32 %v6887_v17, %v6647_v7  ;;  %v11150_v38 = vld [vmem:[#allocation20_spill] sm:$0xff]  ;;  %v3420_v17 = vunpack.c.l.b16 %v9777_v46 }
 0x38b   : > { %v2841_v42 = vunpack.c.l.bf16 %v2779_v13  ;;  %v2842_v59 = vunpack.c.h.bf16 %v2779_v13  ;;  %v9789_v53 = vadd.f32 %v3775_v62, %v3687_v34  ;;  %v2657_v58 = vpop.f32.mrf.mxu0  ;;  %v2746_v32 = vpop.f32.mrf.mxu1  ;;  %v3193_v34 = vunpack.c.l.bf16 %v11150_v38 }
 0x38c   : > { %v3255_v21 = vadd.f32 %v3191_v33, %v3127_v4  ;;  %v3256_v15 = vadd.f32 %v3192_v29, %v3128_v8  ;;  %v2658_v5 = vadd.f32 %v2657_v58, %v8921_v14  ;;  %4958 = vmatpush.bf16.msra.mxu1 %v6650_v35  ;;  %v3194_v43 = vunpack.c.h.bf16 %v11150_v38 }
 0x38d   : > { %vm9798_vm0 = vcmp.gt.f32.partialorder %v2841_v42, 0.0  ;;  %vm9802_vm13 = vcmp.gt.f32.partialorder %v2842_v59, 0.0  ;;  %v2969_v31 = vmul.f32 0.010009766, %v2841_v42  ;;  %v2970_v37 = vmul.f32 0.010009766, %v2842_v59 }
 0x38e   : > { %v9806_v44 = vpack.c.bf16 %v3256_v15, %v3255_v21  ;;  %v2747_v62 = vadd.f32 %v2746_v32, %v2658_v5  ;;  %vm3035_vm14 = vmpackc.low %vm9802_vm13, %vm9798_vm0  ;;  %v9818_v59 = vperm.slane %v9463_v9, 1  ;;  %v3421_v7 = vunpack.c.h.b16 %v9777_v46 }
 0x38f   : > { %v3003_v14 = vpack.c.bf16 %v2970_v37, %v2969_v31 }
 0x390   : > { %11149 = vst [vmem:[#allocation17_spill] sm:$0xff] %v9806_v44  ;;  %v2780_v33 = vpack.c.bf16 %v2747_v62, %v9438_v23  ;;  %v3688_v29 = vpop.f32.mrf.mxu2  ;;  %v3777_v4 = vpop.f32.mrf.mxu3  ;;  %v3422_v8 = vunpack.c.l.b16 %v9806_v44  ;;  %v3423_v42 = vunpack.c.h.b16 %v9806_v44 }
 0x391   : > { %v3067_v58 = vsel %vm3035_vm14, %v2779_v13, %v3003_v14  ;;  %v3689_v32 = vadd.f32 %v3688_v29, %v9472_v39 }
 0x392   : > { %v3129_v21 = vunpack.c.l.bf16 %v3067_v58  ;;  %v3130_v15 = vunpack.c.h.bf16 %v3067_v58  ;;  %v2843_v5 = vunpack.c.l.bf16 %v2780_v33  ;;  %v2844_v23 = vunpack.c.h.bf16 %v2780_v33 }
 0x393   : > { %v9823_v35 = vadd.f32 %v3777_v4, %v3689_v32  ;;  %v9825_v10 = vpack.c.b16 %v3422_v8, %v3420_v17  ;;  %v9827_v27 = vpack.c.b16 %v3423_v42, %v3421_v7  ;;  %v3839_v31 = vpop.f32.mrf.mxu0  ;;  %v3928_v9 = vpop.f32.mrf.mxu1  ;;  %v11154_v7 = vld [vmem:[#allocation21_spill] sm:$0xff] }
 0x394   : > { %v3257_v37 = vadd.f32 %v3193_v34, %v3129_v21  ;;  %v3258_v13 = vadd.f32 %v3194_v43, %v3130_v15  ;;  %vm9829_vm15 = vcmp.gt.f32.partialorder %v2843_v5, 0.0  ;;  %vm2908_vm1 = vcmp.gt.f32.partialorder %v2844_v23, 0.0 }
 0x395   : > { %v2971_v38 = vmul.f32 0.010009766, %v2843_v5  ;;  %v2972_v14 = vmul.f32 0.010009766, %v2844_v23  ;;  %3730 = vmatmul.bf16.gmra.mxu2 %v9825_v10  ;;  %3819 = vmatmul.bf16.gmra.mxu3 %v9827_v27  ;;  %v3840_v29 = vadd.f32 %v3839_v31, %v9818_v59  ;;  %vm3036_vm2 = vmpackc.low %vm2908_vm1, %vm9829_vm15  ;;  %v3195_v21 = vunpack.c.l.bf16 %v11154_v7 }
 0x396   : > { %v9836_v4 = vpack.c.bf16 %v3258_v13, %v3257_v37  ;;  %3878 = vmatmul.bf16.gmra.mxu0 %v9465_v57  ;;  %3967 = vmatmul.bf16.gmra.mxu1 %v9467_v54  ;;  %v3196_v15 = vunpack.c.h.bf16 %v11154_v7 }
 0x397   : > { %v3004_v34 = vpack.c.bf16 %v2972_v14, %v2971_v38  ;;  %v3929_v43 = vadd.f32 %v3928_v9, %v3840_v29 }
 0x398   : > { %11153 = vst [vmem:[#allocation18_spill] sm:$0xff] %v9836_v4  ;;  %v3691_v8 = vpop.f32.mrf.mxu2  ;;  %v3780_v42 = vpop.f32.mrf.mxu3 }
 0x399   : > { %v3068_v58 = vsel %vm3036_vm2, %v2780_v33, %v3004_v34  ;;  %v4008_v32 = vpack.c.bf16 %v3929_v43, %v9483_v55  ;;  %v3692_v17 = vadd.f32 %v3691_v8, %v9472_v39  ;;  %v6904_v34 = vld [vmem:[%s10776_s6 + $0x38] sm:$0xff]  ;;  %v3424_v8 = vunpack.c.l.b16 %v9836_v4 }
 0x39a   : > { %v3131_v5 = vunpack.c.l.bf16 %v3068_v58  ;;  %v3132_v57 = vunpack.c.h.bf16 %v3068_v58  ;;  %v6912_v43 = vld [vmem:[%s10776_s6 + $0x78] sm:$0xff]  ;;  %v6869_v58 = vld [vmem:[%s10775_s5 + $0x24] sm:$0xf]  ;;  %5716 = vmatpush.bf16.msra.mxu2 %v6904_v34 }
 0x39b   : > { %v4040_v23 = vunpack.c.l.bf16 %v4008_v32  ;;  %v4041_v54 = vunpack.c.h.bf16 %v4008_v32  ;;  %v9846_v31 = vadd.f32 %v3780_v42, %v3692_v17  ;;  %v3841_v9 = vpop.f32.mrf.mxu0  ;;  %v3930_v37 = vpop.f32.mrf.mxu1  ;;  %v3425_v42 = vunpack.c.h.b16 %v9836_v4  ;;  %v6575_v17 = vld [vmem:[%s10775_s5 + $0x28] sm:$0xf0]  ;;  %5805 = vmatpush.bf16.msra.mxu3 %v6912_v43 }
 0x39c   : > { %v3259_v13 = vadd.f32 %v3195_v21, %v3131_v5  ;;  %v3260_v62 = vadd.f32 %v3196_v15, %v3132_v57  ;;  %v3842_v33 = vadd.f32 %v3841_v9, %v9818_v59  ;;  %v6578_v9 = vor.u32 %v6869_v58, %v6575_v17  ;;  %v6885_v17 = vld [vmem:[%s10775_s5 + $0xa4] sm:$0xf] }
 0x39d   : > { %v4168_v38 = vmul.f32 0.010009766, %v4040_v23  ;;  %v4169_v55 = vmul.f32 0.010009766, %v4041_v54  ;;  %vm9868_vm3 = vcmp.gt.f32.partialorder %v4040_v23, 0.0  ;;  %vm9872_vm4 = vcmp.gt.f32.partialorder %v4041_v54, 0.0 }
 0x39e   : > { %v9849_v14 = vpack.c.bf16 %v3260_v62, %v3259_v13  ;;  %v3931_v29 = vadd.f32 %v3930_v37, %v3842_v33  ;;  %4870 = vmatpush.bf16.msra.mxu0 %v6578_v9  ;;  %vm4264_vm5 = vmpackc.low %vm9872_vm4, %vm9868_vm3 }
 0x39f   : > { %v4232_v62 = vpack.c.bf16 %v4169_v55, %v4168_v38 }
 0x3a0   : > { %11155 = vst [vmem:[#allocation19_spill] sm:$0xff] %v9849_v14  ;;  %v4009_v7 = vpack.c.bf16 %v3931_v29, %v9502_v0  ;;  %v3693_v21 = vpop.f32.mrf.mxu2  ;;  %v3782_v15 = vpop.f32.mrf.mxu3  ;;  %v3426_v5 = vunpack.c.l.b16 %v9849_v14  ;;  %v3427_v57 = vunpack.c.h.b16 %v9849_v14 }
 0x3a1   : > { %v3694_v0 = vadd.f32 %v3693_v21, %v9472_v39  ;;  %v4296_v58 = vsel %vm4264_vm5, %v4008_v32, %v4232_v62  ;;  %v6639_v21 = vld [vmem:[%s10775_s5 + $0xa8] sm:$0xf0] }
 0x3a2   : > { %v4042_v33 = vunpack.c.l.bf16 %v4009_v7  ;;  %v4043_v29 = vunpack.c.h.bf16 %v4009_v7  ;;  %v9879_v14 = vpack.c.b16 %v3426_v5, %v3424_v8  ;;  %v9881_v34 = vpack.c.b16 %v3427_v57, %v3425_v42 }
 0x3a3   : > { %v9877_v4 = vadd.f32 %v3782_v15, %v3694_v0  ;;  %v3844_v23 = vpop.f32.mrf.mxu0  ;;  %v3933_v43 = vpop.f32.mrf.mxu1  ;;  %v6642_v32 = vor.u32 %v6885_v17, %v6639_v21  ;;  %v4399_v57 = vunpack.c.l.b16 %v4296_v58  ;;  %v4400_v9 = vunpack.c.h.b16 %v4296_v58 }
 0x3a4   : > { %vm9887_vm6 = vcmp.gt.f32.partialorder %v4042_v33, 0.0  ;;  %vm9891_vm7 = vcmp.gt.f32.partialorder %v4043_v29, 0.0  ;;  %v4170_v55 = vmul.f32 0.010009766, %v4042_v33  ;;  %v4171_v8 = vmul.f32 0.010009766, %v4043_v29 }
 0x3a5   : > { %3735 = vmatmul.bf16.gmra.mxu2 %v9879_v14  ;;  %3824 = vmatmul.bf16.gmra.mxu3 %v9881_v34  ;;  %v3845_v42 = vadd.f32 %v3844_v23, %v9818_v59  ;;  %vm4265_vm8 = vmpackc.low %vm9891_vm7, %vm9887_vm6 }
 0x3a6   : > { %v4233_v15 = vpack.c.bf16 %v4171_v8, %v4170_v55  ;;  %3883 = vmatmul.bf16.gmra.mxu0 %v9504_v49  ;;  %3972 = vmatmul.bf16.gmra.mxu1 %v9506_v51 }
 0x3a7   : > { %v3934_v5 = vadd.f32 %v3933_v43, %v3845_v42  ;;  %4959 = vmatpush.bf16.msra.mxu1 %v6642_v32 }
 0x3a8   : > { %v4297_v37 = vsel %vm4265_vm8, %v4009_v7, %v4233_v15  ;;  %v3696_v13 = vpop.f32.mrf.mxu2  ;;  %v3785_v62 = vpop.f32.mrf.mxu3 }
 0x3a9   : > { %v4401_v0 = vunpack.c.l.b16 %v4297_v37  ;;  %v4402_v33 = vunpack.c.h.b16 %v4297_v37  ;;  %v4010_v29 = vpack.c.bf16 %v3934_v5, %v9549_v63  ;;  %v3697_v49 = vadd.f32 %v3696_v13, %v9472_v39 }
 0x3ab   : > { %v9912_v51 = vpack.c.b16 %v4401_v0, %v4399_v57  ;;  %v9914_v23 = vpack.c.b16 %v4402_v33, %v4400_v9  ;;  %v4044_v54 = vunpack.c.l.bf16 %v4010_v29  ;;  %v4045_v38 = vunpack.c.h.bf16 %v4010_v29  ;;  %v3846_v55 = vpop.f32.mrf.mxu0  ;;  %v3935_v43 = vpop.f32.mrf.mxu1 }
 0x3ac   : > { %v9916_v8 = vadd.f32 %v3785_v62, %v3697_v49  ;;  %v3847_v7 = vadd.f32 %v3846_v55, %v9818_v59 }
 0x3ad   : > { %v4172_v58 = vmul.f32 0.010009766, %v4044_v54  ;;  %v4173_v42 = vmul.f32 0.010009766, %v4045_v38  ;;  %vm9920_vm9 = vcmp.gt.f32.partialorder %v4044_v54, 0.0  ;;  %vm9924_vm10 = vcmp.gt.f32.partialorder %v4045_v38, 0.0 }
 0x3ae   : > { %v3936_v17 = vadd.f32 %v3935_v43, %v3847_v7  ;;  %vm4266_vm12 = vmpackc.low %vm9924_vm10, %vm9920_vm9 }
 0x3af   : > { %v4234_v57 = vpack.c.bf16 %v4173_v42, %v4172_v58 }
 0x3b0   : > { %v4011_v21 = vpack.c.bf16 %v3936_v17, %v9580_v26  ;;  %v3698_v63 = vpop.f32.mrf.mxu2  ;;  %v3787_v15 = vpop.f32.mrf.mxu3 }
 0x3b1   : > { %v3699_v9 = vadd.f32 %v3698_v63, %v9472_v39  ;;  %v4298_v38 = vsel %vm4266_vm12, %v4010_v29, %v4234_v57 }
 0x3b2   : > { %v4046_v37 = vunpack.c.l.bf16 %v4011_v21  ;;  %v4047_v13 = vunpack.c.h.bf16 %v4011_v21  ;;  %v4403_v63 = vunpack.c.l.b16 %v4298_v38  ;;  %v4404_v5 = vunpack.c.h.b16 %v4298_v38 }
 0x3b3   : > { %v9929_v62 = vadd.f32 %v3787_v15, %v3699_v9  ;;  %v3849_v0 = vpop.f32.mrf.mxu0  ;;  %v3938_v33 = vpop.f32.mrf.mxu1 }
 0x3b4   : > { %v4174_v26 = vmul.f32 0.010009766, %v4046_v37  ;;  %v4175_v49 = vmul.f32 0.010009766, %v4047_v13  ;;  %v3850_v54 = vadd.f32 %v3849_v0, %v9818_v59  ;;  %vm4110_vm11 = vcmp.gt.f32.partialorder %v4046_v37, 0.0 }
 0x3b5   : > { %4695 = vmatmul.bf16.vlgmr.msrb.gmra.mxu2 %v9912_v51  ;;  %4784 = vmatmul.bf16.vlgmr.msrb.gmra.mxu3 %v9914_v23  ;;  %vm4111_vm0 = vcmp.gt.f32.partialorder %v4047_v13, 0.0 }
 0x3b6   : > { %v3939_v55 = vadd.f32 %v3938_v33, %v3850_v54  ;;  %3888 = vmatmul.bf16.gmra.mxu0 %v9582_v48  ;;  %3977 = vmatmul.bf16.gmra.mxu1 %v9584_v12  ;;  %v4235_v43 = vpack.c.bf16 %v4175_v49, %v4174_v26  ;;  %vm4267_vm13 = vmpackc.low %vm4111_vm0, %vm4110_vm11  ;;  %v6911_v33 = vld [vmem:[%s10776_s6 + $0x70] sm:$0xff]  ;;  %v6567_v54 = vld [vmem:[%s10775_s5 + $0x18] sm:$0xf0] }
 0x3b7   : > { %v6867_v26 = vld [vmem:[%s10775_s5 + $0x14] sm:$0xf]  ;;  %5806 = vmatpush.bf16.msra.mxu3 %v6911_v33 }
 0x3b8   : > { %v4012_v7 = vpack.c.bf16 %v3939_v55, %v9603_v28  ;;  %v3701_v58 = vpop.f32.mrf.mxu2  ;;  %v3790_v42 = vpop.f32.mrf.mxu3  ;;  %v4299_v17 = vsel %vm4267_vm13, %v4011_v21, %v4235_v43  ;;  %v6903_v21 = vld [vmem:[%s10776_s6 + $0x30] sm:$0xff] }
 0x3b9   : > { %v3702_v15 = vadd.f32 %v3701_v58, %v9472_v39  ;;  %v4405_v32 = vunpack.c.l.b16 %v4299_v17  ;;  %v4406_v9 = vunpack.c.h.b16 %v4299_v17  ;;  %5717 = vmatpush.bf16.msra.mxu2 %v6903_v21 }
 0x3ba   : > { %v4048_v13 = vunpack.c.l.bf16 %v4012_v7  ;;  %v4049_v0 = vunpack.c.h.bf16 %v4012_v7 }
 0x3bb   : > { %v9942_v37 = vadd.f32 %v3790_v42, %v3702_v15  ;;  %v3851_v29 = vpop.f32.mrf.mxu0  ;;  %v3940_v57 = vpop.f32.mrf.mxu1  ;;  %v9944_v48 = vpack.c.b16 %v4405_v32, %v4403_v63  ;;  %v9946_v12 = vpack.c.b16 %v4406_v9, %v4404_v5  ;;  %v6570_v42 = vor.u32 %v6867_v26, %v6567_v54 }
 0x3bc   : > { %v3852_v28 = vadd.f32 %v3851_v29, %v9818_v59  ;;  %v4176_v38 = vmul.f32 0.010009766, %v4048_v13  ;;  %v4177_v55 = vmul.f32 0.010009766, %v4049_v0  ;;  %vm9965_vm14 = vcmp.gt.f32.partialorder %v4048_v13, 0.0 }
 0x3bd   : > { %4871 = vmatpush.bf16.msra.mxu0 %v6570_v42  ;;  %vm9969_vm15 = vcmp.gt.f32.partialorder %v4049_v0, 0.0  ;;  %v6883_v0 = vld [vmem:[%s10775_s5 + $0x94] sm:$0xf] }
 0x3be   : > { %v3941_v49 = vadd.f32 %v3940_v57, %v3852_v28  ;;  %v4236_v21 = vpack.c.bf16 %v4177_v55, %v4176_v38  ;;  %v6631_v38 = vld [vmem:[%s10775_s5 + $0x98] sm:$0xf0]  ;;  %vm4268_vm3 = vmpackc.low %vm9969_vm15, %vm9965_vm14 }
 0x3c0   : > { %v3703_v43 = vpop.f32.mrf.mxu2  ;;  %v3792_v58 = vpop.f32.mrf.mxu3  ;;  %v4013_v17 = vpack.c.bf16 %v3941_v49, %v9622_v11 }
 0x3c1   : > { %v3704_v63 = vadd.f32 %v3703_v43, %v9472_v39  ;;  %v6634_v43 = vor.u32 %v6883_v0, %v6631_v38 }
 0x3c2   : > { %v4050_v15 = vunpack.c.l.bf16 %v4013_v17  ;;  %v4051_v32 = vunpack.c.h.bf16 %v4013_v17 }
 0x3c3   : > { %v9963_v5 = vadd.f32 %v3792_v58, %v3704_v63  ;;  %v3854_v9 = vpop.f32.mrf.mxu0  ;;  %v3943_v29 = vpop.f32.mrf.mxu1  ;;  %4960 = vmatpush.bf16.msra.mxu1 %v6634_v43 }
 0x3c4   : > { %v3855_v11 = vadd.f32 %v3854_v9, %v9818_v59  ;;  %v4178_v33 = vmul.f32 0.010009766, %v4050_v15  ;;  %v4179_v26 = vmul.f32 0.010009766, %v4051_v32  ;;  %vm9976_vm1 = vcmp.gt.f32.partialorder %v4050_v15, 0.0 }
 0x3c5   : > { %4700 = vmatmul.bf16.gmra.mxu2 %v9944_v48  ;;  %4789 = vmatmul.bf16.gmra.mxu3 %v9946_v12  ;;  %vm9980_vm2 = vcmp.gt.f32.partialorder %v4051_v32, 0.0 }
 0x3c6   : > { %v3944_v54 = vadd.f32 %v3943_v29, %v3855_v11  ;;  %3893 = vmatmul.bf16.gmra.mxu0 %v9624_v47  ;;  %3982 = vmatmul.bf16.gmra.mxu1 %v9626_v56  ;;  %v4237_v55 = vpack.c.bf16 %v4179_v26, %v4178_v33  ;;  %vm4269_vm4 = vmpackc.low %vm9980_vm2, %vm9976_vm1  ;;  %v4300_v47 = vsel %vm4268_vm3, %v4012_v7, %v4236_v21 }
 0x3c7   : > { %v4407_v11 = vunpack.c.l.b16 %v4300_v47 }
 0x3c8   : > { %v4014_v58 = vpack.c.bf16 %v3944_v54, %v9669_v50  ;;  %v3706_v42 = vpop.f32.mrf.mxu2  ;;  %v3795_v63 = vpop.f32.mrf.mxu3  ;;  %v4301_v15 = vsel %vm4269_vm4, %v4013_v17, %v4237_v55  ;;  %v4408_v50 = vunpack.c.h.b16 %v4300_v47 }
 0x3c9   : > { %v3707_v56 = vadd.f32 %v3706_v42, %v9472_v39  ;;  %v4409_v32 = vunpack.c.l.b16 %v4301_v15  ;;  %v4410_v9 = vunpack.c.h.b16 %v4301_v15 }
 0x3ca   : > { %v4052_v33 = vunpack.c.l.bf16 %v4014_v58  ;;  %v4053_v26 = vunpack.c.h.bf16 %v4014_v58 }
 0x3cb   : > { %v10002_v29 = vadd.f32 %v3795_v63, %v3707_v56  ;;  %v3856_v57 = vpop.f32.mrf.mxu0  ;;  %v3945_v28 = vpop.f32.mrf.mxu1  ;;  %v10005_v0 = vpack.c.b16 %v4409_v32, %v4407_v11  ;;  %v10007_v13 = vpack.c.b16 %v4410_v9, %v4408_v50 }
 0x3cc   : > { %v3857_v49 = vadd.f32 %v3856_v57, %v9818_v59  ;;  %v4180_v21 = vmul.f32 0.010009766, %v4052_v33  ;;  %v4181_v17 = vmul.f32 0.010009766, %v4053_v26  ;;  %vm10013_vm5 = vcmp.gt.f32.partialorder %v4052_v33, 0.0 }
 0x3cd   : > { %vm10017_vm6 = vcmp.gt.f32.partialorder %v4053_v26, 0.0 }
 0x3ce   : > { %v3946_v7 = vadd.f32 %v3945_v28, %v3857_v49  ;;  %v4238_v57 = vpack.c.bf16 %v4181_v17, %v4180_v21  ;;  %vm4270_vm9 = vmpackc.low %vm10017_vm6, %vm10013_vm5 }
 0x3d0   : > { %v3708_v54 = vpop.f32.mrf.mxu2  ;;  %v3797_v38 = vpop.f32.mrf.mxu3  ;;  %v4015_v55 = vpack.c.bf16 %v3946_v7, %v9700_v18  ;;  %v4302_v21 = vsel %vm4270_vm9, %v4014_v58, %v4238_v57  ;;  %v6902_v58 = vld [vmem:[%s10776_s6 + $0x28] sm:$0xff]  ;;  %v6865_v57 = vld [vmem:[%s10775_s5 + $0x4] sm:$0xf] }
 0x3d1   : > { %v3709_v43 = vadd.f32 %v3708_v54, %v9472_v39  ;;  %5718 = vmatpush.bf16.msra.mxu2 %v6902_v58 }
 0x3d2   : > { %v4054_v42 = vunpack.c.l.bf16 %v4015_v55  ;;  %v4055_v63 = vunpack.c.h.bf16 %v4015_v55 }
 0x3d3   : > { %v10011_v47 = vadd.f32 %v3797_v38, %v3709_v43  ;;  %v3859_v56 = vpop.f32.mrf.mxu0  ;;  %v3948_v15 = vpop.f32.mrf.mxu1 }
 0x3d4   : > { %v3860_v28 = vadd.f32 %v3859_v56, %v9818_v59  ;;  %v4182_v18 = vmul.f32 0.010009766, %v4054_v42  ;;  %v4183_v11 = vmul.f32 0.010009766, %v4055_v63  ;;  %vm4118_vm7 = vcmp.gt.f32.partialorder %v4054_v42, 0.0 }
 0x3d5   : > { %4705 = vmatmul.bf16.gmra.mxu2 %v10005_v0  ;;  %4794 = vmatmul.bf16.gmra.mxu3 %v10007_v13  ;;  %vm4119_vm8 = vcmp.gt.f32.partialorder %v4055_v63, 0.0  ;;  %v4411_v63 = vunpack.c.l.b16 %v4302_v21  ;;  %v4412_v56 = vunpack.c.h.b16 %v4302_v21 }
 0x3d6   : > { %v3949_v50 = vadd.f32 %v3948_v15, %v3860_v28  ;;  %3898 = vmatmul.bf16.gmra.mxu0 %v9702_v24  ;;  %3987 = vmatmul.bf16.gmra.mxu1 %v9704_v1  ;;  %v4239_v33 = vpack.c.bf16 %v4183_v11, %v4182_v18  ;;  %vm4271_vm10 = vmpackc.low %vm4119_vm8, %vm4118_vm7  ;;  %v6559_v11 = vld [vmem:[%s10775_s5 + $0x8] sm:$0xf0] }
 0x3d7   : > { %v6562_v21 = vor.u32 %v6865_v57, %v6559_v11 }
 0x3d8   : > { %v4016_v26 = vpack.c.bf16 %v3949_v50, %v9723_v20  ;;  %v3711_v49 = vpop.f32.mrf.mxu2  ;;  %v3800_v7 = vpop.f32.mrf.mxu3  ;;  %v4303_v54 = vsel %vm4271_vm10, %v4015_v55, %v4239_v33  ;;  %v6910_v55 = vld [vmem:[%s10776_s6 + $0x68] sm:$0xff] }
 0x3d9   : > { %v3712_v17 = vadd.f32 %v3711_v49, %v9472_v39  ;;  %v4413_v38 = vunpack.c.l.b16 %v4303_v54  ;;  %v4414_v43 = vunpack.c.h.b16 %v4303_v54  ;;  %5807 = vmatpush.bf16.msra.mxu3 %v6910_v55  ;;  %4872 = vmatpush.bf16.msra.mxu0 %v6562_v21 }
 0x3da   : > { %v4056_v15 = vunpack.c.l.bf16 %v4016_v26  ;;  %v4057_v32 = vunpack.c.h.bf16 %v4016_v26 }
 0x3db   : > { %v10032_v24 = vadd.f32 %v3800_v7, %v3712_v17  ;;  %v3861_v1 = vpop.f32.mrf.mxu0  ;;  %v3950_v42 = vpop.f32.mrf.mxu1  ;;  %v10035_v20 = vpack.c.b16 %v4413_v38, %v4411_v63  ;;  %v10037_v28 = vpack.c.b16 %v4414_v43, %v4412_v56 }
 0x3dc   : > { %v3862_v9 = vadd.f32 %v3861_v1, %v9818_v59  ;;  %v4184_v50 = vmul.f32 0.010009766, %v4056_v15  ;;  %v4185_v33 = vmul.f32 0.010009766, %v4057_v32  ;;  %vm10055_vm11 = vcmp.gt.f32.partialorder %v4056_v15, 0.0 }
 0x3dd   : > { %vm10059_vm12 = vcmp.gt.f32.partialorder %v4057_v32, 0.0  ;;  %v6881_v32 = vld [vmem:[%s10775_s5 + $0x84] sm:$0xf] }
 0x3de   : > { %v3951_v18 = vadd.f32 %v3950_v42, %v3862_v9  ;;  %v4240_v58 = vpack.c.bf16 %v4185_v33, %v4184_v50  ;;  %v6623_v50 = vld [vmem:[%s10775_s5 + $0x88] sm:$0xf0]  ;;  %vm4272_vm14 = vmpackc.low %vm10059_vm12, %vm10055_vm11 }
 0x3e0   : > { %v3713_v49 = vpop.f32.mrf.mxu2  ;;  %v3802_v7 = vpop.f32.mrf.mxu3  ;;  %v4017_v17 = vpack.c.bf16 %v3951_v18, %v9751_v41 }
 0x3e1   : > { %v3714_v54 = vadd.f32 %v3713_v49, %v9472_v39  ;;  %v6626_v49 = vor.u32 %v6881_v32, %v6623_v50 }
 0x3e2   : > { %v4058_v38 = vunpack.c.l.bf16 %v4017_v17  ;;  %v4059_v43 = vunpack.c.h.bf16 %v4017_v17 }
 0x3e3   : > { %v10053_v1 = vadd.f32 %v3802_v7, %v3714_v54  ;;  %v3864_v42 = vpop.f32.mrf.mxu0  ;;  %v3953_v63 = vpop.f32.mrf.mxu1  ;;  %4961 = vmatpush.bf16.msra.mxu1 %v6626_v49 }
 0x3e4   : > { %v3865_v41 = vadd.f32 %v3864_v42, %v9818_v59  ;;  %v4186_v55 = vmul.f32 0.010009766, %v4058_v38  ;;  %v4187_v57 = vmul.f32 0.010009766, %v4059_v43  ;;  %vm10066_vm0 = vcmp.gt.f32.partialorder %v4058_v38, 0.0 }
 0x3e5   : > { %4710 = vmatmul.bf16.gmra.mxu2 %v10035_v20  ;;  %4799 = vmatmul.bf16.gmra.mxu3 %v10037_v28  ;;  %vm10070_vm13 = vcmp.gt.f32.partialorder %v4059_v43, 0.0 }
 0x3e6   : > { %v3954_v11 = vadd.f32 %v3953_v63, %v3865_v41  ;;  %3903 = vmatmul.bf16.gmra.mxu0 %v9753_v25  ;;  %3992 = vmatmul.bf16.gmra.mxu1 %v9755_v61  ;;  %v4241_v33 = vpack.c.bf16 %v4187_v57, %v4186_v55  ;;  %vm4273_vm15 = vmpackc.low %vm10070_vm13, %vm10066_vm0  ;;  %v4304_v25 = vsel %vm4272_vm14, %v4016_v26, %v4240_v58 }
 0x3e7   : > { %v4415_v41 = vunpack.c.l.b16 %v4304_v25 }
 0x3e8   : > { %v4018_v7 = vpack.c.bf16 %v3954_v11, %v9789_v53  ;;  %v3716_v21 = vpop.f32.mrf.mxu2  ;;  %v3805_v54 = vpop.f32.mrf.mxu3  ;;  %v4305_v38 = vsel %vm4273_vm15, %v4017_v17, %v4241_v33  ;;  %v4416_v53 = vunpack.c.h.b16 %v4304_v25 }
 0x3e9   : > { %v3717_v61 = vadd.f32 %v3716_v21, %v9472_v39  ;;  %v4417_v43 = vunpack.c.l.b16 %v4305_v38  ;;  %v4418_v42 = vunpack.c.h.b16 %v4305_v38 }
 0x3ea   : > { %v4060_v55 = vunpack.c.l.bf16 %v4018_v7  ;;  %v4061_v57 = vunpack.c.h.bf16 %v4018_v7 }
 0x3eb   : > { %v10092_v63 = vadd.f32 %v3805_v54, %v3717_v61  ;;  %v3866_v56 = vpop.f32.mrf.mxu0  ;;  %v3955_v9 = vpop.f32.mrf.mxu1  ;;  %v10095_v32 = vpack.c.b16 %v4417_v43, %v4415_v41  ;;  %v10097_v15 = vpack.c.b16 %v4418_v42, %v4416_v53 }
 0x3ec   : > { %v3867_v18 = vadd.f32 %v3866_v56, %v9818_v59  ;;  %v4188_v58 = vmul.f32 0.010009766, %v4060_v55  ;;  %v4189_v17 = vmul.f32 0.010009766, %v4061_v57  ;;  %vm10103_vm1 = vcmp.gt.f32.partialorder %v4060_v55, 0.0 }
 0x3ed   : > { %vm10107_vm2 = vcmp.gt.f32.partialorder %v4061_v57, 0.0 }
 0x3ee   : > { %v3956_v26 = vadd.f32 %v3955_v9, %v3867_v18  ;;  %v4242_v56 = vpack.c.bf16 %v4189_v17, %v4188_v58  ;;  %vm4274_vm5 = vmpackc.low %vm10107_vm2, %vm10103_vm1 }
 0x3f0   : > { %v3718_v11 = vpop.f32.mrf.mxu2  ;;  %v3807_v50 = vpop.f32.mrf.mxu3  ;;  %v4019_v33 = vpack.c.bf16 %v3956_v26, %v9823_v35  ;;  %v4306_v58 = vsel %vm4274_vm5, %v4018_v7, %v4242_v56  ;;  %v6901_v7 = vld [vmem:[%s10776_s6 + $0x20] sm:$0xff] }
 0x3f1   : > { %v3719_v49 = vadd.f32 %v3718_v11, %v9472_v39  ;;  %5719 = vmatpush.bf16.msra.mxu2 %v6901_v7 }
 0x3f2   : > { %v4062_v21 = vunpack.c.l.bf16 %v4019_v33  ;;  %v4063_v54 = vunpack.c.h.bf16 %v4019_v33 }
 0x3f3   : > { %v10101_v25 = vadd.f32 %v3807_v50, %v3719_v49  ;;  %v3869_v61 = vpop.f32.mrf.mxu0  ;;  %v3958_v38 = vpop.f32.mrf.mxu1 }
 0x3f4   : > { %v3870_v9 = vadd.f32 %v3869_v61, %v9818_v59  ;;  %v4190_v35 = vmul.f32 0.010009766, %v4062_v21  ;;  %v4191_v41 = vmul.f32 0.010009766, %v4063_v54  ;;  %vm4126_vm3 = vcmp.gt.f32.partialorder %v4062_v21, 0.0 }
 0x3f5   : > { %4715 = vmatmul.bf16.gmra.mxu2 %v10095_v32  ;;  %4804 = vmatmul.bf16.gmra.mxu3 %v10097_v15  ;;  %vm4127_vm4 = vcmp.gt.f32.partialorder %v4063_v54, 0.0  ;;  %v4419_v54 = vunpack.c.l.b16 %v4306_v58  ;;  %v4420_v61 = vunpack.c.h.b16 %v4306_v58 }
 0x3f6   : > { %v3959_v53 = vadd.f32 %v3958_v38, %v3870_v9  ;;  %3908 = vmatmul.bf16.gmra.mxu0 %v9825_v10  ;;  %3997 = vmatmul.bf16.gmra.mxu1 %v9827_v27  ;;  %v4243_v55 = vpack.c.bf16 %v4191_v41, %v4190_v35  ;;  %vm4275_vm6 = vmpackc.low %vm4127_vm4, %vm4126_vm3 }
 0x3f8   : > { %v4020_v57 = vpack.c.bf16 %v3959_v53, %v9846_v31  ;;  %v3721_v18 = vpop.f32.mrf.mxu2  ;;  %v3810_v26 = vpop.f32.mrf.mxu3  ;;  %v4307_v11 = vsel %vm4275_vm6, %v4019_v33, %v4243_v55  ;;  %v6909_v33 = vld [vmem:[%s10776_s6 + $0x60] sm:$0xff] }
 0x3f9   : > { %v3722_v17 = vadd.f32 %v3721_v18, %v9472_v39  ;;  %v4421_v50 = vunpack.c.l.b16 %v4307_v11  ;;  %v4422_v49 = vunpack.c.h.b16 %v4307_v11  ;;  %5808 = vmatpush.bf16.msra.mxu3 %v6909_v33 }
 0x3fa   : > { %v4064_v38 = vunpack.c.l.bf16 %v4020_v57  ;;  %v4065_v43 = vunpack.c.h.bf16 %v4020_v57 }
 0x3fb   : > { %v10122_v10 = vadd.f32 %v3810_v26, %v3722_v17  ;;  %v3871_v27 = vpop.f32.mrf.mxu0  ;;  %v3960_v21 = vpop.f32.mrf.mxu1  ;;  %v10125_v31 = vpack.c.b16 %v4421_v50, %v4419_v54  ;;  %v10127_v9 = vpack.c.b16 %v4422_v49, %v4420_v61 }
 0x3fc   : > { %v3872_v42 = vadd.f32 %v3871_v27, %v9818_v59  ;;  %v4192_v35 = vmul.f32 0.010009766, %v4064_v38  ;;  %v4193_v41 = vmul.f32 0.010009766, %v4065_v43  ;;  %vm10139_vm7 = vcmp.gt.f32.partialorder %v4064_v38, 0.0 }
 0x3fd   : > { %vm10143_vm8 = vcmp.gt.f32.partialorder %v4065_v43, 0.0 }
 0x3fe   : > { %v3961_v56 = vadd.f32 %v3960_v21, %v3872_v42  ;;  %v4244_v54 = vpack.c.bf16 %v4193_v41, %v4192_v35  ;;  %vm4276_vm11 = vmpackc.low %vm10143_vm8, %vm10139_vm7 }
 0x400   : > { %v3723_v53 = vpop.f32.mrf.mxu2  ;;  %v3812_v55 = vpop.f32.mrf.mxu3  ;;  %v4021_v18 = vpack.c.bf16 %v3961_v56, %v9877_v4  ;;  %v4308_v35 = vsel %vm4276_vm11, %v4020_v57, %v4244_v54 }
 0x401   : > { %v3724_v26 = vadd.f32 %v3723_v53, %v9472_v39 }
 0x402   : > { %v4066_v58 = vunpack.c.l.bf16 %v4021_v18  ;;  %v4067_v17 = vunpack.c.h.bf16 %v4021_v18 }
 0x403   : > { %v10137_v11 = vadd.f32 %v3812_v55, %v3724_v26  ;;  %v3874_v50 = vpop.f32.mrf.mxu0  ;;  %v3963_v49 = vpop.f32.mrf.mxu1 }
 0x404   : > { %v3875_v61 = vadd.f32 %v3874_v50, %v9818_v59  ;;  %v4194_v4 = vmul.f32 0.010009766, %v4066_v58  ;;  %v4195_v42 = vmul.f32 0.010009766, %v4067_v17  ;;  %vm4130_vm9 = vcmp.gt.f32.partialorder %v4066_v58, 0.0 }
 0x405   : > { %4720 = vmatmul.bf16.gmra.mxu2 %v10125_v31  ;;  %4809 = vmatmul.bf16.gmra.mxu3 %v10127_v9  ;;  %vm4131_vm10 = vcmp.gt.f32.partialorder %v4067_v17, 0.0  ;;  %v4423_v17 = vunpack.c.l.b16 %v4308_v35  ;;  %v4424_v50 = vunpack.c.h.b16 %v4308_v35 }
 0x406   : > { %v3964_v7 = vadd.f32 %v3963_v49, %v3875_v61  ;;  %3913 = vmatmul.bf16.gmra.mxu0 %v9879_v14  ;;  %4002 = vmatmul.bf16.gmra.mxu1 %v9881_v34  ;;  %v4245_v38 = vpack.c.bf16 %v4195_v42, %v4194_v4  ;;  %vm4277_vm12 = vmpackc.low %vm4131_vm10, %vm4130_vm9 }
 0x408   : > { %v4022_v43 = vpack.c.bf16 %v3964_v7, %v9916_v8  ;;  %v3726_v33 = vpop.f32.mrf.mxu2  ;;  %v3815_v56 = vpop.f32.mrf.mxu3  ;;  %v4309_v53 = vsel %vm4277_vm12, %v4021_v18, %v4245_v38 }
 0x409   : > { %v3727_v41 = vadd.f32 %v3726_v33, %v9472_v39  ;;  %v4425_v55 = vunpack.c.l.b16 %v4309_v53  ;;  %v4426_v26 = vunpack.c.h.b16 %v4309_v53 }
 0x40a   : > { %v4068_v49 = vunpack.c.l.bf16 %v4022_v43  ;;  %v4069_v27 = vunpack.c.h.bf16 %v4022_v43 }
 0x40b   : > { %v10158_v14 = vadd.f32 %v3815_v56, %v3727_v41  ;;  %v3876_v34 = vpop.f32.mrf.mxu0  ;;  %v3965_v58 = vpop.f32.mrf.mxu1  ;;  %v10161_v8 = vpack.c.b16 %v4425_v55, %v4423_v17  ;;  %v10163_v61 = vpack.c.b16 %v4426_v26, %v4424_v50 }
 0x40c   : > { %v3877_v21 = vadd.f32 %v3876_v34, %v9818_v59  ;;  %v4196_v54 = vmul.f32 0.010009766, %v4068_v49  ;;  %v4197_v4 = vmul.f32 0.010009766, %v4069_v27  ;;  %vm10169_vm0 = vcmp.gt.f32.partialorder %v4068_v49, 0.0 }
 0x40d   : > { %vm10173_vm13 = vcmp.gt.f32.partialorder %v4069_v27, 0.0 }
 0x40e   : > { %v3966_v57 = vadd.f32 %v3965_v58, %v3877_v21  ;;  %v4246_v34 = vpack.c.bf16 %v4197_v4, %v4196_v54  ;;  %vm4278_vm1 = vmpackc.low %vm10173_vm13, %vm10169_vm0 }
 0x410   : > { %v3728_v18 = vpop.f32.mrf.mxu2  ;;  %v3817_v42 = vpop.f32.mrf.mxu3  ;;  %v4023_v7 = vpack.c.bf16 %v3966_v57, %v9929_v62  ;;  %v4310_v54 = vsel %vm4278_vm1, %v4022_v43, %v4246_v34  ;;  %v6900_v43 = vld [vmem:[%s10776_s6 + $0x18] sm:$0xff] }
 0x411   : > { %v3729_v38 = vadd.f32 %v3728_v18, %v9472_v39  ;;  %5720 = vmatpush.bf16.msra.mxu2 %v6900_v43 }
 0x412   : > { %v4070_v33 = vunpack.c.l.bf16 %v4023_v7  ;;  %v4071_v56 = vunpack.c.h.bf16 %v4023_v7 }
 0x413   : > { %v10167_v35 = vadd.f32 %v3817_v42, %v3729_v38  ;;  %v3879_v41 = vpop.f32.mrf.mxu0  ;;  %v3968_v53 = vpop.f32.mrf.mxu1 }
 0x414   : > { %v3880_v58 = vadd.f32 %v3879_v41, %v9818_v59  ;;  %v4198_v62 = vmul.f32 0.010009766, %v4070_v33  ;;  %v4199_v17 = vmul.f32 0.010009766, %v4071_v56  ;;  %vm4134_vm14 = vcmp.gt.f32.partialorder %v4070_v33, 0.0 }
 0x415   : > { %4725 = vmatmul.bf16.gmra.mxu2 %v10161_v8  ;;  %4814 = vmatmul.bf16.gmra.mxu3 %v10163_v61  ;;  %vm4135_vm15 = vcmp.gt.f32.partialorder %v4071_v56, 0.0  ;;  %v4427_v56 = vunpack.c.l.b16 %v4310_v54  ;;  %v4428_v41 = vunpack.c.h.b16 %v4310_v54 }
 0x416   : > { %v3969_v50 = vadd.f32 %v3968_v53, %v3880_v58  ;;  %4873 = vmatmul.bf16.vlgmr.msra.gmra.mxu0 %v9912_v51  ;;  %4962 = vmatmul.bf16.vlgmr.msra.gmra.mxu1 %v9914_v23  ;;  %v4247_v49 = vpack.c.bf16 %v4199_v17, %v4198_v62  ;;  %vm4279_vm2 = vmpackc.low %vm4135_vm15, %vm4134_vm14 }
 0x418   : > { %v4024_v27 = vpack.c.bf16 %v3969_v50, %v9942_v37  ;;  %v3731_v21 = vpop.f32.mrf.mxu2  ;;  %v3820_v57 = vpop.f32.mrf.mxu3  ;;  %v4311_v18 = vsel %vm4279_vm2, %v4023_v7, %v4247_v49  ;;  %v6908_v7 = vld [vmem:[%s10776_s6 + $0x58] sm:$0xff] }
 0x419   : > { %v3732_v4 = vadd.f32 %v3731_v21, %v9472_v39  ;;  %v4429_v42 = vunpack.c.l.b16 %v4311_v18  ;;  %v4430_v38 = vunpack.c.h.b16 %v4311_v18  ;;  %5809 = vmatpush.bf16.msra.mxu3 %v6908_v7 }
 0x41a   : > { %v4072_v53 = vunpack.c.l.bf16 %v4024_v27  ;;  %v4073_v55 = vunpack.c.h.bf16 %v4024_v27 }
 0x41b   : > { %v10188_v51 = vadd.f32 %v3820_v57, %v3732_v4  ;;  %v3881_v23 = vpop.f32.mrf.mxu0  ;;  %v3970_v33 = vpop.f32.mrf.mxu1  ;;  %v10191_v37 = vpack.c.b16 %v4429_v42, %v4427_v56  ;;  %v10193_v58 = vpack.c.b16 %v4430_v38, %v4428_v41 }
 0x41c   : > { %v3882_v26 = vadd.f32 %v3881_v23, %v9818_v59  ;;  %v4200_v62 = vmul.f32 0.010009766, %v4072_v53  ;;  %v4201_v17 = vmul.f32 0.010009766, %v4073_v55  ;;  %vm10205_vm3 = vcmp.gt.f32.partialorder %v4072_v53, 0.0 }
 0x41d   : > { %vm10209_vm4 = vcmp.gt.f32.partialorder %v4073_v55, 0.0 }
 0x41e   : > { %v3971_v34 = vadd.f32 %v3970_v33, %v3882_v26  ;;  %v4248_v56 = vpack.c.bf16 %v4201_v17, %v4200_v62  ;;  %vm4280_vm7 = vmpackc.low %vm10209_vm4, %vm10205_vm3 }
 0x420   : > { %v3733_v50 = vpop.f32.mrf.mxu2  ;;  %v3822_v49 = vpop.f32.mrf.mxu3  ;;  %v4025_v21 = vpack.c.bf16 %v3971_v34, %v9963_v5  ;;  %v4312_v62 = vsel %vm4280_vm7, %v4024_v27, %v4248_v56 }
 0x421   : > { %v3734_v57 = vadd.f32 %v3733_v50, %v9472_v39 }
 0x422   : > { %v4074_v54 = vunpack.c.l.bf16 %v4025_v21  ;;  %v4075_v4 = vunpack.c.h.bf16 %v4025_v21 }
 0x423   : > { %v10203_v18 = vadd.f32 %v3822_v49, %v3734_v57  ;;  %v3884_v42 = vpop.f32.mrf.mxu0  ;;  %v3973_v38 = vpop.f32.mrf.mxu1 }
 0x424   : > { %v3885_v41 = vadd.f32 %v3884_v42, %v9818_v59  ;;  %v4202_v5 = vmul.f32 0.010009766, %v4074_v54  ;;  %v4203_v26 = vmul.f32 0.010009766, %v4075_v4  ;;  %vm4138_vm5 = vcmp.gt.f32.partialorder %v4074_v54, 0.0 }
 0x425   : > { %4730 = vmatmul.bf16.gmra.mxu2 %v10191_v37  ;;  %4819 = vmatmul.bf16.gmra.mxu3 %v10193_v58  ;;  %vm4139_vm6 = vcmp.gt.f32.partialorder %v4075_v4, 0.0  ;;  %v4431_v4 = vunpack.c.l.b16 %v4312_v62  ;;  %v4432_v42 = vunpack.c.h.b16 %v4312_v62 }
 0x426   : > { %v3974_v43 = vadd.f32 %v3973_v38, %v3885_v41  ;;  %4878 = vmatmul.bf16.gmra.mxu0 %v9944_v48  ;;  %4967 = vmatmul.bf16.gmra.mxu1 %v9946_v12  ;;  %v4249_v53 = vpack.c.bf16 %v4203_v26, %v4202_v5  ;;  %vm4281_vm8 = vmpackc.low %vm4139_vm6, %vm4138_vm5 }
 0x428   : > { %v4026_v55 = vpack.c.bf16 %v3974_v43, %v10002_v29  ;;  %v3736_v7 = vpop.f32.mrf.mxu2  ;;  %v3825_v34 = vpop.f32.mrf.mxu3  ;;  %v4313_v50 = vsel %vm4281_vm8, %v4025_v21, %v4249_v53  ;;  %v10234_v43 = vld [vmem:[%s10777_s7 + $0x4] ss:$8 sm:$0x3] }
 0x429   : > { %v3737_v17 = vadd.f32 %v3736_v7, %v9472_v39  ;;  %v4433_v49 = vunpack.c.l.b16 %v4313_v50  ;;  %v4434_v57 = vunpack.c.h.b16 %v4313_v50 }
 0x42a   : > { %v4076_v38 = vunpack.c.l.bf16 %v4026_v55  ;;  %v4077_v23 = vunpack.c.h.bf16 %v4026_v55 }
 0x42b   : > { %v10224_v48 = vadd.f32 %v3825_v34, %v3737_v17  ;;  %v3886_v12 = vpop.f32.mrf.mxu0  ;;  %v3975_v54 = vpop.f32.mrf.mxu1  ;;  %v10227_v29 = vpack.c.b16 %v4433_v49, %v4431_v4  ;;  %v10229_v41 = vpack.c.b16 %v4434_v57, %v4432_v42  ;;  %v10241_v57 = vperm.slane %v10234_v43, 0 }
 0x42c   : > { %v3887_v33 = vadd.f32 %v3886_v12, %v9818_v59  ;;  %v4204_v56 = vmul.f32 0.010009766, %v4076_v38  ;;  %v4205_v5 = vmul.f32 0.010009766, %v4077_v23  ;;  %vm10243_vm9 = vcmp.gt.f32.partialorder %v4076_v38, 0.0 }
 0x42d   : > { %vm10247_vm10 = vcmp.gt.f32.partialorder %v4077_v23, 0.0 }
 0x42e   : > { %v3976_v27 = vadd.f32 %v3975_v54, %v3887_v33  ;;  %vm4282_vm0 = vmpackc.low %vm10247_vm10, %vm10243_vm9 }
 0x430   : > { %v3738_v21 = vpop.f32.mrf.mxu2  ;;  %v3827_v26 = vpop.f32.mrf.mxu3  ;;  %v4027_v53 = vpack.c.bf16 %v3976_v27, %v10011_v47  ;;  %v4250_v47 = vpack.c.bf16 %v4205_v5, %v4204_v56 }
 0x431   : > { %v3739_v7 = vadd.f32 %v3738_v21, %v9472_v39 }
 0x432   : > { %v4078_v34 = vunpack.c.l.bf16 %v4027_v53  ;;  %v4079_v62 = vunpack.c.h.bf16 %v4027_v53  ;;  %v4314_v5 = vsel %vm4282_vm0, %v4026_v55, %v4250_v47  ;;  %v6899_v55 = vld [vmem:[%s10776_s6 + $0x10] sm:$0xff] }
 0x433   : > { %v10238_v17 = vadd.f32 %v3827_v26, %v3739_v7  ;;  %v3889_v50 = vpop.f32.mrf.mxu0  ;;  %v3978_v49 = vpop.f32.mrf.mxu1  ;;  %5721 = vmatpush.bf16.msra.mxu2 %v6899_v55 }
 0x434   : > { %v3890_v39 = vadd.f32 %v3889_v50, %v9818_v59  ;;  %v4206_v4 = vmul.f32 0.010009766, %v4078_v34  ;;  %v4207_v42 = vmul.f32 0.010009766, %v4079_v62  ;;  %vm4142_vm11 = vcmp.gt.f32.partialorder %v4078_v34, 0.0 }
 0x435   : > { %4735 = vmatmul.bf16.gmra.mxu2 %v10227_v29  ;;  %4824 = vmatmul.bf16.gmra.mxu3 %v10229_v41  ;;  %vm4143_vm12 = vcmp.gt.f32.partialorder %v4079_v62, 0.0  ;;  %v4435_v50 = vunpack.c.l.b16 %v4314_v5 }
 0x436   : > { %v3979_v33 = vadd.f32 %v3978_v49, %v3890_v39  ;;  %4883 = vmatmul.bf16.gmra.mxu0 %v10005_v0  ;;  %4972 = vmatmul.bf16.gmra.mxu1 %v10007_v13  ;;  %v4251_v38 = vpack.c.bf16 %v4207_v42, %v4206_v4  ;;  %vm4283_vm13 = vmpackc.low %vm4143_vm12, %vm4142_vm11  ;;  %v4436_v49 = vunpack.c.h.b16 %v4314_v5 }
 0x438   : > { %v4028_v23 = vpack.c.bf16 %v3979_v33, %v10032_v24  ;;  %v4696_v27 = vpop.f32.mrf.mxu2  ;;  %v4785_v56 = vpop.f32.mrf.mxu3  ;;  %v4315_v26 = vsel %vm4283_vm13, %v4027_v53, %v4251_v38  ;;  %v6907_v53 = vld [vmem:[%s10776_s6 + $0x50] sm:$0xff] }
 0x439   : > { %v4697_v21 = vadd.f32 %v4696_v27, %v10241_v57  ;;  %v4437_v7 = vunpack.c.l.b16 %v4315_v26  ;;  %v4438_v34 = vunpack.c.h.b16 %v4315_v26  ;;  %5810 = vmatpush.bf16.msra.mxu3 %v6907_v53 }
 0x43a   : > { %v4080_v12 = vunpack.c.l.bf16 %v4028_v23  ;;  %v4081_v54 = vunpack.c.h.bf16 %v4028_v23 }
 0x43b   : > { %v10262_v0 = vadd.f32 %v4785_v56, %v4697_v21  ;;  %v3891_v13 = vpop.f32.mrf.mxu0  ;;  %v3980_v62 = vpop.f32.mrf.mxu1  ;;  %v10265_v24 = vpack.c.b16 %v4437_v7, %v4435_v50  ;;  %v10267_v4 = vpack.c.b16 %v4438_v34, %v4436_v49 }
 0x43c   : > { %v3892_v39 = vadd.f32 %v3891_v13, %v9818_v59  ;;  %v4208_v42 = vmul.f32 0.010009766, %v4080_v12  ;;  %v4209_v33 = vmul.f32 0.010009766, %v4081_v54  ;;  %vm10279_vm14 = vcmp.gt.f32.partialorder %v4080_v12, 0.0 }
 0x43d   : > { %vm10283_vm15 = vcmp.gt.f32.partialorder %v4081_v54, 0.0 }
 0x43e   : > { %v3981_v47 = vadd.f32 %v3980_v62, %v3892_v39  ;;  %v4252_v49 = vpack.c.bf16 %v4209_v33, %v4208_v42  ;;  %vm4284_vm3 = vmpackc.low %vm10283_vm15, %vm10279_vm14 }
 0x440   : > { %v4698_v38 = vpop.f32.mrf.mxu2  ;;  %v4787_v27 = vpop.f32.mrf.mxu3  ;;  %v4029_v56 = vpack.c.bf16 %v3981_v47, %v10053_v1  ;;  %v4316_v33 = vsel %vm4284_vm3, %v4028_v23, %v4252_v49 }
 0x441   : > { %v4699_v5 = vadd.f32 %v4698_v38, %v10241_v57 }
 0x442   : > { %v4082_v21 = vunpack.c.l.bf16 %v4029_v56  ;;  %v4083_v26 = vunpack.c.h.bf16 %v4029_v56 }
 0x443   : > { %v10277_v7 = vadd.f32 %v4787_v27, %v4699_v5  ;;  %v3894_v34 = vpop.f32.mrf.mxu0  ;;  %v3983_v13 = vpop.f32.mrf.mxu1 }
 0x444   : > { %v3895_v39 = vadd.f32 %v3894_v34, %v9818_v59  ;;  %v4210_v1 = vmul.f32 0.010009766, %v4082_v21  ;;  %v4211_v55 = vmul.f32 0.010009766, %v4083_v26  ;;  %vm4146_vm1 = vcmp.gt.f32.partialorder %v4082_v21, 0.0 }
 0x445   : > { %4740 = vmatmul.bf16.gmra.mxu2 %v10265_v24  ;;  %4829 = vmatmul.bf16.gmra.mxu3 %v10267_v4  ;;  %vm4147_vm2 = vcmp.gt.f32.partialorder %v4083_v26, 0.0  ;;  %v4439_v34 = vunpack.c.l.b16 %v4316_v33 }
 0x446   : > { %v3984_v53 = vadd.f32 %v3983_v13, %v3895_v39  ;;  %4888 = vmatmul.bf16.gmra.mxu0 %v10035_v20  ;;  %4977 = vmatmul.bf16.gmra.mxu1 %v10037_v28  ;;  %v4253_v12 = vpack.c.bf16 %v4211_v55, %v4210_v1  ;;  %vm4285_vm4 = vmpackc.low %vm4147_vm2, %vm4146_vm1  ;;  %v4440_v13 = vunpack.c.h.b16 %v4316_v33 }
 0x448   : > { %v4030_v54 = vpack.c.bf16 %v3984_v53, %v10092_v63  ;;  %v4701_v47 = vpop.f32.mrf.mxu2  ;;  %v4790_v42 = vpop.f32.mrf.mxu3  ;;  %v4317_v27 = vsel %vm4285_vm4, %v4029_v56, %v4253_v12 }
 0x449   : > { %v4702_v38 = vadd.f32 %v4701_v47, %v10241_v57  ;;  %v4441_v5 = vunpack.c.l.b16 %v4317_v27  ;;  %v4442_v21 = vunpack.c.h.b16 %v4317_v27 }
 0x44a   : > { %v4084_v50 = vunpack.c.l.bf16 %v4030_v54  ;;  %v4085_v62 = vunpack.c.h.bf16 %v4030_v54 }
 0x44b   : > { %v10298_v20 = vadd.f32 %v4790_v42, %v4702_v38  ;;  %v3896_v28 = vpop.f32.mrf.mxu0  ;;  %v3985_v26 = vpop.f32.mrf.mxu1  ;;  %v10301_v63 = vpack.c.b16 %v4441_v5, %v4439_v34  ;;  %v10303_v1 = vpack.c.b16 %v4442_v21, %v4440_v13 }
 0x44c   : > { %v3897_v39 = vadd.f32 %v3896_v28, %v9818_v59  ;;  %v4212_v49 = vmul.f32 0.010009766, %v4084_v50  ;;  %v4213_v55 = vmul.f32 0.010009766, %v4085_v62  ;;  %vm10309_vm5 = vcmp.gt.f32.partialorder %v4084_v50, 0.0 }
 0x44d   : > { %vm10313_vm6 = vcmp.gt.f32.partialorder %v4085_v62, 0.0 }
 0x44e   : > { %v3986_v23 = vadd.f32 %v3985_v26, %v3897_v39  ;;  %v4254_v28 = vpack.c.bf16 %v4213_v55, %v4212_v49  ;;  %vm4286_vm9 = vmpackc.low %vm10313_vm6, %vm10309_vm5 }
 0x450   : > { %v4703_v56 = vpop.f32.mrf.mxu2  ;;  %v4792_v53 = vpop.f32.mrf.mxu3  ;;  %v4031_v12 = vpack.c.bf16 %v3986_v23, %v10101_v25  ;;  %v4318_v49 = vsel %vm4286_vm9, %v4030_v54, %v4254_v28  ;;  %v6898_v54 = vld [vmem:[%s10776_s6 + $0x8] sm:$0xff] }
 0x451   : > { %v4704_v47 = vadd.f32 %v4703_v56, %v10241_v57  ;;  %5722 = vmatpush.bf16.msra.mxu2 %v6898_v54 }
 0x452   : > { %v4086_v42 = vunpack.c.l.bf16 %v4031_v12  ;;  %v4087_v38 = vunpack.c.h.bf16 %v4031_v12 }
 0x453   : > { %v10307_v33 = vadd.f32 %v4792_v53, %v4704_v47  ;;  %v3899_v27 = vpop.f32.mrf.mxu0  ;;  %v3988_v44 = vpop.f32.mrf.mxu1 }
 0x454   : > { %v3900_v26 = vadd.f32 %v3899_v27, %v9818_v59  ;;  %v4214_v25 = vmul.f32 0.010009766, %v4086_v42  ;;  %v4215_v34 = vmul.f32 0.010009766, %v4087_v38  ;;  %vm4150_vm7 = vcmp.gt.f32.partialorder %v4086_v42, 0.0 }
 0x455   : > { %4745 = vmatmul.bf16.gmra.mxu2 %v10301_v63  ;;  %4834 = vmatmul.bf16.gmra.mxu3 %v10303_v1  ;;  %vm4151_vm8 = vcmp.gt.f32.partialorder %v4087_v38, 0.0  ;;  %v4443_v42 = vunpack.c.l.b16 %v4318_v49  ;;  %v4444_v38 = vunpack.c.h.b16 %v4318_v49 }
 0x456   : > { %v3989_v13 = vadd.f32 %v3988_v44, %v3900_v26  ;;  %4893 = vmatmul.bf16.gmra.mxu0 %v10095_v32  ;;  %4982 = vmatmul.bf16.gmra.mxu1 %v10097_v15  ;;  %v4255_v50 = vpack.c.bf16 %v4215_v34, %v4214_v25  ;;  %vm4287_vm10 = vmpackc.low %vm4151_vm8, %vm4150_vm7 }
 0x458   : > { %v4032_v62 = vpack.c.bf16 %v3989_v13, %v10122_v10  ;;  %v4706_v39 = vpop.f32.mrf.mxu2  ;;  %v4795_v23 = vpop.f32.mrf.mxu3  ;;  %v4319_v56 = vsel %vm4287_vm10, %v4031_v12, %v4255_v50  ;;  %v6906_v12 = vld [vmem:[%s10776_s6 + $0x48] sm:$0xff] }
 0x459   : > { %v4707_v55 = vadd.f32 %v4706_v39, %v10241_v57  ;;  %v4445_v44 = vunpack.c.l.b16 %v4319_v56  ;;  %v4446_v53 = vunpack.c.h.b16 %v4319_v56  ;;  %5811 = vmatpush.bf16.msra.mxu3 %v6906_v12 }
 0x45a   : > { %v4088_v27 = vunpack.c.l.bf16 %v4032_v62  ;;  %v4089_v5 = vunpack.c.h.bf16 %v4032_v62 }
 0x45b   : > { %v10328_v32 = vadd.f32 %v4795_v23, %v4707_v55  ;;  %v3901_v15 = vpop.f32.mrf.mxu0  ;;  %v3990_v47 = vpop.f32.mrf.mxu1  ;;  %v10331_v10 = vpack.c.b16 %v4445_v44, %v4443_v42  ;;  %v10333_v26 = vpack.c.b16 %v4446_v53, %v4444_v38 }
 0x45c   : > { %v3902_v21 = vadd.f32 %v3901_v15, %v9818_v59  ;;  %v4216_v25 = vmul.f32 0.010009766, %v4088_v27  ;;  %v4217_v34 = vmul.f32 0.010009766, %v4089_v5  ;;  %vm10345_vm11 = vcmp.gt.f32.partialorder %v4088_v27, 0.0 }
 0x45d   : > { %vm10349_vm12 = vcmp.gt.f32.partialorder %v4089_v5, 0.0 }
 0x45e   : > { %v3991_v28 = vadd.f32 %v3990_v47, %v3902_v21  ;;  %v4256_v42 = vpack.c.bf16 %v4217_v34, %v4216_v25  ;;  %vm4288_vm14 = vmpackc.low %vm10349_vm12, %vm10345_vm11 }
 0x460   : > { %v4708_v13 = vpop.f32.mrf.mxu2  ;;  %v4797_v50 = vpop.f32.mrf.mxu3  ;;  %v4033_v39 = vpack.c.bf16 %v3991_v28, %v10137_v11  ;;  %v4320_v25 = vsel %vm4288_vm14, %v4032_v62, %v4256_v42 }
 0x461   : > { %v4709_v23 = vadd.f32 %v4708_v13, %v10241_v57 }
 0x462   : > { %v4090_v49 = vunpack.c.l.bf16 %v4033_v39  ;;  %v4091_v55 = vunpack.c.h.bf16 %v4033_v39 }
 0x463   : > { %v10343_v56 = vadd.f32 %v4797_v50, %v4709_v23  ;;  %v3904_v44 = vpop.f32.mrf.mxu0  ;;  %v3993_v53 = vpop.f32.mrf.mxu1 }
 0x464   : > { %v3905_v38 = vadd.f32 %v3904_v44, %v9818_v59  ;;  %v4218_v11 = vmul.f32 0.010009766, %v4090_v49  ;;  %v4219_v21 = vmul.f32 0.010009766, %v4091_v55  ;;  %vm4154_vm0 = vcmp.gt.f32.partialorder %v4090_v49, 0.0 }
 0x465   : > { %4750 = vmatmul.bf16.gmra.mxu2 %v10331_v10  ;;  %4839 = vmatmul.bf16.gmra.mxu3 %v10333_v26  ;;  %vm4155_vm13 = vcmp.gt.f32.partialorder %v4091_v55, 0.0  ;;  %v4447_v55 = vunpack.c.l.b16 %v4320_v25  ;;  %v4448_v44 = vunpack.c.h.b16 %v4320_v25 }
 0x466   : > { %v3994_v54 = vadd.f32 %v3993_v53, %v3905_v38  ;;  %4898 = vmatmul.bf16.gmra.mxu0 %v10125_v31  ;;  %4987 = vmatmul.bf16.gmra.mxu1 %v10127_v9  ;;  %v4257_v27 = vpack.c.bf16 %v4219_v21, %v4218_v11  ;;  %vm4289_vm15 = vmpackc.low %vm4155_vm13, %vm4154_vm0 }
 0x468   : > { %v4034_v5 = vpack.c.bf16 %v3994_v54, %v10158_v14  ;;  %v4711_v12 = vpop.f32.mrf.mxu2  ;;  %v4800_v28 = vpop.f32.mrf.mxu3  ;;  %v4321_v13 = vsel %vm4289_vm15, %v4033_v39, %v4257_v27 }
 0x469   : > { %v4712_v34 = vadd.f32 %v4711_v12, %v10241_v57  ;;  %v4449_v50 = vunpack.c.l.b16 %v4321_v13  ;;  %v4450_v23 = vunpack.c.h.b16 %v4321_v13 }
 0x46a   : > { %v4092_v53 = vunpack.c.l.bf16 %v4034_v5  ;;  %v4093_v15 = vunpack.c.h.bf16 %v4034_v5 }
 0x46b   : > { %v10364_v31 = vadd.f32 %v4800_v28, %v4712_v34  ;;  %v3906_v9 = vpop.f32.mrf.mxu0  ;;  %v3995_v49 = vpop.f32.mrf.mxu1  ;;  %v10367_v14 = vpack.c.b16 %v4449_v50, %v4447_v55  ;;  %v10369_v38 = vpack.c.b16 %v4450_v23, %v4448_v44 }
 0x46c   : > { %v3907_v47 = vadd.f32 %v3906_v9, %v9818_v59  ;;  %v4220_v42 = vmul.f32 0.010009766, %v4092_v53  ;;  %v4221_v11 = vmul.f32 0.010009766, %v4093_v15  ;;  %vm10375_vm1 = vcmp.gt.f32.partialorder %v4092_v53, 0.0 }
 0x46d   : > { %vm10379_vm2 = vcmp.gt.f32.partialorder %v4093_v15, 0.0 }
 0x46e   : > { %v3996_v62 = vadd.f32 %v3995_v49, %v3907_v47  ;;  %v4258_v9 = vpack.c.bf16 %v4221_v11, %v4220_v42  ;;  %vm4290_vm5 = vmpackc.low %vm10379_vm2, %vm10375_vm1 }
 0x470   : > { %v4713_v39 = vpop.f32.mrf.mxu2  ;;  %v4802_v21 = vpop.f32.mrf.mxu3  ;;  %v4035_v54 = vpack.c.bf16 %v3996_v62, %v10167_v35  ;;  %v4322_v42 = vsel %vm4290_vm5, %v4034_v5, %v4258_v9 }
 0x471   : > { %v4714_v27 = vadd.f32 %v4713_v39, %v10241_v57 }
 0x472   : > { %v4094_v12 = vunpack.c.l.bf16 %v4035_v54  ;;  %v4095_v28 = vunpack.c.h.bf16 %v4035_v54 }
 0x473   : > { %v10373_v25 = vadd.f32 %v4802_v21, %v4714_v27  ;;  %v3909_v34 = vpop.f32.mrf.mxu0  ;;  %v3998_v13 = vpop.f32.mrf.mxu1 }
 0x474   : > { %v3910_v49 = vadd.f32 %v3909_v34, %v9818_v59  ;;  %v4222_v35 = vmul.f32 0.010009766, %v4094_v12  ;;  %v4223_v55 = vmul.f32 0.010009766, %v4095_v28  ;;  %vm4158_vm3 = vcmp.gt.f32.partialorder %v4094_v12, 0.0 }
 0x475   : > { %4755 = vmatmul.bf16.gmra.mxu2 %v10367_v14  ;;  %4844 = vmatmul.bf16.gmra.mxu3 %v10369_v38  ;;  %vm4159_vm4 = vcmp.gt.f32.partialorder %v4095_v28, 0.0  ;;  %v4451_v28 = vunpack.c.l.b16 %v4322_v42  ;;  %v4452_v34 = vunpack.c.h.b16 %v4322_v42 }
 0x476   : > { %v3999_v44 = vadd.f32 %v3998_v13, %v3910_v49  ;;  %4903 = vmatmul.bf16.gmra.mxu0 %v10161_v8  ;;  %4992 = vmatmul.bf16.gmra.mxu1 %v10163_v61  ;;  %v4259_v53 = vpack.c.bf16 %v4223_v55, %v4222_v35  ;;  %vm4291_vm6 = vmpackc.low %vm4159_vm4, %vm4158_vm3 }
 0x478   : > { %v4036_v15 = vpack.c.bf16 %v3999_v44, %v10188_v51  ;;  %v4716_v47 = vpop.f32.mrf.mxu2  ;;  %v4805_v62 = vpop.f32.mrf.mxu3  ;;  %v4323_v39 = vsel %vm4291_vm6, %v4035_v54, %v4259_v53 }
 0x479   : > { %v4717_v11 = vadd.f32 %v4716_v47, %v10241_v57  ;;  %v4453_v21 = vunpack.c.l.b16 %v4323_v39  ;;  %v4454_v27 = vunpack.c.h.b16 %v4323_v39 }
 0x47a   : > { %v4096_v13 = vunpack.c.l.bf16 %v4036_v15  ;;  %v4097_v50 = vunpack.c.h.bf16 %v4036_v15 }
 0x47b   : > { %v10394_v8 = vadd.f32 %v4805_v62, %v4717_v11  ;;  %v3911_v61 = vpop.f32.mrf.mxu0  ;;  %v4000_v12 = vpop.f32.mrf.mxu1  ;;  %v10397_v51 = vpack.c.b16 %v4453_v21, %v4451_v28  ;;  %v10399_v49 = vpack.c.b16 %v4454_v27, %v4452_v34  ;;  %v6897_v21 = vld [vmem:[%s10776_s6] sm:$0xff] }
 0x47c   : > { %v3912_v23 = vadd.f32 %v3911_v61, %v9818_v59  ;;  %v4224_v9 = vmul.f32 0.010009766, %v4096_v13  ;;  %v4225_v35 = vmul.f32 0.010009766, %v4097_v50  ;;  %v6905_v27 = vld [vmem:[%s10776_s6 + $0x40] sm:$0xff]  ;;  %vm10411_vm7 = vcmp.gt.f32.partialorder %v4096_v13, 0.0  ;;  %5723 = vmatpush.bf16.msra.mxu2 %v6897_v21 }
 0x47d   : > { %vm10415_vm8 = vcmp.gt.f32.partialorder %v4097_v50, 0.0  ;;  %5812 = vmatpush.bf16.msra.mxu3 %v6905_v27 }
 0x47e   : > { %v4001_v5 = vadd.f32 %v4000_v12, %v3912_v23  ;;  %v4260_v12 = vpack.c.bf16 %v4225_v35, %v4224_v9  ;;  %vm4292_vm11 = vmpackc.low %vm10415_vm8, %vm10411_vm7 }
 0x480   : > { %v4718_v54 = vpop.f32.mrf.mxu2  ;;  %v4807_v55 = vpop.f32.mrf.mxu3  ;;  %v4037_v44 = vpack.c.bf16 %v4001_v5, %v10203_v18 }
 0x481   : > { %v4719_v53 = vadd.f32 %v4718_v54, %v10241_v57 }
 0x482   : > { %v4098_v47 = vunpack.c.l.bf16 %v4037_v44  ;;  %v4099_v62 = vunpack.c.h.bf16 %v4037_v44 }
 0x483   : > { %v10403_v42 = vadd.f32 %v4807_v55, %v4719_v53  ;;  %v3914_v11 = vpop.f32.mrf.mxu0  ;;  %v4003_v39 = vpop.f32.mrf.mxu1  ;;  %v4324_v55 = vsel %vm4292_vm11, %v4036_v15, %v4260_v12 }
 0x484   : > { %v3915_v28 = vadd.f32 %v3914_v11, %v9818_v59  ;;  %v4226_v34 = vmul.f32 0.010009766, %v4098_v47  ;;  %v4227_v23 = vmul.f32 0.010009766, %v4099_v62  ;;  %vm10422_vm9 = vcmp.gt.f32.partialorder %v4098_v47, 0.0 }
 0x485   : > { %4760 = vmatmul.bf16.gmra.mxu2 %v10397_v51  ;;  %4849 = vmatmul.bf16.gmra.mxu3 %v10399_v49  ;;  %vm4163_vm10 = vcmp.gt.f32.partialorder %v4099_v62, 0.0  ;;  %v4455_v61 = vunpack.c.l.b16 %v4324_v55  ;;  %v4456_v21 = vunpack.c.h.b16 %v4324_v55 }
 0x486   : > { %v4004_v13 = vadd.f32 %v4003_v39, %v3915_v28  ;;  %4908 = vmatmul.bf16.gmra.mxu0 %v10191_v37  ;;  %4997 = vmatmul.bf16.gmra.mxu1 %v10193_v58  ;;  %v4261_v50 = vpack.c.bf16 %v4227_v23, %v4226_v34  ;;  %vm4293_vm12 = vmpackc.low %vm4163_vm10, %vm10422_vm9 }
 0x488   : > { %v4038_v9 = vpack.c.bf16 %v4004_v13, %v10224_v48  ;;  %v4721_v35 = vpop.f32.mrf.mxu2  ;;  %v4810_v54 = vpop.f32.mrf.mxu3  ;;  %v4325_v53 = vsel %vm4293_vm12, %v4037_v44, %v4261_v50  ;;  %v10444_v13 = vperm.slane %v10234_v43, 1 }
 0x489   : > { %v4722_v37 = vadd.f32 %v4721_v35, %v10241_v57  ;;  %v4457_v58 = vunpack.c.l.b16 %v4325_v53  ;;  %v4458_v47 = vunpack.c.h.b16 %v4325_v53 }
 0x48a   : > { %v4100_v27 = vunpack.c.l.bf16 %v4038_v9  ;;  %v4101_v18 = vunpack.c.h.bf16 %v4038_v9 }
 0x48b   : > { %v10436_v62 = vadd.f32 %v4810_v54, %v4722_v37  ;;  %v3916_v11 = vpop.f32.mrf.mxu0  ;;  %v4005_v39 = vpop.f32.mrf.mxu1  ;;  %v10439_v28 = vpack.c.b16 %v4457_v58, %v4455_v61  ;;  %v10441_v34 = vpack.c.b16 %v4458_v47, %v4456_v21 }
 0x48c   : > { %v3917_v48 = vadd.f32 %v3916_v11, %v9818_v59  ;;  %v4228_v12 = vmul.f32 0.010009766, %v4100_v27  ;;  %v4229_v23 = vmul.f32 0.010009766, %v4101_v18  ;;  %vm10450_vm0 = vcmp.gt.f32.partialorder %v4100_v27, 0.0 }
 0x48d   : > { %vm10454_vm13 = vcmp.gt.f32.partialorder %v4101_v18, 0.0 }
 0x48e   : > { %v4006_v15 = vadd.f32 %v4005_v39, %v3917_v48  ;;  %v4262_v43 = vpack.c.bf16 %v4229_v23, %v4228_v12  ;;  %vm4294_vm1 = vmpackc.low %vm10454_vm13, %vm10450_vm0 }
 0x490   : > { %v4723_v44 = vpop.f32.mrf.mxu2  ;;  %v4812_v5 = vpop.f32.mrf.mxu3  ;;  %v4039_v50 = vpack.c.bf16 %v4006_v15, %v10238_v17  ;;  %v4326_v15 = vsel %vm4294_vm1, %v4038_v9, %v4262_v43 }
 0x491   : > { %v4724_v35 = vadd.f32 %v4723_v44, %v10241_v57 }
 0x492   : > { %v4102_v54 = vunpack.c.l.bf16 %v4039_v50  ;;  %v4103_v55 = vunpack.c.h.bf16 %v4039_v50 }
 0x493   : > { %v10448_v37 = vadd.f32 %v4812_v5, %v4724_v35  ;;  %v4874_v59 = vpop.f32.mrf.mxu0  ;;  %v4963_v53 = vpop.f32.mrf.mxu1 }
 0x494   : > { %v4875_v11 = vadd.f32 %v4874_v59, %v10444_v13  ;;  %v4230_v17 = vmul.f32 0.010009766, %v4102_v54  ;;  %v4231_v39 = vmul.f32 0.010009766, %v4103_v55  ;;  %vm4166_vm14 = vcmp.gt.f32.partialorder %v4102_v54, 0.0 }
 0x495   : > { %4765 = vmatmul.bf16.gmra.mxu2 %v10439_v28  ;;  %4854 = vmatmul.bf16.gmra.mxu3 %v10441_v34  ;;  %vm4167_vm15 = vcmp.gt.f32.partialorder %v4103_v55, 0.0  ;;  %v4459_v59 = vunpack.c.l.b16 %v4326_v15 }
 0x496   : > { %v4964_v61 = vadd.f32 %v4963_v53, %v4875_v11  ;;  %4913 = vmatmul.bf16.gmra.mxu0 %v10227_v29  ;;  %5002 = vmatmul.bf16.gmra.mxu1 %v10229_v41  ;;  %v4263_v21 = vpack.c.bf16 %v4231_v39, %v4230_v17  ;;  %vm4295_vm2 = vmpackc.low %vm4167_vm15, %vm4166_vm14  ;;  %v4460_v53 = vunpack.c.h.b16 %v4326_v15  ;;  %v5427_v39 = vunpack.c.l.bf16 %v8958_v40 }
 0x498   : > { %v5043_v27 = vpack.c.bf16 %v4964_v61, %v10262_v0  ;;  %v4726_v18 = vpop.f32.mrf.mxu2  ;;  %v4815_v48 = vpop.f32.mrf.mxu3  ;;  %v4327_v23 = vsel %vm4295_vm2, %v4039_v50, %v4263_v21  ;;  %v5428_v61 = vunpack.c.h.bf16 %v8958_v40 }
 0x499   : > { %v4727_v12 = vadd.f32 %v4726_v18, %v10241_v57  ;;  %v4461_v29 = vunpack.c.l.b16 %v4327_v23  ;;  %v4462_v35 = vunpack.c.h.b16 %v4327_v23 }
 0x49a   : > { %v5075_v44 = vunpack.c.l.bf16 %v5043_v27  ;;  %v5076_v5 = vunpack.c.h.bf16 %v5043_v27 }
 0x49b   : > { %v10469_v41 = vadd.f32 %v4815_v48, %v4727_v12  ;;  %v4876_v54 = vpop.f32.mrf.mxu0  ;;  %v4965_v55 = vpop.f32.mrf.mxu1  ;;  %v10472_v9 = vpack.c.b16 %v4461_v29, %v4459_v59  ;;  %v10474_v43 = vpack.c.b16 %v4462_v35, %v4460_v53 }
 0x49c   : > { %vm5139_vm3 = vcmp.gt.f32.partialorder %v5075_v44, 0.0  ;;  %vm5140_vm4 = vcmp.gt.f32.partialorder %v5076_v5, 0.0  ;;  %v5203_v0 = vmul.f32 0.010009766, %v5075_v44  ;;  %v5204_v58 = vmul.f32 0.010009766, %v5076_v5 }
 0x49d   : > { %v4877_v47 = vadd.f32 %v4876_v54, %v10444_v13  ;;  %vm5299_vm5 = vmpackc.low %vm5140_vm4, %vm5139_vm3 }
 0x49e   : > { %v5267_v50 = vpack.c.bf16 %v5204_v58, %v5203_v0 }
 0x49f   : > { %v4966_v11 = vadd.f32 %v4965_v55, %v4877_v47 }
 0x4a0   : > { %v5331_v17 = vsel %vm5299_vm5, %v5043_v27, %v5267_v50  ;;  %v4728_v21 = vpop.f32.mrf.mxu2  ;;  %v4817_v18 = vpop.f32.mrf.mxu3 }
 0x4a1   : > { %v5363_v48 = vunpack.c.l.bf16 %v5331_v17  ;;  %v5364_v15 = vunpack.c.h.bf16 %v5331_v17  ;;  %v5044_v12 = vpack.c.bf16 %v4966_v11, %v10277_v7  ;;  %v4729_v23 = vadd.f32 %v4728_v21, %v10241_v57 }
 0x4a2   : > { %v5429_v17 = vunpack.c.l.bf16 %v9009_v6 }
 0x4a3   : > { %v10480_v44 = vadd.f32 %v5427_v39, %v5363_v48  ;;  %v10482_v5 = vadd.f32 %v5428_v61, %v5364_v15  ;;  %v5077_v29 = vunpack.c.l.bf16 %v5044_v12  ;;  %v5078_v35 = vunpack.c.h.bf16 %v5044_v12  ;;  %v4879_v54 = vpop.f32.mrf.mxu0  ;;  %v4968_v27 = vpop.f32.mrf.mxu1 }
 0x4a4   : > { %v10484_v55 = vadd.f32 %v4817_v18, %v4729_v23  ;;  %v4880_v40 = vadd.f32 %v4879_v54, %v10444_v13  ;;  %v5430_v39 = vunpack.c.h.bf16 %v9009_v6 }
 0x4a5   : > { %vm5141_vm6 = vcmp.gt.f32.partialorder %v5077_v29, 0.0  ;;  %vm5142_vm7 = vcmp.gt.f32.partialorder %v5078_v35, 0.0  ;;  %v5205_v59 = vmul.f32 0.010009766, %v5077_v29  ;;  %v5206_v53 = vmul.f32 0.010009766, %v5078_v35  ;;  %4770 = vmatmul.bf16.gmra.mxu2 %v10472_v9  ;;  %4859 = vmatmul.bf16.gmra.mxu3 %v10474_v43 }
 0x4a6   : > { %v4969_v7 = vadd.f32 %v4968_v27, %v4880_v40  ;;  %4918 = vmatmul.bf16.gmra.mxu0 %v10265_v24  ;;  %5007 = vmatmul.bf16.gmra.mxu1 %v10267_v4  ;;  %vm5300_vm8 = vmpackc.low %vm5142_vm7, %vm5141_vm6 }
 0x4a7   : > { %v5268_v0 = vpack.c.bf16 %v5206_v53, %v5205_v59 }
 0x4a8   : > { %v5045_v58 = vpack.c.bf16 %v4969_v7, %v10298_v20  ;;  %v4731_v47 = vpop.f32.mrf.mxu2  ;;  %v4820_v50 = vpop.f32.mrf.mxu3 }
 0x4a9   : > { %v5332_v11 = vsel %vm5300_vm8, %v5044_v12, %v5268_v0  ;;  %v4732_v61 = vadd.f32 %v4731_v47, %v10241_v57 }
 0x4aa   : > { %v5365_v21 = vunpack.c.l.bf16 %v5332_v11  ;;  %v5366_v18 = vunpack.c.h.bf16 %v5332_v11  ;;  %v5079_v48 = vunpack.c.l.bf16 %v5045_v58  ;;  %v5080_v15 = vunpack.c.h.bf16 %v5045_v58 }
 0x4ab   : > { %v10495_v24 = vadd.f32 %v4820_v50, %v4732_v61  ;;  %v4881_v4 = vpop.f32.mrf.mxu0  ;;  %v4970_v23 = vpop.f32.mrf.mxu1  ;;  %v5432_v61 = vunpack.c.h.bf16 %v9034_v22 }
 0x4ac   : > { %v5493_v29 = vadd.f32 %v5429_v17, %v5365_v21  ;;  %v5494_v35 = vadd.f32 %v5430_v39, %v5366_v18  ;;  %vm5143_vm9 = vcmp.gt.f32.partialorder %v5079_v48, 0.0  ;;  %vm5144_vm10 = vcmp.gt.f32.partialorder %v5080_v15, 0.0 }
 0x4ad   : > { %v5207_v20 = vmul.f32 0.010009766, %v5079_v48  ;;  %v5208_v12 = vmul.f32 0.010009766, %v5080_v15  ;;  %v4882_v54 = vadd.f32 %v4881_v4, %v10444_v13  ;;  %vm5301_vm11 = vmpackc.low %vm5144_vm10, %vm5143_vm9  ;;  %v5431_v17 = vunpack.c.l.bf16 %v9034_v22 }
 0x4ae   : > { %v5555_v6 = vpack.c.bf16 %v5493_v29, %v10480_v44  ;;  %v5556_v27 = vpack.c.bf16 %v5494_v35, %v10482_v5 }
 0x4af   : > { %v5269_v40 = vpack.c.bf16 %v5208_v12, %v5207_v20  ;;  %v4971_v59 = vadd.f32 %v4970_v23, %v4882_v54 }
 0x4b0   : > { %v4733_v53 = vpop.f32.mrf.mxu2  ;;  %v4822_v7 = vpop.f32.mrf.mxu3 }
 0x4b1   : > { %v5333_v0 = vsel %vm5301_vm11, %v5045_v58, %v5269_v40  ;;  %v5046_v47 = vpack.c.bf16 %v4971_v59, %v10307_v33  ;;  %v4734_v50 = vadd.f32 %v4733_v53, %v10241_v57 }
 0x4b2   : > { %v5367_v11 = vunpack.c.l.bf16 %v5333_v0  ;;  %v5368_v39 = vunpack.c.h.bf16 %v5333_v0 }
 0x4b3   : > { %v5081_v21 = vunpack.c.l.bf16 %v5046_v47  ;;  %v5082_v44 = vunpack.c.h.bf16 %v5046_v47  ;;  %v10504_v18 = vadd.f32 %v4822_v7, %v4734_v50  ;;  %v4884_v5 = vpop.f32.mrf.mxu0  ;;  %v4973_v48 = vpop.f32.mrf.mxu1 }
 0x4b4   : > { %v4885_v15 = vadd.f32 %v4884_v5, %v10444_v13  ;;  %v5495_v4 = vadd.f32 %v5431_v17, %v5367_v11  ;;  %v5496_v58 = vadd.f32 %v5432_v61, %v5368_v39 }
 0x4b5   : > { %vm5145_vm12 = vcmp.gt.f32.partialorder %v5081_v21, 0.0  ;;  %vm5146_vm0 = vcmp.gt.f32.partialorder %v5082_v44, 0.0  ;;  %v5209_v33 = vmul.f32 0.010009766, %v5081_v21  ;;  %v5210_v23 = vmul.f32 0.010009766, %v5082_v44  ;;  %5724 = vmatmul.bf16.vlgmr.msra.gmra.mxu2 %v5555_v6  ;;  %5813 = vmatmul.bf16.vlgmr.msra.gmra.mxu3 %v5556_v27 }
 0x4b6   : > { %v4974_v29 = vadd.f32 %v4973_v48, %v4885_v15  ;;  %4923 = vmatmul.bf16.gmra.mxu0 %v10301_v63  ;;  %5012 = vmatmul.bf16.gmra.mxu1 %v10303_v1  ;;  %vm5302_vm13 = vmpackc.low %vm5146_vm0, %vm5145_vm12  ;;  %v5433_v63 = vunpack.c.l.bf16 %v9049_v19  ;;  %v5434_v1 = vunpack.c.h.bf16 %v9049_v19 }
 0x4b7   : > { %v5270_v22 = vpack.c.bf16 %v5210_v23, %v5209_v33  ;;  %v5435_v23 = vunpack.c.l.bf16 %v9064_v45 }
 0x4b8   : > { %v5047_v35 = vpack.c.bf16 %v4974_v29, %v10328_v32  ;;  %v4736_v20 = vpop.f32.mrf.mxu2  ;;  %v4825_v12 = vpop.f32.mrf.mxu3 }
 0x4b9   : > { %v5334_v54 = vsel %vm5302_vm13, %v5046_v47, %v5270_v22  ;;  %v4737_v40 = vadd.f32 %v4736_v20, %v10241_v57 }
 0x4ba   : > { %v5083_v59 = vunpack.c.l.bf16 %v5047_v35  ;;  %v5084_v53 = vunpack.c.h.bf16 %v5047_v35  ;;  %v5369_v7 = vunpack.c.l.bf16 %v5334_v54  ;;  %v5370_v0 = vunpack.c.h.bf16 %v5334_v54 }
 0x4bb   : > { %v10511_v6 = vadd.f32 %v4825_v12, %v4737_v40  ;;  %v4886_v27 = vpop.f32.mrf.mxu0  ;;  %v4975_v50 = vpop.f32.mrf.mxu1  ;;  %v5436_v12 = vunpack.c.h.bf16 %v9064_v45 }
 0x4bc   : > { %vm5147_vm14 = vcmp.gt.f32.partialorder %v5083_v59, 0.0  ;;  %vm5148_vm15 = vcmp.gt.f32.partialorder %v5084_v53, 0.0  ;;  %v5211_v32 = vmul.f32 0.010009766, %v5083_v59  ;;  %v5212_v11 = vmul.f32 0.010009766, %v5084_v53 }
 0x4bd   : > { %v4887_v47 = vadd.f32 %v4886_v27, %v10444_v13  ;;  %v5497_v17 = vadd.f32 %v5433_v63, %v5369_v7  ;;  %v5498_v39 = vadd.f32 %v5434_v1, %v5370_v0  ;;  %vm5303_vm1 = vmpackc.low %vm5148_vm15, %vm5147_vm14 }
 0x4be   : > { %v5271_v61 = vpack.c.bf16 %v5212_v11, %v5211_v32 }
 0x4bf   : > { %v4976_v21 = vadd.f32 %v4975_v50, %v4887_v47  ;;  %v5557_v44 = vpack.c.bf16 %v5497_v17, %v5495_v4  ;;  %v5558_v5 = vpack.c.bf16 %v5498_v39, %v5496_v58 }
 0x4c0   : > { %v5335_v48 = vsel %vm5303_vm1, %v5047_v35, %v5271_v61  ;;  %v4738_v15 = vpop.f32.mrf.mxu2  ;;  %v4827_v33 = vpop.f32.mrf.mxu3 }
 0x4c1   : > { %v5048_v19 = vpack.c.bf16 %v4976_v21, %v10343_v56  ;;  %v4739_v29 = vadd.f32 %v4738_v15, %v10241_v57  ;;  %v5371_v22 = vunpack.c.l.bf16 %v5335_v48  ;;  %v5372_v20 = vunpack.c.h.bf16 %v5335_v48 }
 0x4c3   : > { %v5085_v54 = vunpack.c.l.bf16 %v5048_v19  ;;  %v5086_v40 = vunpack.c.h.bf16 %v5048_v19  ;;  %v10520_v59 = vadd.f32 %v4827_v33, %v4739_v29  ;;  %v4889_v53 = vpop.f32.mrf.mxu0  ;;  %v4978_v4 = vpop.f32.mrf.mxu1  ;;  %v5499_v58 = vadd.f32 %v5435_v23, %v5371_v22 }
 0x4c4   : > { %v4890_v35 = vadd.f32 %v4889_v53, %v10444_v13  ;;  %v5500_v7 = vadd.f32 %v5436_v12, %v5372_v20  ;;  %v5439_v53 = vunpack.c.l.bf16 %v9142_v16 }
 0x4c5   : > { %vm5149_vm2 = vcmp.gt.f32.partialorder %v5085_v54, 0.0  ;;  %vm5150_vm3 = vcmp.gt.f32.partialorder %v5086_v40, 0.0  ;;  %v5213_v0 = vmul.f32 0.010009766, %v5085_v54  ;;  %v5214_v56 = vmul.f32 0.010009766, %v5086_v40  ;;  %5729 = vmatmul.bf16.gmra.mxu2 %v5557_v44  ;;  %5818 = vmatmul.bf16.gmra.mxu3 %v5558_v5 }
 0x4c6   : > { %v4979_v27 = vadd.f32 %v4978_v4, %v4890_v35  ;;  %4928 = vmatmul.bf16.gmra.mxu0 %v10331_v10  ;;  %5017 = vmatmul.bf16.gmra.mxu1 %v10333_v26  ;;  %vm5304_vm4 = vmpackc.low %vm5150_vm3, %vm5149_vm2  ;;  %v5437_v10 = vunpack.c.l.bf16 %v9117_v52  ;;  %v5438_v26 = vunpack.c.h.bf16 %v9117_v52 }
 0x4c7   : > { %v5272_v45 = vpack.c.bf16 %v5214_v56, %v5213_v0  ;;  %v5440_v56 = vunpack.c.h.bf16 %v9142_v16 }
 0x4c8   : > { %v5049_v50 = vpack.c.bf16 %v4979_v27, %v10364_v31  ;;  %v4741_v63 = vpop.f32.mrf.mxu2  ;;  %v4830_v1 = vpop.f32.mrf.mxu3 }
 0x4c9   : > { %v5336_v32 = vsel %vm5304_vm4, %v5048_v19, %v5272_v45  ;;  %v4742_v11 = vadd.f32 %v4741_v63, %v10241_v57 }
 0x4ca   : > { %v5087_v47 = vunpack.c.l.bf16 %v5049_v50  ;;  %v5088_v17 = vunpack.c.h.bf16 %v5049_v50  ;;  %v5373_v39 = vunpack.c.l.bf16 %v5336_v32  ;;  %v5374_v61 = vunpack.c.h.bf16 %v5336_v32 }
 0x4cb   : > { %v10527_v21 = vadd.f32 %v4830_v1, %v4742_v11  ;;  %v4891_v44 = vpop.f32.mrf.mxu0  ;;  %v4980_v5 = vpop.f32.mrf.mxu1 }
 0x4cc   : > { %vm5151_vm5 = vcmp.gt.f32.partialorder %v5087_v47, 0.0  ;;  %vm5152_vm6 = vcmp.gt.f32.partialorder %v5088_v17, 0.0  ;;  %v5215_v31 = vmul.f32 0.010009766, %v5087_v47  ;;  %v5216_v48 = vmul.f32 0.010009766, %v5088_v17 }
 0x4cd   : > { %v4892_v15 = vadd.f32 %v4891_v44, %v10444_v13  ;;  %v5501_v33 = vadd.f32 %v5437_v10, %v5373_v39  ;;  %v5502_v23 = vadd.f32 %v5438_v26, %v5374_v61  ;;  %vm5305_vm7 = vmpackc.low %vm5152_vm6, %vm5151_vm5 }
 0x4ce   : > { %v5273_v19 = vpack.c.bf16 %v5216_v48, %v5215_v31 }
 0x4cf   : > { %v4981_v29 = vadd.f32 %v4980_v5, %v4892_v15  ;;  %v5559_v22 = vpack.c.bf16 %v5501_v33, %v5499_v58  ;;  %v5560_v20 = vpack.c.bf16 %v5502_v23, %v5500_v7 }
 0x4d0   : > { %v5337_v12 = vsel %vm5305_vm7, %v5049_v50, %v5273_v19  ;;  %v4743_v54 = vpop.f32.mrf.mxu2  ;;  %v4832_v40 = vpop.f32.mrf.mxu3 }
 0x4d1   : > { %v5050_v52 = vpack.c.bf16 %v4981_v29, %v10373_v25  ;;  %v4744_v4 = vadd.f32 %v4743_v54, %v10241_v57  ;;  %v5375_v35 = vunpack.c.l.bf16 %v5337_v12  ;;  %v5376_v0 = vunpack.c.h.bf16 %v5337_v12 }
 0x4d3   : > { %v5089_v27 = vunpack.c.l.bf16 %v5050_v52  ;;  %v5090_v45 = vunpack.c.h.bf16 %v5050_v52  ;;  %v10536_v63 = vadd.f32 %v4832_v40, %v4744_v4  ;;  %v4894_v1 = vpop.f32.mrf.mxu0  ;;  %v4983_v58 = vpop.f32.mrf.mxu1  ;;  %v5503_v7 = vadd.f32 %v5439_v53, %v5375_v35 }
 0x4d4   : > { %v4895_v50 = vadd.f32 %v4894_v1, %v10444_v13  ;;  %v5504_v32 = vadd.f32 %v5440_v56, %v5376_v0  ;;  %v5443_v0 = vunpack.c.l.bf16 %v9172_v3  ;;  %v5444_v1 = vunpack.c.h.bf16 %v9172_v3 }
 0x4d5   : > { %vm5153_vm8 = vcmp.gt.f32.partialorder %v5089_v27, 0.0  ;;  %vm5154_vm9 = vcmp.gt.f32.partialorder %v5090_v45, 0.0  ;;  %v5217_v11 = vmul.f32 0.010009766, %v5089_v27  ;;  %v5218_v25 = vmul.f32 0.010009766, %v5090_v45  ;;  %5734 = vmatmul.bf16.gmra.mxu2 %v5559_v22  ;;  %5823 = vmatmul.bf16.gmra.mxu3 %v5560_v20 }
 0x4d6   : > { %v4984_v47 = vadd.f32 %v4983_v58, %v4895_v50  ;;  %4933 = vmatmul.bf16.gmra.mxu0 %v10367_v14  ;;  %5022 = vmatmul.bf16.gmra.mxu1 %v10369_v38  ;;  %vm5306_vm10 = vmpackc.low %vm5154_vm9, %vm5153_vm8  ;;  %v5441_v14 = vunpack.c.l.bf16 %v9157_v2  ;;  %v5442_v38 = vunpack.c.h.bf16 %v9157_v2 }
 0x4d7   : > { %v5274_v16 = vpack.c.bf16 %v5218_v25, %v5217_v11 }
 0x4d8   : > { %v5051_v17 = vpack.c.bf16 %v4984_v47, %v10394_v8  ;;  %v4746_v39 = vpop.f32.mrf.mxu2  ;;  %v4835_v61 = vpop.f32.mrf.mxu3 }
 0x4d9   : > { %v5338_v44 = vsel %vm5306_vm10, %v5050_v52, %v5274_v16  ;;  %v4747_v5 = vadd.f32 %v4746_v39, %v10241_v57 }
 0x4da   : > { %v5091_v10 = vunpack.c.l.bf16 %v5051_v17  ;;  %v5092_v26 = vunpack.c.h.bf16 %v5051_v17  ;;  %v5377_v31 = vunpack.c.l.bf16 %v5338_v44  ;;  %v5378_v48 = vunpack.c.h.bf16 %v5338_v44 }
 0x4db   : > { %v10543_v15 = vadd.f32 %v4835_v61, %v4747_v5  ;;  %v4896_v33 = vpop.f32.mrf.mxu0  ;;  %v4985_v23 = vpop.f32.mrf.mxu1 }
 0x4dc   : > { %vm5155_vm11 = vcmp.gt.f32.partialorder %v5091_v10, 0.0  ;;  %vm5156_vm12 = vcmp.gt.f32.partialorder %v5092_v26, 0.0  ;;  %v5219_v8 = vmul.f32 0.010009766, %v5091_v10  ;;  %v5220_v19 = vmul.f32 0.010009766, %v5092_v26 }
 0x4dd   : > { %v4897_v29 = vadd.f32 %v4896_v33, %v10444_v13  ;;  %v5505_v22 = vadd.f32 %v5441_v14, %v5377_v31  ;;  %v5506_v20 = vadd.f32 %v5442_v38, %v5378_v48  ;;  %vm5307_vm0 = vmpackc.low %vm5156_vm12, %vm5155_vm11 }
 0x4de   : > { %v5275_v12 = vpack.c.bf16 %v5220_v19, %v5219_v8 }
 0x4df   : > { %v4986_v54 = vadd.f32 %v4985_v23, %v4897_v29  ;;  %v5561_v40 = vpack.c.bf16 %v5505_v22, %v5503_v7  ;;  %v5562_v53 = vpack.c.bf16 %v5506_v20, %v5504_v32 }
 0x4e0   : > { %v5339_v52 = vsel %vm5307_vm0, %v5051_v17, %v5275_v12  ;;  %v4748_v4 = vpop.f32.mrf.mxu2  ;;  %v4837_v35 = vpop.f32.mrf.mxu3 }
 0x4e1   : > { %v5052_v2 = vpack.c.bf16 %v4986_v54, %v10403_v42  ;;  %v4749_v56 = vadd.f32 %v4748_v4, %v10241_v57  ;;  %v5379_v27 = vunpack.c.l.bf16 %v5339_v52  ;;  %v5380_v45 = vunpack.c.h.bf16 %v5339_v52 }
 0x4e3   : > { %v5093_v58 = vunpack.c.l.bf16 %v5052_v2  ;;  %v5094_v50 = vunpack.c.h.bf16 %v5052_v2  ;;  %v10552_v11 = vadd.f32 %v4837_v35, %v4749_v56  ;;  %v4899_v25 = vpop.f32.mrf.mxu0  ;;  %v4988_v7 = vpop.f32.mrf.mxu1  ;;  %v5507_v32 = vadd.f32 %v5443_v0, %v5379_v27 }
 0x4e4   : > { %v4900_v47 = vadd.f32 %v4899_v25, %v10444_v13  ;;  %v5508_v16 = vadd.f32 %v5444_v1, %v5380_v45  ;;  %v5447_v0 = vunpack.c.l.bf16 %v9250_v30  ;;  %v5448_v45 = vunpack.c.h.bf16 %v9250_v30 }
 0x4e5   : > { %vm5157_vm13 = vcmp.gt.f32.partialorder %v5093_v58, 0.0  ;;  %vm5158_vm14 = vcmp.gt.f32.partialorder %v5094_v50, 0.0  ;;  %v5221_v17 = vmul.f32 0.010009766, %v5093_v58  ;;  %v5222_v42 = vmul.f32 0.010009766, %v5094_v50  ;;  %5739 = vmatmul.bf16.gmra.mxu2 %v5561_v40  ;;  %5828 = vmatmul.bf16.gmra.mxu3 %v5562_v53 }
 0x4e6   : > { %v4989_v39 = vadd.f32 %v4988_v7, %v4900_v47  ;;  %4938 = vmatmul.bf16.gmra.mxu0 %v10397_v51  ;;  %5027 = vmatmul.bf16.gmra.mxu1 %v10399_v49  ;;  %vm5308_vm15 = vmpackc.low %vm5158_vm14, %vm5157_vm13  ;;  %v5445_v51 = vunpack.c.l.bf16 %v9225_v36  ;;  %v5446_v49 = vunpack.c.h.bf16 %v9225_v36 }
 0x4e7   : > { %v5276_v3 = vpack.c.bf16 %v5222_v42, %v5221_v17 }
 0x4e8   : > { %v5053_v61 = vpack.c.bf16 %v4989_v39, %v10436_v62  ;;  %v4751_v44 = vpop.f32.mrf.mxu2  ;;  %v4840_v5 = vpop.f32.mrf.mxu3 }
 0x4e9   : > { %v5340_v10 = vsel %vm5308_vm15, %v5052_v2, %v5276_v3  ;;  %v4752_v26 = vadd.f32 %v4751_v44, %v10241_v57 }
 0x4ea   : > { %v5095_v31 = vunpack.c.l.bf16 %v5053_v61  ;;  %v5096_v48 = vunpack.c.h.bf16 %v5053_v61  ;;  %v5381_v33 = vunpack.c.l.bf16 %v5340_v10  ;;  %v5382_v23 = vunpack.c.h.bf16 %v5340_v10 }
 0x4eb   : > { %v10559_v14 = vadd.f32 %v4840_v5, %v4752_v26  ;;  %v4901_v38 = vpop.f32.mrf.mxu0  ;;  %v4990_v8 = vpop.f32.mrf.mxu1 }
 0x4ec   : > { %vm5159_vm1 = vcmp.gt.f32.partialorder %v5095_v31, 0.0  ;;  %vm5160_vm2 = vcmp.gt.f32.partialorder %v5096_v48, 0.0  ;;  %v5223_v62 = vmul.f32 0.010009766, %v5095_v31  ;;  %v5224_v19 = vmul.f32 0.010009766, %v5096_v48 }
 0x4ed   : > { %v4902_v29 = vadd.f32 %v4901_v38, %v10444_v13  ;;  %v5509_v22 = vadd.f32 %v5445_v51, %v5381_v33  ;;  %v5510_v20 = vadd.f32 %v5446_v49, %v5382_v23  ;;  %vm5309_vm3 = vmpackc.low %vm5160_vm2, %vm5159_vm1 }
 0x4ee   : > { %v5277_v12 = vpack.c.bf16 %v5224_v19, %v5223_v62 }
 0x4ef   : > { %v4991_v54 = vadd.f32 %v4990_v8, %v4902_v29  ;;  %v5563_v40 = vpack.c.bf16 %v5509_v22, %v5507_v32  ;;  %v5564_v53 = vpack.c.bf16 %v5510_v20, %v5508_v16 }
 0x4f0   : > { %v5341_v52 = vsel %vm5309_vm3, %v5053_v61, %v5277_v12  ;;  %v4753_v4 = vpop.f32.mrf.mxu2  ;;  %v4842_v35 = vpop.f32.mrf.mxu3 }
 0x4f1   : > { %v5054_v36 = vpack.c.bf16 %v4991_v54, %v10448_v37  ;;  %v4754_v2 = vadd.f32 %v4753_v4, %v10241_v57  ;;  %v5383_v56 = vunpack.c.l.bf16 %v5341_v52  ;;  %v5384_v27 = vunpack.c.h.bf16 %v5341_v52  ;;  %v11235_v52 = vld [vmem:[#allocation2_spill] sm:$0xff] }
 0x4f2   : > { %v5451_v4 = vunpack.c.l.bf16 %v11235_v52 }
 0x4f3   : > { %v5097_v1 = vunpack.c.l.bf16 %v5054_v36  ;;  %v5098_v58 = vunpack.c.h.bf16 %v5054_v36  ;;  %v10568_v50 = vadd.f32 %v4842_v35, %v4754_v2  ;;  %v4904_v25 = vpop.f32.mrf.mxu0  ;;  %v4993_v7 = vpop.f32.mrf.mxu1  ;;  %v5511_v32 = vadd.f32 %v5447_v0, %v5383_v56 }
 0x4f4   : > { %v4905_v47 = vadd.f32 %v4904_v25, %v10444_v13  ;;  %v5512_v16 = vadd.f32 %v5448_v45, %v5384_v27  ;;  %v5452_v56 = vunpack.c.h.bf16 %v11235_v52 }
 0x4f5   : > { %vm5161_vm4 = vcmp.gt.f32.partialorder %v5097_v1, 0.0  ;;  %vm5162_vm5 = vcmp.gt.f32.partialorder %v5098_v58, 0.0  ;;  %v5225_v17 = vmul.f32 0.010009766, %v5097_v1  ;;  %v5226_v37 = vmul.f32 0.010009766, %v5098_v58  ;;  %5744 = vmatmul.bf16.gmra.mxu2 %v5563_v40  ;;  %5833 = vmatmul.bf16.gmra.mxu3 %v5564_v53 }
 0x4f6   : > { %v4994_v42 = vadd.f32 %v4993_v7, %v4905_v47  ;;  %4943 = vmatmul.bf16.gmra.mxu0 %v10439_v28  ;;  %5032 = vmatmul.bf16.gmra.mxu1 %v10441_v34  ;;  %vm5310_vm6 = vmpackc.low %vm5162_vm5, %vm5161_vm4  ;;  %v11234_v28 = vld [vmem:[#allocation22_spill] sm:$0xff] }
 0x4f7   : > { %v5278_v30 = vpack.c.bf16 %v5226_v37, %v5225_v17  ;;  %v5449_v8 = vunpack.c.l.bf16 %v11234_v28  ;;  %v5450_v34 = vunpack.c.h.bf16 %v11234_v28 }
 0x4f8   : > { %v5055_v39 = vpack.c.bf16 %v4994_v42, %v10469_v41  ;;  %v4756_v3 = vpop.f32.mrf.mxu2  ;;  %v4845_v61 = vpop.f32.mrf.mxu3 }
 0x4f9   : > { %v5342_v44 = vsel %vm5310_vm6, %v5054_v36, %v5278_v30  ;;  %v4757_v5 = vadd.f32 %v4756_v3, %v10241_v57 }
 0x4fa   : > { %v5099_v10 = vunpack.c.l.bf16 %v5055_v39  ;;  %v5100_v26 = vunpack.c.h.bf16 %v5055_v39  ;;  %v5385_v31 = vunpack.c.l.bf16 %v5342_v44  ;;  %v5386_v48 = vunpack.c.h.bf16 %v5342_v44 }
 0x4fb   : > { %v10575_v33 = vadd.f32 %v4845_v61, %v4757_v5  ;;  %v4906_v23 = vpop.f32.mrf.mxu0  ;;  %v4995_v38 = vpop.f32.mrf.mxu1 }
 0x4fc   : > { %vm5163_vm7 = vcmp.gt.f32.partialorder %v5099_v10, 0.0  ;;  %vm5164_vm8 = vcmp.gt.f32.partialorder %v5100_v26, 0.0  ;;  %v5227_v41 = vmul.f32 0.010009766, %v5099_v10  ;;  %v5228_v51 = vmul.f32 0.010009766, %v5100_v26 }
 0x4fd   : > { %v4907_v49 = vadd.f32 %v4906_v23, %v10444_v13  ;;  %v5513_v62 = vadd.f32 %v5449_v8, %v5385_v31  ;;  %v5514_v19 = vadd.f32 %v5450_v34, %v5386_v48  ;;  %vm5311_vm9 = vmpackc.low %vm5164_vm8, %vm5163_vm7 }
 0x4fe   : > { %v5279_v29 = vpack.c.bf16 %v5228_v51, %v5227_v41 }
 0x4ff   : > { %v4996_v22 = vadd.f32 %v4995_v38, %v4907_v49  ;;  %v5565_v20 = vpack.c.bf16 %v5513_v62, %v5511_v32  ;;  %v5566_v12 = vpack.c.bf16 %v5514_v19, %v5512_v16 }
 0x500   : > { %v5343_v54 = vsel %vm5311_vm9, %v5055_v39, %v5279_v29  ;;  %v4758_v40 = vpop.f32.mrf.mxu2  ;;  %v4847_v53 = vpop.f32.mrf.mxu3 }
 0x501   : > { %v5056_v35 = vpack.c.bf16 %v4996_v22, %v10484_v55  ;;  %v4759_v0 = vadd.f32 %v4758_v40, %v10241_v57  ;;  %v5387_v36 = vunpack.c.l.bf16 %v5343_v54  ;;  %v5388_v2 = vunpack.c.h.bf16 %v5343_v54 }
 0x503   : > { %v5101_v27 = vunpack.c.l.bf16 %v5056_v35  ;;  %v5102_v45 = vunpack.c.h.bf16 %v5056_v35  ;;  %v10584_v1 = vadd.f32 %v4847_v53, %v4759_v0  ;;  %v4909_v58 = vpop.f32.mrf.mxu0  ;;  %v4998_v25 = vpop.f32.mrf.mxu1  ;;  %v5515_v7 = vadd.f32 %v5451_v4, %v5387_v36 }
 0x504   : > { %v4910_v32 = vadd.f32 %v4909_v58, %v10444_v13  ;;  %v5516_v47 = vadd.f32 %v5452_v56, %v5388_v2  ;;  %v5456_v4 = vunpack.c.h.bf16 %v9358_v60 }
 0x505   : > { %vm5165_vm10 = vcmp.gt.f32.partialorder %v5101_v27, 0.0  ;;  %vm5166_vm11 = vcmp.gt.f32.partialorder %v5102_v45, 0.0  ;;  %v5229_v16 = vmul.f32 0.010009766, %v5101_v27  ;;  %v5230_v55 = vmul.f32 0.010009766, %v5102_v45  ;;  %5749 = vmatmul.bf16.gmra.mxu2 %v5565_v20  ;;  %5838 = vmatmul.bf16.gmra.mxu3 %v5566_v12 }
 0x506   : > { %v4999_v17 = vadd.f32 %v4998_v25, %v4910_v32  ;;  %4948 = vmatmul.bf16.gmra.mxu0 %v10472_v9  ;;  %5037 = vmatmul.bf16.gmra.mxu1 %v10474_v43  ;;  %vm5312_vm12 = vmpackc.low %vm5166_vm11, %vm5165_vm10  ;;  %v11236_v9 = vld [vmem:[#allocation3_spill] sm:$0xff]  ;;  %v5455_v12 = vunpack.c.l.bf16 %v9358_v60 }
 0x507   : > { %v5280_v37 = vpack.c.bf16 %v5230_v55, %v5229_v16  ;;  %v5453_v38 = vunpack.c.l.bf16 %v11236_v9  ;;  %v5454_v43 = vunpack.c.h.bf16 %v11236_v9 }
 0x508   : > { %v5057_v42 = vpack.c.bf16 %v4999_v17, %v10495_v24  ;;  %v4761_v30 = vpop.f32.mrf.mxu2  ;;  %v4850_v39 = vpop.f32.mrf.mxu3 }
 0x509   : > { %v5344_v3 = vsel %vm5312_vm12, %v5056_v35, %v5280_v37  ;;  %v4762_v61 = vadd.f32 %v4761_v30, %v10241_v57 }
 0x50a   : > { %v5103_v44 = vunpack.c.l.bf16 %v5057_v42  ;;  %v5104_v5 = vunpack.c.h.bf16 %v5057_v42  ;;  %v5389_v10 = vunpack.c.l.bf16 %v5344_v3  ;;  %v5390_v26 = vunpack.c.h.bf16 %v5344_v3 }
 0x50b   : > { %v10591_v31 = vadd.f32 %v4850_v39, %v4762_v61  ;;  %v4911_v48 = vpop.f32.mrf.mxu0  ;;  %v5000_v23 = vpop.f32.mrf.mxu1 }
 0x50c   : > { %vm5167_vm0 = vcmp.gt.f32.partialorder %v5103_v44, 0.0  ;;  %vm5168_vm13 = vcmp.gt.f32.partialorder %v5104_v5, 0.0  ;;  %v5231_v24 = vmul.f32 0.010009766, %v5103_v44  ;;  %v5232_v28 = vmul.f32 0.010009766, %v5104_v5  ;;  %v11237_v5 = vld [vmem:[#allocation4_spill] sm:$0xff] }
 0x50d   : > { %v4912_v8 = vadd.f32 %v4911_v48, %v10444_v13  ;;  %v5517_v34 = vadd.f32 %v5453_v38, %v5389_v10  ;;  %v5518_v41 = vadd.f32 %v5454_v43, %v5390_v26  ;;  %vm5313_vm14 = vmpackc.low %vm5168_vm13, %vm5167_vm0  ;;  %v5457_v10 = vunpack.c.l.bf16 %v11237_v5 }
 0x50e   : > { %v5281_v51 = vpack.c.bf16 %v5232_v28, %v5231_v24  ;;  %v5458_v26 = vunpack.c.h.bf16 %v11237_v5 }
 0x50f   : > { %v5001_v49 = vadd.f32 %v5000_v23, %v4912_v8  ;;  %v5567_v62 = vpack.c.bf16 %v5517_v34, %v5515_v7  ;;  %v5568_v19 = vpack.c.bf16 %v5518_v41, %v5516_v47 }
 0x510   : > { %v5345_v29 = vsel %vm5313_vm14, %v5057_v42, %v5281_v51  ;;  %v4763_v22 = vpop.f32.mrf.mxu2  ;;  %v4852_v20 = vpop.f32.mrf.mxu3 }
 0x511   : > { %v5058_v54 = vpack.c.bf16 %v5001_v49, %v10504_v18  ;;  %v4764_v40 = vadd.f32 %v4763_v22, %v10241_v57  ;;  %v5391_v53 = vunpack.c.l.bf16 %v5345_v29  ;;  %v5392_v52 = vunpack.c.h.bf16 %v5345_v29  ;;  %v11238_v49 = vld [vmem:[#allocation5_spill] sm:$0xff] }
 0x513   : > { %v5105_v35 = vunpack.c.l.bf16 %v5058_v54  ;;  %v5106_v0 = vunpack.c.h.bf16 %v5058_v54  ;;  %v10600_v36 = vadd.f32 %v4852_v20, %v4764_v40  ;;  %v4914_v2 = vpop.f32.mrf.mxu0  ;;  %v5003_v56 = vpop.f32.mrf.mxu1  ;;  %v5519_v27 = vadd.f32 %v5455_v12, %v5391_v53 }
 0x514   : > { %v4915_v45 = vadd.f32 %v4914_v2, %v10444_v13  ;;  %v5520_v58 = vadd.f32 %v5456_v4, %v5392_v52  ;;  %v5460_v12 = vunpack.c.h.bf16 %v11238_v49 }
 0x515   : > { %vm5169_vm15 = vcmp.gt.f32.partialorder %v5105_v35, 0.0  ;;  %vm5170_vm1 = vcmp.gt.f32.partialorder %v5106_v0, 0.0  ;;  %v5233_v25 = vmul.f32 0.010009766, %v5105_v35  ;;  %v5234_v18 = vmul.f32 0.010009766, %v5106_v0  ;;  %5754 = vmatmul.bf16.gmra.mxu2 %v5567_v62  ;;  %5843 = vmatmul.bf16.gmra.mxu3 %v5568_v19 }
 0x516   : > { %v5004_v7 = vadd.f32 %v5003_v56, %v4915_v45  ;;  %vm5314_vm2 = vmpackc.low %vm5170_vm1, %vm5169_vm15  ;;  %v5459_v62 = vunpack.c.l.bf16 %v11238_v49 }
 0x517   : > { %v5282_v32 = vpack.c.bf16 %v5234_v18, %v5233_v25 }
 0x518   : > { %v5059_v60 = vpack.c.bf16 %v5004_v7, %v10511_v6  ;;  %v4766_v47 = vpop.f32.mrf.mxu2  ;;  %v4855_v16 = vpop.f32.mrf.mxu3 }
 0x519   : > { %v5346_v55 = vsel %vm5314_vm2, %v5058_v54, %v5282_v32  ;;  %v4767_v17 = vadd.f32 %v4766_v47, %v10241_v57 }
 0x51a   : > { %v5107_v37 = vunpack.c.l.bf16 %v5059_v60  ;;  %v5108_v42 = vunpack.c.h.bf16 %v5059_v60  ;;  %v5393_v30 = vunpack.c.l.bf16 %v5346_v55  ;;  %v5394_v39 = vunpack.c.h.bf16 %v5346_v55 }
 0x51b   : > { %v10605_v3 = vadd.f32 %v4855_v16, %v4767_v17  ;;  %v4916_v61 = vpop.f32.mrf.mxu0  ;;  %v5005_v44 = vpop.f32.mrf.mxu1 }
 0x51c   : > { %vm5171_vm3 = vcmp.gt.f32.partialorder %v5107_v37, 0.0  ;;  %vm5172_vm4 = vcmp.gt.f32.partialorder %v5108_v42, 0.0  ;;  %v5235_v6 = vmul.f32 0.010009766, %v5107_v37  ;;  %v5236_v48 = vmul.f32 0.010009766, %v5108_v42 }
 0x51d   : > { %v4917_v23 = vadd.f32 %v4916_v61, %v10444_v13  ;;  %v5521_v9 = vadd.f32 %v5457_v10, %v5393_v30  ;;  %v5522_v38 = vadd.f32 %v5458_v26, %v5394_v39  ;;  %vm5315_vm5 = vmpackc.low %vm5172_vm4, %vm5171_vm3  ;;  %v11239_v30 = vld [vmem:[#allocation6_spill] sm:$0xff] }
 0x51e   : > { %v5283_v43 = vpack.c.bf16 %v5236_v48, %v5235_v6  ;;  %v5461_v39 = vunpack.c.l.bf16 %v11239_v30  ;;  %v5462_v61 = vunpack.c.h.bf16 %v11239_v30 }
 0x51f   : > { %v5006_v24 = vadd.f32 %v5005_v44, %v4917_v23  ;;  %v5569_v28 = vpack.c.bf16 %v5521_v9, %v5519_v27  ;;  %v5570_v8 = vpack.c.bf16 %v5522_v38, %v5520_v58 }
 0x520   : > { %v5347_v34 = vsel %vm5315_vm5, %v5059_v60, %v5283_v43  ;;  %v4768_v41 = vpop.f32.mrf.mxu2  ;;  %v4857_v51 = vpop.f32.mrf.mxu3 }
 0x521   : > { %v5060_v19 = vpack.c.bf16 %v5006_v24, %v10520_v59  ;;  %v4769_v29 = vadd.f32 %v4768_v41, %v10241_v57  ;;  %v5395_v22 = vunpack.c.l.bf16 %v5347_v34  ;;  %v5396_v20 = vunpack.c.h.bf16 %v5347_v34 }
 0x523   : > { %v5109_v54 = vunpack.c.l.bf16 %v5060_v19  ;;  %v5110_v40 = vunpack.c.h.bf16 %v5060_v19  ;;  %v10614_v53 = vadd.f32 %v4857_v51, %v4769_v29  ;;  %v4919_v52 = vpop.f32.mrf.mxu0  ;;  %v5008_v4 = vpop.f32.mrf.mxu1  ;;  %v5523_v35 = vadd.f32 %v5459_v62, %v5395_v22 }
 0x524   : > { %v4920_v0 = vadd.f32 %v4919_v52, %v10444_v13  ;;  %v5524_v2 = vadd.f32 %v5460_v12, %v5396_v20 }
 0x525   : > { %vm5173_vm6 = vcmp.gt.f32.partialorder %v5109_v54, 0.0  ;;  %vm5174_vm7 = vcmp.gt.f32.partialorder %v5110_v40, 0.0  ;;  %v5237_v56 = vmul.f32 0.010009766, %v5109_v54  ;;  %v5238_v59 = vmul.f32 0.010009766, %v5110_v40  ;;  %5759 = vmatmul.bf16.gmra.mxu2 %v5569_v28  ;;  %5848 = vmatmul.bf16.gmra.mxu3 %v5570_v8  ;;  %v11240_v28 = vld [vmem:[#allocation7_spill] sm:$0xff] }
 0x526   : > { %v5009_v27 = vadd.f32 %v5008_v4, %v4920_v0  ;;  %vm5316_vm8 = vmpackc.low %vm5174_vm7, %vm5173_vm6  ;;  %v5463_v8 = vunpack.c.l.bf16 %v11240_v28  ;;  %v5464_v62 = vunpack.c.h.bf16 %v11240_v28 }
 0x527   : > { %v5284_v45 = vpack.c.bf16 %v5238_v59, %v5237_v56 }
 0x528   : > { %v5061_v58 = vpack.c.bf16 %v5009_v27, %v10527_v21  ;;  %v4771_v25 = vpop.f32.mrf.mxu2  ;;  %v4860_v18 = vpop.f32.mrf.mxu3 }
 0x529   : > { %v5348_v7 = vsel %vm5316_vm8, %v5060_v19, %v5284_v45  ;;  %v4772_v32 = vadd.f32 %v4771_v25, %v10241_v57 }
 0x52a   : > { %v5111_v60 = vunpack.c.l.bf16 %v5061_v58  ;;  %v5112_v47 = vunpack.c.h.bf16 %v5061_v58  ;;  %v5397_v16 = vunpack.c.l.bf16 %v5348_v7  ;;  %v5398_v55 = vunpack.c.h.bf16 %v5348_v7 }
 0x52b   : > { %v10619_v17 = vadd.f32 %v4860_v18, %v4772_v32  ;;  %v4921_v37 = vpop.f32.mrf.mxu0  ;;  %v5010_v42 = vpop.f32.mrf.mxu1 }
 0x52c   : > { %vm5175_vm9 = vcmp.gt.f32.partialorder %v5111_v60, 0.0  ;;  %vm5176_vm10 = vcmp.gt.f32.partialorder %v5112_v47, 0.0  ;;  %v5239_v21 = vmul.f32 0.010009766, %v5111_v60  ;;  %v5240_v44 = vmul.f32 0.010009766, %v5112_v47  ;;  %v11241_v47 = vld [vmem:[#allocation8_spill] sm:$0xff] }
 0x52d   : > { %v4922_v5 = vadd.f32 %v4921_v37, %v10444_v13  ;;  %v5525_v10 = vadd.f32 %v5461_v39, %v5397_v16  ;;  %v5526_v26 = vadd.f32 %v5462_v61, %v5398_v55  ;;  %vm5317_vm11 = vmpackc.low %vm5176_vm10, %vm5175_vm9  ;;  %v5465_v16 = vunpack.c.l.bf16 %v11241_v47 }
 0x52e   : > { %v5285_v6 = vpack.c.bf16 %v5240_v44, %v5239_v21 }
 0x52f   : > { %v5011_v48 = vadd.f32 %v5010_v42, %v4922_v5  ;;  %v5571_v23 = vpack.c.bf16 %v5525_v10, %v5523_v35  ;;  %v5572_v9 = vpack.c.bf16 %v5526_v26, %v5524_v2  ;;  %v10635_v2 = vld [vmem:[%s10777_s7 + $0x5] ss:$0 sm:$0xff] }
 0x530   : > { %v5349_v38 = vsel %vm5317_vm11, %v5061_v58, %v5285_v6  ;;  %v4773_v43 = vpop.f32.mrf.mxu2  ;;  %v4862_v24 = vpop.f32.mrf.mxu3 }
 0x531   : > { %v5062_v34 = vpack.c.bf16 %v5011_v48, %v10536_v63  ;;  %v4774_v41 = vadd.f32 %v4773_v43, %v10241_v57  ;;  %v5399_v51 = vunpack.c.l.bf16 %v5349_v38  ;;  %v5400_v49 = vunpack.c.h.bf16 %v5349_v38 }
 0x533   : > { %v5113_v19 = vunpack.c.l.bf16 %v5062_v34  ;;  %v5114_v29 = vunpack.c.h.bf16 %v5062_v34  ;;  %v10628_v22 = vadd.f32 %v4862_v24, %v4774_v41  ;;  %v4924_v20 = vpop.f32.mrf.mxu0  ;;  %v5013_v12 = vpop.f32.mrf.mxu1  ;;  %v5527_v54 = vadd.f32 %v5463_v8, %v5399_v51 }
 0x534   : > { %v4925_v40 = vadd.f32 %v4924_v20, %v10444_v13  ;;  %v5528_v52 = vadd.f32 %v5464_v62, %v5400_v49 }
 0x535   : > { %vm5177_vm12 = vcmp.gt.f32.partialorder %v5113_v19, 0.0  ;;  %vm5178_vm0 = vcmp.gt.f32.partialorder %v5114_v29, 0.0  ;;  %v5241_v4 = vmul.f32 0.010009766, %v5113_v19  ;;  %v5242_v63 = vmul.f32 0.010009766, %v5114_v29  ;;  %5764 = vmatmul.bf16.gmra.mxu2 %v5571_v23  ;;  %5853 = vmatmul.bf16.gmra.mxu3 %v5572_v9  ;;  %v11242_v23 = vld [vmem:[#allocation9_spill] sm:$0xff] }
 0x536   : > { %v5014_v57 = vadd.f32 %v5013_v12, %v4925_v40  ;;  %vm5318_vm13 = vmpackc.low %vm5178_vm0, %vm5177_vm12  ;;  %v5467_v9 = vunpack.c.l.bf16 %v11242_v23  ;;  %v5468_v8 = vunpack.c.h.bf16 %v11242_v23 }
 0x537   : > { %v5286_v35 = vpack.c.bf16 %v5242_v63, %v5241_v4 }
 0x538   : > { %v5063_v0 = vpack.c.bf16 %v5014_v57, %v10543_v15  ;;  %v5725_v56 = vpop.f32.mrf.mxu2  ;;  %v5814_v59 = vpop.f32.mrf.mxu3  ;;  %v5466_v15 = vunpack.c.h.bf16 %v11241_v47 }
 0x539   : > { %v5350_v27 = vsel %vm5318_vm13, %v5062_v34, %v5286_v35  ;;  %v5726_v7 = vadd.f32 %v5725_v56, %v10635_v2 }
 0x53a   : > { %v5115_v45 = vunpack.c.l.bf16 %v5063_v0  ;;  %v5116_v58 = vunpack.c.h.bf16 %v5063_v0  ;;  %v5401_v25 = vunpack.c.l.bf16 %v5350_v27  ;;  %v5402_v18 = vunpack.c.h.bf16 %v5350_v27 }
 0x53b   : > { %v4926_v32 = vpop.f32.mrf.mxu0  ;;  %v5015_v60 = vpop.f32.mrf.mxu1  ;;  %v5815_v26 = vadd.f32 %v5814_v59, %v5726_v7 }
 0x53c   : > { %vm5179_vm14 = vcmp.gt.f32.partialorder %v5115_v45, 0.0  ;;  %vm5180_vm15 = vcmp.gt.f32.partialorder %v5116_v58, 0.0  ;;  %v5243_v55 = vmul.f32 0.010009766, %v5115_v45  ;;  %v5244_v37 = vmul.f32 0.010009766, %v5116_v58 }
 0x53d   : > { %v4927_v42 = vadd.f32 %v4926_v32, %v10444_v13  ;;  %v5529_v30 = vadd.f32 %v5465_v16, %v5401_v25  ;;  %v5530_v39 = vadd.f32 %v5466_v15, %v5402_v18  ;;  %vm5319_vm1 = vmpackc.low %vm5180_vm15, %vm5179_vm14  ;;  %7016 = vtanh.f32 %v5815_v26  ;;  %v11243_v18 = vld [vmem:[#allocation10_spill] sm:$0xff]  ;;  %v11244_v26 = vld [vmem:[#allocation11_spill] sm:$0xff] }
 0x53e   : > { %v5287_v61 = vpack.c.bf16 %v5244_v37, %v5243_v55  ;;  %v5469_v7 = vunpack.c.l.bf16 %v11243_v18  ;;  %v5470_v32 = vunpack.c.h.bf16 %v11243_v18 }
 0x53f   : > { %v5016_v21 = vadd.f32 %v5015_v60, %v4927_v42  ;;  %v5573_v44 = vpack.c.bf16 %v5529_v30, %v5527_v54  ;;  %v5574_v5 = vpack.c.bf16 %v5530_v39, %v5528_v52 }
 0x540   : > { %v5351_v10 = vsel %vm5319_vm1, %v5063_v0, %v5287_v61  ;;  %v5727_v6 = vpop.f32.mrf.mxu2  ;;  %v5816_v48 = vpop.f32.mrf.mxu3 }
 0x541   : > { %v5064_v38 = vpack.c.bf16 %v5016_v21, %v10552_v11  ;;  %v5728_v43 = vadd.f32 %v5727_v6, %v10635_v2  ;;  %v5403_v24 = vunpack.c.l.bf16 %v5351_v10  ;;  %v5404_v28 = vunpack.c.h.bf16 %v5351_v10 }
 0x542   : > { %v5471_v6 = vunpack.c.l.bf16 %v11244_v26 }
 0x543   : > { %v5117_v34 = vunpack.c.l.bf16 %v5064_v38  ;;  %v5118_v41 = vunpack.c.h.bf16 %v5064_v38  ;;  %v5817_v51 = vadd.f32 %v5816_v48, %v5728_v43  ;;  %v4929_v49 = vpop.f32.mrf.mxu0  ;;  %v5018_v62 = vpop.f32.mrf.mxu1  ;;  %v10645_v19 = vadd.f32 %v5467_v9, %v5403_v24 }
 0x544   : > { %v4930_v29 = vadd.f32 %v4929_v49, %v10444_v13  ;;  %v10648_v20 = vadd.f32 %v5468_v8, %v5404_v28  ;;  %v7017_v35 = vpop.eup %7016  ;;  %v5472_v43 = vunpack.c.h.bf16 %v11244_v26 }
 0x545   : > { %vm5181_vm2 = vcmp.gt.f32.partialorder %v5117_v34, 0.0  ;;  %vm5182_vm3 = vcmp.gt.f32.partialorder %v5118_v41, 0.0  ;;  %v5245_v11 = vmul.f32 0.010009766, %v5117_v34  ;;  %v5246_v12 = vmul.f32 0.010009766, %v5118_v41  ;;  %5769 = vmatmul.bf16.gmra.mxu2 %v5573_v44  ;;  %5858 = vmatmul.bf16.gmra.mxu3 %v5574_v5 }
 0x546   : > { %7018 = vtanh.f32 %v5817_v51  ;;  %v5019_v54 = vadd.f32 %v5018_v62, %v4930_v29  ;;  %vm5320_vm4 = vmpackc.low %vm5182_vm3, %vm5181_vm2 }
 0x547   : > { %v5288_v40 = vpack.c.bf16 %v5246_v12, %v5245_v11 }
 0x548   : > { %v5065_v52 = vpack.c.bf16 %v5019_v54, %v10559_v14  ;;  %v5730_v4 = vpop.f32.mrf.mxu2  ;;  %v5819_v63 = vpop.f32.mrf.mxu3 }
 0x549   : > { %v5352_v57 = vsel %vm5320_vm4, %v5064_v38, %v5288_v40  ;;  %v5731_v45 = vadd.f32 %v5730_v4, %v10635_v2 }
 0x54a   : > { %v5119_v0 = vunpack.c.l.bf16 %v5065_v52  ;;  %v5120_v56 = vunpack.c.h.bf16 %v5065_v52  ;;  %v5405_v59 = vunpack.c.l.bf16 %v5352_v57  ;;  %v5406_v27 = vunpack.c.h.bf16 %v5352_v57 }
 0x54b   : > { %v4931_v58 = vpop.f32.mrf.mxu0  ;;  %v5020_v25 = vpop.f32.mrf.mxu1  ;;  %v5820_v21 = vadd.f32 %v5819_v63, %v5731_v45 }
 0x54c   : > { %v7019_v60 = vpop.eup %7018  ;;  %vm5183_vm5 = vcmp.gt.f32.partialorder %v5119_v0, 0.0  ;;  %vm5184_vm6 = vcmp.gt.f32.partialorder %v5120_v56, 0.0  ;;  %v5247_v14 = vmul.f32 0.010009766, %v5119_v0  ;;  %v5248_v47 = vmul.f32 0.010009766, %v5120_v56 }
 0x54d   : > { %v6916_v16 = vpack.c.bf16 %v7019_v60, %v7017_v35  ;;  %v4932_v15 = vadd.f32 %v4931_v58, %v10444_v13  ;;  %v5533_v55 = vadd.f32 %v5469_v7, %v5405_v59  ;;  %v5534_v42 = vadd.f32 %v5470_v32, %v5406_v27  ;;  %vm5321_vm7 = vmpackc.low %vm5184_vm6, %vm5183_vm5  ;;  %v11245_v27 = vld [vmem:[#allocation12_spill] sm:$0xff] }
 0x54e   : > { %v5289_v37 = vpack.c.bf16 %v5248_v47, %v5247_v14  ;;  %7020 = vtanh.f32 %v5820_v21  ;;  %v5473_v45 = vunpack.c.l.bf16 %v11245_v27  ;;  %v5474_v58 = vunpack.c.h.bf16 %v11245_v27 }
 0x54f   : > { %6917 = vst [vmem:[%s10659_s22] sm:$0xff] %v6916_v16   ;;  %v5021_v30 = vadd.f32 %v5020_v25, %v4932_v15  ;;  %v5575_v39 = vpack.c.bf16 %v5533_v55, %v10645_v19  ;;  %v5576_v10 = vpack.c.bf16 %v5534_v42, %v10648_v20 }
 0x550   : > { %v5353_v61 = vsel %vm5321_vm7, %v5065_v52, %v5289_v37  ;;  %v5732_v44 = vpop.f32.mrf.mxu2  ;;  %v5821_v5 = vpop.f32.mrf.mxu3 }
 0x551   : > { %v5066_v48 = vpack.c.bf16 %v5021_v30, %v10568_v50  ;;  %v5733_v23 = vadd.f32 %v5732_v44, %v10635_v2  ;;  %v5407_v9 = vunpack.c.l.bf16 %v5353_v61  ;;  %v5408_v38 = vunpack.c.h.bf16 %v5353_v61  ;;  %v11246_v61 = vld [vmem:[#allocation13_spill] sm:$0xff] }
 0x552   : > { %v5475_v21 = vunpack.c.l.bf16 %v11246_v61 }
 0x553   : > { %v5121_v24 = vunpack.c.l.bf16 %v5066_v48  ;;  %v5122_v28 = vunpack.c.h.bf16 %v5066_v48  ;;  %v5822_v8 = vadd.f32 %v5821_v5, %v5733_v23  ;;  %v4934_v34 = vpop.f32.mrf.mxu0  ;;  %v5023_v41 = vpop.f32.mrf.mxu1  ;;  %v10669_v51 = vadd.f32 %v5471_v6, %v5407_v9 }
 0x554   : > { %v4935_v49 = vadd.f32 %v4934_v34, %v10444_v13  ;;  %v10672_v62 = vadd.f32 %v5472_v43, %v5408_v38  ;;  %v7021_v52 = vpop.eup %7020  ;;  %v5476_v6 = vunpack.c.h.bf16 %v11246_v61 }
 0x555   : > { %vm5185_vm8 = vcmp.gt.f32.partialorder %v5121_v24, 0.0  ;;  %vm5186_vm9 = vcmp.gt.f32.partialorder %v5122_v28, 0.0  ;;  %v5249_v50 = vmul.f32 0.010009766, %v5121_v24  ;;  %v5250_v19 = vmul.f32 0.010009766, %v5122_v28  ;;  %5774 = vmatmul.bf16.gmra.mxu2 %v5575_v39  ;;  %5863 = vmatmul.bf16.gmra.mxu3 %v5576_v10 }
 0x556   : > { %7022 = vtanh.f32 %v5822_v8  ;;  %v5024_v29 = vadd.f32 %v5023_v41, %v4935_v49  ;;  %vm5322_vm10 = vmpackc.low %vm5186_vm9, %vm5185_vm8 }
 0x557   : > { %v5290_v20 = vpack.c.bf16 %v5250_v19, %v5249_v50 }
 0x558   : > { %v5067_v11 = vpack.c.bf16 %v5024_v29, %v10575_v33  ;;  %v5735_v12 = vpop.f32.mrf.mxu2  ;;  %v5824_v54 = vpop.f32.mrf.mxu3 }
 0x559   : > { %v5354_v40 = vsel %vm5322_vm10, %v5066_v48, %v5290_v20  ;;  %v5736_v0 = vadd.f32 %v5735_v12, %v10635_v2 }
 0x55a   : > { %v5123_v4 = vunpack.c.l.bf16 %v5067_v11  ;;  %v5124_v63 = vunpack.c.h.bf16 %v5067_v11  ;;  %v5409_v57 = vunpack.c.l.bf16 %v5354_v40  ;;  %v5410_v35 = vunpack.c.h.bf16 %v5354_v40 }
 0x55b   : > { %v4936_v56 = vpop.f32.mrf.mxu0  ;;  %v5025_v59 = vpop.f32.mrf.mxu1  ;;  %v5825_v37 = vadd.f32 %v5824_v54, %v5736_v0 }
 0x55c   : > { %v7023_v25 = vpop.eup %7022  ;;  %vm5187_vm11 = vcmp.gt.f32.partialorder %v5123_v4, 0.0  ;;  %vm5188_vm12 = vcmp.gt.f32.partialorder %v5124_v63, 0.0  ;;  %v5251_v33 = vmul.f32 0.010009766, %v5123_v4  ;;  %v5252_v18 = vmul.f32 0.010009766, %v5124_v63  ;;  %v11247_v63 = vld [vmem:[#allocation14_spill] sm:$0xff] }
 0x55d   : > { %v6921_v7 = vpack.c.bf16 %v7023_v25, %v7021_v52  ;;  %v4937_v32 = vadd.f32 %v4936_v56, %v10444_v13  ;;  %v5537_v60 = vadd.f32 %v5473_v45, %v5409_v57  ;;  %v5538_v47 = vadd.f32 %v5474_v58, %v5410_v35  ;;  %vm5323_vm0 = vmpackc.low %vm5188_vm12, %vm5187_vm11 }
 0x55e   : > { %v5291_v14 = vpack.c.bf16 %v5252_v18, %v5251_v33  ;;  %7024 = vtanh.f32 %v5825_v37  ;;  %v5477_v57 = vunpack.c.l.bf16 %v11247_v63  ;;  %v5478_v35 = vunpack.c.h.bf16 %v11247_v63 }
 0x55f   : > { %6993 = vst [vmem:[%s10659_s22 + $0x8] sm:$0xff] %v6921_v7   ;;  %v5026_v16 = vadd.f32 %v5025_v59, %v4937_v32  ;;  %v5577_v15 = vpack.c.bf16 %v5537_v60, %v10669_v51  ;;  %v5578_v39 = vpack.c.bf16 %v5538_v47, %v10672_v62 }
 0x560   : > { %v5355_v55 = vsel %vm5323_vm0, %v5067_v11, %v5291_v14  ;;  %v5737_v42 = vpop.f32.mrf.mxu2  ;;  %v5826_v30 = vpop.f32.mrf.mxu3 }
 0x561   : > { %v5068_v44 = vpack.c.bf16 %v5026_v16, %v10584_v1  ;;  %v5738_v5 = vadd.f32 %v5737_v42, %v10635_v2  ;;  %v5411_v10 = vunpack.c.l.bf16 %v5355_v55  ;;  %v5412_v26 = vunpack.c.h.bf16 %v5355_v55  ;;  %v11248_v16 = vld [vmem:[#allocation15_spill] sm:$0xff] }
 0x563   : > { %v5125_v48 = vunpack.c.l.bf16 %v5068_v44  ;;  %v5126_v23 = vunpack.c.h.bf16 %v5068_v44  ;;  %v5827_v9 = vadd.f32 %v5826_v30, %v5738_v5  ;;  %v4939_v38 = vpop.f32.mrf.mxu0  ;;  %v5028_v43 = vpop.f32.mrf.mxu1  ;;  %v10686_v24 = vadd.f32 %v5475_v21, %v5411_v10 }
 0x564   : > { %v4940_v28 = vadd.f32 %v4939_v38, %v10444_v13  ;;  %v10689_v8 = vadd.f32 %v5476_v6, %v5412_v26  ;;  %v7025_v29 = vpop.eup %7024 }
 0x565   : > { %vm5189_vm13 = vcmp.gt.f32.partialorder %v5125_v48, 0.0  ;;  %vm5190_vm14 = vcmp.gt.f32.partialorder %v5126_v23, 0.0  ;;  %v5253_v1 = vmul.f32 0.010009766, %v5125_v48  ;;  %v5254_v34 = vmul.f32 0.010009766, %v5126_v23  ;;  %5779 = vmatmul.bf16.gmra.mxu2 %v5577_v15  ;;  %5868 = vmatmul.bf16.gmra.mxu3 %v5578_v39 }
 0x566   : > { %7026 = vtanh.f32 %v5827_v9  ;;  %v5029_v41 = vadd.f32 %v5028_v43, %v4940_v28  ;;  %vm5324_vm15 = vmpackc.low %vm5190_vm14, %vm5189_vm13  ;;  %v5479_v15 = vunpack.c.l.bf16 %v11248_v16  ;;  %v5480_v39 = vunpack.c.h.bf16 %v11248_v16 }
 0x567   : > { %v5292_v51 = vpack.c.bf16 %v5254_v34, %v5253_v1 }
 0x568   : > { %v5069_v49 = vpack.c.bf16 %v5029_v41, %v10591_v31  ;;  %v5740_v62 = vpop.f32.mrf.mxu2  ;;  %v5829_v50 = vpop.f32.mrf.mxu3 }
 0x569   : > { %v5356_v19 = vsel %vm5324_vm15, %v5068_v44, %v5292_v51  ;;  %v5741_v40 = vadd.f32 %v5740_v62, %v10635_v2 }
 0x56a   : > { %v5127_v20 = vunpack.c.l.bf16 %v5069_v49  ;;  %v5128_v11 = vunpack.c.h.bf16 %v5069_v49  ;;  %v5413_v12 = vunpack.c.l.bf16 %v5356_v19  ;;  %v5414_v54 = vunpack.c.h.bf16 %v5356_v19 }
 0x56b   : > { %v4941_v52 = vpop.f32.mrf.mxu0  ;;  %v5030_v4 = vpop.f32.mrf.mxu1  ;;  %v5830_v32 = vadd.f32 %v5829_v50, %v5741_v40 }
 0x56c   : > { %v7027_v0 = vpop.eup %7026  ;;  %vm5191_vm1 = vcmp.gt.f32.partialorder %v5127_v20, 0.0  ;;  %vm5192_vm2 = vcmp.gt.f32.partialorder %v5128_v11, 0.0  ;;  %v5255_v31 = vmul.f32 0.010009766, %v5127_v20  ;;  %v5256_v56 = vmul.f32 0.010009766, %v5128_v11 }
 0x56d   : > { %v6926_v59 = vpack.c.bf16 %v7027_v0, %v7025_v29  ;;  %v4942_v27 = vadd.f32 %v4941_v52, %v10444_v13  ;;  %v5541_v45 = vadd.f32 %v5477_v57, %v5413_v12  ;;  %v5542_v25 = vadd.f32 %v5478_v35, %v5414_v54  ;;  %vm5325_vm3 = vmpackc.low %vm5192_vm2, %vm5191_vm1  ;;  %v11249_v29 = vld [vmem:[#allocation16_spill] sm:$0xff] }
 0x56e   : > { %v5293_v58 = vpack.c.bf16 %v5256_v56, %v5255_v31  ;;  %7028 = vtanh.f32 %v5830_v32  ;;  %v5481_v20 = vunpack.c.l.bf16 %v11249_v29  ;;  %v5482_v11 = vunpack.c.h.bf16 %v11249_v29 }
 0x56f   : > { %6994 = vst [vmem:[%s10659_s22 + $0x10] sm:$0xff] %v6926_v59   ;;  %v5031_v33 = vadd.f32 %v5030_v4, %v4942_v27  ;;  %v5579_v18 = vpack.c.bf16 %v5541_v45, %v10686_v24  ;;  %v5580_v47 = vpack.c.bf16 %v5542_v25, %v10689_v8  ;;  %v5484_v32 = vunpack.c.h.bf16 %v9777_v46 }
 0x570   : > { %v5357_v7 = vsel %vm5325_vm3, %v5069_v49, %v5293_v58  ;;  %v5742_v60 = vpop.f32.mrf.mxu2  ;;  %v5831_v14 = vpop.f32.mrf.mxu3  ;;  %v5483_v58 = vunpack.c.l.bf16 %v9777_v46 }
 0x571   : > { %v5070_v55 = vpack.c.bf16 %v5031_v33, %v10600_v36  ;;  %v5743_v37 = vadd.f32 %v5742_v60, %v10635_v2  ;;  %v5415_v42 = vunpack.c.l.bf16 %v5357_v7  ;;  %v5416_v30 = vunpack.c.h.bf16 %v5357_v7 }
 0x573   : > { %v5129_v61 = vunpack.c.l.bf16 %v5070_v55  ;;  %v5130_v21 = vunpack.c.h.bf16 %v5070_v55  ;;  %v5832_v44 = vadd.f32 %v5831_v14, %v5743_v37  ;;  %v4944_v5 = vpop.f32.mrf.mxu0  ;;  %v5033_v10 = vpop.f32.mrf.mxu1  ;;  %v10703_v26 = vadd.f32 %v5479_v15, %v5415_v42 }
 0x574   : > { %v4945_v6 = vadd.f32 %v4944_v5, %v10444_v13  ;;  %v10706_v48 = vadd.f32 %v5480_v39, %v5416_v30  ;;  %v7029_v1 = vpop.eup %7028 }
 0x575   : > { %vm5193_vm4 = vcmp.gt.f32.partialorder %v5129_v61, 0.0  ;;  %vm5194_vm5 = vcmp.gt.f32.partialorder %v5130_v21, 0.0  ;;  %v5257_v36 = vmul.f32 0.010009766, %v5129_v61  ;;  %v5258_v23 = vmul.f32 0.010009766, %v5130_v21  ;;  %5784 = vmatmul.bf16.gmra.mxu2 %v5579_v18  ;;  %5873 = vmatmul.bf16.gmra.mxu3 %v5580_v47 }
 0x576   : > { %7030 = vtanh.f32 %v5832_v44  ;;  %v5034_v9 = vadd.f32 %v5033_v10, %v4945_v6  ;;  %vm5326_vm6 = vmpackc.low %vm5194_vm5, %vm5193_vm4 }
 0x577   : > { %v5294_v38 = vpack.c.bf16 %v5258_v23, %v5257_v36 }
 0x578   : > { %v5071_v43 = vpack.c.bf16 %v5034_v9, %v10605_v3  ;;  %v5745_v24 = vpop.f32.mrf.mxu2  ;;  %v5834_v28 = vpop.f32.mrf.mxu3 }
 0x579   : > { %v5358_v8 = vsel %vm5326_vm6, %v5070_v55, %v5294_v38  ;;  %v5746_v62 = vadd.f32 %v5745_v24, %v10635_v2  ;;  %v11250_v38 = vld [vmem:[#allocation17_spill] sm:$0xff] }
 0x57a   : > { %v5131_v34 = vunpack.c.l.bf16 %v5071_v43  ;;  %v5132_v41 = vunpack.c.h.bf16 %v5071_v43  ;;  %v5417_v51 = vunpack.c.l.bf16 %v5358_v8  ;;  %v5418_v49 = vunpack.c.h.bf16 %v5358_v8 }
 0x57b   : > { %v4946_v50 = vpop.f32.mrf.mxu0  ;;  %v5035_v19 = vpop.f32.mrf.mxu1  ;;  %v5835_v56 = vadd.f32 %v5834_v28, %v5746_v62  ;;  %v5486_v24 = vunpack.c.h.bf16 %v11250_v38 }
 0x57c   : > { %v7031_v12 = vpop.eup %7030  ;;  %vm5195_vm7 = vcmp.gt.f32.partialorder %v5131_v34, 0.0  ;;  %vm5196_vm8 = vcmp.gt.f32.partialorder %v5132_v41, 0.0  ;;  %v5259_v3 = vmul.f32 0.010009766, %v5131_v34  ;;  %v5260_v54 = vmul.f32 0.010009766, %v5132_v41 }
 0x57d   : > { %v6931_v40 = vpack.c.bf16 %v7031_v12, %v7029_v1  ;;  %v4947_v52 = vadd.f32 %v4946_v50, %v10444_v13  ;;  %v5545_v4 = vadd.f32 %v5481_v20, %v5417_v51  ;;  %v5546_v57 = vadd.f32 %v5482_v11, %v5418_v49  ;;  %vm5327_vm9 = vmpackc.low %vm5196_vm8, %vm5195_vm7 }
 0x57e   : > { %v5295_v63 = vpack.c.bf16 %v5260_v54, %v5259_v3  ;;  %7032 = vtanh.f32 %v5835_v56  ;;  %v11251_v54 = vld [vmem:[#allocation18_spill] sm:$0xff] }
 0x57f   : > { %6995 = vst [vmem:[%s10659_s22 + $0x18] sm:$0xff] %v6931_v40   ;;  %v5036_v35 = vadd.f32 %v5035_v19, %v4947_v52  ;;  %v5581_v0 = vpack.c.bf16 %v5545_v4, %v10703_v26  ;;  %v5582_v45 = vpack.c.bf16 %v5546_v57, %v10706_v48  ;;  %v5487_v40 = vunpack.c.l.bf16 %v11251_v54 }
 0x580   : > { %v5359_v31 = vsel %vm5327_vm9, %v5071_v43, %v5295_v63  ;;  %v5747_v59 = vpop.f32.mrf.mxu2  ;;  %v5836_v27 = vpop.f32.mrf.mxu3  ;;  %v5485_v43 = vunpack.c.l.bf16 %v11250_v38  ;;  %v5488_v57 = vunpack.c.h.bf16 %v11251_v54 }
 0x581   : > { %v5072_v25 = vpack.c.bf16 %v5036_v35, %v10614_v53  ;;  %v5748_v33 = vadd.f32 %v5747_v59, %v10635_v2  ;;  %v5419_v18 = vunpack.c.l.bf16 %v5359_v31  ;;  %v5420_v7 = vunpack.c.h.bf16 %v5359_v31 }
 0x583   : > { %v5133_v60 = vunpack.c.l.bf16 %v5072_v25  ;;  %v5134_v14 = vunpack.c.h.bf16 %v5072_v25  ;;  %v5837_v47 = vadd.f32 %v5836_v27, %v5748_v33  ;;  %v4949_v16 = vpop.f32.mrf.mxu0  ;;  %v10720_v15 = vadd.f32 %v5483_v58, %v5419_v18  ;;  %v5038_v37 = vpop.f32.mrf.mxu1 }
 0x584   : > { %v4950_v55 = vadd.f32 %v4949_v16, %v10444_v13  ;;  %v5548_v42 = vadd.f32 %v5484_v32, %v5420_v7  ;;  %v7033_v10 = vpop.eup %7032  ;;  %v11252_v32 = vld [vmem:[#allocation19_spill] sm:$0xff] }
 0x585   : > { %vm5197_vm10 = vcmp.gt.f32.partialorder %v5133_v60, 0.0  ;;  %vm5198_vm11 = vcmp.gt.f32.partialorder %v5134_v14, 0.0  ;;  %v5261_v53 = vmul.f32 0.010009766, %v5133_v60  ;;  %v5262_v30 = vmul.f32 0.010009766, %v5134_v14  ;;  %5789 = vmatmul.bf16.gmra.mxu2 %v5581_v0  ;;  %5878 = vmatmul.bf16.gmra.mxu3 %v5582_v45 }
 0x586   : > { %7034 = vtanh.f32 %v5837_v47  ;;  %v5039_v39 = vadd.f32 %v5038_v37, %v4950_v55  ;;  %vm5328_vm12 = vmpackc.low %vm5198_vm11, %vm5197_vm10  ;;  %v5489_v60 = vunpack.c.l.bf16 %v11252_v32  ;;  %v5490_v47 = vunpack.c.h.bf16 %v11252_v32 }
 0x587   : > { %v5296_v46 = vpack.c.bf16 %v5262_v30, %v5261_v53 }
 0x588   : > { %v5073_v61 = vpack.c.bf16 %v5039_v39, %v10619_v17  ;;  %v5750_v21 = vpop.f32.mrf.mxu2  ;;  %v5839_v44 = vpop.f32.mrf.mxu3 }
 0x589   : > { %v5360_v5 = vsel %vm5328_vm12, %v5072_v25, %v5296_v46  ;;  %v5751_v23 = vadd.f32 %v5750_v21, %v10635_v2 }
 0x58a   : > { %v5135_v26 = vunpack.c.l.bf16 %v5073_v61  ;;  %v5136_v6 = vunpack.c.h.bf16 %v5073_v61  ;;  %v5421_v48 = vunpack.c.l.bf16 %v5360_v5  ;;  %v5422_v36 = vunpack.c.h.bf16 %v5360_v5 }
 0x58b   : > { %v4951_v9 = vpop.f32.mrf.mxu0  ;;  %v5040_v49 = vpop.f32.mrf.mxu1  ;;  %v5840_v20 = vadd.f32 %v5839_v44, %v5751_v23 }
 0x58c   : > { %v7035_v28 = vpop.eup %7034  ;;  %vm5199_vm0 = vcmp.gt.f32.partialorder %v5135_v26, 0.0  ;;  %vm5200_vm13 = vcmp.gt.f32.partialorder %v5136_v6, 0.0  ;;  %v5263_v17 = vmul.f32 0.010009766, %v5135_v26  ;;  %v5264_v8 = vmul.f32 0.010009766, %v5136_v6 }
 0x58d   : > { %v6936_v1 = vpack.c.bf16 %v7035_v28, %v7033_v10  ;;  %v4952_v34 = vadd.f32 %v4951_v9, %v10444_v13  ;;  %v5549_v41 = vadd.f32 %v5485_v43, %v5421_v48  ;;  %v5550_v62 = vadd.f32 %v5486_v24, %v5422_v36  ;;  %vm5329_vm14 = vmpackc.low %vm5200_vm13, %vm5199_vm0 }
 0x58e   : > { %v5297_v51 = vpack.c.bf16 %v5264_v8, %v5263_v17  ;;  %7036 = vtanh.f32 %v5840_v20 }
 0x58f   : > { %6996 = vst [vmem:[%s10659_s22 + $0x20] sm:$0xff] %v6936_v1   ;;  %v5041_v50 = vadd.f32 %v5040_v49, %v4952_v34  ;;  %v5583_v19 = vpack.c.bf16 %v5549_v41, %v10720_v15  ;;  %v5584_v3 = vpack.c.bf16 %v5550_v62, %v5548_v42 }
 0x590   : > { %v5361_v29 = vsel %vm5329_vm14, %v5073_v61, %v5297_v51  ;;  %v5752_v11 = vpop.f32.mrf.mxu2  ;;  %v5841_v12 = vpop.f32.mrf.mxu3 }
 0x591   : > { %v5074_v52 = vpack.c.bf16 %v5041_v50, %v10628_v22  ;;  %v5753_v13 = vadd.f32 %v5752_v11, %v10635_v2  ;;  %v5423_v4 = vunpack.c.l.bf16 %v5361_v29  ;;  %v5424_v63 = vunpack.c.h.bf16 %v5361_v29 }
 0x593   : > { %v5137_v35 = vunpack.c.l.bf16 %v5074_v52  ;;  %v5138_v0 = vunpack.c.h.bf16 %v5074_v52  ;;  %v5842_v31 = vadd.f32 %v5841_v12, %v5753_v13  ;;  %v5551_v56 = vadd.f32 %v5487_v40, %v5423_v4 }
 0x594   : > { %v5552_v59 = vadd.f32 %v5488_v57, %v5424_v63  ;;  %v7037_v18 = vpop.eup %7036 }
 0x595   : > { %vm5201_vm15 = vcmp.gt.f32.partialorder %v5137_v35, 0.0  ;;  %vm5202_vm1 = vcmp.gt.f32.partialorder %v5138_v0, 0.0  ;;  %v5265_v27 = vmul.f32 0.010009766, %v5137_v35  ;;  %v5266_v45 = vmul.f32 0.010009766, %v5138_v0  ;;  %5794 = vmatmul.bf16.gmra.mxu2 %v5583_v19  ;;  %5883 = vmatmul.bf16.gmra.mxu3 %v5584_v3 }
 0x596   : > { %7038 = vtanh.f32 %v5842_v31  ;;  %vm5330_vm2 = vmpackc.low %vm5202_vm1, %vm5201_vm15 }
 0x597   : > { %v5298_v22 = vpack.c.bf16 %v5266_v45, %v5265_v27 }
 0x598   : > { %v5755_v58 = vpop.f32.mrf.mxu2  ;;  %v5844_v25 = vpop.f32.mrf.mxu3 }
 0x599   : > { %v5362_v33 = vsel %vm5330_vm2, %v5074_v52, %v5298_v22  ;;  %v5756_v15 = vadd.f32 %v5755_v58, %v10635_v2 }
 0x59a   : > { %v5425_v7 = vunpack.c.l.bf16 %v5362_v33  ;;  %v5426_v14 = vunpack.c.h.bf16 %v5362_v33 }
 0x59b   : > { %v5845_v39 = vadd.f32 %v5844_v25, %v5756_v15 }
 0x59c   : > { %v7039_v16 = vpop.eup %7038  ;;  %v5553_v55 = vadd.f32 %v5489_v60, %v5425_v7  ;;  %v5554_v37 = vadd.f32 %v5490_v47, %v5426_v14 }
 0x59d   : > { %v6941_v42 = vpack.c.bf16 %v7039_v16, %v7037_v18  ;;  %7040 = vtanh.f32 %v5845_v39 }
 0x59e   : > { %v5585_v53 = vpack.c.bf16 %v5553_v55, %v5551_v56  ;;  %v5586_v30 = vpack.c.bf16 %v5554_v37, %v5552_v59 }
 0x59f   : > { %6997 = vst [vmem:[%s10659_s22 + $0x28] sm:$0xff] %v6941_v42  }
 0x5a0   : > { %v5757_v46 = vpop.f32.mrf.mxu2  ;;  %v5846_v61 = vpop.f32.mrf.mxu3 }
 0x5a1   : > { %v5758_v21 = vadd.f32 %v5757_v46, %v10635_v2 }
 0x5a3   : > { %v5847_v44 = vadd.f32 %v5846_v61, %v5758_v21  ;;  %v7041_v26 = vpop.eup %7040 }
 0x5a5   : > { %7042 = vtanh.f32 %v5847_v44  ;;  %5799 = vmatmul.bf16.gmra.mxu2 %v5585_v53  ;;  %5888 = vmatmul.bf16.gmra.mxu3 %v5586_v30 }
 0x5a8   : > { %v5760_v5 = vpop.f32.mrf.mxu2  ;;  %v5849_v10 = vpop.f32.mrf.mxu3 }
 0x5a9   : > { %v5761_v36 = vadd.f32 %v5760_v5, %v10635_v2 }
 0x5ab   : > { %v7043_v6 = vpop.eup %7042  ;;  %v5850_v23 = vadd.f32 %v5849_v10, %v5761_v36 }
 0x5ac   : > { %v6946_v48 = vpack.c.bf16 %v7043_v6, %v7041_v26 }
 0x5ad   : > { %7044 = vtanh.f32 %v5850_v23 }
 0x5ae   : > { %6998 = vst [vmem:[%s10659_s22 + $0x30] sm:$0xff] %v6946_v48  }
 0x5b0   : > { %v5762_v9 = vpop.f32.mrf.mxu2  ;;  %v5851_v38 = vpop.f32.mrf.mxu3 }
 0x5b1   : > { %v5763_v43 = vadd.f32 %v5762_v9, %v10635_v2 }
 0x5b3   : > { %v5852_v24 = vadd.f32 %v5851_v38, %v5763_v43  ;;  %v7045_v8 = vpop.eup %7044 }
 0x5b5   : > { %7046 = vtanh.f32 %v5852_v24 }
 0x5b8   : > { %v5765_v28 = vpop.f32.mrf.mxu2  ;;  %v5854_v17 = vpop.f32.mrf.mxu3 }
 0x5b9   : > { %v5766_v41 = vadd.f32 %v5765_v28, %v10635_v2 }
 0x5bb   : > { %v7047_v1 = vpop.eup %7046  ;;  %v5855_v51 = vadd.f32 %v5854_v17, %v5766_v41 }
 0x5bc   : > { %v6951_v34 = vpack.c.bf16 %v7047_v1, %v7045_v8 }
 0x5bd   : > { %7048 = vtanh.f32 %v5855_v51 }
 0x5be   : > { %6999 = vst [vmem:[%s10659_s22 + $0x38] sm:$0xff] %v6951_v34  }
 0x5c0   : > { %v5767_v49 = vpop.f32.mrf.mxu2  ;;  %v5856_v62 = vpop.f32.mrf.mxu3 }
 0x5c1   : > { %v5768_v50 = vadd.f32 %v5767_v49, %v10635_v2 }
 0x5c3   : > { %v5857_v19 = vadd.f32 %v5856_v62, %v5768_v50  ;;  %v7049_v11 = vpop.eup %7048 }
 0x5c5   : > { %7050 = vtanh.f32 %v5857_v19 }
 0x5c8   : > { %v5770_v29 = vpop.f32.mrf.mxu2  ;;  %v5859_v20 = vpop.f32.mrf.mxu3 }
 0x5c9   : > { %v5771_v54 = vadd.f32 %v5770_v29, %v10635_v2 }
 0x5cb   : > { %v7051_v12 = vpop.eup %7050  ;;  %v5860_v40 = vadd.f32 %v5859_v20, %v5771_v54 }
 0x5cc   : > { %v6956_v3 = vpack.c.bf16 %v7051_v12, %v7049_v11 }
 0x5cd   : > { %7052 = vtanh.f32 %v5860_v40 }
 0x5ce   : > { %7000 = vst [vmem:[%s10659_s22 + $0x40] sm:$0xff] %v6956_v3  }
 0x5d0   : > { %v5772_v52 = vpop.f32.mrf.mxu2  ;;  %v5861_v13 = vpop.f32.mrf.mxu3 }
 0x5d1   : > { %v5773_v4 = vadd.f32 %v5772_v52, %v10635_v2 }
 0x5d3   : > { %v5862_v63 = vadd.f32 %v5861_v13, %v5773_v4  ;;  %v7053_v0 = vpop.eup %7052 }
 0x5d5   : > { %7054 = vtanh.f32 %v5862_v63 }
 0x5d8   : > { %v5775_v57 = vpop.f32.mrf.mxu2  ;;  %v5864_v35 = vpop.f32.mrf.mxu3 }
 0x5d9   : > { %v5776_v59 = vadd.f32 %v5775_v57, %v10635_v2 }
 0x5db   : > { %v7055_v31 = vpop.eup %7054  ;;  %v5865_v27 = vadd.f32 %v5864_v35, %v5776_v59 }
 0x5dc   : > { %v6961_v56 = vpack.c.bf16 %v7055_v31, %v7053_v0 }
 0x5dd   : > { %7056 = vtanh.f32 %v5865_v27 }
 0x5de   : > { %7001 = vst [vmem:[%s10659_s22 + $0x48] sm:$0xff] %v6961_v56  }
 0x5e0   : > { %v5777_v45 = vpop.f32.mrf.mxu2  ;;  %v5866_v22 = vpop.f32.mrf.mxu3 }
 0x5e1   : > { %v5778_v58 = vadd.f32 %v5777_v45, %v10635_v2 }
 0x5e3   : > { %v5867_v25 = vadd.f32 %v5866_v22, %v5778_v58  ;;  %v7057_v7 = vpop.eup %7056 }
 0x5e5   : > { %7058 = vtanh.f32 %v5867_v25 }
 0x5e8   : > { %v5780_v33 = vpop.f32.mrf.mxu2  ;;  %v5869_v18 = vpop.f32.mrf.mxu3 }
 0x5e9   : > { %v5781_v14 = vadd.f32 %v5780_v33, %v10635_v2 }
 0x5eb   : > { %v7059_v32 = vpop.eup %7058  ;;  %v5870_v47 = vadd.f32 %v5869_v18, %v5781_v14 }
 0x5ec   : > { %v6966_v60 = vpack.c.bf16 %v7059_v32, %v7057_v7 }
 0x5ed   : > { %7060 = vtanh.f32 %v5870_v47 }
 0x5ee   : > { %7002 = vst [vmem:[%s10659_s22 + $0x50] sm:$0xff] %v6966_v60  }
 0x5f0   : > { %v5782_v16 = vpop.f32.mrf.mxu2  ;;  %v5871_v15 = vpop.f32.mrf.mxu3 }
 0x5f1   : > { %v5783_v55 = vadd.f32 %v5782_v16, %v10635_v2 }
 0x5f3   : > { %v5872_v37 = vadd.f32 %v5871_v15, %v5783_v55  ;;  %v7061_v30 = vpop.eup %7060 }
 0x5f5   : > { %7062 = vtanh.f32 %v5872_v37 }
 0x5f8   : > { %v5785_v42 = vpop.f32.mrf.mxu2  ;;  %v5874_v53 = vpop.f32.mrf.mxu3 }
 0x5f9   : > { %v5786_v61 = vadd.f32 %v5785_v42, %v10635_v2 }
 0x5fb   : > { %v7063_v39 = vpop.eup %7062  ;;  %v5875_v21 = vadd.f32 %v5874_v53, %v5786_v61 }
 0x5fc   : > { %v6971_v46 = vpack.c.bf16 %v7063_v39, %v7061_v30 }
 0x5fd   : > { %7064 = vtanh.f32 %v5875_v21 }
 0x5fe   : > { %7003 = vst [vmem:[%s10659_s22 + $0x58] sm:$0xff] %v6971_v46  }
 0x600   : > { %v5787_v44 = vpop.f32.mrf.mxu2  ;;  %v5876_v5 = vpop.f32.mrf.mxu3 }
 0x601   : > { %v5788_v10 = vadd.f32 %v5787_v44, %v10635_v2 }
 0x603   : > { %v5877_v26 = vadd.f32 %v5876_v5, %v5788_v10  ;;  %v7065_v36 = vpop.eup %7064 }
 0x605   : > { %7066 = vtanh.f32 %v5877_v26 }
 0x608   : > { %v5790_v6 = vpop.f32.mrf.mxu2  ;;  %v5879_v48 = vpop.f32.mrf.mxu3 }
 0x609   : > { %v5791_v38 = vadd.f32 %v5790_v6, %v10635_v2 }
 0x60b   : > { %v7067_v23 = vpop.eup %7066  ;;  %v5880_v43 = vadd.f32 %v5879_v48, %v5791_v38 }
 0x60c   : > { %v6976_v9 = vpack.c.bf16 %v7067_v23, %v7065_v36 }
 0x60d   : > { %7068 = vtanh.f32 %v5880_v43 }
 0x60e   : > { %7004 = vst [vmem:[%s10659_s22 + $0x60] sm:$0xff] %v6976_v9  }
 0x610   : > { %v5792_v24 = vpop.f32.mrf.mxu2  ;;  %v5881_v28 = vpop.f32.mrf.mxu3 }
 0x611   : > { %v5793_v17 = vadd.f32 %v5792_v24, %v10635_v2 }
 0x613   : > { %v5882_v8 = vadd.f32 %v5881_v28, %v5793_v17  ;;  %v7069_v41 = vpop.eup %7068 }
 0x615   : > { %7070 = vtanh.f32 %v5882_v8 }
 0x618   : > { %v5795_v1 = vpop.f32.mrf.mxu2  ;;  %v5884_v34 = vpop.f32.mrf.mxu3 }
 0x619   : > { %v5796_v62 = vadd.f32 %v5795_v1, %v10635_v2 }
 0x61b   : > { %v7071_v51 = vpop.eup %7070  ;;  %v5885_v50 = vadd.f32 %v5884_v34, %v5796_v62 }
 0x61c   : > { %v6981_v49 = vpack.c.bf16 %v7071_v51, %v7069_v41 }
 0x61d   : > { %7072 = vtanh.f32 %v5885_v50 }
 0x61e   : > { %7005 = vst [vmem:[%s10659_s22 + $0x68] sm:$0xff] %v6981_v49  }
 0x620   : > { %v5797_v19 = vpop.f32.mrf.mxu2  ;;  %v5886_v29 = vpop.f32.mrf.mxu3 }
 0x621   : > { %v5798_v20 = vadd.f32 %v5797_v19, %v10635_v2 }
 0x623   : > { %v5887_v11 = vadd.f32 %v5886_v29, %v5798_v20  ;;  %v7073_v54 = vpop.eup %7072 }
 0x625   : > { %7074 = vtanh.f32 %v5887_v11 }
 0x628   : > { %v5800_v12 = vpop.f32.mrf.mxu2  ;;  %v5889_v3 = vpop.f32.mrf.mxu3 }
 0x629   : > { %v5801_v13 = vadd.f32 %v5800_v12, %v10635_v2 }
 0x62b   : > { %v7075_v40 = vpop.eup %7074  ;;  %v5890_v4 = vadd.f32 %v5889_v3, %v5801_v13 }
 0x62c   : > { %v6986_v52 = vpack.c.bf16 %v7075_v40, %v7073_v54 }
 0x62d   : > { %7076 = vtanh.f32 %v5890_v4 }
 0x62e   : > { %7006 = vst [vmem:[%s10659_s22 + $0x70] sm:$0xff] %v6986_v52  }
 0x630   : > { %v5802_v63 = vpop.f32.mrf.mxu2  ;;  %v5891_v35 = vpop.f32.mrf.mxu3 }
 0x631   : > { %v5803_v57 = vadd.f32 %v5802_v63, %v10635_v2 }
 0x633   : > { %v5892_v0 = vadd.f32 %v5891_v35, %v5803_v57  ;;  %v7077_v31 = vpop.eup %7076 }
 0x635   : > { %7078 = vtanh.f32 %v5892_v0 }
 0x63b   : > { %v7079_v56 = vpop.eup %7078 }
 0x63c   : > { %v6991_v59 = vpack.c.bf16 %v7079_v56, %v7077_v31 }
 0x63e   : > { %7007 = vst [vmem:[%s10659_s22 + $0x78] sm:$0xff] %v6991_v59  }
 0x63f PF: > { %s18_s27 = sadd.s32 1, %s7086_s27  }
 0x640   : > { %p15_p4 = scmp.ge.s32.totalorder %s18_s27, 4  }
 0x642   :  { %17 = sbr.rel (!%p15_p4) target bundleno = 1 (0x1), region = 86 }

</bundles_post_ra>
